<compile_context>
chip_gen: v7x
topology: tpu7x:2x2x1
jax: 0.10.0
libtpu: 0.0.40
codegen_flags: <defaults>
</compile_context>

<pallas_src>
import functools

import numpy as np
import jax
import jax.numpy as jnp
from jax.experimental import pallas as pl
from jax.experimental.pallas import tpu as pltpu

LAYER_SIZE = 3200  # 64 channels * 5 * 10 spatial after three stride-2 convs


# ---------------------------------------------------------------------------
# Fused whole-network kernel (one batch sample per grid step)
# ---------------------------------------------------------------------------
def _critic_kernel(
    xp_ref,                     # (1, H+2, W+2, 8)  zero-padded NHWC state
    act_ref,                    # (1, 1, 2)         action
    s1_ref, s2_ref, s3_ref,     # (3, Wo, Wp)       stride-2 column decimation
    e1_ref, e2_ref,             # (Wo+2, Wo)        embed row into padded row
    cw1_ref, cb1_ref,           # (9, 8, 16), (1, 16)    conv taps / bias
    cw2_ref, cb2_ref,           # (9, 16, 32), (1, 32)
    cw3_ref, cb3_ref,           # (9, 32, 64), (1, 64)
    w1r_ref,                    # (50, 64, hidden)  linear1 conv rows (NHWC order)
    w1a_ref,                    # (2, hidden)       linear1 action rows
    lb1_ref,                    # (1, hidden)
    lw2_ref, lb2_ref,           # (hidden, hidden), (1, hidden)
    lw3_ref, lb3_ref,           # (hidden, 1), (1, 1)
    out_ref,                    # (1, 1, 1)
    a2_ref,                     # scratch: padded conv1 output (Ho1+2, Wo1+2, 16)
    a3_ref,                     # scratch: padded conv2 output (Ho2+2, Wo2+2, 32)
    *, ho1, ho2, ho3, wo3, hidden,
):
    f32 = jnp.float32

    def conv_row(read_row, r0, smat_ref, wc_ref, cb_ref):
        """One output row of a stride-2 3x3 conv + bias + ReLU -> (Wo, Cout)."""
        acc = None
        for dh in range(3):
            slab = read_row(r0 + dh)                                # (Wp, Cin)
            for dw in range(3):
                dec = jnp.dot(smat_ref[dw], slab,
                              preferred_element_type=f32)           # (Wo, Cin)
                part = jnp.dot(dec, wc_ref[dh * 3 + dw],
                               preferred_element_type=f32)          # (Wo, Cout)
                acc = part if acc is None else acc + part
        return jnp.maximum(acc + cb_ref[...], 0.0)

    # Zero the padded scratch activations (borders must stay zero).
    a2_ref[...] = jnp.zeros(a2_ref.shape, f32)
    a3_ref[...] = jnp.zeros(a3_ref.shape, f32)

    # ---- conv1: (H, W, 8) -> padded (Ho1+2, Wo1+2, 16) in VMEM ----
    def body1(i, c):
        row = conv_row(lambda r: xp_ref[0, r], 2 * i, s1_ref, cw1_ref, cb1_ref)
        a2_ref[i + 1] = jnp.dot(e1_ref[...], row, preferred_element_type=f32)
        return c
    jax.lax.fori_loop(0, ho1, body1, 0)

    # ---- conv2: -> padded (Ho2+2, Wo2+2, 32) ----
    def body2(i, c):
        row = conv_row(lambda r: a2_ref[r], 2 * i, s2_ref, cw2_ref, cb2_ref)
        a3_ref[i + 1] = jnp.dot(e2_ref[...], row, preferred_element_type=f32)
        return c
    jax.lax.fori_loop(0, ho2, body2, 0)

    # ---- conv3 + linear1 (conv part): accumulate directly, no flatten ----
    acc1 = jnp.zeros((1, hidden), f32)
    for i3 in range(ho3):                        # static: ho3 == 5
        row = conv_row(lambda r: a3_ref[r], 2 * i3, s3_ref, cw3_ref, cb3_ref)
        for wo in range(wo3):                    # static: wo3 == 10
            acc1 = acc1 + jnp.dot(row[wo:wo + 1, :],
                                  w1r_ref[i3 * wo3 + wo],
                                  preferred_element_type=f32)        # (1, hidden)

    # ---- linear1 action rows + bias, relu; linear2; linear3 ----
    h = acc1 + jnp.dot(act_ref[0], w1a_ref[...],
                       preferred_element_type=f32) + lb1_ref[...]
    h = jnp.maximum(h, 0.0)
    h = jnp.maximum(jnp.dot(h, lw2_ref[...],
                            preferred_element_type=f32) + lb2_ref[...], 0.0)
    out_ref[0] = jnp.dot(h, lw3_ref[...],
                         preferred_element_type=f32) + lb3_ref[...]


# ---------------------------------------------------------------------------
# Constant helper matrices (built host-side with numpy; become jit constants)
# ---------------------------------------------------------------------------
def _decim(wo, wp):
    """S[dw, o, w] = 1 iff w == 2*o + dw   (stride-2 column decimation)."""
    s = np.zeros((3, wo, wp), np.float32)
    for dw in range(3):
        s[dw, np.arange(wo), 2 * np.arange(wo) + dw] = 1.0
    return jnp.asarray(s)


def _embed(wo):
    """E[w', o] = 1 iff w' == o + 1   (place a row inside a zero-padded row)."""
    e = np.zeros((wo + 2, wo), np.float32)
    e[np.arange(wo) + 1, np.arange(wo)] = 1.0
    return jnp.asarray(e)


# ---------------------------------------------------------------------------
# Critic forward (single pallas_call)
# ---------------------------------------------------------------------------
def critic_forward(params, state, action):
    B, H, W, Cin = state.shape
    assert Cin == 8 and H % 8 == 0 and W % 8 == 0
    Ho1, Wo1 = H // 2, W // 2
    Ho2, Wo2 = Ho1 // 2, Wo1 // 2
    Ho3, Wo3 = Ho2 // 2, Wo2 // 2
    hidden = params["lw2"].shape[0]

    xp = jnp.pad(state, ((0, 0), (1, 1), (1, 1), (0, 0)))    # (B, H+2, W+2, 8)
    act3 = action.reshape(B, 1, action.shape[1])             # (B, 1, 2)

    S1, S2, S3 = _decim(Wo1, W + 2), _decim(Wo2, Wo1 + 2), _decim(Wo3, Wo2 + 2)
    E1, E2 = _embed(Wo1), _embed(Wo2)

    operands = (
        xp, act3, S1, S2, S3, E1, E2,
        params["cw1"], params["cb1"], params["cw2"], params["cb2"],
        params["cw3"], params["cb3"],
        params["lw1r"], params["lw1a"], params["lb1"],
        params["lw2"], params["lb2"], params["lw3"], params["lb3"],
    )

    def full_spec(x):                      # full-array, VMEM-resident operand
        zeros = (0,) * x.ndim
        return pl.BlockSpec(x.shape, lambda b: zeros)

    in_specs = [
        pl.BlockSpec((1, H + 2, W + 2, 8), lambda b: (b, 0, 0, 0)),
        pl.BlockSpec((1, 1, act3.shape[-1]), lambda b: (b, 0, 0)),
    ] + [full_spec(x) for x in operands[2:]]

    kernel = functools.partial(_critic_kernel, ho1=Ho1, ho2=Ho2, ho3=Ho3,
                               wo3=Wo3, hidden=hidden)

    out = pl.pallas_call(
        kernel,
        out_shape=jax.ShapeDtypeStruct((B, 1, 1), jnp.float32),
        grid_spec=pltpu.PrefetchScalarGridSpec(
            num_scalar_prefetch=0,
            grid=(B,),
            in_specs=in_specs,
            out_specs=pl.BlockSpec((1, 1, 1), lambda b: (b, 0, 0)),
            scratch_shapes=[
                pltpu.VMEM((Ho1 + 2, Wo1 + 2, 16), jnp.float32),
                pltpu.VMEM((Ho2 + 2, Wo2 + 2, 32), jnp.float32),
            ],
        ),
        compiler_params=pltpu.CompilerParams(
            dimension_semantics=("parallel",)),
    )(*operands)
    return out.reshape(B, 1)


# ---------------------------------------------------------------------------
# Parameter init (PyTorch-style uniform(-1/sqrt(fan_in), +), kernel layouts)
# ---------------------------------------------------------------------------
def init_params(key, hidden_size):
    ks = jax.random.split(key, 13)

    def u(k, shape, fan_in):
        bound = 1.0 / float(fan_in) ** 0.5
        return jax.random.uniform(k, shape, jnp.float32, -bound, bound)

    spatial3 = LAYER_SIZE // 64   # Ho3 * Wo3 = 50

    # TODO(synk): `output_size` ctor arg is unused by the PyTorch forward
    #             (linear3 is fixed to 1 output), so it is not modeled here.
    return {
        # Conv taps stored as (kh*3+kw, Cin, Cout).  From a PyTorch OIHW conv
        # weight this is w.permute(2, 3, 1, 0).reshape(9, Cin, Cout).
        "cw1": u(ks[0], (9, 8, 16), 8 * 9),   "cb1": u(ks[1], (1, 16), 8 * 9),
        "cw2": u(ks[2], (9, 16, 32), 16 * 9), "cb2": u(ks[3], (1, 32), 16 * 9),
        "cw3": u(ks[4], (9, 32, 64), 32 * 9), "cb3": u(ks[5], (1, 64), 32 * 9),
        # linear1: conv-feature rows pre-permuted (one-time, host side) to
        # NHWC flatten order: lw1r[h*10 + w, c, :] == W1_pt[:, c*50 + h*10 + w].T
        # Action rows kept separate -> no runtime concat, no runtime transpose.
        "lw1r": u(ks[6], (spatial3, 64, hidden_size), LAYER_SIZE + 2),
        "lw1a": u(ks[7], (2, hidden_size), LAYER_SIZE + 2),
        "lb1":  u(ks[8], (1, hidden_size), LAYER_SIZE + 2),
        "lw2":  u(ks[9], (hidden_size, hidden_size), hidden_size),
        "lb2":  u(ks[10], (1, hidden_size), hidden_size),
        "lw3":  u(ks[11], (hidden_size, 1), hidden_size),
        "lb3":  u(ks[12], (1, 1), hidden_size),
    }


# ---------------------------------------------------------------------------
# Pure-XLA reference with identical semantics (used only for verification)
# ---------------------------------------------------------------------------
def critic_reference(params, state, action):
    hp = jax.lax.Precision.HIGHEST
    x = state
    for i in (1, 2, 3):
        w = params[f"cw{i}"].reshape(3, 3, x.shape[-1], -1)      # HWIO
        x = jax.lax.conv_general_dilated(
            x, w, window_strides=(2, 2), padding=((1, 1), (1, 1)),
            dimension_numbers=("NHWC", "HWIO", "NHWC"), precision=hp)
        x = jax.nn.relu(x + params[f"cb{i}"].reshape(1, 1, 1, -1))
    _, h3, w3, c = x.shape
    w1r = params["lw1r"].reshape(h3, w3, c, -1)
    y = jnp.einsum("bhwc,hwcj->bj", x, w1r, precision=hp)
    y = jax.nn.relu(y + jnp.dot(action, params["lw1a"], precision=hp)
                    + params["lb1"])
    y = jax.nn.relu(jnp.dot(y, params["lw2"], precision=hp) + params["lb2"])
    return jnp.dot(y, params["lw3"], precision=hp) + params["lb3"]


if __name__ == "__main__":
    # Smallest shapes consistent with LAYER_SIZE = 3200:
    # H=40, W=80 -> 20x40 -> 10x20 -> 5x10, and 64*5*10 = 3200.
    B, H, W, Cin = 2, 40, 80, 8
    ACTION_DIM = 2
    HIDDEN = 64

    key = jax.random.PRNGKey(0)
    k_param, k_state, k_action = jax.random.split(key, 3)

    params = init_params(k_param, HIDDEN)
    state = jax.random.normal(k_state, (B, H, W, Cin), jnp.float32)   # NHWC
    action = jax.random.normal(k_action, (B, ACTION_DIM), jnp.float32)

    fwd = jax.jit(critic_forward)
    out = jax.block_until_ready(fwd(params, state, action))

    assert out.shape == (B, 1), out.shape
    assert bool(jnp.all(jnp.isfinite(out)))

    # Cross-check the fused kernel against a pure-XLA reference.
    ref = jax.block_until_ready(jax.jit(critic_reference)(params, state, action))
    np.testing.assert_allclose(np.asarray(out), np.asarray(ref),
                               rtol=5e-2, atol=5e-2)

    print("KERNEL_OK")
</pallas_src>

<mosaic_0001>
module attributes {stable_mosaic.version = 11 : i64} {
  func.func @_critic_kernel(%arg0: i32, %arg1: memref<1x42x82x8xf32, #tpu.memory_space<vmem>>, %arg2: memref<1x1x2xf32, #tpu.memory_space<vmem>>, %arg3: memref<3x40x82xf32, #tpu.memory_space<vmem>>, %arg4: memref<3x20x42xf32, #tpu.memory_space<vmem>>, %arg5: memref<3x10x22xf32, #tpu.memory_space<vmem>>, %arg6: memref<42x40xf32, #tpu.memory_space<vmem>>, %arg7: memref<22x20xf32, #tpu.memory_space<vmem>>, %arg8: memref<9x8x16xf32, #tpu.memory_space<vmem>>, %arg9: memref<1x16xf32, #tpu.memory_space<vmem>>, %arg10: memref<9x16x32xf32, #tpu.memory_space<vmem>>, %arg11: memref<1x32xf32, #tpu.memory_space<vmem>>, %arg12: memref<9x32x64xf32, #tpu.memory_space<vmem>>, %arg13: memref<1x64xf32, #tpu.memory_space<vmem>>, %arg14: memref<50x64x64xf32, #tpu.memory_space<vmem>>, %arg15: memref<2x64xf32, #tpu.memory_space<vmem>>, %arg16: memref<1x64xf32, #tpu.memory_space<vmem>>, %arg17: memref<64x64xf32, #tpu.memory_space<vmem>>, %arg18: memref<1x64xf32, #tpu.memory_space<vmem>>, %arg19: memref<64x1xf32, #tpu.memory_space<vmem>>, %arg20: memref<1x1xf32, #tpu.memory_space<vmem>>, %arg21: memref<1x1x1xf32, #tpu.memory_space<vmem>>, %arg22: memref<22x42x16xf32, #tpu.memory_space<vmem>>, %arg23: memref<12x22x32xf32, #tpu.memory_space<vmem>>) attributes {dimension_semantics = [#tpu.dimension_semantics<parallel>], iteration_bounds = array<i64: 2>, scalar_prefetch = 0 : i64, scratch_operands = 2 : i64, tpu.core_type = #tpu.core_type<tc>, window_params = [{transform_indices = @transform_0, window_bounds = array<i64: 1, 42, 82, 8>}, {transform_indices = @transform_1, window_bounds = array<i64: 1, 1, 2>}, {pipeline_mode = #tpu.pipeline_mode<synchronous>, transform_indices = @transform_2, window_bounds = array<i64: 3, 40, 82>}, {pipeline_mode = #tpu.pipeline_mode<synchronous>, transform_indices = @transform_3, window_bounds = array<i64: 3, 20, 42>}, {pipeline_mode = #tpu.pipeline_mode<synchronous>, transform_indices = @transform_4, window_bounds = array<i64: 3, 10, 22>}, {pipeline_mode = #tpu.pipeline_mode<synchronous>, transform_indices = @transform_5, window_bounds = array<i64: 42, 40>}, {pipeline_mode = #tpu.pipeline_mode<synchronous>, transform_indices = @transform_6, window_bounds = array<i64: 22, 20>}, {pipeline_mode = #tpu.pipeline_mode<synchronous>, transform_indices = @transform_7, window_bounds = array<i64: 9, 8, 16>}, {pipeline_mode = #tpu.pipeline_mode<synchronous>, transform_indices = @transform_8, window_bounds = array<i64: 1, 16>}, {pipeline_mode = #tpu.pipeline_mode<synchronous>, transform_indices = @transform_9, window_bounds = array<i64: 9, 16, 32>}, {pipeline_mode = #tpu.pipeline_mode<synchronous>, transform_indices = @transform_10, window_bounds = array<i64: 1, 32>}, {pipeline_mode = #tpu.pipeline_mode<synchronous>, transform_indices = @transform_11, window_bounds = array<i64: 9, 32, 64>}, {pipeline_mode = #tpu.pipeline_mode<synchronous>, transform_indices = @transform_12, window_bounds = array<i64: 1, 64>}, {pipeline_mode = #tpu.pipeline_mode<synchronous>, transform_indices = @transform_13, window_bounds = array<i64: 50, 64, 64>}, {pipeline_mode = #tpu.pipeline_mode<synchronous>, transform_indices = @transform_14, window_bounds = array<i64: 2, 64>}, {pipeline_mode = #tpu.pipeline_mode<synchronous>, transform_indices = @transform_15, window_bounds = array<i64: 1, 64>}, {pipeline_mode = #tpu.pipeline_mode<synchronous>, transform_indices = @transform_16, window_bounds = array<i64: 64, 64>}, {pipeline_mode = #tpu.pipeline_mode<synchronous>, transform_indices = @transform_17, window_bounds = array<i64: 1, 64>}, {pipeline_mode = #tpu.pipeline_mode<synchronous>, transform_indices = @transform_18, window_bounds = array<i64: 64, 1>}, {pipeline_mode = #tpu.pipeline_mode<synchronous>, transform_indices = @transform_19, window_bounds = array<i64: 1, 1>}, {transform_indices = @transform_20, window_bounds = array<i64: 1, 1, 1>}]} {
    %cst = arith.constant 0.000000e+00 : f32
    %0 = vector.broadcast %cst : f32 to vector<22x42x16xf32>
    %c0 = arith.constant 0 : index
    %c0_0 = arith.constant 0 : index
    %c0_1 = arith.constant 0 : index
    %1 = vector.load %arg22[%c0, %c0_0, %c0_1] : memref<22x42x16xf32, #tpu.memory_space<vmem>>, vector<22x42x16xf32>
    tpu.vector_store %arg22[%c0, %c0_0, %c0_1], %0 {strides = array<i32>} : memref<22x42x16xf32, #tpu.memory_space<vmem>>, vector<22x42x16xf32>,
    %cst_2 = arith.constant 0.000000e+00 : f32
    %2 = vector.broadcast %cst_2 : f32 to vector<12x22x32xf32>
    %c0_3 = arith.constant 0 : index
    %c0_4 = arith.constant 0 : index
    %c0_5 = arith.constant 0 : index
    %3 = vector.load %arg23[%c0_3, %c0_4, %c0_5] : memref<12x22x32xf32, #tpu.memory_space<vmem>>, vector<12x22x32xf32>
    tpu.vector_store %arg23[%c0_3, %c0_4, %c0_5], %2 {strides = array<i32>} : memref<12x22x32xf32, #tpu.memory_space<vmem>>, vector<12x22x32xf32>,
    %c0_i32 = arith.constant 0 : i32
    %c20_i32 = arith.constant 20 : i32
    %4 = arith.addi %c0_i32, %c20_i32 : i32
    %c1_i32 = arith.constant 1 : i32
    scf.for %arg24 = %c0_i32 to %4 step %c1_i32  : i32 {
      %c2_i32 = arith.constant 2 : i32
      %644 = arith.muli %c2_i32, %arg24 : i32
      %c0_i32_605 = arith.constant 0 : i32
      %645 = arith.addi %644, %c0_i32_605 : i32
      %c0_606 = arith.constant 0 : index
      %646 = arith.index_cast %645 : i32 to index
      %c0_607 = arith.constant 0 : index
      %c0_608 = arith.constant 0 : index
      %647 = vector.load %arg1[%c0_606, %646, %c0_607, %c0_608] : memref<1x42x82x8xf32, #tpu.memory_space<vmem>>, vector<1x1x82x8xf32>
      %648 = vector.shape_cast %647 : vector<1x1x82x8xf32> to vector<82x8xf32>
      %c0_609 = arith.constant 0 : index
      %c0_610 = arith.constant 0 : index
      %c0_611 = arith.constant 0 : index
      %649 = vector.load %arg3[%c0_609, %c0_610, %c0_611] : memref<3x40x82xf32, #tpu.memory_space<vmem>>, vector<1x40x82xf32>
      %650 = vector.shape_cast %649 : vector<1x40x82xf32> to vector<40x82xf32>
      %cst_612 = arith.constant dense<0.000000e+00> : vector<40x8xf32>
      %651 = tpu.matmul %650, %648, %cst_612 {dimension_numbers = #tpu.dot_dimension_numbers<[1], [0], [0], [1], [0, 0, 1, 1], [], []>} : vector<40x82xf32>, vector<82x8xf32>, vector<40x8xf32> -> vector<40x8xf32>
      %c0_613 = arith.constant 0 : index
      %c0_614 = arith.constant 0 : index
      %c0_615 = arith.constant 0 : index
      %652 = vector.load %arg8[%c0_613, %c0_614, %c0_615] : memref<9x8x16xf32, #tpu.memory_space<vmem>>, vector<1x8x16xf32>
      %653 = vector.shape_cast %652 : vector<1x8x16xf32> to vector<8x16xf32>
      %cst_616 = arith.constant dense<0.000000e+00> : vector<40x16xf32>
      %654 = tpu.matmul %651, %653, %cst_616 {dimension_numbers = #tpu.dot_dimension_numbers<[1], [0], [0], [1], [0, 0, 1, 1], [], []>} : vector<40x8xf32>, vector<8x16xf32>, vector<40x16xf32> -> vector<40x16xf32>
      %c1_617 = arith.constant 1 : index
      %c0_618 = arith.constant 0 : index
      %c0_619 = arith.constant 0 : index
      %655 = vector.load %arg3[%c1_617, %c0_618, %c0_619] : memref<3x40x82xf32, #tpu.memory_space<vmem>>, vector<1x40x82xf32>
      %656 = vector.shape_cast %655 : vector<1x40x82xf32> to vector<40x82xf32>
      %cst_620 = arith.constant dense<0.000000e+00> : vector<40x8xf32>
      %657 = tpu.matmul %656, %648, %cst_620 {dimension_numbers = #tpu.dot_dimension_numbers<[1], [0], [0], [1], [0, 0, 1, 1], [], []>} : vector<40x82xf32>, vector<82x8xf32>, vector<40x8xf32> -> vector<40x8xf32>
      %c1_621 = arith.constant 1 : index
      %c0_622 = arith.constant 0 : index
      %c0_623 = arith.constant 0 : index
      %658 = vector.load %arg8[%c1_621, %c0_622, %c0_623] : memref<9x8x16xf32, #tpu.memory_space<vmem>>, vector<1x8x16xf32>
      %659 = vector.shape_cast %658 : vector<1x8x16xf32> to vector<8x16xf32>
      %cst_624 = arith.constant dense<0.000000e+00> : vector<40x16xf32>
      %660 = tpu.matmul %657, %659, %cst_624 {dimension_numbers = #tpu.dot_dimension_numbers<[1], [0], [0], [1], [0, 0, 1, 1], [], []>} : vector<40x8xf32>, vector<8x16xf32>, vector<40x16xf32> -> vector<40x16xf32>
      %661 = arith.addf %654, %660 : vector<40x16xf32>
      %c2_625 = arith.constant 2 : index
      %c0_626 = arith.constant 0 : index
      %c0_627 = arith.constant 0 : index
      %662 = vector.load %arg3[%c2_625, %c0_626, %c0_627] : memref<3x40x82xf32, #tpu.memory_space<vmem>>, vector<1x40x82xf32>
      %663 = vector.shape_cast %662 : vector<1x40x82xf32> to vector<40x82xf32>
      %cst_628 = arith.constant dense<0.000000e+00> : vector<40x8xf32>
      %664 = tpu.matmul %663, %648, %cst_628 {dimension_numbers = #tpu.dot_dimension_numbers<[1], [0], [0], [1], [0, 0, 1, 1], [], []>} : vector<40x82xf32>, vector<82x8xf32>, vector<40x8xf32> -> vector<40x8xf32>
      %c2_629 = arith.constant 2 : index
      %c0_630 = arith.constant 0 : index
      %c0_631 = arith.constant 0 : index
      %665 = vector.load %arg8[%c2_629, %c0_630, %c0_631] : memref<9x8x16xf32, #tpu.memory_space<vmem>>, vector<1x8x16xf32>
      %666 = vector.shape_cast %665 : vector<1x8x16xf32> to vector<8x16xf32>
      %cst_632 = arith.constant dense<0.000000e+00> : vector<40x16xf32>
      %667 = tpu.matmul %664, %666, %cst_632 {dimension_numbers = #tpu.dot_dimension_numbers<[1], [0], [0], [1], [0, 0, 1, 1], [], []>} : vector<40x8xf32>, vector<8x16xf32>, vector<40x16xf32> -> vector<40x16xf32>
      %668 = arith.addf %661, %667 : vector<40x16xf32>
      %c1_i32_633 = arith.constant 1 : i32
      %669 = arith.addi %644, %c1_i32_633 : i32
      %c0_634 = arith.constant 0 : index
      %670 = arith.index_cast %669 : i32 to index
      %c0_635 = arith.constant 0 : index
      %c0_636 = arith.constant 0 : index
      %671 = vector.load %arg1[%c0_634, %670, %c0_635, %c0_636] : memref<1x42x82x8xf32, #tpu.memory_space<vmem>>, vector<1x1x82x8xf32>
      %672 = vector.shape_cast %671 : vector<1x1x82x8xf32> to vector<82x8xf32>
      %c0_637 = arith.constant 0 : index
      %c0_638 = arith.constant 0 : index
      %c0_639 = arith.constant 0 : index
      %673 = vector.load %arg3[%c0_637, %c0_638, %c0_639] : memref<3x40x82xf32, #tpu.memory_space<vmem>>, vector<1x40x82xf32>
      %674 = vector.shape_cast %673 : vector<1x40x82xf32> to vector<40x82xf32>
      %cst_640 = arith.constant dense<0.000000e+00> : vector<40x8xf32>
      %675 = tpu.matmul %674, %672, %cst_640 {dimension_numbers = #tpu.dot_dimension_numbers<[1], [0], [0], [1], [0, 0, 1, 1], [], []>} : vector<40x82xf32>, vector<82x8xf32>, vector<40x8xf32> -> vector<40x8xf32>
      %c3_641 = arith.constant 3 : index
      %c0_642 = arith.constant 0 : index
      %c0_643 = arith.constant 0 : index
      %676 = vector.load %arg8[%c3_641, %c0_642, %c0_643] : memref<9x8x16xf32, #tpu.memory_space<vmem>>, vector<1x8x16xf32>
      %677 = vector.shape_cast %676 : vector<1x8x16xf32> to vector<8x16xf32>
      %cst_644 = arith.constant dense<0.000000e+00> : vector<40x16xf32>
      %678 = tpu.matmul %675, %677, %cst_644 {dimension_numbers = #tpu.dot_dimension_numbers<[1], [0], [0], [1], [0, 0, 1, 1], [], []>} : vector<40x8xf32>, vector<8x16xf32>, vector<40x16xf32> -> vector<40x16xf32>
      %679 = arith.addf %668, %678 : vector<40x16xf32>
      %c1_645 = arith.constant 1 : index
      %c0_646 = arith.constant 0 : index
      %c0_647 = arith.constant 0 : index
      %680 = vector.load %arg3[%c1_645, %c0_646, %c0_647] : memref<3x40x82xf32, #tpu.memory_space<vmem>>, vector<1x40x82xf32>
      %681 = vector.shape_cast %680 : vector<1x40x82xf32> to vector<40x82xf32>
      %cst_648 = arith.constant dense<0.000000e+00> : vector<40x8xf32>
      %682 = tpu.matmul %681, %672, %cst_648 {dimension_numbers = #tpu.dot_dimension_numbers<[1], [0], [0], [1], [0, 0, 1, 1], [], []>} : vector<40x82xf32>, vector<82x8xf32>, vector<40x8xf32> -> vector<40x8xf32>
      %c4_649 = arith.constant 4 : index
      %c0_650 = arith.constant 0 : index
      %c0_651 = arith.constant 0 : index
      %683 = vector.load %arg8[%c4_649, %c0_650, %c0_651] : memref<9x8x16xf32, #tpu.memory_space<vmem>>, vector<1x8x16xf32>
      %684 = vector.shape_cast %683 : vector<1x8x16xf32> to vector<8x16xf32>
      %cst_652 = arith.constant dense<0.000000e+00> : vector<40x16xf32>
      %685 = tpu.matmul %682, %684, %cst_652 {dimension_numbers = #tpu.dot_dimension_numbers<[1], [0], [0], [1], [0, 0, 1, 1], [], []>} : vector<40x8xf32>, vector<8x16xf32>, vector<40x16xf32> -> vector<40x16xf32>
      %686 = arith.addf %679, %685 : vector<40x16xf32>
      %c2_653 = arith.constant 2 : index
      %c0_654 = arith.constant 0 : index
      %c0_655 = arith.constant 0 : index
      %687 = vector.load %arg3[%c2_653, %c0_654, %c0_655] : memref<3x40x82xf32, #tpu.memory_space<vmem>>, vector<1x40x82xf32>
      %688 = vector.shape_cast %687 : vector<1x40x82xf32> to vector<40x82xf32>
      %cst_656 = arith.constant dense<0.000000e+00> : vector<40x8xf32>
      %689 = tpu.matmul %688, %672, %cst_656 {dimension_numbers = #tpu.dot_dimension_numbers<[1], [0], [0], [1], [0, 0, 1, 1], [], []>} : vector<40x82xf32>, vector<82x8xf32>, vector<40x8xf32> -> vector<40x8xf32>
      %c5_657 = arith.constant 5 : index
      %c0_658 = arith.constant 0 : index
      %c0_659 = arith.constant 0 : index
      %690 = vector.load %arg8[%c5_657, %c0_658, %c0_659] : memref<9x8x16xf32, #tpu.memory_space<vmem>>, vector<1x8x16xf32>
      %691 = vector.shape_cast %690 : vector<1x8x16xf32> to vector<8x16xf32>
      %cst_660 = arith.constant dense<0.000000e+00> : vector<40x16xf32>
      %692 = tpu.matmul %689, %691, %cst_660 {dimension_numbers = #tpu.dot_dimension_numbers<[1], [0], [0], [1], [0, 0, 1, 1], [], []>} : vector<40x8xf32>, vector<8x16xf32>, vector<40x16xf32> -> vector<40x16xf32>
      %693 = arith.addf %686, %692 : vector<40x16xf32>
      %c2_i32_661 = arith.constant 2 : i32
      %694 = arith.addi %644, %c2_i32_661 : i32
      %c0_662 = arith.constant 0 : index
      %695 = arith.index_cast %694 : i32 to index
      %c0_663 = arith.constant 0 : index
      %c0_664 = arith.constant 0 : index
      %696 = vector.load %arg1[%c0_662, %695, %c0_663, %c0_664] : memref<1x42x82x8xf32, #tpu.memory_space<vmem>>, vector<1x1x82x8xf32>
      %697 = vector.shape_cast %696 : vector<1x1x82x8xf32> to vector<82x8xf32>
      %c0_665 = arith.constant 0 : index
      %c0_666 = arith.constant 0 : index
      %c0_667 = arith.constant 0 : index
      %698 = vector.load %arg3[%c0_665, %c0_666, %c0_667] : memref<3x40x82xf32, #tpu.memory_space<vmem>>, vector<1x40x82xf32>
      %699 = vector.shape_cast %698 : vector<1x40x82xf32> to vector<40x82xf32>
      %cst_668 = arith.constant dense<0.000000e+00> : vector<40x8xf32>
      %700 = tpu.matmul %699, %697, %cst_668 {dimension_numbers = #tpu.dot_dimension_numbers<[1], [0], [0], [1], [0, 0, 1, 1], [], []>} : vector<40x82xf32>, vector<82x8xf32>, vector<40x8xf32> -> vector<40x8xf32>
      %c6_669 = arith.constant 6 : index
      %c0_670 = arith.constant 0 : index
      %c0_671 = arith.constant 0 : index
      %701 = vector.load %arg8[%c6_669, %c0_670, %c0_671] : memref<9x8x16xf32, #tpu.memory_space<vmem>>, vector<1x8x16xf32>
      %702 = vector.shape_cast %701 : vector<1x8x16xf32> to vector<8x16xf32>
      %cst_672 = arith.constant dense<0.000000e+00> : vector<40x16xf32>
      %703 = tpu.matmul %700, %702, %cst_672 {dimension_numbers = #tpu.dot_dimension_numbers<[1], [0], [0], [1], [0, 0, 1, 1], [], []>} : vector<40x8xf32>, vector<8x16xf32>, vector<40x16xf32> -> vector<40x16xf32>
      %704 = arith.addf %693, %703 : vector<40x16xf32>
      %c1_673 = arith.constant 1 : index
      %c0_674 = arith.constant 0 : index
      %c0_675 = arith.constant 0 : index
      %705 = vector.load %arg3[%c1_673, %c0_674, %c0_675] : memref<3x40x82xf32, #tpu.memory_space<vmem>>, vector<1x40x82xf32>
      %706 = vector.shape_cast %705 : vector<1x40x82xf32> to vector<40x82xf32>
      %cst_676 = arith.constant dense<0.000000e+00> : vector<40x8xf32>
      %707 = tpu.matmul %706, %697, %cst_676 {dimension_numbers = #tpu.dot_dimension_numbers<[1], [0], [0], [1], [0, 0, 1, 1], [], []>} : vector<40x82xf32>, vector<82x8xf32>, vector<40x8xf32> -> vector<40x8xf32>
      %c7_677 = arith.constant 7 : index
      %c0_678 = arith.constant 0 : index
      %c0_679 = arith.constant 0 : index
      %708 = vector.load %arg8[%c7_677, %c0_678, %c0_679] : memref<9x8x16xf32, #tpu.memory_space<vmem>>, vector<1x8x16xf32>
      %709 = vector.shape_cast %708 : vector<1x8x16xf32> to vector<8x16xf32>
      %cst_680 = arith.constant dense<0.000000e+00> : vector<40x16xf32>
      %710 = tpu.matmul %707, %709, %cst_680 {dimension_numbers = #tpu.dot_dimension_numbers<[1], [0], [0], [1], [0, 0, 1, 1], [], []>} : vector<40x8xf32>, vector<8x16xf32>, vector<40x16xf32> -> vector<40x16xf32>
      %711 = arith.addf %704, %710 : vector<40x16xf32>
      %c2_681 = arith.constant 2 : index
      %c0_682 = arith.constant 0 : index
      %c0_683 = arith.constant 0 : index
      %712 = vector.load %arg3[%c2_681, %c0_682, %c0_683] : memref<3x40x82xf32, #tpu.memory_space<vmem>>, vector<1x40x82xf32>
      %713 = vector.shape_cast %712 : vector<1x40x82xf32> to vector<40x82xf32>
      %cst_684 = arith.constant dense<0.000000e+00> : vector<40x8xf32>
      %714 = tpu.matmul %713, %697, %cst_684 {dimension_numbers = #tpu.dot_dimension_numbers<[1], [0], [0], [1], [0, 0, 1, 1], [], []>} : vector<40x82xf32>, vector<82x8xf32>, vector<40x8xf32> -> vector<40x8xf32>
      %c8_685 = arith.constant 8 : index
      %c0_686 = arith.constant 0 : index
      %c0_687 = arith.constant 0 : index
      %715 = vector.load %arg8[%c8_685, %c0_686, %c0_687] : memref<9x8x16xf32, #tpu.memory_space<vmem>>, vector<1x8x16xf32>
      %716 = vector.shape_cast %715 : vector<1x8x16xf32> to vector<8x16xf32>
      %cst_688 = arith.constant dense<0.000000e+00> : vector<40x16xf32>
      %717 = tpu.matmul %714, %716, %cst_688 {dimension_numbers = #tpu.dot_dimension_numbers<[1], [0], [0], [1], [0, 0, 1, 1], [], []>} : vector<40x8xf32>, vector<8x16xf32>, vector<40x16xf32> -> vector<40x16xf32>
      %718 = arith.addf %711, %717 : vector<40x16xf32>
      %c0_689 = arith.constant 0 : index
      %c0_690 = arith.constant 0 : index
      %719 = vector.load %arg9[%c0_689, %c0_690] : memref<1x16xf32, #tpu.memory_space<vmem>>, vector<1x16xf32>
      %720 = vector.broadcast %719 : vector<1x16xf32> to vector<40x16xf32>
      %721 = arith.addf %718, %720 : vector<40x16xf32>
      %cst_691 = arith.constant 0.000000e+00 : f32
      %722 = vector.broadcast %cst_691 : f32 to vector<40x16xf32>
      %723 = arith.maximumf %721, %722 : vector<40x16xf32>
      %c0_692 = arith.constant 0 : index
      %c0_693 = arith.constant 0 : index
      %724 = vector.load %arg6[%c0_692, %c0_693] : memref<42x40xf32, #tpu.memory_space<vmem>>, vector<42x40xf32>
      %cst_694 = arith.constant dense<0.000000e+00> : vector<42x16xf32>
      %725 = tpu.matmul %724, %723, %cst_694 {dimension_numbers = #tpu.dot_dimension_numbers<[1], [0], [0], [1], [0, 0, 1, 1], [], []>} : vector<42x40xf32>, vector<40x16xf32>, vector<42x16xf32> -> vector<42x16xf32>
      %c1_i32_695 = arith.constant 1 : i32
      %726 = arith.addi %arg24, %c1_i32_695 : i32
      %727 = arith.index_cast %726 : i32 to index
      %c0_696 = arith.constant 0 : index
      %c0_697 = arith.constant 0 : index
      %728 = vector.load %arg22[%727, %c0_696, %c0_697] : memref<22x42x16xf32, #tpu.memory_space<vmem>>, vector<1x42x16xf32>
      %729 = vector.shape_cast %728 : vector<1x42x16xf32> to vector<42x16xf32>
      %730 = vector.shape_cast %725 : vector<42x16xf32> to vector<1x42x16xf32>
      tpu.vector_store %arg22[%727, %c0_696, %c0_697], %730 {strides = array<i32>} : memref<22x42x16xf32, #tpu.memory_space<vmem>>, vector<1x42x16xf32>,
    }
    %c20_i32_6 = arith.constant 20 : i32
    %c0_i32_7 = arith.constant 0 : i32
    %c10_i32 = arith.constant 10 : i32
    %5 = arith.addi %c0_i32_7, %c10_i32 : i32
    %c1_i32_8 = arith.constant 1 : i32
    scf.for %arg24 = %c0_i32_7 to %5 step %c1_i32_8  : i32 {
      %c2_i32 = arith.constant 2 : i32
      %644 = arith.muli %c2_i32, %arg24 : i32
      %c0_i32_605 = arith.constant 0 : i32
      %645 = arith.addi %644, %c0_i32_605 : i32
      %646 = arith.index_cast %645 : i32 to index
      %c0_606 = arith.constant 0 : index
      %c0_607 = arith.constant 0 : index
      %647 = vector.load %arg22[%646, %c0_606, %c0_607] : memref<22x42x16xf32, #tpu.memory_space<vmem>>, vector<1x42x16xf32>
      %648 = vector.shape_cast %647 : vector<1x42x16xf32> to vector<42x16xf32>
      %c0_608 = arith.constant 0 : index
      %c0_609 = arith.constant 0 : index
      %c0_610 = arith.constant 0 : index
      %649 = vector.load %arg4[%c0_608, %c0_609, %c0_610] : memref<3x20x42xf32, #tpu.memory_space<vmem>>, vector<1x20x42xf32>
      %650 = vector.shape_cast %649 : vector<1x20x42xf32> to vector<20x42xf32>
      %cst_611 = arith.constant dense<0.000000e+00> : vector<20x16xf32>
      %651 = tpu.matmul %650, %648, %cst_611 {dimension_numbers = #tpu.dot_dimension_numbers<[1], [0], [0], [1], [0, 0, 1, 1], [], []>} : vector<20x42xf32>, vector<42x16xf32>, vector<20x16xf32> -> vector<20x16xf32>
      %c0_612 = arith.constant 0 : index
      %c0_613 = arith.constant 0 : index
      %c0_614 = arith.constant 0 : index
      %652 = vector.load %arg10[%c0_612, %c0_613, %c0_614] : memref<9x16x32xf32, #tpu.memory_space<vmem>>, vector<1x16x32xf32>
      %653 = vector.shape_cast %652 : vector<1x16x32xf32> to vector<16x32xf32>
      %cst_615 = arith.constant dense<0.000000e+00> : vector<20x32xf32>
      %654 = tpu.matmul %651, %653, %cst_615 {dimension_numbers = #tpu.dot_dimension_numbers<[1], [0], [0], [1], [0, 0, 1, 1], [], []>} : vector<20x16xf32>, vector<16x32xf32>, vector<20x32xf32> -> vector<20x32xf32>
      %c1_616 = arith.constant 1 : index
      %c0_617 = arith.constant 0 : index
      %c0_618 = arith.constant 0 : index
      %655 = vector.load %arg4[%c1_616, %c0_617, %c0_618] : memref<3x20x42xf32, #tpu.memory_space<vmem>>, vector<1x20x42xf32>
      %656 = vector.shape_cast %655 : vector<1x20x42xf32> to vector<20x42xf32>
      %cst_619 = arith.constant dense<0.000000e+00> : vector<20x16xf32>
      %657 = tpu.matmul %656, %648, %cst_619 {dimension_numbers = #tpu.dot_dimension_numbers<[1], [0], [0], [1], [0, 0, 1, 1], [], []>} : vector<20x42xf32>, vector<42x16xf32>, vector<20x16xf32> -> vector<20x16xf32>
      %c1_620 = arith.constant 1 : index
      %c0_621 = arith.constant 0 : index
      %c0_622 = arith.constant 0 : index
      %658 = vector.load %arg10[%c1_620, %c0_621, %c0_622] : memref<9x16x32xf32, #tpu.memory_space<vmem>>, vector<1x16x32xf32>
      %659 = vector.shape_cast %658 : vector<1x16x32xf32> to vector<16x32xf32>
      %cst_623 = arith.constant dense<0.000000e+00> : vector<20x32xf32>
      %660 = tpu.matmul %657, %659, %cst_623 {dimension_numbers = #tpu.dot_dimension_numbers<[1], [0], [0], [1], [0, 0, 1, 1], [], []>} : vector<20x16xf32>, vector<16x32xf32>, vector<20x32xf32> -> vector<20x32xf32>
      %661 = arith.addf %654, %660 : vector<20x32xf32>
      %c2_624 = arith.constant 2 : index
      %c0_625 = arith.constant 0 : index
      %c0_626 = arith.constant 0 : index
      %662 = vector.load %arg4[%c2_624, %c0_625, %c0_626] : memref<3x20x42xf32, #tpu.memory_space<vmem>>, vector<1x20x42xf32>
      %663 = vector.shape_cast %662 : vector<1x20x42xf32> to vector<20x42xf32>
      %cst_627 = arith.constant dense<0.000000e+00> : vector<20x16xf32>
      %664 = tpu.matmul %663, %648, %cst_627 {dimension_numbers = #tpu.dot_dimension_numbers<[1], [0], [0], [1], [0, 0, 1, 1], [], []>} : vector<20x42xf32>, vector<42x16xf32>, vector<20x16xf32> -> vector<20x16xf32>
      %c2_628 = arith.constant 2 : index
      %c0_629 = arith.constant 0 : index
      %c0_630 = arith.constant 0 : index
      %665 = vector.load %arg10[%c2_628, %c0_629, %c0_630] : memref<9x16x32xf32, #tpu.memory_space<vmem>>, vector<1x16x32xf32>
      %666 = vector.shape_cast %665 : vector<1x16x32xf32> to vector<16x32xf32>
      %cst_631 = arith.constant dense<0.000000e+00> : vector<20x32xf32>
      %667 = tpu.matmul %664, %666, %cst_631 {dimension_numbers = #tpu.dot_dimension_numbers<[1], [0], [0], [1], [0, 0, 1, 1], [], []>} : vector<20x16xf32>, vector<16x32xf32>, vector<20x32xf32> -> vector<20x32xf32>
      %668 = arith.addf %661, %667 : vector<20x32xf32>
      %c1_i32_632 = arith.constant 1 : i32
      %669 = arith.addi %644, %c1_i32_632 : i32
      %670 = arith.index_cast %669 : i32 to index
      %c0_633 = arith.constant 0 : index
      %c0_634 = arith.constant 0 : index
      %671 = vector.load %arg22[%670, %c0_633, %c0_634] : memref<22x42x16xf32, #tpu.memory_space<vmem>>, vector<1x42x16xf32>
      %672 = vector.shape_cast %671 : vector<1x42x16xf32> to vector<42x16xf32>
      %c0_635 = arith.constant 0 : index
      %c0_636 = arith.constant 0 : index
      %c0_637 = arith.constant 0 : index
      %673 = vector.load %arg4[%c0_635, %c0_636, %c0_637] : memref<3x20x42xf32, #tpu.memory_space<vmem>>, vector<1x20x42xf32>
      %674 = vector.shape_cast %673 : vector<1x20x42xf32> to vector<20x42xf32>
      %cst_638 = arith.constant dense<0.000000e+00> : vector<20x16xf32>
      %675 = tpu.matmul %674, %672, %cst_638 {dimension_numbers = #tpu.dot_dimension_numbers<[1], [0], [0], [1], [0, 0, 1, 1], [], []>} : vector<20x42xf32>, vector<42x16xf32>, vector<20x16xf32> -> vector<20x16xf32>
      %c3_639 = arith.constant 3 : index
      %c0_640 = arith.constant 0 : index
      %c0_641 = arith.constant 0 : index
      %676 = vector.load %arg10[%c3_639, %c0_640, %c0_641] : memref<9x16x32xf32, #tpu.memory_space<vmem>>, vector<1x16x32xf32>
      %677 = vector.shape_cast %676 : vector<1x16x32xf32> to vector<16x32xf32>
      %cst_642 = arith.constant dense<0.000000e+00> : vector<20x32xf32>
      %678 = tpu.matmul %675, %677, %cst_642 {dimension_numbers = #tpu.dot_dimension_numbers<[1], [0], [0], [1], [0, 0, 1, 1], [], []>} : vector<20x16xf32>, vector<16x32xf32>, vector<20x32xf32> -> vector<20x32xf32>
      %679 = arith.addf %668, %678 : vector<20x32xf32>
      %c1_643 = arith.constant 1 : index
      %c0_644 = arith.constant 0 : index
      %c0_645 = arith.constant 0 : index
      %680 = vector.load %arg4[%c1_643, %c0_644, %c0_645] : memref<3x20x42xf32, #tpu.memory_space<vmem>>, vector<1x20x42xf32>
      %681 = vector.shape_cast %680 : vector<1x20x42xf32> to vector<20x42xf32>
      %cst_646 = arith.constant dense<0.000000e+00> : vector<20x16xf32>
      %682 = tpu.matmul %681, %672, %cst_646 {dimension_numbers = #tpu.dot_dimension_numbers<[1], [0], [0], [1], [0, 0, 1, 1], [], []>} : vector<20x42xf32>, vector<42x16xf32>, vector<20x16xf32> -> vector<20x16xf32>
      %c4_647 = arith.constant 4 : index
      %c0_648 = arith.constant 0 : index
      %c0_649 = arith.constant 0 : index
      %683 = vector.load %arg10[%c4_647, %c0_648, %c0_649] : memref<9x16x32xf32, #tpu.memory_space<vmem>>, vector<1x16x32xf32>
      %684 = vector.shape_cast %683 : vector<1x16x32xf32> to vector<16x32xf32>
      %cst_650 = arith.constant dense<0.000000e+00> : vector<20x32xf32>
      %685 = tpu.matmul %682, %684, %cst_650 {dimension_numbers = #tpu.dot_dimension_numbers<[1], [0], [0], [1], [0, 0, 1, 1], [], []>} : vector<20x16xf32>, vector<16x32xf32>, vector<20x32xf32> -> vector<20x32xf32>
      %686 = arith.addf %679, %685 : vector<20x32xf32>
      %c2_651 = arith.constant 2 : index
      %c0_652 = arith.constant 0 : index
      %c0_653 = arith.constant 0 : index
      %687 = vector.load %arg4[%c2_651, %c0_652, %c0_653] : memref<3x20x42xf32, #tpu.memory_space<vmem>>, vector<1x20x42xf32>
      %688 = vector.shape_cast %687 : vector<1x20x42xf32> to vector<20x42xf32>
      %cst_654 = arith.constant dense<0.000000e+00> : vector<20x16xf32>
      %689 = tpu.matmul %688, %672, %cst_654 {dimension_numbers = #tpu.dot_dimension_numbers<[1], [0], [0], [1], [0, 0, 1, 1], [], []>} : vector<20x42xf32>, vector<42x16xf32>, vector<20x16xf32> -> vector<20x16xf32>
      %c5_655 = arith.constant 5 : index
      %c0_656 = arith.constant 0 : index
      %c0_657 = arith.constant 0 : index
      %690 = vector.load %arg10[%c5_655, %c0_656, %c0_657] : memref<9x16x32xf32, #tpu.memory_space<vmem>>, vector<1x16x32xf32>
      %691 = vector.shape_cast %690 : vector<1x16x32xf32> to vector<16x32xf32>
      %cst_658 = arith.constant dense<0.000000e+00> : vector<20x32xf32>
      %692 = tpu.matmul %689, %691, %cst_658 {dimension_numbers = #tpu.dot_dimension_numbers<[1], [0], [0], [1], [0, 0, 1, 1], [], []>} : vector<20x16xf32>, vector<16x32xf32>, vector<20x32xf32> -> vector<20x32xf32>
      %693 = arith.addf %686, %692 : vector<20x32xf32>
      %c2_i32_659 = arith.constant 2 : i32
      %694 = arith.addi %644, %c2_i32_659 : i32
      %695 = arith.index_cast %694 : i32 to index
      %c0_660 = arith.constant 0 : index
      %c0_661 = arith.constant 0 : index
      %696 = vector.load %arg22[%695, %c0_660, %c0_661] : memref<22x42x16xf32, #tpu.memory_space<vmem>>, vector<1x42x16xf32>
      %697 = vector.shape_cast %696 : vector<1x42x16xf32> to vector<42x16xf32>
      %c0_662 = arith.constant 0 : index
      %c0_663 = arith.constant 0 : index
      %c0_664 = arith.constant 0 : index
      %698 = vector.load %arg4[%c0_662, %c0_663, %c0_664] : memref<3x20x42xf32, #tpu.memory_space<vmem>>, vector<1x20x42xf32>
      %699 = vector.shape_cast %698 : vector<1x20x42xf32> to vector<20x42xf32>
      %cst_665 = arith.constant dense<0.000000e+00> : vector<20x16xf32>
      %700 = tpu.matmul %699, %697, %cst_665 {dimension_numbers = #tpu.dot_dimension_numbers<[1], [0], [0], [1], [0, 0, 1, 1], [], []>} : vector<20x42xf32>, vector<42x16xf32>, vector<20x16xf32> -> vector<20x16xf32>
      %c6_666 = arith.constant 6 : index
      %c0_667 = arith.constant 0 : index
      %c0_668 = arith.constant 0 : index
      %701 = vector.load %arg10[%c6_666, %c0_667, %c0_668] : memref<9x16x32xf32, #tpu.memory_space<vmem>>, vector<1x16x32xf32>
      %702 = vector.shape_cast %701 : vector<1x16x32xf32> to vector<16x32xf32>
      %cst_669 = arith.constant dense<0.000000e+00> : vector<20x32xf32>
      %703 = tpu.matmul %700, %702, %cst_669 {dimension_numbers = #tpu.dot_dimension_numbers<[1], [0], [0], [1], [0, 0, 1, 1], [], []>} : vector<20x16xf32>, vector<16x32xf32>, vector<20x32xf32> -> vector<20x32xf32>
      %704 = arith.addf %693, %703 : vector<20x32xf32>
      %c1_670 = arith.constant 1 : index
      %c0_671 = arith.constant 0 : index
      %c0_672 = arith.constant 0 : index
      %705 = vector.load %arg4[%c1_670, %c0_671, %c0_672] : memref<3x20x42xf32, #tpu.memory_space<vmem>>, vector<1x20x42xf32>
      %706 = vector.shape_cast %705 : vector<1x20x42xf32> to vector<20x42xf32>
      %cst_673 = arith.constant dense<0.000000e+00> : vector<20x16xf32>
      %707 = tpu.matmul %706, %697, %cst_673 {dimension_numbers = #tpu.dot_dimension_numbers<[1], [0], [0], [1], [0, 0, 1, 1], [], []>} : vector<20x42xf32>, vector<42x16xf32>, vector<20x16xf32> -> vector<20x16xf32>
      %c7_674 = arith.constant 7 : index
      %c0_675 = arith.constant 0 : index
      %c0_676 = arith.constant 0 : index
      %708 = vector.load %arg10[%c7_674, %c0_675, %c0_676] : memref<9x16x32xf32, #tpu.memory_space<vmem>>, vector<1x16x32xf32>
      %709 = vector.shape_cast %708 : vector<1x16x32xf32> to vector<16x32xf32>
      %cst_677 = arith.constant dense<0.000000e+00> : vector<20x32xf32>
      %710 = tpu.matmul %707, %709, %cst_677 {dimension_numbers = #tpu.dot_dimension_numbers<[1], [0], [0], [1], [0, 0, 1, 1], [], []>} : vector<20x16xf32>, vector<16x32xf32>, vector<20x32xf32> -> vector<20x32xf32>
      %711 = arith.addf %704, %710 : vector<20x32xf32>
      %c2_678 = arith.constant 2 : index
      %c0_679 = arith.constant 0 : index
      %c0_680 = arith.constant 0 : index
      %712 = vector.load %arg4[%c2_678, %c0_679, %c0_680] : memref<3x20x42xf32, #tpu.memory_space<vmem>>, vector<1x20x42xf32>
      %713 = vector.shape_cast %712 : vector<1x20x42xf32> to vector<20x42xf32>
      %cst_681 = arith.constant dense<0.000000e+00> : vector<20x16xf32>
      %714 = tpu.matmul %713, %697, %cst_681 {dimension_numbers = #tpu.dot_dimension_numbers<[1], [0], [0], [1], [0, 0, 1, 1], [], []>} : vector<20x42xf32>, vector<42x16xf32>, vector<20x16xf32> -> vector<20x16xf32>
      %c8_682 = arith.constant 8 : index
      %c0_683 = arith.constant 0 : index
      %c0_684 = arith.constant 0 : index
      %715 = vector.load %arg10[%c8_682, %c0_683, %c0_684] : memref<9x16x32xf32, #tpu.memory_space<vmem>>, vector<1x16x32xf32>
      %716 = vector.shape_cast %715 : vector<1x16x32xf32> to vector<16x32xf32>
      %cst_685 = arith.constant dense<0.000000e+00> : vector<20x32xf32>
      %717 = tpu.matmul %714, %716, %cst_685 {dimension_numbers = #tpu.dot_dimension_numbers<[1], [0], [0], [1], [0, 0, 1, 1], [], []>} : vector<20x16xf32>, vector<16x32xf32>, vector<20x32xf32> -> vector<20x32xf32>
      %718 = arith.addf %711, %717 : vector<20x32xf32>
      %c0_686 = arith.constant 0 : index
      %c0_687 = arith.constant 0 : index
      %719 = vector.load %arg11[%c0_686, %c0_687] : memref<1x32xf32, #tpu.memory_space<vmem>>, vector<1x32xf32>
      %720 = vector.broadcast %719 : vector<1x32xf32> to vector<20x32xf32>
      %721 = arith.addf %718, %720 : vector<20x32xf32>
      %cst_688 = arith.constant 0.000000e+00 : f32
      %722 = vector.broadcast %cst_688 : f32 to vector<20x32xf32>
      %723 = arith.maximumf %721, %722 : vector<20x32xf32>
      %c0_689 = arith.constant 0 : index
      %c0_690 = arith.constant 0 : index
      %724 = vector.load %arg7[%c0_689, %c0_690] : memref<22x20xf32, #tpu.memory_space<vmem>>, vector<22x20xf32>
      %cst_691 = arith.constant dense<0.000000e+00> : vector<22x32xf32>
      %725 = tpu.matmul %724, %723, %cst_691 {dimension_numbers = #tpu.dot_dimension_numbers<[1], [0], [0], [1], [0, 0, 1, 1], [], []>} : vector<22x20xf32>, vector<20x32xf32>, vector<22x32xf32> -> vector<22x32xf32>
      %c1_i32_692 = arith.constant 1 : i32
      %726 = arith.addi %arg24, %c1_i32_692 : i32
      %727 = arith.index_cast %726 : i32 to index
      %c0_693 = arith.constant 0 : index
      %c0_694 = arith.constant 0 : index
      %728 = vector.load %arg23[%727, %c0_693, %c0_694] : memref<12x22x32xf32, #tpu.memory_space<vmem>>, vector<1x22x32xf32>
      %729 = vector.shape_cast %728 : vector<1x22x32xf32> to vector<22x32xf32>
      %730 = vector.shape_cast %725 : vector<22x32xf32> to vector<1x22x32xf32>
      tpu.vector_store %arg23[%727, %c0_693, %c0_694], %730 {strides = array<i32>} : memref<12x22x32xf32, #tpu.memory_space<vmem>>, vector<1x22x32xf32>,
    }
    %c10_i32_9 = arith.constant 10 : i32
    %cst_10 = arith.constant 0.000000e+00 : f32
    %6 = vector.broadcast %cst_10 : f32 to vector<1x64xf32>
    %c0_11 = arith.constant 0 : index
    %c0_12 = arith.constant 0 : index
    %c0_13 = arith.constant 0 : index
    %7 = vector.load %arg23[%c0_11, %c0_12, %c0_13] : memref<12x22x32xf32, #tpu.memory_space<vmem>>, vector<1x22x32xf32>
    %8 = vector.shape_cast %7 : vector<1x22x32xf32> to vector<22x32xf32>
    %c0_14 = arith.constant 0 : index
    %c0_15 = arith.constant 0 : index
    %c0_16 = arith.constant 0 : index
    %9 = vector.load %arg5[%c0_14, %c0_15, %c0_16] : memref<3x10x22xf32, #tpu.memory_space<vmem>>, vector<1x10x22xf32>
    %10 = vector.shape_cast %9 : vector<1x10x22xf32> to vector<10x22xf32>
    %cst_17 = arith.constant dense<0.000000e+00> : vector<10x32xf32>
    %11 = tpu.matmul %10, %8, %cst_17 {dimension_numbers = #tpu.dot_dimension_numbers<[1], [0], [0], [1], [0, 0, 1, 1], [], []>} : vector<10x22xf32>, vector<22x32xf32>, vector<10x32xf32> -> vector<10x32xf32>
    %c0_18 = arith.constant 0 : index
    %c0_19 = arith.constant 0 : index
    %c0_20 = arith.constant 0 : index
    %12 = vector.load %arg12[%c0_18, %c0_19, %c0_20] : memref<9x32x64xf32, #tpu.memory_space<vmem>>, vector<1x32x64xf32>
    %13 = vector.shape_cast %12 : vector<1x32x64xf32> to vector<32x64xf32>
    %cst_21 = arith.constant dense<0.000000e+00> : vector<10x64xf32>
    %14 = tpu.matmul %11, %13, %cst_21 {dimension_numbers = #tpu.dot_dimension_numbers<[1], [0], [0], [1], [0, 0, 1, 1], [], []>} : vector<10x32xf32>, vector<32x64xf32>, vector<10x64xf32> -> vector<10x64xf32>
    %c1 = arith.constant 1 : index
    %c0_22 = arith.constant 0 : index
    %c0_23 = arith.constant 0 : index
    %15 = vector.load %arg5[%c1, %c0_22, %c0_23] : memref<3x10x22xf32, #tpu.memory_space<vmem>>, vector<1x10x22xf32>
    %16 = vector.shape_cast %15 : vector<1x10x22xf32> to vector<10x22xf32>
    %cst_24 = arith.constant dense<0.000000e+00> : vector<10x32xf32>
    %17 = tpu.matmul %16, %8, %cst_24 {dimension_numbers = #tpu.dot_dimension_numbers<[1], [0], [0], [1], [0, 0, 1, 1], [], []>} : vector<10x22xf32>, vector<22x32xf32>, vector<10x32xf32> -> vector<10x32xf32>
    %c1_25 = arith.constant 1 : index
    %c0_26 = arith.constant 0 : index
    %c0_27 = arith.constant 0 : index
    %18 = vector.load %arg12[%c1_25, %c0_26, %c0_27] : memref<9x32x64xf32, #tpu.memory_space<vmem>>, vector<1x32x64xf32>
    %19 = vector.shape_cast %18 : vector<1x32x64xf32> to vector<32x64xf32>
    %cst_28 = arith.constant dense<0.000000e+00> : vector<10x64xf32>
    %20 = tpu.matmul %17, %19, %cst_28 {dimension_numbers = #tpu.dot_dimension_numbers<[1], [0], [0], [1], [0, 0, 1, 1], [], []>} : vector<10x32xf32>, vector<32x64xf32>, vector<10x64xf32> -> vector<10x64xf32>
    %21 = arith.addf %14, %20 : vector<10x64xf32>
    %c2 = arith.constant 2 : index
    %c0_29 = arith.constant 0 : index
    %c0_30 = arith.constant 0 : index
    %22 = vector.load %arg5[%c2, %c0_29, %c0_30] : memref<3x10x22xf32, #tpu.memory_space<vmem>>, vector<1x10x22xf32>
    %23 = vector.shape_cast %22 : vector<1x10x22xf32> to vector<10x22xf32>
    %cst_31 = arith.constant dense<0.000000e+00> : vector<10x32xf32>
    %24 = tpu.matmul %23, %8, %cst_31 {dimension_numbers = #tpu.dot_dimension_numbers<[1], [0], [0], [1], [0, 0, 1, 1], [], []>} : vector<10x22xf32>, vector<22x32xf32>, vector<10x32xf32> -> vector<10x32xf32>
    %c2_32 = arith.constant 2 : index
    %c0_33 = arith.constant 0 : index
    %c0_34 = arith.constant 0 : index
    %25 = vector.load %arg12[%c2_32, %c0_33, %c0_34] : memref<9x32x64xf32, #tpu.memory_space<vmem>>, vector<1x32x64xf32>
    %26 = vector.shape_cast %25 : vector<1x32x64xf32> to vector<32x64xf32>
    %cst_35 = arith.constant dense<0.000000e+00> : vector<10x64xf32>
    %27 = tpu.matmul %24, %26, %cst_35 {dimension_numbers = #tpu.dot_dimension_numbers<[1], [0], [0], [1], [0, 0, 1, 1], [], []>} : vector<10x32xf32>, vector<32x64xf32>, vector<10x64xf32> -> vector<10x64xf32>
    %28 = arith.addf %21, %27 : vector<10x64xf32>
    %c1_36 = arith.constant 1 : index
    %c0_37 = arith.constant 0 : index
    %c0_38 = arith.constant 0 : index
    %29 = vector.load %arg23[%c1_36, %c0_37, %c0_38] : memref<12x22x32xf32, #tpu.memory_space<vmem>>, vector<1x22x32xf32>
    %30 = vector.shape_cast %29 : vector<1x22x32xf32> to vector<22x32xf32>
    %c0_39 = arith.constant 0 : index
    %c0_40 = arith.constant 0 : index
    %c0_41 = arith.constant 0 : index
    %31 = vector.load %arg5[%c0_39, %c0_40, %c0_41] : memref<3x10x22xf32, #tpu.memory_space<vmem>>, vector<1x10x22xf32>
    %32 = vector.shape_cast %31 : vector<1x10x22xf32> to vector<10x22xf32>
    %cst_42 = arith.constant dense<0.000000e+00> : vector<10x32xf32>
    %33 = tpu.matmul %32, %30, %cst_42 {dimension_numbers = #tpu.dot_dimension_numbers<[1], [0], [0], [1], [0, 0, 1, 1], [], []>} : vector<10x22xf32>, vector<22x32xf32>, vector<10x32xf32> -> vector<10x32xf32>
    %c3 = arith.constant 3 : index
    %c0_43 = arith.constant 0 : index
    %c0_44 = arith.constant 0 : index
    %34 = vector.load %arg12[%c3, %c0_43, %c0_44] : memref<9x32x64xf32, #tpu.memory_space<vmem>>, vector<1x32x64xf32>
    %35 = vector.shape_cast %34 : vector<1x32x64xf32> to vector<32x64xf32>
    %cst_45 = arith.constant dense<0.000000e+00> : vector<10x64xf32>
    %36 = tpu.matmul %33, %35, %cst_45 {dimension_numbers = #tpu.dot_dimension_numbers<[1], [0], [0], [1], [0, 0, 1, 1], [], []>} : vector<10x32xf32>, vector<32x64xf32>, vector<10x64xf32> -> vector<10x64xf32>
    %37 = arith.addf %28, %36 : vector<10x64xf32>
    %c1_46 = arith.constant 1 : index
    %c0_47 = arith.constant 0 : index
    %c0_48 = arith.constant 0 : index
    %38 = vector.load %arg5[%c1_46, %c0_47, %c0_48] : memref<3x10x22xf32, #tpu.memory_space<vmem>>, vector<1x10x22xf32>
    %39 = vector.shape_cast %38 : vector<1x10x22xf32> to vector<10x22xf32>
    %cst_49 = arith.constant dense<0.000000e+00> : vector<10x32xf32>
    %40 = tpu.matmul %39, %30, %cst_49 {dimension_numbers = #tpu.dot_dimension_numbers<[1], [0], [0], [1], [0, 0, 1, 1], [], []>} : vector<10x22xf32>, vector<22x32xf32>, vector<10x32xf32> -> vector<10x32xf32>
    %c4 = arith.constant 4 : index
    %c0_50 = arith.constant 0 : index
    %c0_51 = arith.constant 0 : index
    %41 = vector.load %arg12[%c4, %c0_50, %c0_51] : memref<9x32x64xf32, #tpu.memory_space<vmem>>, vector<1x32x64xf32>
    %42 = vector.shape_cast %41 : vector<1x32x64xf32> to vector<32x64xf32>
    %cst_52 = arith.constant dense<0.000000e+00> : vector<10x64xf32>
    %43 = tpu.matmul %40, %42, %cst_52 {dimension_numbers = #tpu.dot_dimension_numbers<[1], [0], [0], [1], [0, 0, 1, 1], [], []>} : vector<10x32xf32>, vector<32x64xf32>, vector<10x64xf32> -> vector<10x64xf32>
    %44 = arith.addf %37, %43 : vector<10x64xf32>
    %c2_53 = arith.constant 2 : index
    %c0_54 = arith.constant 0 : index
    %c0_55 = arith.constant 0 : index
    %45 = vector.load %arg5[%c2_53, %c0_54, %c0_55] : memref<3x10x22xf32, #tpu.memory_space<vmem>>, vector<1x10x22xf32>
    %46 = vector.shape_cast %45 : vector<1x10x22xf32> to vector<10x22xf32>
    %cst_56 = arith.constant dense<0.000000e+00> : vector<10x32xf32>
    %47 = tpu.matmul %46, %30, %cst_56 {dimension_numbers = #tpu.dot_dimension_numbers<[1], [0], [0], [1], [0, 0, 1, 1], [], []>} : vector<10x22xf32>, vector<22x32xf32>, vector<10x32xf32> -> vector<10x32xf32>
    %c5 = arith.constant 5 : index
    %c0_57 = arith.constant 0 : index
    %c0_58 = arith.constant 0 : index
    %48 = vector.load %arg12[%c5, %c0_57, %c0_58] : memref<9x32x64xf32, #tpu.memory_space<vmem>>, vector<1x32x64xf32>
    %49 = vector.shape_cast %48 : vector<1x32x64xf32> to vector<32x64xf32>
    %cst_59 = arith.constant dense<0.000000e+00> : vector<10x64xf32>
    %50 = tpu.matmul %47, %49, %cst_59 {dimension_numbers = #tpu.dot_dimension_numbers<[1], [0], [0], [1], [0, 0, 1, 1], [], []>} : vector<10x32xf32>, vector<32x64xf32>, vector<10x64xf32> -> vector<10x64xf32>
    %51 = arith.addf %44, %50 : vector<10x64xf32>
    %c2_60 = arith.constant 2 : index
    %c0_61 = arith.constant 0 : index
    %c0_62 = arith.constant 0 : index
    %52 = vector.load %arg23[%c2_60, %c0_61, %c0_62] : memref<12x22x32xf32, #tpu.memory_space<vmem>>, vector<1x22x32xf32>
    %53 = vector.shape_cast %52 : vector<1x22x32xf32> to vector<22x32xf32>
    %c0_63 = arith.constant 0 : index
    %c0_64 = arith.constant 0 : index
    %c0_65 = arith.constant 0 : index
    %54 = vector.load %arg5[%c0_63, %c0_64, %c0_65] : memref<3x10x22xf32, #tpu.memory_space<vmem>>, vector<1x10x22xf32>
    %55 = vector.shape_cast %54 : vector<1x10x22xf32> to vector<10x22xf32>
    %cst_66 = arith.constant dense<0.000000e+00> : vector<10x32xf32>
    %56 = tpu.matmul %55, %53, %cst_66 {dimension_numbers = #tpu.dot_dimension_numbers<[1], [0], [0], [1], [0, 0, 1, 1], [], []>} : vector<10x22xf32>, vector<22x32xf32>, vector<10x32xf32> -> vector<10x32xf32>
    %c6 = arith.constant 6 : index
    %c0_67 = arith.constant 0 : index
    %c0_68 = arith.constant 0 : index
    %57 = vector.load %arg12[%c6, %c0_67, %c0_68] : memref<9x32x64xf32, #tpu.memory_space<vmem>>, vector<1x32x64xf32>
    %58 = vector.shape_cast %57 : vector<1x32x64xf32> to vector<32x64xf32>
    %cst_69 = arith.constant dense<0.000000e+00> : vector<10x64xf32>
    %59 = tpu.matmul %56, %58, %cst_69 {dimension_numbers = #tpu.dot_dimension_numbers<[1], [0], [0], [1], [0, 0, 1, 1], [], []>} : vector<10x32xf32>, vector<32x64xf32>, vector<10x64xf32> -> vector<10x64xf32>
    %60 = arith.addf %51, %59 : vector<10x64xf32>
    %c1_70 = arith.constant 1 : index
    %c0_71 = arith.constant 0 : index
    %c0_72 = arith.constant 0 : index
    %61 = vector.load %arg5[%c1_70, %c0_71, %c0_72] : memref<3x10x22xf32, #tpu.memory_space<vmem>>, vector<1x10x22xf32>
    %62 = vector.shape_cast %61 : vector<1x10x22xf32> to vector<10x22xf32>
    %cst_73 = arith.constant dense<0.000000e+00> : vector<10x32xf32>
    %63 = tpu.matmul %62, %53, %cst_73 {dimension_numbers = #tpu.dot_dimension_numbers<[1], [0], [0], [1], [0, 0, 1, 1], [], []>} : vector<10x22xf32>, vector<22x32xf32>, vector<10x32xf32> -> vector<10x32xf32>
    %c7 = arith.constant 7 : index
    %c0_74 = arith.constant 0 : index
    %c0_75 = arith.constant 0 : index
    %64 = vector.load %arg12[%c7, %c0_74, %c0_75] : memref<9x32x64xf32, #tpu.memory_space<vmem>>, vector<1x32x64xf32>
    %65 = vector.shape_cast %64 : vector<1x32x64xf32> to vector<32x64xf32>
    %cst_76 = arith.constant dense<0.000000e+00> : vector<10x64xf32>
    %66 = tpu.matmul %63, %65, %cst_76 {dimension_numbers = #tpu.dot_dimension_numbers<[1], [0], [0], [1], [0, 0, 1, 1], [], []>} : vector<10x32xf32>, vector<32x64xf32>, vector<10x64xf32> -> vector<10x64xf32>
    %67 = arith.addf %60, %66 : vector<10x64xf32>
    %c2_77 = arith.constant 2 : index
    %c0_78 = arith.constant 0 : index
    %c0_79 = arith.constant 0 : index
    %68 = vector.load %arg5[%c2_77, %c0_78, %c0_79] : memref<3x10x22xf32, #tpu.memory_space<vmem>>, vector<1x10x22xf32>
    %69 = vector.shape_cast %68 : vector<1x10x22xf32> to vector<10x22xf32>
    %cst_80 = arith.constant dense<0.000000e+00> : vector<10x32xf32>
    %70 = tpu.matmul %69, %53, %cst_80 {dimension_numbers = #tpu.dot_dimension_numbers<[1], [0], [0], [1], [0, 0, 1, 1], [], []>} : vector<10x22xf32>, vector<22x32xf32>, vector<10x32xf32> -> vector<10x32xf32>
    %c8 = arith.constant 8 : index
    %c0_81 = arith.constant 0 : index
    %c0_82 = arith.constant 0 : index
    %71 = vector.load %arg12[%c8, %c0_81, %c0_82] : memref<9x32x64xf32, #tpu.memory_space<vmem>>, vector<1x32x64xf32>
    %72 = vector.shape_cast %71 : vector<1x32x64xf32> to vector<32x64xf32>
    %cst_83 = arith.constant dense<0.000000e+00> : vector<10x64xf32>
    %73 = tpu.matmul %70, %72, %cst_83 {dimension_numbers = #tpu.dot_dimension_numbers<[1], [0], [0], [1], [0, 0, 1, 1], [], []>} : vector<10x32xf32>, vector<32x64xf32>, vector<10x64xf32> -> vector<10x64xf32>
    %74 = arith.addf %67, %73 : vector<10x64xf32>
    %c0_84 = arith.constant 0 : index
    %c0_85 = arith.constant 0 : index
    %75 = vector.load %arg13[%c0_84, %c0_85] : memref<1x64xf32, #tpu.memory_space<vmem>>, vector<1x64xf32>
    %76 = vector.broadcast %75 : vector<1x64xf32> to vector<10x64xf32>
    %77 = arith.addf %74, %76 : vector<10x64xf32>
    %cst_86 = arith.constant 0.000000e+00 : f32
    %78 = vector.broadcast %cst_86 : f32 to vector<10x64xf32>
    %79 = arith.maximumf %77, %78 : vector<10x64xf32>
    %80 = vector.extract_strided_slice %79 {offsets = [0, 0], sizes = [1, 64], strides = [1, 1]} : vector<10x64xf32> to vector<1x64xf32>
    %c0_87 = arith.constant 0 : index
    %c0_88 = arith.constant 0 : index
    %c0_89 = arith.constant 0 : index
    %81 = vector.load %arg14[%c0_87, %c0_88, %c0_89] : memref<50x64x64xf32, #tpu.memory_space<vmem>>, vector<1x64x64xf32>
    %82 = vector.shape_cast %81 : vector<1x64x64xf32> to vector<64x64xf32>
    %cst_90 = arith.constant dense<0.000000e+00> : vector<1x64xf32>
    %83 = tpu.matmul %80, %82, %cst_90 {dimension_numbers = #tpu.dot_dimension_numbers<[1], [0], [0], [1], [0, 0, 1, 1], [], []>} : vector<1x64xf32>, vector<64x64xf32>, vector<1x64xf32> -> vector<1x64xf32>
    %84 = arith.addf %6, %83 : vector<1x64xf32>
    %85 = vector.extract_strided_slice %79 {offsets = [1, 0], sizes = [1, 64], strides = [1, 1]} : vector<10x64xf32> to vector<1x64xf32>
    %c1_91 = arith.constant 1 : index
    %c0_92 = arith.constant 0 : index
    %c0_93 = arith.constant 0 : index
    %86 = vector.load %arg14[%c1_91, %c0_92, %c0_93] : memref<50x64x64xf32, #tpu.memory_space<vmem>>, vector<1x64x64xf32>
    %87 = vector.shape_cast %86 : vector<1x64x64xf32> to vector<64x64xf32>
    %cst_94 = arith.constant dense<0.000000e+00> : vector<1x64xf32>
    %88 = tpu.matmul %85, %87, %cst_94 {dimension_numbers = #tpu.dot_dimension_numbers<[1], [0], [0], [1], [0, 0, 1, 1], [], []>} : vector<1x64xf32>, vector<64x64xf32>, vector<1x64xf32> -> vector<1x64xf32>
    %89 = arith.addf %84, %88 : vector<1x64xf32>
    %90 = vector.extract_strided_slice %79 {offsets = [2, 0], sizes = [1, 64], strides = [1, 1]} : vector<10x64xf32> to vector<1x64xf32>
    %c2_95 = arith.constant 2 : index
    %c0_96 = arith.constant 0 : index
    %c0_97 = arith.constant 0 : index
    %91 = vector.load %arg14[%c2_95, %c0_96, %c0_97] : memref<50x64x64xf32, #tpu.memory_space<vmem>>, vector<1x64x64xf32>
    %92 = vector.shape_cast %91 : vector<1x64x64xf32> to vector<64x64xf32>
    %cst_98 = arith.constant dense<0.000000e+00> : vector<1x64xf32>
    %93 = tpu.matmul %90, %92, %cst_98 {dimension_numbers = #tpu.dot_dimension_numbers<[1], [0], [0], [1], [0, 0, 1, 1], [], []>} : vector<1x64xf32>, vector<64x64xf32>, vector<1x64xf32> -> vector<1x64xf32>
    %94 = arith.addf %89, %93 : vector<1x64xf32>
    %95 = vector.extract_strided_slice %79 {offsets = [3, 0], sizes = [1, 64], strides = [1, 1]} : vector<10x64xf32> to vector<1x64xf32>
    %c3_99 = arith.constant 3 : index
    %c0_100 = arith.constant 0 : index
    %c0_101 = arith.constant 0 : index
    %96 = vector.load %arg14[%c3_99, %c0_100, %c0_101] : memref<50x64x64xf32, #tpu.memory_space<vmem>>, vector<1x64x64xf32>
    %97 = vector.shape_cast %96 : vector<1x64x64xf32> to vector<64x64xf32>
    %cst_102 = arith.constant dense<0.000000e+00> : vector<1x64xf32>
    %98 = tpu.matmul %95, %97, %cst_102 {dimension_numbers = #tpu.dot_dimension_numbers<[1], [0], [0], [1], [0, 0, 1, 1], [], []>} : vector<1x64xf32>, vector<64x64xf32>, vector<1x64xf32> -> vector<1x64xf32>
    %99 = arith.addf %94, %98 : vector<1x64xf32>
    %100 = vector.extract_strided_slice %79 {offsets = [4, 0], sizes = [1, 64], strides = [1, 1]} : vector<10x64xf32> to vector<1x64xf32>
    %c4_103 = arith.constant 4 : index
    %c0_104 = arith.constant 0 : index
    %c0_105 = arith.constant 0 : index
    %101 = vector.load %arg14[%c4_103, %c0_104, %c0_105] : memref<50x64x64xf32, #tpu.memory_space<vmem>>, vector<1x64x64xf32>
    %102 = vector.shape_cast %101 : vector<1x64x64xf32> to vector<64x64xf32>
    %cst_106 = arith.constant dense<0.000000e+00> : vector<1x64xf32>
    %103 = tpu.matmul %100, %102, %cst_106 {dimension_numbers = #tpu.dot_dimension_numbers<[1], [0], [0], [1], [0, 0, 1, 1], [], []>} : vector<1x64xf32>, vector<64x64xf32>, vector<1x64xf32> -> vector<1x64xf32>
    %104 = arith.addf %99, %103 : vector<1x64xf32>
    %105 = vector.extract_strided_slice %79 {offsets = [5, 0], sizes = [1, 64], strides = [1, 1]} : vector<10x64xf32> to vector<1x64xf32>
    %c5_107 = arith.constant 5 : index
    %c0_108 = arith.constant 0 : index
    %c0_109 = arith.constant 0 : index
    %106 = vector.load %arg14[%c5_107, %c0_108, %c0_109] : memref<50x64x64xf32, #tpu.memory_space<vmem>>, vector<1x64x64xf32>
    %107 = vector.shape_cast %106 : vector<1x64x64xf32> to vector<64x64xf32>
    %cst_110 = arith.constant dense<0.000000e+00> : vector<1x64xf32>
    %108 = tpu.matmul %105, %107, %cst_110 {dimension_numbers = #tpu.dot_dimension_numbers<[1], [0], [0], [1], [0, 0, 1, 1], [], []>} : vector<1x64xf32>, vector<64x64xf32>, vector<1x64xf32> -> vector<1x64xf32>
    %109 = arith.addf %104, %108 : vector<1x64xf32>
    %110 = vector.extract_strided_slice %79 {offsets = [6, 0], sizes = [1, 64], strides = [1, 1]} : vector<10x64xf32> to vector<1x64xf32>
    %c6_111 = arith.constant 6 : index
    %c0_112 = arith.constant 0 : index
    %c0_113 = arith.constant 0 : index
    %111 = vector.load %arg14[%c6_111, %c0_112, %c0_113] : memref<50x64x64xf32, #tpu.memory_space<vmem>>, vector<1x64x64xf32>
    %112 = vector.shape_cast %111 : vector<1x64x64xf32> to vector<64x64xf32>
    %cst_114 = arith.constant dense<0.000000e+00> : vector<1x64xf32>
    %113 = tpu.matmul %110, %112, %cst_114 {dimension_numbers = #tpu.dot_dimension_numbers<[1], [0], [0], [1], [0, 0, 1, 1], [], []>} : vector<1x64xf32>, vector<64x64xf32>, vector<1x64xf32> -> vector<1x64xf32>
    %114 = arith.addf %109, %113 : vector<1x64xf32>
    %115 = vector.extract_strided_slice %79 {offsets = [7, 0], sizes = [1, 64], strides = [1, 1]} : vector<10x64xf32> to vector<1x64xf32>
    %c7_115 = arith.constant 7 : index
    %c0_116 = arith.constant 0 : index
    %c0_117 = arith.constant 0 : index
    %116 = vector.load %arg14[%c7_115, %c0_116, %c0_117] : memref<50x64x64xf32, #tpu.memory_space<vmem>>, vector<1x64x64xf32>
    %117 = vector.shape_cast %116 : vector<1x64x64xf32> to vector<64x64xf32>
    %cst_118 = arith.constant dense<0.000000e+00> : vector<1x64xf32>
    %118 = tpu.matmul %115, %117, %cst_118 {dimension_numbers = #tpu.dot_dimension_numbers<[1], [0], [0], [1], [0, 0, 1, 1], [], []>} : vector<1x64xf32>, vector<64x64xf32>, vector<1x64xf32> -> vector<1x64xf32>
    %119 = arith.addf %114, %118 : vector<1x64xf32>
    %120 = vector.extract_strided_slice %79 {offsets = [8, 0], sizes = [1, 64], strides = [1, 1]} : vector<10x64xf32> to vector<1x64xf32>
    %c8_119 = arith.constant 8 : index
    %c0_120 = arith.constant 0 : index
    %c0_121 = arith.constant 0 : index
    %121 = vector.load %arg14[%c8_119, %c0_120, %c0_121] : memref<50x64x64xf32, #tpu.memory_space<vmem>>, vector<1x64x64xf32>
    %122 = vector.shape_cast %121 : vector<1x64x64xf32> to vector<64x64xf32>
    %cst_122 = arith.constant dense<0.000000e+00> : vector<1x64xf32>
    %123 = tpu.matmul %120, %122, %cst_122 {dimension_numbers = #tpu.dot_dimension_numbers<[1], [0], [0], [1], [0, 0, 1, 1], [], []>} : vector<1x64xf32>, vector<64x64xf32>, vector<1x64xf32> -> vector<1x64xf32>
    %124 = arith.addf %119, %123 : vector<1x64xf32>
    %125 = vector.extract_strided_slice %79 {offsets = [9, 0], sizes = [1, 64], strides = [1, 1]} : vector<10x64xf32> to vector<1x64xf32>
    %c9 = arith.constant 9 : index
    %c0_123 = arith.constant 0 : index
    %c0_124 = arith.constant 0 : index
    %126 = vector.load %arg14[%c9, %c0_123, %c0_124] : memref<50x64x64xf32, #tpu.memory_space<vmem>>, vector<1x64x64xf32>
    %127 = vector.shape_cast %126 : vector<1x64x64xf32> to vector<64x64xf32>
    %cst_125 = arith.constant dense<0.000000e+00> : vector<1x64xf32>
    %128 = tpu.matmul %125, %127, %cst_125 {dimension_numbers = #tpu.dot_dimension_numbers<[1], [0], [0], [1], [0, 0, 1, 1], [], []>} : vector<1x64xf32>, vector<64x64xf32>, vector<1x64xf32> -> vector<1x64xf32>
    %129 = arith.addf %124, %128 : vector<1x64xf32>
    %c2_126 = arith.constant 2 : index
    %c0_127 = arith.constant 0 : index
    %c0_128 = arith.constant 0 : index
    %130 = vector.load %arg23[%c2_126, %c0_127, %c0_128] : memref<12x22x32xf32, #tpu.memory_space<vmem>>, vector<1x22x32xf32>
    %131 = vector.shape_cast %130 : vector<1x22x32xf32> to vector<22x32xf32>
    %c0_129 = arith.constant 0 : index
    %c0_130 = arith.constant 0 : index
    %c0_131 = arith.constant 0 : index
    %132 = vector.load %arg5[%c0_129, %c0_130, %c0_131] : memref<3x10x22xf32, #tpu.memory_space<vmem>>, vector<1x10x22xf32>
    %133 = vector.shape_cast %132 : vector<1x10x22xf32> to vector<10x22xf32>
    %cst_132 = arith.constant dense<0.000000e+00> : vector<10x32xf32>
    %134 = tpu.matmul %133, %131, %cst_132 {dimension_numbers = #tpu.dot_dimension_numbers<[1], [0], [0], [1], [0, 0, 1, 1], [], []>} : vector<10x22xf32>, vector<22x32xf32>, vector<10x32xf32> -> vector<10x32xf32>
    %c0_133 = arith.constant 0 : index
    %c0_134 = arith.constant 0 : index
    %c0_135 = arith.constant 0 : index
    %135 = vector.load %arg12[%c0_133, %c0_134, %c0_135] : memref<9x32x64xf32, #tpu.memory_space<vmem>>, vector<1x32x64xf32>
    %136 = vector.shape_cast %135 : vector<1x32x64xf32> to vector<32x64xf32>
    %cst_136 = arith.constant dense<0.000000e+00> : vector<10x64xf32>
    %137 = tpu.matmul %134, %136, %cst_136 {dimension_numbers = #tpu.dot_dimension_numbers<[1], [0], [0], [1], [0, 0, 1, 1], [], []>} : vector<10x32xf32>, vector<32x64xf32>, vector<10x64xf32> -> vector<10x64xf32>
    %c1_137 = arith.constant 1 : index
    %c0_138 = arith.constant 0 : index
    %c0_139 = arith.constant 0 : index
    %138 = vector.load %arg5[%c1_137, %c0_138, %c0_139] : memref<3x10x22xf32, #tpu.memory_space<vmem>>, vector<1x10x22xf32>
    %139 = vector.shape_cast %138 : vector<1x10x22xf32> to vector<10x22xf32>
    %cst_140 = arith.constant dense<0.000000e+00> : vector<10x32xf32>
    %140 = tpu.matmul %139, %131, %cst_140 {dimension_numbers = #tpu.dot_dimension_numbers<[1], [0], [0], [1], [0, 0, 1, 1], [], []>} : vector<10x22xf32>, vector<22x32xf32>, vector<10x32xf32> -> vector<10x32xf32>
    %c1_141 = arith.constant 1 : index
    %c0_142 = arith.constant 0 : index
    %c0_143 = arith.constant 0 : index
    %141 = vector.load %arg12[%c1_141, %c0_142, %c0_143] : memref<9x32x64xf32, #tpu.memory_space<vmem>>, vector<1x32x64xf32>
    %142 = vector.shape_cast %141 : vector<1x32x64xf32> to vector<32x64xf32>
    %cst_144 = arith.constant dense<0.000000e+00> : vector<10x64xf32>
    %143 = tpu.matmul %140, %142, %cst_144 {dimension_numbers = #tpu.dot_dimension_numbers<[1], [0], [0], [1], [0, 0, 1, 1], [], []>} : vector<10x32xf32>, vector<32x64xf32>, vector<10x64xf32> -> vector<10x64xf32>
    %144 = arith.addf %137, %143 : vector<10x64xf32>
    %c2_145 = arith.constant 2 : index
    %c0_146 = arith.constant 0 : index
    %c0_147 = arith.constant 0 : index
    %145 = vector.load %arg5[%c2_145, %c0_146, %c0_147] : memref<3x10x22xf32, #tpu.memory_space<vmem>>, vector<1x10x22xf32>
    %146 = vector.shape_cast %145 : vector<1x10x22xf32> to vector<10x22xf32>
    %cst_148 = arith.constant dense<0.000000e+00> : vector<10x32xf32>
    %147 = tpu.matmul %146, %131, %cst_148 {dimension_numbers = #tpu.dot_dimension_numbers<[1], [0], [0], [1], [0, 0, 1, 1], [], []>} : vector<10x22xf32>, vector<22x32xf32>, vector<10x32xf32> -> vector<10x32xf32>
    %c2_149 = arith.constant 2 : index
    %c0_150 = arith.constant 0 : index
    %c0_151 = arith.constant 0 : index
    %148 = vector.load %arg12[%c2_149, %c0_150, %c0_151] : memref<9x32x64xf32, #tpu.memory_space<vmem>>, vector<1x32x64xf32>
    %149 = vector.shape_cast %148 : vector<1x32x64xf32> to vector<32x64xf32>
    %cst_152 = arith.constant dense<0.000000e+00> : vector<10x64xf32>
    %150 = tpu.matmul %147, %149, %cst_152 {dimension_numbers = #tpu.dot_dimension_numbers<[1], [0], [0], [1], [0, 0, 1, 1], [], []>} : vector<10x32xf32>, vector<32x64xf32>, vector<10x64xf32> -> vector<10x64xf32>
    %151 = arith.addf %144, %150 : vector<10x64xf32>
    %c3_153 = arith.constant 3 : index
    %c0_154 = arith.constant 0 : index
    %c0_155 = arith.constant 0 : index
    %152 = vector.load %arg23[%c3_153, %c0_154, %c0_155] : memref<12x22x32xf32, #tpu.memory_space<vmem>>, vector<1x22x32xf32>
    %153 = vector.shape_cast %152 : vector<1x22x32xf32> to vector<22x32xf32>
    %c0_156 = arith.constant 0 : index
    %c0_157 = arith.constant 0 : index
    %c0_158 = arith.constant 0 : index
    %154 = vector.load %arg5[%c0_156, %c0_157, %c0_158] : memref<3x10x22xf32, #tpu.memory_space<vmem>>, vector<1x10x22xf32>
    %155 = vector.shape_cast %154 : vector<1x10x22xf32> to vector<10x22xf32>
    %cst_159 = arith.constant dense<0.000000e+00> : vector<10x32xf32>
    %156 = tpu.matmul %155, %153, %cst_159 {dimension_numbers = #tpu.dot_dimension_numbers<[1], [0], [0], [1], [0, 0, 1, 1], [], []>} : vector<10x22xf32>, vector<22x32xf32>, vector<10x32xf32> -> vector<10x32xf32>
    %c3_160 = arith.constant 3 : index
    %c0_161 = arith.constant 0 : index
    %c0_162 = arith.constant 0 : index
    %157 = vector.load %arg12[%c3_160, %c0_161, %c0_162] : memref<9x32x64xf32, #tpu.memory_space<vmem>>, vector<1x32x64xf32>
    %158 = vector.shape_cast %157 : vector<1x32x64xf32> to vector<32x64xf32>
    %cst_163 = arith.constant dense<0.000000e+00> : vector<10x64xf32>
    %159 = tpu.matmul %156, %158, %cst_163 {dimension_numbers = #tpu.dot_dimension_numbers<[1], [0], [0], [1], [0, 0, 1, 1], [], []>} : vector<10x32xf32>, vector<32x64xf32>, vector<10x64xf32> -> vector<10x64xf32>
    %160 = arith.addf %151, %159 : vector<10x64xf32>
    %c1_164 = arith.constant 1 : index
    %c0_165 = arith.constant 0 : index
    %c0_166 = arith.constant 0 : index
    %161 = vector.load %arg5[%c1_164, %c0_165, %c0_166] : memref<3x10x22xf32, #tpu.memory_space<vmem>>, vector<1x10x22xf32>
    %162 = vector.shape_cast %161 : vector<1x10x22xf32> to vector<10x22xf32>
    %cst_167 = arith.constant dense<0.000000e+00> : vector<10x32xf32>
    %163 = tpu.matmul %162, %153, %cst_167 {dimension_numbers = #tpu.dot_dimension_numbers<[1], [0], [0], [1], [0, 0, 1, 1], [], []>} : vector<10x22xf32>, vector<22x32xf32>, vector<10x32xf32> -> vector<10x32xf32>
    %c4_168 = arith.constant 4 : index
    %c0_169 = arith.constant 0 : index
    %c0_170 = arith.constant 0 : index
    %164 = vector.load %arg12[%c4_168, %c0_169, %c0_170] : memref<9x32x64xf32, #tpu.memory_space<vmem>>, vector<1x32x64xf32>
    %165 = vector.shape_cast %164 : vector<1x32x64xf32> to vector<32x64xf32>
    %cst_171 = arith.constant dense<0.000000e+00> : vector<10x64xf32>
    %166 = tpu.matmul %163, %165, %cst_171 {dimension_numbers = #tpu.dot_dimension_numbers<[1], [0], [0], [1], [0, 0, 1, 1], [], []>} : vector<10x32xf32>, vector<32x64xf32>, vector<10x64xf32> -> vector<10x64xf32>
    %167 = arith.addf %160, %166 : vector<10x64xf32>
    %c2_172 = arith.constant 2 : index
    %c0_173 = arith.constant 0 : index
    %c0_174 = arith.constant 0 : index
    %168 = vector.load %arg5[%c2_172, %c0_173, %c0_174] : memref<3x10x22xf32, #tpu.memory_space<vmem>>, vector<1x10x22xf32>
    %169 = vector.shape_cast %168 : vector<1x10x22xf32> to vector<10x22xf32>
    %cst_175 = arith.constant dense<0.000000e+00> : vector<10x32xf32>
    %170 = tpu.matmul %169, %153, %cst_175 {dimension_numbers = #tpu.dot_dimension_numbers<[1], [0], [0], [1], [0, 0, 1, 1], [], []>} : vector<10x22xf32>, vector<22x32xf32>, vector<10x32xf32> -> vector<10x32xf32>
    %c5_176 = arith.constant 5 : index
    %c0_177 = arith.constant 0 : index
    %c0_178 = arith.constant 0 : index
    %171 = vector.load %arg12[%c5_176, %c0_177, %c0_178] : memref<9x32x64xf32, #tpu.memory_space<vmem>>, vector<1x32x64xf32>
    %172 = vector.shape_cast %171 : vector<1x32x64xf32> to vector<32x64xf32>
    %cst_179 = arith.constant dense<0.000000e+00> : vector<10x64xf32>
    %173 = tpu.matmul %170, %172, %cst_179 {dimension_numbers = #tpu.dot_dimension_numbers<[1], [0], [0], [1], [0, 0, 1, 1], [], []>} : vector<10x32xf32>, vector<32x64xf32>, vector<10x64xf32> -> vector<10x64xf32>
    %174 = arith.addf %167, %173 : vector<10x64xf32>
    %c4_180 = arith.constant 4 : index
    %c0_181 = arith.constant 0 : index
    %c0_182 = arith.constant 0 : index
    %175 = vector.load %arg23[%c4_180, %c0_181, %c0_182] : memref<12x22x32xf32, #tpu.memory_space<vmem>>, vector<1x22x32xf32>
    %176 = vector.shape_cast %175 : vector<1x22x32xf32> to vector<22x32xf32>
    %c0_183 = arith.constant 0 : index
    %c0_184 = arith.constant 0 : index
    %c0_185 = arith.constant 0 : index
    %177 = vector.load %arg5[%c0_183, %c0_184, %c0_185] : memref<3x10x22xf32, #tpu.memory_space<vmem>>, vector<1x10x22xf32>
    %178 = vector.shape_cast %177 : vector<1x10x22xf32> to vector<10x22xf32>
    %cst_186 = arith.constant dense<0.000000e+00> : vector<10x32xf32>
    %179 = tpu.matmul %178, %176, %cst_186 {dimension_numbers = #tpu.dot_dimension_numbers<[1], [0], [0], [1], [0, 0, 1, 1], [], []>} : vector<10x22xf32>, vector<22x32xf32>, vector<10x32xf32> -> vector<10x32xf32>
    %c6_187 = arith.constant 6 : index
    %c0_188 = arith.constant 0 : index
    %c0_189 = arith.constant 0 : index
    %180 = vector.load %arg12[%c6_187, %c0_188, %c0_189] : memref<9x32x64xf32, #tpu.memory_space<vmem>>, vector<1x32x64xf32>
    %181 = vector.shape_cast %180 : vector<1x32x64xf32> to vector<32x64xf32>
    %cst_190 = arith.constant dense<0.000000e+00> : vector<10x64xf32>
    %182 = tpu.matmul %179, %181, %cst_190 {dimension_numbers = #tpu.dot_dimension_numbers<[1], [0], [0], [1], [0, 0, 1, 1], [], []>} : vector<10x32xf32>, vector<32x64xf32>, vector<10x64xf32> -> vector<10x64xf32>
    %183 = arith.addf %174, %182 : vector<10x64xf32>
    %c1_191 = arith.constant 1 : index
    %c0_192 = arith.constant 0 : index
    %c0_193 = arith.constant 0 : index
    %184 = vector.load %arg5[%c1_191, %c0_192, %c0_193] : memref<3x10x22xf32, #tpu.memory_space<vmem>>, vector<1x10x22xf32>
    %185 = vector.shape_cast %184 : vector<1x10x22xf32> to vector<10x22xf32>
    %cst_194 = arith.constant dense<0.000000e+00> : vector<10x32xf32>
    %186 = tpu.matmul %185, %176, %cst_194 {dimension_numbers = #tpu.dot_dimension_numbers<[1], [0], [0], [1], [0, 0, 1, 1], [], []>} : vector<10x22xf32>, vector<22x32xf32>, vector<10x32xf32> -> vector<10x32xf32>
    %c7_195 = arith.constant 7 : index
    %c0_196 = arith.constant 0 : index
    %c0_197 = arith.constant 0 : index
    %187 = vector.load %arg12[%c7_195, %c0_196, %c0_197] : memref<9x32x64xf32, #tpu.memory_space<vmem>>, vector<1x32x64xf32>
    %188 = vector.shape_cast %187 : vector<1x32x64xf32> to vector<32x64xf32>
    %cst_198 = arith.constant dense<0.000000e+00> : vector<10x64xf32>
    %189 = tpu.matmul %186, %188, %cst_198 {dimension_numbers = #tpu.dot_dimension_numbers<[1], [0], [0], [1], [0, 0, 1, 1], [], []>} : vector<10x32xf32>, vector<32x64xf32>, vector<10x64xf32> -> vector<10x64xf32>
    %190 = arith.addf %183, %189 : vector<10x64xf32>
    %c2_199 = arith.constant 2 : index
    %c0_200 = arith.constant 0 : index
    %c0_201 = arith.constant 0 : index
    %191 = vector.load %arg5[%c2_199, %c0_200, %c0_201] : memref<3x10x22xf32, #tpu.memory_space<vmem>>, vector<1x10x22xf32>
    %192 = vector.shape_cast %191 : vector<1x10x22xf32> to vector<10x22xf32>
    %cst_202 = arith.constant dense<0.000000e+00> : vector<10x32xf32>
    %193 = tpu.matmul %192, %176, %cst_202 {dimension_numbers = #tpu.dot_dimension_numbers<[1], [0], [0], [1], [0, 0, 1, 1], [], []>} : vector<10x22xf32>, vector<22x32xf32>, vector<10x32xf32> -> vector<10x32xf32>
    %c8_203 = arith.constant 8 : index
    %c0_204 = arith.constant 0 : index
    %c0_205 = arith.constant 0 : index
    %194 = vector.load %arg12[%c8_203, %c0_204, %c0_205] : memref<9x32x64xf32, #tpu.memory_space<vmem>>, vector<1x32x64xf32>
    %195 = vector.shape_cast %194 : vector<1x32x64xf32> to vector<32x64xf32>
    %cst_206 = arith.constant dense<0.000000e+00> : vector<10x64xf32>
    %196 = tpu.matmul %193, %195, %cst_206 {dimension_numbers = #tpu.dot_dimension_numbers<[1], [0], [0], [1], [0, 0, 1, 1], [], []>} : vector<10x32xf32>, vector<32x64xf32>, vector<10x64xf32> -> vector<10x64xf32>
    %197 = arith.addf %190, %196 : vector<10x64xf32>
    %c0_207 = arith.constant 0 : index
    %c0_208 = arith.constant 0 : index
    %198 = vector.load %arg13[%c0_207, %c0_208] : memref<1x64xf32, #tpu.memory_space<vmem>>, vector<1x64xf32>
    %199 = vector.broadcast %198 : vector<1x64xf32> to vector<10x64xf32>
    %200 = arith.addf %197, %199 : vector<10x64xf32>
    %cst_209 = arith.constant 0.000000e+00 : f32
    %201 = vector.broadcast %cst_209 : f32 to vector<10x64xf32>
    %202 = arith.maximumf %200, %201 : vector<10x64xf32>
    %203 = vector.extract_strided_slice %202 {offsets = [0, 0], sizes = [1, 64], strides = [1, 1]} : vector<10x64xf32> to vector<1x64xf32>
    %c10 = arith.constant 10 : index
    %c0_210 = arith.constant 0 : index
    %c0_211 = arith.constant 0 : index
    %204 = vector.load %arg14[%c10, %c0_210, %c0_211] : memref<50x64x64xf32, #tpu.memory_space<vmem>>, vector<1x64x64xf32>
    %205 = vector.shape_cast %204 : vector<1x64x64xf32> to vector<64x64xf32>
    %cst_212 = arith.constant dense<0.000000e+00> : vector<1x64xf32>
    %206 = tpu.matmul %203, %205, %cst_212 {dimension_numbers = #tpu.dot_dimension_numbers<[1], [0], [0], [1], [0, 0, 1, 1], [], []>} : vector<1x64xf32>, vector<64x64xf32>, vector<1x64xf32> -> vector<1x64xf32>
    %207 = arith.addf %129, %206 : vector<1x64xf32>
    %208 = vector.extract_strided_slice %202 {offsets = [1, 0], sizes = [1, 64], strides = [1, 1]} : vector<10x64xf32> to vector<1x64xf32>
    %c11 = arith.constant 11 : index
    %c0_213 = arith.constant 0 : index
    %c0_214 = arith.constant 0 : index
    %209 = vector.load %arg14[%c11, %c0_213, %c0_214] : memref<50x64x64xf32, #tpu.memory_space<vmem>>, vector<1x64x64xf32>
    %210 = vector.shape_cast %209 : vector<1x64x64xf32> to vector<64x64xf32>
    %cst_215 = arith.constant dense<0.000000e+00> : vector<1x64xf32>
    %211 = tpu.matmul %208, %210, %cst_215 {dimension_numbers = #tpu.dot_dimension_numbers<[1], [0], [0], [1], [0, 0, 1, 1], [], []>} : vector<1x64xf32>, vector<64x64xf32>, vector<1x64xf32> -> vector<1x64xf32>
    %212 = arith.addf %207, %211 : vector<1x64xf32>
    %213 = vector.extract_strided_slice %202 {offsets = [2, 0], sizes = [1, 64], strides = [1, 1]} : vector<10x64xf32> to vector<1x64xf32>
    %c12 = arith.constant 12 : index
    %c0_216 = arith.constant 0 : index
    %c0_217 = arith.constant 0 : index
    %214 = vector.load %arg14[%c12, %c0_216, %c0_217] : memref<50x64x64xf32, #tpu.memory_space<vmem>>, vector<1x64x64xf32>
    %215 = vector.shape_cast %214 : vector<1x64x64xf32> to vector<64x64xf32>
    %cst_218 = arith.constant dense<0.000000e+00> : vector<1x64xf32>
    %216 = tpu.matmul %213, %215, %cst_218 {dimension_numbers = #tpu.dot_dimension_numbers<[1], [0], [0], [1], [0, 0, 1, 1], [], []>} : vector<1x64xf32>, vector<64x64xf32>, vector<1x64xf32> -> vector<1x64xf32>
    %217 = arith.addf %212, %216 : vector<1x64xf32>
    %218 = vector.extract_strided_slice %202 {offsets = [3, 0], sizes = [1, 64], strides = [1, 1]} : vector<10x64xf32> to vector<1x64xf32>
    %c13 = arith.constant 13 : index
    %c0_219 = arith.constant 0 : index
    %c0_220 = arith.constant 0 : index
    %219 = vector.load %arg14[%c13, %c0_219, %c0_220] : memref<50x64x64xf32, #tpu.memory_space<vmem>>, vector<1x64x64xf32>
    %220 = vector.shape_cast %219 : vector<1x64x64xf32> to vector<64x64xf32>
    %cst_221 = arith.constant dense<0.000000e+00> : vector<1x64xf32>
    %221 = tpu.matmul %218, %220, %cst_221 {dimension_numbers = #tpu.dot_dimension_numbers<[1], [0], [0], [1], [0, 0, 1, 1], [], []>} : vector<1x64xf32>, vector<64x64xf32>, vector<1x64xf32> -> vector<1x64xf32>
    %222 = arith.addf %217, %221 : vector<1x64xf32>
    %223 = vector.extract_strided_slice %202 {offsets = [4, 0], sizes = [1, 64], strides = [1, 1]} : vector<10x64xf32> to vector<1x64xf32>
    %c14 = arith.constant 14 : index
    %c0_222 = arith.constant 0 : index
    %c0_223 = arith.constant 0 : index
    %224 = vector.load %arg14[%c14, %c0_222, %c0_223] : memref<50x64x64xf32, #tpu.memory_space<vmem>>, vector<1x64x64xf32>
    %225 = vector.shape_cast %224 : vector<1x64x64xf32> to vector<64x64xf32>
    %cst_224 = arith.constant dense<0.000000e+00> : vector<1x64xf32>
    %226 = tpu.matmul %223, %225, %cst_224 {dimension_numbers = #tpu.dot_dimension_numbers<[1], [0], [0], [1], [0, 0, 1, 1], [], []>} : vector<1x64xf32>, vector<64x64xf32>, vector<1x64xf32> -> vector<1x64xf32>
    %227 = arith.addf %222, %226 : vector<1x64xf32>
    %228 = vector.extract_strided_slice %202 {offsets = [5, 0], sizes = [1, 64], strides = [1, 1]} : vector<10x64xf32> to vector<1x64xf32>
    %c15 = arith.constant 15 : index
    %c0_225 = arith.constant 0 : index
    %c0_226 = arith.constant 0 : index
    %229 = vector.load %arg14[%c15, %c0_225, %c0_226] : memref<50x64x64xf32, #tpu.memory_space<vmem>>, vector<1x64x64xf32>
    %230 = vector.shape_cast %229 : vector<1x64x64xf32> to vector<64x64xf32>
    %cst_227 = arith.constant dense<0.000000e+00> : vector<1x64xf32>
    %231 = tpu.matmul %228, %230, %cst_227 {dimension_numbers = #tpu.dot_dimension_numbers<[1], [0], [0], [1], [0, 0, 1, 1], [], []>} : vector<1x64xf32>, vector<64x64xf32>, vector<1x64xf32> -> vector<1x64xf32>
    %232 = arith.addf %227, %231 : vector<1x64xf32>
    %233 = vector.extract_strided_slice %202 {offsets = [6, 0], sizes = [1, 64], strides = [1, 1]} : vector<10x64xf32> to vector<1x64xf32>
    %c16 = arith.constant 16 : index
    %c0_228 = arith.constant 0 : index
    %c0_229 = arith.constant 0 : index
    %234 = vector.load %arg14[%c16, %c0_228, %c0_229] : memref<50x64x64xf32, #tpu.memory_space<vmem>>, vector<1x64x64xf32>
    %235 = vector.shape_cast %234 : vector<1x64x64xf32> to vector<64x64xf32>
    %cst_230 = arith.constant dense<0.000000e+00> : vector<1x64xf32>
    %236 = tpu.matmul %233, %235, %cst_230 {dimension_numbers = #tpu.dot_dimension_numbers<[1], [0], [0], [1], [0, 0, 1, 1], [], []>} : vector<1x64xf32>, vector<64x64xf32>, vector<1x64xf32> -> vector<1x64xf32>
    %237 = arith.addf %232, %236 : vector<1x64xf32>
    %238 = vector.extract_strided_slice %202 {offsets = [7, 0], sizes = [1, 64], strides = [1, 1]} : vector<10x64xf32> to vector<1x64xf32>
    %c17 = arith.constant 17 : index
    %c0_231 = arith.constant 0 : index
    %c0_232 = arith.constant 0 : index
    %239 = vector.load %arg14[%c17, %c0_231, %c0_232] : memref<50x64x64xf32, #tpu.memory_space<vmem>>, vector<1x64x64xf32>
    %240 = vector.shape_cast %239 : vector<1x64x64xf32> to vector<64x64xf32>
    %cst_233 = arith.constant dense<0.000000e+00> : vector<1x64xf32>
    %241 = tpu.matmul %238, %240, %cst_233 {dimension_numbers = #tpu.dot_dimension_numbers<[1], [0], [0], [1], [0, 0, 1, 1], [], []>} : vector<1x64xf32>, vector<64x64xf32>, vector<1x64xf32> -> vector<1x64xf32>
    %242 = arith.addf %237, %241 : vector<1x64xf32>
    %243 = vector.extract_strided_slice %202 {offsets = [8, 0], sizes = [1, 64], strides = [1, 1]} : vector<10x64xf32> to vector<1x64xf32>
    %c18 = arith.constant 18 : index
    %c0_234 = arith.constant 0 : index
    %c0_235 = arith.constant 0 : index
    %244 = vector.load %arg14[%c18, %c0_234, %c0_235] : memref<50x64x64xf32, #tpu.memory_space<vmem>>, vector<1x64x64xf32>
    %245 = vector.shape_cast %244 : vector<1x64x64xf32> to vector<64x64xf32>
    %cst_236 = arith.constant dense<0.000000e+00> : vector<1x64xf32>
    %246 = tpu.matmul %243, %245, %cst_236 {dimension_numbers = #tpu.dot_dimension_numbers<[1], [0], [0], [1], [0, 0, 1, 1], [], []>} : vector<1x64xf32>, vector<64x64xf32>, vector<1x64xf32> -> vector<1x64xf32>
    %247 = arith.addf %242, %246 : vector<1x64xf32>
    %248 = vector.extract_strided_slice %202 {offsets = [9, 0], sizes = [1, 64], strides = [1, 1]} : vector<10x64xf32> to vector<1x64xf32>
    %c19 = arith.constant 19 : index
    %c0_237 = arith.constant 0 : index
    %c0_238 = arith.constant 0 : index
    %249 = vector.load %arg14[%c19, %c0_237, %c0_238] : memref<50x64x64xf32, #tpu.memory_space<vmem>>, vector<1x64x64xf32>
    %250 = vector.shape_cast %249 : vector<1x64x64xf32> to vector<64x64xf32>
    %cst_239 = arith.constant dense<0.000000e+00> : vector<1x64xf32>
    %251 = tpu.matmul %248, %250, %cst_239 {dimension_numbers = #tpu.dot_dimension_numbers<[1], [0], [0], [1], [0, 0, 1, 1], [], []>} : vector<1x64xf32>, vector<64x64xf32>, vector<1x64xf32> -> vector<1x64xf32>
    %252 = arith.addf %247, %251 : vector<1x64xf32>
    %c4_240 = arith.constant 4 : index
    %c0_241 = arith.constant 0 : index
    %c0_242 = arith.constant 0 : index
    %253 = vector.load %arg23[%c4_240, %c0_241, %c0_242] : memref<12x22x32xf32, #tpu.memory_space<vmem>>, vector<1x22x32xf32>
    %254 = vector.shape_cast %253 : vector<1x22x32xf32> to vector<22x32xf32>
    %c0_243 = arith.constant 0 : index
    %c0_244 = arith.constant 0 : index
    %c0_245 = arith.constant 0 : index
    %255 = vector.load %arg5[%c0_243, %c0_244, %c0_245] : memref<3x10x22xf32, #tpu.memory_space<vmem>>, vector<1x10x22xf32>
    %256 = vector.shape_cast %255 : vector<1x10x22xf32> to vector<10x22xf32>
    %cst_246 = arith.constant dense<0.000000e+00> : vector<10x32xf32>
    %257 = tpu.matmul %256, %254, %cst_246 {dimension_numbers = #tpu.dot_dimension_numbers<[1], [0], [0], [1], [0, 0, 1, 1], [], []>} : vector<10x22xf32>, vector<22x32xf32>, vector<10x32xf32> -> vector<10x32xf32>
    %c0_247 = arith.constant 0 : index
    %c0_248 = arith.constant 0 : index
    %c0_249 = arith.constant 0 : index
    %258 = vector.load %arg12[%c0_247, %c0_248, %c0_249] : memref<9x32x64xf32, #tpu.memory_space<vmem>>, vector<1x32x64xf32>
    %259 = vector.shape_cast %258 : vector<1x32x64xf32> to vector<32x64xf32>
    %cst_250 = arith.constant dense<0.000000e+00> : vector<10x64xf32>
    %260 = tpu.matmul %257, %259, %cst_250 {dimension_numbers = #tpu.dot_dimension_numbers<[1], [0], [0], [1], [0, 0, 1, 1], [], []>} : vector<10x32xf32>, vector<32x64xf32>, vector<10x64xf32> -> vector<10x64xf32>
    %c1_251 = arith.constant 1 : index
    %c0_252 = arith.constant 0 : index
    %c0_253 = arith.constant 0 : index
    %261 = vector.load %arg5[%c1_251, %c0_252, %c0_253] : memref<3x10x22xf32, #tpu.memory_space<vmem>>, vector<1x10x22xf32>
    %262 = vector.shape_cast %261 : vector<1x10x22xf32> to vector<10x22xf32>
    %cst_254 = arith.constant dense<0.000000e+00> : vector<10x32xf32>
    %263 = tpu.matmul %262, %254, %cst_254 {dimension_numbers = #tpu.dot_dimension_numbers<[1], [0], [0], [1], [0, 0, 1, 1], [], []>} : vector<10x22xf32>, vector<22x32xf32>, vector<10x32xf32> -> vector<10x32xf32>
    %c1_255 = arith.constant 1 : index
    %c0_256 = arith.constant 0 : index
    %c0_257 = arith.constant 0 : index
    %264 = vector.load %arg12[%c1_255, %c0_256, %c0_257] : memref<9x32x64xf32, #tpu.memory_space<vmem>>, vector<1x32x64xf32>
    %265 = vector.shape_cast %264 : vector<1x32x64xf32> to vector<32x64xf32>
    %cst_258 = arith.constant dense<0.000000e+00> : vector<10x64xf32>
    %266 = tpu.matmul %263, %265, %cst_258 {dimension_numbers = #tpu.dot_dimension_numbers<[1], [0], [0], [1], [0, 0, 1, 1], [], []>} : vector<10x32xf32>, vector<32x64xf32>, vector<10x64xf32> -> vector<10x64xf32>
    %267 = arith.addf %260, %266 : vector<10x64xf32>
    %c2_259 = arith.constant 2 : index
    %c0_260 = arith.constant 0 : index
    %c0_261 = arith.constant 0 : index
    %268 = vector.load %arg5[%c2_259, %c0_260, %c0_261] : memref<3x10x22xf32, #tpu.memory_space<vmem>>, vector<1x10x22xf32>
    %269 = vector.shape_cast %268 : vector<1x10x22xf32> to vector<10x22xf32>
    %cst_262 = arith.constant dense<0.000000e+00> : vector<10x32xf32>
    %270 = tpu.matmul %269, %254, %cst_262 {dimension_numbers = #tpu.dot_dimension_numbers<[1], [0], [0], [1], [0, 0, 1, 1], [], []>} : vector<10x22xf32>, vector<22x32xf32>, vector<10x32xf32> -> vector<10x32xf32>
    %c2_263 = arith.constant 2 : index
    %c0_264 = arith.constant 0 : index
    %c0_265 = arith.constant 0 : index
    %271 = vector.load %arg12[%c2_263, %c0_264, %c0_265] : memref<9x32x64xf32, #tpu.memory_space<vmem>>, vector<1x32x64xf32>
    %272 = vector.shape_cast %271 : vector<1x32x64xf32> to vector<32x64xf32>
    %cst_266 = arith.constant dense<0.000000e+00> : vector<10x64xf32>
    %273 = tpu.matmul %270, %272, %cst_266 {dimension_numbers = #tpu.dot_dimension_numbers<[1], [0], [0], [1], [0, 0, 1, 1], [], []>} : vector<10x32xf32>, vector<32x64xf32>, vector<10x64xf32> -> vector<10x64xf32>
    %274 = arith.addf %267, %273 : vector<10x64xf32>
    %c5_267 = arith.constant 5 : index
    %c0_268 = arith.constant 0 : index
    %c0_269 = arith.constant 0 : index
    %275 = vector.load %arg23[%c5_267, %c0_268, %c0_269] : memref<12x22x32xf32, #tpu.memory_space<vmem>>, vector<1x22x32xf32>
    %276 = vector.shape_cast %275 : vector<1x22x32xf32> to vector<22x32xf32>
    %c0_270 = arith.constant 0 : index
    %c0_271 = arith.constant 0 : index
    %c0_272 = arith.constant 0 : index
    %277 = vector.load %arg5[%c0_270, %c0_271, %c0_272] : memref<3x10x22xf32, #tpu.memory_space<vmem>>, vector<1x10x22xf32>
    %278 = vector.shape_cast %277 : vector<1x10x22xf32> to vector<10x22xf32>
    %cst_273 = arith.constant dense<0.000000e+00> : vector<10x32xf32>
    %279 = tpu.matmul %278, %276, %cst_273 {dimension_numbers = #tpu.dot_dimension_numbers<[1], [0], [0], [1], [0, 0, 1, 1], [], []>} : vector<10x22xf32>, vector<22x32xf32>, vector<10x32xf32> -> vector<10x32xf32>
    %c3_274 = arith.constant 3 : index
    %c0_275 = arith.constant 0 : index
    %c0_276 = arith.constant 0 : index
    %280 = vector.load %arg12[%c3_274, %c0_275, %c0_276] : memref<9x32x64xf32, #tpu.memory_space<vmem>>, vector<1x32x64xf32>
    %281 = vector.shape_cast %280 : vector<1x32x64xf32> to vector<32x64xf32>
    %cst_277 = arith.constant dense<0.000000e+00> : vector<10x64xf32>
    %282 = tpu.matmul %279, %281, %cst_277 {dimension_numbers = #tpu.dot_dimension_numbers<[1], [0], [0], [1], [0, 0, 1, 1], [], []>} : vector<10x32xf32>, vector<32x64xf32>, vector<10x64xf32> -> vector<10x64xf32>
    %283 = arith.addf %274, %282 : vector<10x64xf32>
    %c1_278 = arith.constant 1 : index
    %c0_279 = arith.constant 0 : index
    %c0_280 = arith.constant 0 : index
    %284 = vector.load %arg5[%c1_278, %c0_279, %c0_280] : memref<3x10x22xf32, #tpu.memory_space<vmem>>, vector<1x10x22xf32>
    %285 = vector.shape_cast %284 : vector<1x10x22xf32> to vector<10x22xf32>
    %cst_281 = arith.constant dense<0.000000e+00> : vector<10x32xf32>
    %286 = tpu.matmul %285, %276, %cst_281 {dimension_numbers = #tpu.dot_dimension_numbers<[1], [0], [0], [1], [0, 0, 1, 1], [], []>} : vector<10x22xf32>, vector<22x32xf32>, vector<10x32xf32> -> vector<10x32xf32>
    %c4_282 = arith.constant 4 : index
    %c0_283 = arith.constant 0 : index
    %c0_284 = arith.constant 0 : index
    %287 = vector.load %arg12[%c4_282, %c0_283, %c0_284] : memref<9x32x64xf32, #tpu.memory_space<vmem>>, vector<1x32x64xf32>
    %288 = vector.shape_cast %287 : vector<1x32x64xf32> to vector<32x64xf32>
    %cst_285 = arith.constant dense<0.000000e+00> : vector<10x64xf32>
    %289 = tpu.matmul %286, %288, %cst_285 {dimension_numbers = #tpu.dot_dimension_numbers<[1], [0], [0], [1], [0, 0, 1, 1], [], []>} : vector<10x32xf32>, vector<32x64xf32>, vector<10x64xf32> -> vector<10x64xf32>
    %290 = arith.addf %283, %289 : vector<10x64xf32>
    %c2_286 = arith.constant 2 : index
    %c0_287 = arith.constant 0 : index
    %c0_288 = arith.constant 0 : index
    %291 = vector.load %arg5[%c2_286, %c0_287, %c0_288] : memref<3x10x22xf32, #tpu.memory_space<vmem>>, vector<1x10x22xf32>
    %292 = vector.shape_cast %291 : vector<1x10x22xf32> to vector<10x22xf32>
    %cst_289 = arith.constant dense<0.000000e+00> : vector<10x32xf32>
    %293 = tpu.matmul %292, %276, %cst_289 {dimension_numbers = #tpu.dot_dimension_numbers<[1], [0], [0], [1], [0, 0, 1, 1], [], []>} : vector<10x22xf32>, vector<22x32xf32>, vector<10x32xf32> -> vector<10x32xf32>
    %c5_290 = arith.constant 5 : index
    %c0_291 = arith.constant 0 : index
    %c0_292 = arith.constant 0 : index
    %294 = vector.load %arg12[%c5_290, %c0_291, %c0_292] : memref<9x32x64xf32, #tpu.memory_space<vmem>>, vector<1x32x64xf32>
    %295 = vector.shape_cast %294 : vector<1x32x64xf32> to vector<32x64xf32>
    %cst_293 = arith.constant dense<0.000000e+00> : vector<10x64xf32>
    %296 = tpu.matmul %293, %295, %cst_293 {dimension_numbers = #tpu.dot_dimension_numbers<[1], [0], [0], [1], [0, 0, 1, 1], [], []>} : vector<10x32xf32>, vector<32x64xf32>, vector<10x64xf32> -> vector<10x64xf32>
    %297 = arith.addf %290, %296 : vector<10x64xf32>
    %c6_294 = arith.constant 6 : index
    %c0_295 = arith.constant 0 : index
    %c0_296 = arith.constant 0 : index
    %298 = vector.load %arg23[%c6_294, %c0_295, %c0_296] : memref<12x22x32xf32, #tpu.memory_space<vmem>>, vector<1x22x32xf32>
    %299 = vector.shape_cast %298 : vector<1x22x32xf32> to vector<22x32xf32>
    %c0_297 = arith.constant 0 : index
    %c0_298 = arith.constant 0 : index
    %c0_299 = arith.constant 0 : index
    %300 = vector.load %arg5[%c0_297, %c0_298, %c0_299] : memref<3x10x22xf32, #tpu.memory_space<vmem>>, vector<1x10x22xf32>
    %301 = vector.shape_cast %300 : vector<1x10x22xf32> to vector<10x22xf32>
    %cst_300 = arith.constant dense<0.000000e+00> : vector<10x32xf32>
    %302 = tpu.matmul %301, %299, %cst_300 {dimension_numbers = #tpu.dot_dimension_numbers<[1], [0], [0], [1], [0, 0, 1, 1], [], []>} : vector<10x22xf32>, vector<22x32xf32>, vector<10x32xf32> -> vector<10x32xf32>
    %c6_301 = arith.constant 6 : index
    %c0_302 = arith.constant 0 : index
    %c0_303 = arith.constant 0 : index
    %303 = vector.load %arg12[%c6_301, %c0_302, %c0_303] : memref<9x32x64xf32, #tpu.memory_space<vmem>>, vector<1x32x64xf32>
    %304 = vector.shape_cast %303 : vector<1x32x64xf32> to vector<32x64xf32>
    %cst_304 = arith.constant dense<0.000000e+00> : vector<10x64xf32>
    %305 = tpu.matmul %302, %304, %cst_304 {dimension_numbers = #tpu.dot_dimension_numbers<[1], [0], [0], [1], [0, 0, 1, 1], [], []>} : vector<10x32xf32>, vector<32x64xf32>, vector<10x64xf32> -> vector<10x64xf32>
    %306 = arith.addf %297, %305 : vector<10x64xf32>
    %c1_305 = arith.constant 1 : index
    %c0_306 = arith.constant 0 : index
    %c0_307 = arith.constant 0 : index
    %307 = vector.load %arg5[%c1_305, %c0_306, %c0_307] : memref<3x10x22xf32, #tpu.memory_space<vmem>>, vector<1x10x22xf32>
    %308 = vector.shape_cast %307 : vector<1x10x22xf32> to vector<10x22xf32>
    %cst_308 = arith.constant dense<0.000000e+00> : vector<10x32xf32>
    %309 = tpu.matmul %308, %299, %cst_308 {dimension_numbers = #tpu.dot_dimension_numbers<[1], [0], [0], [1], [0, 0, 1, 1], [], []>} : vector<10x22xf32>, vector<22x32xf32>, vector<10x32xf32> -> vector<10x32xf32>
    %c7_309 = arith.constant 7 : index
    %c0_310 = arith.constant 0 : index
    %c0_311 = arith.constant 0 : index
    %310 = vector.load %arg12[%c7_309, %c0_310, %c0_311] : memref<9x32x64xf32, #tpu.memory_space<vmem>>, vector<1x32x64xf32>
    %311 = vector.shape_cast %310 : vector<1x32x64xf32> to vector<32x64xf32>
    %cst_312 = arith.constant dense<0.000000e+00> : vector<10x64xf32>
    %312 = tpu.matmul %309, %311, %cst_312 {dimension_numbers = #tpu.dot_dimension_numbers<[1], [0], [0], [1], [0, 0, 1, 1], [], []>} : vector<10x32xf32>, vector<32x64xf32>, vector<10x64xf32> -> vector<10x64xf32>
    %313 = arith.addf %306, %312 : vector<10x64xf32>
    %c2_313 = arith.constant 2 : index
    %c0_314 = arith.constant 0 : index
    %c0_315 = arith.constant 0 : index
    %314 = vector.load %arg5[%c2_313, %c0_314, %c0_315] : memref<3x10x22xf32, #tpu.memory_space<vmem>>, vector<1x10x22xf32>
    %315 = vector.shape_cast %314 : vector<1x10x22xf32> to vector<10x22xf32>
    %cst_316 = arith.constant dense<0.000000e+00> : vector<10x32xf32>
    %316 = tpu.matmul %315, %299, %cst_316 {dimension_numbers = #tpu.dot_dimension_numbers<[1], [0], [0], [1], [0, 0, 1, 1], [], []>} : vector<10x22xf32>, vector<22x32xf32>, vector<10x32xf32> -> vector<10x32xf32>
    %c8_317 = arith.constant 8 : index
    %c0_318 = arith.constant 0 : index
    %c0_319 = arith.constant 0 : index
    %317 = vector.load %arg12[%c8_317, %c0_318, %c0_319] : memref<9x32x64xf32, #tpu.memory_space<vmem>>, vector<1x32x64xf32>
    %318 = vector.shape_cast %317 : vector<1x32x64xf32> to vector<32x64xf32>
    %cst_320 = arith.constant dense<0.000000e+00> : vector<10x64xf32>
    %319 = tpu.matmul %316, %318, %cst_320 {dimension_numbers = #tpu.dot_dimension_numbers<[1], [0], [0], [1], [0, 0, 1, 1], [], []>} : vector<10x32xf32>, vector<32x64xf32>, vector<10x64xf32> -> vector<10x64xf32>
    %320 = arith.addf %313, %319 : vector<10x64xf32>
    %c0_321 = arith.constant 0 : index
    %c0_322 = arith.constant 0 : index
    %321 = vector.load %arg13[%c0_321, %c0_322] : memref<1x64xf32, #tpu.memory_space<vmem>>, vector<1x64xf32>
    %322 = vector.broadcast %321 : vector<1x64xf32> to vector<10x64xf32>
    %323 = arith.addf %320, %322 : vector<10x64xf32>
    %cst_323 = arith.constant 0.000000e+00 : f32
    %324 = vector.broadcast %cst_323 : f32 to vector<10x64xf32>
    %325 = arith.maximumf %323, %324 : vector<10x64xf32>
    %326 = vector.extract_strided_slice %325 {offsets = [0, 0], sizes = [1, 64], strides = [1, 1]} : vector<10x64xf32> to vector<1x64xf32>
    %c20 = arith.constant 20 : index
    %c0_324 = arith.constant 0 : index
    %c0_325 = arith.constant 0 : index
    %327 = vector.load %arg14[%c20, %c0_324, %c0_325] : memref<50x64x64xf32, #tpu.memory_space<vmem>>, vector<1x64x64xf32>
    %328 = vector.shape_cast %327 : vector<1x64x64xf32> to vector<64x64xf32>
    %cst_326 = arith.constant dense<0.000000e+00> : vector<1x64xf32>
    %329 = tpu.matmul %326, %328, %cst_326 {dimension_numbers = #tpu.dot_dimension_numbers<[1], [0], [0], [1], [0, 0, 1, 1], [], []>} : vector<1x64xf32>, vector<64x64xf32>, vector<1x64xf32> -> vector<1x64xf32>
    %330 = arith.addf %252, %329 : vector<1x64xf32>
    %331 = vector.extract_strided_slice %325 {offsets = [1, 0], sizes = [1, 64], strides = [1, 1]} : vector<10x64xf32> to vector<1x64xf32>
    %c21 = arith.constant 21 : index
    %c0_327 = arith.constant 0 : index
    %c0_328 = arith.constant 0 : index
    %332 = vector.load %arg14[%c21, %c0_327, %c0_328] : memref<50x64x64xf32, #tpu.memory_space<vmem>>, vector<1x64x64xf32>
    %333 = vector.shape_cast %332 : vector<1x64x64xf32> to vector<64x64xf32>
    %cst_329 = arith.constant dense<0.000000e+00> : vector<1x64xf32>
    %334 = tpu.matmul %331, %333, %cst_329 {dimension_numbers = #tpu.dot_dimension_numbers<[1], [0], [0], [1], [0, 0, 1, 1], [], []>} : vector<1x64xf32>, vector<64x64xf32>, vector<1x64xf32> -> vector<1x64xf32>
    %335 = arith.addf %330, %334 : vector<1x64xf32>
    %336 = vector.extract_strided_slice %325 {offsets = [2, 0], sizes = [1, 64], strides = [1, 1]} : vector<10x64xf32> to vector<1x64xf32>
    %c22 = arith.constant 22 : index
    %c0_330 = arith.constant 0 : index
    %c0_331 = arith.constant 0 : index
    %337 = vector.load %arg14[%c22, %c0_330, %c0_331] : memref<50x64x64xf32, #tpu.memory_space<vmem>>, vector<1x64x64xf32>
    %338 = vector.shape_cast %337 : vector<1x64x64xf32> to vector<64x64xf32>
    %cst_332 = arith.constant dense<0.000000e+00> : vector<1x64xf32>
    %339 = tpu.matmul %336, %338, %cst_332 {dimension_numbers = #tpu.dot_dimension_numbers<[1], [0], [0], [1], [0, 0, 1, 1], [], []>} : vector<1x64xf32>, vector<64x64xf32>, vector<1x64xf32> -> vector<1x64xf32>
    %340 = arith.addf %335, %339 : vector<1x64xf32>
    %341 = vector.extract_strided_slice %325 {offsets = [3, 0], sizes = [1, 64], strides = [1, 1]} : vector<10x64xf32> to vector<1x64xf32>
    %c23 = arith.constant 23 : index
    %c0_333 = arith.constant 0 : index
    %c0_334 = arith.constant 0 : index
    %342 = vector.load %arg14[%c23, %c0_333, %c0_334] : memref<50x64x64xf32, #tpu.memory_space<vmem>>, vector<1x64x64xf32>
    %343 = vector.shape_cast %342 : vector<1x64x64xf32> to vector<64x64xf32>
    %cst_335 = arith.constant dense<0.000000e+00> : vector<1x64xf32>
    %344 = tpu.matmul %341, %343, %cst_335 {dimension_numbers = #tpu.dot_dimension_numbers<[1], [0], [0], [1], [0, 0, 1, 1], [], []>} : vector<1x64xf32>, vector<64x64xf32>, vector<1x64xf32> -> vector<1x64xf32>
    %345 = arith.addf %340, %344 : vector<1x64xf32>
    %346 = vector.extract_strided_slice %325 {offsets = [4, 0], sizes = [1, 64], strides = [1, 1]} : vector<10x64xf32> to vector<1x64xf32>
    %c24 = arith.constant 24 : index
    %c0_336 = arith.constant 0 : index
    %c0_337 = arith.constant 0 : index
    %347 = vector.load %arg14[%c24, %c0_336, %c0_337] : memref<50x64x64xf32, #tpu.memory_space<vmem>>, vector<1x64x64xf32>
    %348 = vector.shape_cast %347 : vector<1x64x64xf32> to vector<64x64xf32>
    %cst_338 = arith.constant dense<0.000000e+00> : vector<1x64xf32>
    %349 = tpu.matmul %346, %348, %cst_338 {dimension_numbers = #tpu.dot_dimension_numbers<[1], [0], [0], [1], [0, 0, 1, 1], [], []>} : vector<1x64xf32>, vector<64x64xf32>, vector<1x64xf32> -> vector<1x64xf32>
    %350 = arith.addf %345, %349 : vector<1x64xf32>
    %351 = vector.extract_strided_slice %325 {offsets = [5, 0], sizes = [1, 64], strides = [1, 1]} : vector<10x64xf32> to vector<1x64xf32>
    %c25 = arith.constant 25 : index
    %c0_339 = arith.constant 0 : index
    %c0_340 = arith.constant 0 : index
    %352 = vector.load %arg14[%c25, %c0_339, %c0_340] : memref<50x64x64xf32, #tpu.memory_space<vmem>>, vector<1x64x64xf32>
    %353 = vector.shape_cast %352 : vector<1x64x64xf32> to vector<64x64xf32>
    %cst_341 = arith.constant dense<0.000000e+00> : vector<1x64xf32>
    %354 = tpu.matmul %351, %353, %cst_341 {dimension_numbers = #tpu.dot_dimension_numbers<[1], [0], [0], [1], [0, 0, 1, 1], [], []>} : vector<1x64xf32>, vector<64x64xf32>, vector<1x64xf32> -> vector<1x64xf32>
    %355 = arith.addf %350, %354 : vector<1x64xf32>
    %356 = vector.extract_strided_slice %325 {offsets = [6, 0], sizes = [1, 64], strides = [1, 1]} : vector<10x64xf32> to vector<1x64xf32>
    %c26 = arith.constant 26 : index
    %c0_342 = arith.constant 0 : index
    %c0_343 = arith.constant 0 : index
    %357 = vector.load %arg14[%c26, %c0_342, %c0_343] : memref<50x64x64xf32, #tpu.memory_space<vmem>>, vector<1x64x64xf32>
    %358 = vector.shape_cast %357 : vector<1x64x64xf32> to vector<64x64xf32>
    %cst_344 = arith.constant dense<0.000000e+00> : vector<1x64xf32>
    %359 = tpu.matmul %356, %358, %cst_344 {dimension_numbers = #tpu.dot_dimension_numbers<[1], [0], [0], [1], [0, 0, 1, 1], [], []>} : vector<1x64xf32>, vector<64x64xf32>, vector<1x64xf32> -> vector<1x64xf32>
    %360 = arith.addf %355, %359 : vector<1x64xf32>
    %361 = vector.extract_strided_slice %325 {offsets = [7, 0], sizes = [1, 64], strides = [1, 1]} : vector<10x64xf32> to vector<1x64xf32>
    %c27 = arith.constant 27 : index
    %c0_345 = arith.constant 0 : index
    %c0_346 = arith.constant 0 : index
    %362 = vector.load %arg14[%c27, %c0_345, %c0_346] : memref<50x64x64xf32, #tpu.memory_space<vmem>>, vector<1x64x64xf32>
    %363 = vector.shape_cast %362 : vector<1x64x64xf32> to vector<64x64xf32>
    %cst_347 = arith.constant dense<0.000000e+00> : vector<1x64xf32>
    %364 = tpu.matmul %361, %363, %cst_347 {dimension_numbers = #tpu.dot_dimension_numbers<[1], [0], [0], [1], [0, 0, 1, 1], [], []>} : vector<1x64xf32>, vector<64x64xf32>, vector<1x64xf32> -> vector<1x64xf32>
    %365 = arith.addf %360, %364 : vector<1x64xf32>
    %366 = vector.extract_strided_slice %325 {offsets = [8, 0], sizes = [1, 64], strides = [1, 1]} : vector<10x64xf32> to vector<1x64xf32>
    %c28 = arith.constant 28 : index
    %c0_348 = arith.constant 0 : index
    %c0_349 = arith.constant 0 : index
    %367 = vector.load %arg14[%c28, %c0_348, %c0_349] : memref<50x64x64xf32, #tpu.memory_space<vmem>>, vector<1x64x64xf32>
    %368 = vector.shape_cast %367 : vector<1x64x64xf32> to vector<64x64xf32>
    %cst_350 = arith.constant dense<0.000000e+00> : vector<1x64xf32>
    %369 = tpu.matmul %366, %368, %cst_350 {dimension_numbers = #tpu.dot_dimension_numbers<[1], [0], [0], [1], [0, 0, 1, 1], [], []>} : vector<1x64xf32>, vector<64x64xf32>, vector<1x64xf32> -> vector<1x64xf32>
    %370 = arith.addf %365, %369 : vector<1x64xf32>
    %371 = vector.extract_strided_slice %325 {offsets = [9, 0], sizes = [1, 64], strides = [1, 1]} : vector<10x64xf32> to vector<1x64xf32>
    %c29 = arith.constant 29 : index
    %c0_351 = arith.constant 0 : index
    %c0_352 = arith.constant 0 : index
    %372 = vector.load %arg14[%c29, %c0_351, %c0_352] : memref<50x64x64xf32, #tpu.memory_space<vmem>>, vector<1x64x64xf32>
    %373 = vector.shape_cast %372 : vector<1x64x64xf32> to vector<64x64xf32>
    %cst_353 = arith.constant dense<0.000000e+00> : vector<1x64xf32>
    %374 = tpu.matmul %371, %373, %cst_353 {dimension_numbers = #tpu.dot_dimension_numbers<[1], [0], [0], [1], [0, 0, 1, 1], [], []>} : vector<1x64xf32>, vector<64x64xf32>, vector<1x64xf32> -> vector<1x64xf32>
    %375 = arith.addf %370, %374 : vector<1x64xf32>
    %c6_354 = arith.constant 6 : index
    %c0_355 = arith.constant 0 : index
    %c0_356 = arith.constant 0 : index
    %376 = vector.load %arg23[%c6_354, %c0_355, %c0_356] : memref<12x22x32xf32, #tpu.memory_space<vmem>>, vector<1x22x32xf32>
    %377 = vector.shape_cast %376 : vector<1x22x32xf32> to vector<22x32xf32>
    %c0_357 = arith.constant 0 : index
    %c0_358 = arith.constant 0 : index
    %c0_359 = arith.constant 0 : index
    %378 = vector.load %arg5[%c0_357, %c0_358, %c0_359] : memref<3x10x22xf32, #tpu.memory_space<vmem>>, vector<1x10x22xf32>
    %379 = vector.shape_cast %378 : vector<1x10x22xf32> to vector<10x22xf32>
    %cst_360 = arith.constant dense<0.000000e+00> : vector<10x32xf32>
    %380 = tpu.matmul %379, %377, %cst_360 {dimension_numbers = #tpu.dot_dimension_numbers<[1], [0], [0], [1], [0, 0, 1, 1], [], []>} : vector<10x22xf32>, vector<22x32xf32>, vector<10x32xf32> -> vector<10x32xf32>
    %c0_361 = arith.constant 0 : index
    %c0_362 = arith.constant 0 : index
    %c0_363 = arith.constant 0 : index
    %381 = vector.load %arg12[%c0_361, %c0_362, %c0_363] : memref<9x32x64xf32, #tpu.memory_space<vmem>>, vector<1x32x64xf32>
    %382 = vector.shape_cast %381 : vector<1x32x64xf32> to vector<32x64xf32>
    %cst_364 = arith.constant dense<0.000000e+00> : vector<10x64xf32>
    %383 = tpu.matmul %380, %382, %cst_364 {dimension_numbers = #tpu.dot_dimension_numbers<[1], [0], [0], [1], [0, 0, 1, 1], [], []>} : vector<10x32xf32>, vector<32x64xf32>, vector<10x64xf32> -> vector<10x64xf32>
    %c1_365 = arith.constant 1 : index
    %c0_366 = arith.constant 0 : index
    %c0_367 = arith.constant 0 : index
    %384 = vector.load %arg5[%c1_365, %c0_366, %c0_367] : memref<3x10x22xf32, #tpu.memory_space<vmem>>, vector<1x10x22xf32>
    %385 = vector.shape_cast %384 : vector<1x10x22xf32> to vector<10x22xf32>
    %cst_368 = arith.constant dense<0.000000e+00> : vector<10x32xf32>
    %386 = tpu.matmul %385, %377, %cst_368 {dimension_numbers = #tpu.dot_dimension_numbers<[1], [0], [0], [1], [0, 0, 1, 1], [], []>} : vector<10x22xf32>, vector<22x32xf32>, vector<10x32xf32> -> vector<10x32xf32>
    %c1_369 = arith.constant 1 : index
    %c0_370 = arith.constant 0 : index
    %c0_371 = arith.constant 0 : index
    %387 = vector.load %arg12[%c1_369, %c0_370, %c0_371] : memref<9x32x64xf32, #tpu.memory_space<vmem>>, vector<1x32x64xf32>
    %388 = vector.shape_cast %387 : vector<1x32x64xf32> to vector<32x64xf32>
    %cst_372 = arith.constant dense<0.000000e+00> : vector<10x64xf32>
    %389 = tpu.matmul %386, %388, %cst_372 {dimension_numbers = #tpu.dot_dimension_numbers<[1], [0], [0], [1], [0, 0, 1, 1], [], []>} : vector<10x32xf32>, vector<32x64xf32>, vector<10x64xf32> -> vector<10x64xf32>
    %390 = arith.addf %383, %389 : vector<10x64xf32>
    %c2_373 = arith.constant 2 : index
    %c0_374 = arith.constant 0 : index
    %c0_375 = arith.constant 0 : index
    %391 = vector.load %arg5[%c2_373, %c0_374, %c0_375] : memref<3x10x22xf32, #tpu.memory_space<vmem>>, vector<1x10x22xf32>
    %392 = vector.shape_cast %391 : vector<1x10x22xf32> to vector<10x22xf32>
    %cst_376 = arith.constant dense<0.000000e+00> : vector<10x32xf32>
    %393 = tpu.matmul %392, %377, %cst_376 {dimension_numbers = #tpu.dot_dimension_numbers<[1], [0], [0], [1], [0, 0, 1, 1], [], []>} : vector<10x22xf32>, vector<22x32xf32>, vector<10x32xf32> -> vector<10x32xf32>
    %c2_377 = arith.constant 2 : index
    %c0_378 = arith.constant 0 : index
    %c0_379 = arith.constant 0 : index
    %394 = vector.load %arg12[%c2_377, %c0_378, %c0_379] : memref<9x32x64xf32, #tpu.memory_space<vmem>>, vector<1x32x64xf32>
    %395 = vector.shape_cast %394 : vector<1x32x64xf32> to vector<32x64xf32>
    %cst_380 = arith.constant dense<0.000000e+00> : vector<10x64xf32>
    %396 = tpu.matmul %393, %395, %cst_380 {dimension_numbers = #tpu.dot_dimension_numbers<[1], [0], [0], [1], [0, 0, 1, 1], [], []>} : vector<10x32xf32>, vector<32x64xf32>, vector<10x64xf32> -> vector<10x64xf32>
    %397 = arith.addf %390, %396 : vector<10x64xf32>
    %c7_381 = arith.constant 7 : index
    %c0_382 = arith.constant 0 : index
    %c0_383 = arith.constant 0 : index
    %398 = vector.load %arg23[%c7_381, %c0_382, %c0_383] : memref<12x22x32xf32, #tpu.memory_space<vmem>>, vector<1x22x32xf32>
    %399 = vector.shape_cast %398 : vector<1x22x32xf32> to vector<22x32xf32>
    %c0_384 = arith.constant 0 : index
    %c0_385 = arith.constant 0 : index
    %c0_386 = arith.constant 0 : index
    %400 = vector.load %arg5[%c0_384, %c0_385, %c0_386] : memref<3x10x22xf32, #tpu.memory_space<vmem>>, vector<1x10x22xf32>
    %401 = vector.shape_cast %400 : vector<1x10x22xf32> to vector<10x22xf32>
    %cst_387 = arith.constant dense<0.000000e+00> : vector<10x32xf32>
    %402 = tpu.matmul %401, %399, %cst_387 {dimension_numbers = #tpu.dot_dimension_numbers<[1], [0], [0], [1], [0, 0, 1, 1], [], []>} : vector<10x22xf32>, vector<22x32xf32>, vector<10x32xf32> -> vector<10x32xf32>
    %c3_388 = arith.constant 3 : index
    %c0_389 = arith.constant 0 : index
    %c0_390 = arith.constant 0 : index
    %403 = vector.load %arg12[%c3_388, %c0_389, %c0_390] : memref<9x32x64xf32, #tpu.memory_space<vmem>>, vector<1x32x64xf32>
    %404 = vector.shape_cast %403 : vector<1x32x64xf32> to vector<32x64xf32>
    %cst_391 = arith.constant dense<0.000000e+00> : vector<10x64xf32>
    %405 = tpu.matmul %402, %404, %cst_391 {dimension_numbers = #tpu.dot_dimension_numbers<[1], [0], [0], [1], [0, 0, 1, 1], [], []>} : vector<10x32xf32>, vector<32x64xf32>, vector<10x64xf32> -> vector<10x64xf32>
    %406 = arith.addf %397, %405 : vector<10x64xf32>
    %c1_392 = arith.constant 1 : index
    %c0_393 = arith.constant 0 : index
    %c0_394 = arith.constant 0 : index
    %407 = vector.load %arg5[%c1_392, %c0_393, %c0_394] : memref<3x10x22xf32, #tpu.memory_space<vmem>>, vector<1x10x22xf32>
    %408 = vector.shape_cast %407 : vector<1x10x22xf32> to vector<10x22xf32>
    %cst_395 = arith.constant dense<0.000000e+00> : vector<10x32xf32>
    %409 = tpu.matmul %408, %399, %cst_395 {dimension_numbers = #tpu.dot_dimension_numbers<[1], [0], [0], [1], [0, 0, 1, 1], [], []>} : vector<10x22xf32>, vector<22x32xf32>, vector<10x32xf32> -> vector<10x32xf32>
    %c4_396 = arith.constant 4 : index
    %c0_397 = arith.constant 0 : index
    %c0_398 = arith.constant 0 : index
    %410 = vector.load %arg12[%c4_396, %c0_397, %c0_398] : memref<9x32x64xf32, #tpu.memory_space<vmem>>, vector<1x32x64xf32>
    %411 = vector.shape_cast %410 : vector<1x32x64xf32> to vector<32x64xf32>
    %cst_399 = arith.constant dense<0.000000e+00> : vector<10x64xf32>
    %412 = tpu.matmul %409, %411, %cst_399 {dimension_numbers = #tpu.dot_dimension_numbers<[1], [0], [0], [1], [0, 0, 1, 1], [], []>} : vector<10x32xf32>, vector<32x64xf32>, vector<10x64xf32> -> vector<10x64xf32>
    %413 = arith.addf %406, %412 : vector<10x64xf32>
    %c2_400 = arith.constant 2 : index
    %c0_401 = arith.constant 0 : index
    %c0_402 = arith.constant 0 : index
    %414 = vector.load %arg5[%c2_400, %c0_401, %c0_402] : memref<3x10x22xf32, #tpu.memory_space<vmem>>, vector<1x10x22xf32>
    %415 = vector.shape_cast %414 : vector<1x10x22xf32> to vector<10x22xf32>
    %cst_403 = arith.constant dense<0.000000e+00> : vector<10x32xf32>
    %416 = tpu.matmul %415, %399, %cst_403 {dimension_numbers = #tpu.dot_dimension_numbers<[1], [0], [0], [1], [0, 0, 1, 1], [], []>} : vector<10x22xf32>, vector<22x32xf32>, vector<10x32xf32> -> vector<10x32xf32>
    %c5_404 = arith.constant 5 : index
    %c0_405 = arith.constant 0 : index
    %c0_406 = arith.constant 0 : index
    %417 = vector.load %arg12[%c5_404, %c0_405, %c0_406] : memref<9x32x64xf32, #tpu.memory_space<vmem>>, vector<1x32x64xf32>
    %418 = vector.shape_cast %417 : vector<1x32x64xf32> to vector<32x64xf32>
    %cst_407 = arith.constant dense<0.000000e+00> : vector<10x64xf32>
    %419 = tpu.matmul %416, %418, %cst_407 {dimension_numbers = #tpu.dot_dimension_numbers<[1], [0], [0], [1], [0, 0, 1, 1], [], []>} : vector<10x32xf32>, vector<32x64xf32>, vector<10x64xf32> -> vector<10x64xf32>
    %420 = arith.addf %413, %419 : vector<10x64xf32>
    %c8_408 = arith.constant 8 : index
    %c0_409 = arith.constant 0 : index
    %c0_410 = arith.constant 0 : index
    %421 = vector.load %arg23[%c8_408, %c0_409, %c0_410] : memref<12x22x32xf32, #tpu.memory_space<vmem>>, vector<1x22x32xf32>
    %422 = vector.shape_cast %421 : vector<1x22x32xf32> to vector<22x32xf32>
    %c0_411 = arith.constant 0 : index
    %c0_412 = arith.constant 0 : index
    %c0_413 = arith.constant 0 : index
    %423 = vector.load %arg5[%c0_411, %c0_412, %c0_413] : memref<3x10x22xf32, #tpu.memory_space<vmem>>, vector<1x10x22xf32>
    %424 = vector.shape_cast %423 : vector<1x10x22xf32> to vector<10x22xf32>
    %cst_414 = arith.constant dense<0.000000e+00> : vector<10x32xf32>
    %425 = tpu.matmul %424, %422, %cst_414 {dimension_numbers = #tpu.dot_dimension_numbers<[1], [0], [0], [1], [0, 0, 1, 1], [], []>} : vector<10x22xf32>, vector<22x32xf32>, vector<10x32xf32> -> vector<10x32xf32>
    %c6_415 = arith.constant 6 : index
    %c0_416 = arith.constant 0 : index
    %c0_417 = arith.constant 0 : index
    %426 = vector.load %arg12[%c6_415, %c0_416, %c0_417] : memref<9x32x64xf32, #tpu.memory_space<vmem>>, vector<1x32x64xf32>
    %427 = vector.shape_cast %426 : vector<1x32x64xf32> to vector<32x64xf32>
    %cst_418 = arith.constant dense<0.000000e+00> : vector<10x64xf32>
    %428 = tpu.matmul %425, %427, %cst_418 {dimension_numbers = #tpu.dot_dimension_numbers<[1], [0], [0], [1], [0, 0, 1, 1], [], []>} : vector<10x32xf32>, vector<32x64xf32>, vector<10x64xf32> -> vector<10x64xf32>
    %429 = arith.addf %420, %428 : vector<10x64xf32>
    %c1_419 = arith.constant 1 : index
    %c0_420 = arith.constant 0 : index
    %c0_421 = arith.constant 0 : index
    %430 = vector.load %arg5[%c1_419, %c0_420, %c0_421] : memref<3x10x22xf32, #tpu.memory_space<vmem>>, vector<1x10x22xf32>
    %431 = vector.shape_cast %430 : vector<1x10x22xf32> to vector<10x22xf32>
    %cst_422 = arith.constant dense<0.000000e+00> : vector<10x32xf32>
    %432 = tpu.matmul %431, %422, %cst_422 {dimension_numbers = #tpu.dot_dimension_numbers<[1], [0], [0], [1], [0, 0, 1, 1], [], []>} : vector<10x22xf32>, vector<22x32xf32>, vector<10x32xf32> -> vector<10x32xf32>
    %c7_423 = arith.constant 7 : index
    %c0_424 = arith.constant 0 : index
    %c0_425 = arith.constant 0 : index
    %433 = vector.load %arg12[%c7_423, %c0_424, %c0_425] : memref<9x32x64xf32, #tpu.memory_space<vmem>>, vector<1x32x64xf32>
    %434 = vector.shape_cast %433 : vector<1x32x64xf32> to vector<32x64xf32>
    %cst_426 = arith.constant dense<0.000000e+00> : vector<10x64xf32>
    %435 = tpu.matmul %432, %434, %cst_426 {dimension_numbers = #tpu.dot_dimension_numbers<[1], [0], [0], [1], [0, 0, 1, 1], [], []>} : vector<10x32xf32>, vector<32x64xf32>, vector<10x64xf32> -> vector<10x64xf32>
    %436 = arith.addf %429, %435 : vector<10x64xf32>
    %c2_427 = arith.constant 2 : index
    %c0_428 = arith.constant 0 : index
    %c0_429 = arith.constant 0 : index
    %437 = vector.load %arg5[%c2_427, %c0_428, %c0_429] : memref<3x10x22xf32, #tpu.memory_space<vmem>>, vector<1x10x22xf32>
    %438 = vector.shape_cast %437 : vector<1x10x22xf32> to vector<10x22xf32>
    %cst_430 = arith.constant dense<0.000000e+00> : vector<10x32xf32>
    %439 = tpu.matmul %438, %422, %cst_430 {dimension_numbers = #tpu.dot_dimension_numbers<[1], [0], [0], [1], [0, 0, 1, 1], [], []>} : vector<10x22xf32>, vector<22x32xf32>, vector<10x32xf32> -> vector<10x32xf32>
    %c8_431 = arith.constant 8 : index
    %c0_432 = arith.constant 0 : index
    %c0_433 = arith.constant 0 : index
    %440 = vector.load %arg12[%c8_431, %c0_432, %c0_433] : memref<9x32x64xf32, #tpu.memory_space<vmem>>, vector<1x32x64xf32>
    %441 = vector.shape_cast %440 : vector<1x32x64xf32> to vector<32x64xf32>
    %cst_434 = arith.constant dense<0.000000e+00> : vector<10x64xf32>
    %442 = tpu.matmul %439, %441, %cst_434 {dimension_numbers = #tpu.dot_dimension_numbers<[1], [0], [0], [1], [0, 0, 1, 1], [], []>} : vector<10x32xf32>, vector<32x64xf32>, vector<10x64xf32> -> vector<10x64xf32>
    %443 = arith.addf %436, %442 : vector<10x64xf32>
    %c0_435 = arith.constant 0 : index
    %c0_436 = arith.constant 0 : index
    %444 = vector.load %arg13[%c0_435, %c0_436] : memref<1x64xf32, #tpu.memory_space<vmem>>, vector<1x64xf32>
    %445 = vector.broadcast %444 : vector<1x64xf32> to vector<10x64xf32>
    %446 = arith.addf %443, %445 : vector<10x64xf32>
    %cst_437 = arith.constant 0.000000e+00 : f32
    %447 = vector.broadcast %cst_437 : f32 to vector<10x64xf32>
    %448 = arith.maximumf %446, %447 : vector<10x64xf32>
    %449 = vector.extract_strided_slice %448 {offsets = [0, 0], sizes = [1, 64], strides = [1, 1]} : vector<10x64xf32> to vector<1x64xf32>
    %c30 = arith.constant 30 : index
    %c0_438 = arith.constant 0 : index
    %c0_439 = arith.constant 0 : index
    %450 = vector.load %arg14[%c30, %c0_438, %c0_439] : memref<50x64x64xf32, #tpu.memory_space<vmem>>, vector<1x64x64xf32>
    %451 = vector.shape_cast %450 : vector<1x64x64xf32> to vector<64x64xf32>
    %cst_440 = arith.constant dense<0.000000e+00> : vector<1x64xf32>
    %452 = tpu.matmul %449, %451, %cst_440 {dimension_numbers = #tpu.dot_dimension_numbers<[1], [0], [0], [1], [0, 0, 1, 1], [], []>} : vector<1x64xf32>, vector<64x64xf32>, vector<1x64xf32> -> vector<1x64xf32>
    %453 = arith.addf %375, %452 : vector<1x64xf32>
    %454 = vector.extract_strided_slice %448 {offsets = [1, 0], sizes = [1, 64], strides = [1, 1]} : vector<10x64xf32> to vector<1x64xf32>
    %c31 = arith.constant 31 : index
    %c0_441 = arith.constant 0 : index
    %c0_442 = arith.constant 0 : index
    %455 = vector.load %arg14[%c31, %c0_441, %c0_442] : memref<50x64x64xf32, #tpu.memory_space<vmem>>, vector<1x64x64xf32>
    %456 = vector.shape_cast %455 : vector<1x64x64xf32> to vector<64x64xf32>
    %cst_443 = arith.constant dense<0.000000e+00> : vector<1x64xf32>
    %457 = tpu.matmul %454, %456, %cst_443 {dimension_numbers = #tpu.dot_dimension_numbers<[1], [0], [0], [1], [0, 0, 1, 1], [], []>} : vector<1x64xf32>, vector<64x64xf32>, vector<1x64xf32> -> vector<1x64xf32>
    %458 = arith.addf %453, %457 : vector<1x64xf32>
    %459 = vector.extract_strided_slice %448 {offsets = [2, 0], sizes = [1, 64], strides = [1, 1]} : vector<10x64xf32> to vector<1x64xf32>
    %c32 = arith.constant 32 : index
    %c0_444 = arith.constant 0 : index
    %c0_445 = arith.constant 0 : index
    %460 = vector.load %arg14[%c32, %c0_444, %c0_445] : memref<50x64x64xf32, #tpu.memory_space<vmem>>, vector<1x64x64xf32>
    %461 = vector.shape_cast %460 : vector<1x64x64xf32> to vector<64x64xf32>
    %cst_446 = arith.constant dense<0.000000e+00> : vector<1x64xf32>
    %462 = tpu.matmul %459, %461, %cst_446 {dimension_numbers = #tpu.dot_dimension_numbers<[1], [0], [0], [1], [0, 0, 1, 1], [], []>} : vector<1x64xf32>, vector<64x64xf32>, vector<1x64xf32> -> vector<1x64xf32>
    %463 = arith.addf %458, %462 : vector<1x64xf32>
    %464 = vector.extract_strided_slice %448 {offsets = [3, 0], sizes = [1, 64], strides = [1, 1]} : vector<10x64xf32> to vector<1x64xf32>
    %c33 = arith.constant 33 : index
    %c0_447 = arith.constant 0 : index
    %c0_448 = arith.constant 0 : index
    %465 = vector.load %arg14[%c33, %c0_447, %c0_448] : memref<50x64x64xf32, #tpu.memory_space<vmem>>, vector<1x64x64xf32>
    %466 = vector.shape_cast %465 : vector<1x64x64xf32> to vector<64x64xf32>
    %cst_449 = arith.constant dense<0.000000e+00> : vector<1x64xf32>
    %467 = tpu.matmul %464, %466, %cst_449 {dimension_numbers = #tpu.dot_dimension_numbers<[1], [0], [0], [1], [0, 0, 1, 1], [], []>} : vector<1x64xf32>, vector<64x64xf32>, vector<1x64xf32> -> vector<1x64xf32>
    %468 = arith.addf %463, %467 : vector<1x64xf32>
    %469 = vector.extract_strided_slice %448 {offsets = [4, 0], sizes = [1, 64], strides = [1, 1]} : vector<10x64xf32> to vector<1x64xf32>
    %c34 = arith.constant 34 : index
    %c0_450 = arith.constant 0 : index
    %c0_451 = arith.constant 0 : index
    %470 = vector.load %arg14[%c34, %c0_450, %c0_451] : memref<50x64x64xf32, #tpu.memory_space<vmem>>, vector<1x64x64xf32>
    %471 = vector.shape_cast %470 : vector<1x64x64xf32> to vector<64x64xf32>
    %cst_452 = arith.constant dense<0.000000e+00> : vector<1x64xf32>
    %472 = tpu.matmul %469, %471, %cst_452 {dimension_numbers = #tpu.dot_dimension_numbers<[1], [0], [0], [1], [0, 0, 1, 1], [], []>} : vector<1x64xf32>, vector<64x64xf32>, vector<1x64xf32> -> vector<1x64xf32>
    %473 = arith.addf %468, %472 : vector<1x64xf32>
    %474 = vector.extract_strided_slice %448 {offsets = [5, 0], sizes = [1, 64], strides = [1, 1]} : vector<10x64xf32> to vector<1x64xf32>
    %c35 = arith.constant 35 : index
    %c0_453 = arith.constant 0 : index
    %c0_454 = arith.constant 0 : index
    %475 = vector.load %arg14[%c35, %c0_453, %c0_454] : memref<50x64x64xf32, #tpu.memory_space<vmem>>, vector<1x64x64xf32>
    %476 = vector.shape_cast %475 : vector<1x64x64xf32> to vector<64x64xf32>
    %cst_455 = arith.constant dense<0.000000e+00> : vector<1x64xf32>
    %477 = tpu.matmul %474, %476, %cst_455 {dimension_numbers = #tpu.dot_dimension_numbers<[1], [0], [0], [1], [0, 0, 1, 1], [], []>} : vector<1x64xf32>, vector<64x64xf32>, vector<1x64xf32> -> vector<1x64xf32>
    %478 = arith.addf %473, %477 : vector<1x64xf32>
    %479 = vector.extract_strided_slice %448 {offsets = [6, 0], sizes = [1, 64], strides = [1, 1]} : vector<10x64xf32> to vector<1x64xf32>
    %c36 = arith.constant 36 : index
    %c0_456 = arith.constant 0 : index
    %c0_457 = arith.constant 0 : index
    %480 = vector.load %arg14[%c36, %c0_456, %c0_457] : memref<50x64x64xf32, #tpu.memory_space<vmem>>, vector<1x64x64xf32>
    %481 = vector.shape_cast %480 : vector<1x64x64xf32> to vector<64x64xf32>
    %cst_458 = arith.constant dense<0.000000e+00> : vector<1x64xf32>
    %482 = tpu.matmul %479, %481, %cst_458 {dimension_numbers = #tpu.dot_dimension_numbers<[1], [0], [0], [1], [0, 0, 1, 1], [], []>} : vector<1x64xf32>, vector<64x64xf32>, vector<1x64xf32> -> vector<1x64xf32>
    %483 = arith.addf %478, %482 : vector<1x64xf32>
    %484 = vector.extract_strided_slice %448 {offsets = [7, 0], sizes = [1, 64], strides = [1, 1]} : vector<10x64xf32> to vector<1x64xf32>
    %c37 = arith.constant 37 : index
    %c0_459 = arith.constant 0 : index
    %c0_460 = arith.constant 0 : index
    %485 = vector.load %arg14[%c37, %c0_459, %c0_460] : memref<50x64x64xf32, #tpu.memory_space<vmem>>, vector<1x64x64xf32>
    %486 = vector.shape_cast %485 : vector<1x64x64xf32> to vector<64x64xf32>
    %cst_461 = arith.constant dense<0.000000e+00> : vector<1x64xf32>
    %487 = tpu.matmul %484, %486, %cst_461 {dimension_numbers = #tpu.dot_dimension_numbers<[1], [0], [0], [1], [0, 0, 1, 1], [], []>} : vector<1x64xf32>, vector<64x64xf32>, vector<1x64xf32> -> vector<1x64xf32>
    %488 = arith.addf %483, %487 : vector<1x64xf32>
    %489 = vector.extract_strided_slice %448 {offsets = [8, 0], sizes = [1, 64], strides = [1, 1]} : vector<10x64xf32> to vector<1x64xf32>
    %c38 = arith.constant 38 : index
    %c0_462 = arith.constant 0 : index
    %c0_463 = arith.constant 0 : index
    %490 = vector.load %arg14[%c38, %c0_462, %c0_463] : memref<50x64x64xf32, #tpu.memory_space<vmem>>, vector<1x64x64xf32>
    %491 = vector.shape_cast %490 : vector<1x64x64xf32> to vector<64x64xf32>
    %cst_464 = arith.constant dense<0.000000e+00> : vector<1x64xf32>
    %492 = tpu.matmul %489, %491, %cst_464 {dimension_numbers = #tpu.dot_dimension_numbers<[1], [0], [0], [1], [0, 0, 1, 1], [], []>} : vector<1x64xf32>, vector<64x64xf32>, vector<1x64xf32> -> vector<1x64xf32>
    %493 = arith.addf %488, %492 : vector<1x64xf32>
    %494 = vector.extract_strided_slice %448 {offsets = [9, 0], sizes = [1, 64], strides = [1, 1]} : vector<10x64xf32> to vector<1x64xf32>
    %c39 = arith.constant 39 : index
    %c0_465 = arith.constant 0 : index
    %c0_466 = arith.constant 0 : index
    %495 = vector.load %arg14[%c39, %c0_465, %c0_466] : memref<50x64x64xf32, #tpu.memory_space<vmem>>, vector<1x64x64xf32>
    %496 = vector.shape_cast %495 : vector<1x64x64xf32> to vector<64x64xf32>
    %cst_467 = arith.constant dense<0.000000e+00> : vector<1x64xf32>
    %497 = tpu.matmul %494, %496, %cst_467 {dimension_numbers = #tpu.dot_dimension_numbers<[1], [0], [0], [1], [0, 0, 1, 1], [], []>} : vector<1x64xf32>, vector<64x64xf32>, vector<1x64xf32> -> vector<1x64xf32>
    %498 = arith.addf %493, %497 : vector<1x64xf32>
    %c8_468 = arith.constant 8 : index
    %c0_469 = arith.constant 0 : index
    %c0_470 = arith.constant 0 : index
    %499 = vector.load %arg23[%c8_468, %c0_469, %c0_470] : memref<12x22x32xf32, #tpu.memory_space<vmem>>, vector<1x22x32xf32>
    %500 = vector.shape_cast %499 : vector<1x22x32xf32> to vector<22x32xf32>
    %c0_471 = arith.constant 0 : index
    %c0_472 = arith.constant 0 : index
    %c0_473 = arith.constant 0 : index
    %501 = vector.load %arg5[%c0_471, %c0_472, %c0_473] : memref<3x10x22xf32, #tpu.memory_space<vmem>>, vector<1x10x22xf32>
    %502 = vector.shape_cast %501 : vector<1x10x22xf32> to vector<10x22xf32>
    %cst_474 = arith.constant dense<0.000000e+00> : vector<10x32xf32>
    %503 = tpu.matmul %502, %500, %cst_474 {dimension_numbers = #tpu.dot_dimension_numbers<[1], [0], [0], [1], [0, 0, 1, 1], [], []>} : vector<10x22xf32>, vector<22x32xf32>, vector<10x32xf32> -> vector<10x32xf32>
    %c0_475 = arith.constant 0 : index
    %c0_476 = arith.constant 0 : index
    %c0_477 = arith.constant 0 : index
    %504 = vector.load %arg12[%c0_475, %c0_476, %c0_477] : memref<9x32x64xf32, #tpu.memory_space<vmem>>, vector<1x32x64xf32>
    %505 = vector.shape_cast %504 : vector<1x32x64xf32> to vector<32x64xf32>
    %cst_478 = arith.constant dense<0.000000e+00> : vector<10x64xf32>
    %506 = tpu.matmul %503, %505, %cst_478 {dimension_numbers = #tpu.dot_dimension_numbers<[1], [0], [0], [1], [0, 0, 1, 1], [], []>} : vector<10x32xf32>, vector<32x64xf32>, vector<10x64xf32> -> vector<10x64xf32>
    %c1_479 = arith.constant 1 : index
    %c0_480 = arith.constant 0 : index
    %c0_481 = arith.constant 0 : index
    %507 = vector.load %arg5[%c1_479, %c0_480, %c0_481] : memref<3x10x22xf32, #tpu.memory_space<vmem>>, vector<1x10x22xf32>
    %508 = vector.shape_cast %507 : vector<1x10x22xf32> to vector<10x22xf32>
    %cst_482 = arith.constant dense<0.000000e+00> : vector<10x32xf32>
    %509 = tpu.matmul %508, %500, %cst_482 {dimension_numbers = #tpu.dot_dimension_numbers<[1], [0], [0], [1], [0, 0, 1, 1], [], []>} : vector<10x22xf32>, vector<22x32xf32>, vector<10x32xf32> -> vector<10x32xf32>
    %c1_483 = arith.constant 1 : index
    %c0_484 = arith.constant 0 : index
    %c0_485 = arith.constant 0 : index
    %510 = vector.load %arg12[%c1_483, %c0_484, %c0_485] : memref<9x32x64xf32, #tpu.memory_space<vmem>>, vector<1x32x64xf32>
    %511 = vector.shape_cast %510 : vector<1x32x64xf32> to vector<32x64xf32>
    %cst_486 = arith.constant dense<0.000000e+00> : vector<10x64xf32>
    %512 = tpu.matmul %509, %511, %cst_486 {dimension_numbers = #tpu.dot_dimension_numbers<[1], [0], [0], [1], [0, 0, 1, 1], [], []>} : vector<10x32xf32>, vector<32x64xf32>, vector<10x64xf32> -> vector<10x64xf32>
    %513 = arith.addf %506, %512 : vector<10x64xf32>
    %c2_487 = arith.constant 2 : index
    %c0_488 = arith.constant 0 : index
    %c0_489 = arith.constant 0 : index
    %514 = vector.load %arg5[%c2_487, %c0_488, %c0_489] : memref<3x10x22xf32, #tpu.memory_space<vmem>>, vector<1x10x22xf32>
    %515 = vector.shape_cast %514 : vector<1x10x22xf32> to vector<10x22xf32>
    %cst_490 = arith.constant dense<0.000000e+00> : vector<10x32xf32>
    %516 = tpu.matmul %515, %500, %cst_490 {dimension_numbers = #tpu.dot_dimension_numbers<[1], [0], [0], [1], [0, 0, 1, 1], [], []>} : vector<10x22xf32>, vector<22x32xf32>, vector<10x32xf32> -> vector<10x32xf32>
    %c2_491 = arith.constant 2 : index
    %c0_492 = arith.constant 0 : index
    %c0_493 = arith.constant 0 : index
    %517 = vector.load %arg12[%c2_491, %c0_492, %c0_493] : memref<9x32x64xf32, #tpu.memory_space<vmem>>, vector<1x32x64xf32>
    %518 = vector.shape_cast %517 : vector<1x32x64xf32> to vector<32x64xf32>
    %cst_494 = arith.constant dense<0.000000e+00> : vector<10x64xf32>
    %519 = tpu.matmul %516, %518, %cst_494 {dimension_numbers = #tpu.dot_dimension_numbers<[1], [0], [0], [1], [0, 0, 1, 1], [], []>} : vector<10x32xf32>, vector<32x64xf32>, vector<10x64xf32> -> vector<10x64xf32>
    %520 = arith.addf %513, %519 : vector<10x64xf32>
    %c9_495 = arith.constant 9 : index
    %c0_496 = arith.constant 0 : index
    %c0_497 = arith.constant 0 : index
    %521 = vector.load %arg23[%c9_495, %c0_496, %c0_497] : memref<12x22x32xf32, #tpu.memory_space<vmem>>, vector<1x22x32xf32>
    %522 = vector.shape_cast %521 : vector<1x22x32xf32> to vector<22x32xf32>
    %c0_498 = arith.constant 0 : index
    %c0_499 = arith.constant 0 : index
    %c0_500 = arith.constant 0 : index
    %523 = vector.load %arg5[%c0_498, %c0_499, %c0_500] : memref<3x10x22xf32, #tpu.memory_space<vmem>>, vector<1x10x22xf32>
    %524 = vector.shape_cast %523 : vector<1x10x22xf32> to vector<10x22xf32>
    %cst_501 = arith.constant dense<0.000000e+00> : vector<10x32xf32>
    %525 = tpu.matmul %524, %522, %cst_501 {dimension_numbers = #tpu.dot_dimension_numbers<[1], [0], [0], [1], [0, 0, 1, 1], [], []>} : vector<10x22xf32>, vector<22x32xf32>, vector<10x32xf32> -> vector<10x32xf32>
    %c3_502 = arith.constant 3 : index
    %c0_503 = arith.constant 0 : index
    %c0_504 = arith.constant 0 : index
    %526 = vector.load %arg12[%c3_502, %c0_503, %c0_504] : memref<9x32x64xf32, #tpu.memory_space<vmem>>, vector<1x32x64xf32>
    %527 = vector.shape_cast %526 : vector<1x32x64xf32> to vector<32x64xf32>
    %cst_505 = arith.constant dense<0.000000e+00> : vector<10x64xf32>
    %528 = tpu.matmul %525, %527, %cst_505 {dimension_numbers = #tpu.dot_dimension_numbers<[1], [0], [0], [1], [0, 0, 1, 1], [], []>} : vector<10x32xf32>, vector<32x64xf32>, vector<10x64xf32> -> vector<10x64xf32>
    %529 = arith.addf %520, %528 : vector<10x64xf32>
    %c1_506 = arith.constant 1 : index
    %c0_507 = arith.constant 0 : index
    %c0_508 = arith.constant 0 : index
    %530 = vector.load %arg5[%c1_506, %c0_507, %c0_508] : memref<3x10x22xf32, #tpu.memory_space<vmem>>, vector<1x10x22xf32>
    %531 = vector.shape_cast %530 : vector<1x10x22xf32> to vector<10x22xf32>
    %cst_509 = arith.constant dense<0.000000e+00> : vector<10x32xf32>
    %532 = tpu.matmul %531, %522, %cst_509 {dimension_numbers = #tpu.dot_dimension_numbers<[1], [0], [0], [1], [0, 0, 1, 1], [], []>} : vector<10x22xf32>, vector<22x32xf32>, vector<10x32xf32> -> vector<10x32xf32>
    %c4_510 = arith.constant 4 : index
    %c0_511 = arith.constant 0 : index
    %c0_512 = arith.constant 0 : index
    %533 = vector.load %arg12[%c4_510, %c0_511, %c0_512] : memref<9x32x64xf32, #tpu.memory_space<vmem>>, vector<1x32x64xf32>
    %534 = vector.shape_cast %533 : vector<1x32x64xf32> to vector<32x64xf32>
    %cst_513 = arith.constant dense<0.000000e+00> : vector<10x64xf32>
    %535 = tpu.matmul %532, %534, %cst_513 {dimension_numbers = #tpu.dot_dimension_numbers<[1], [0], [0], [1], [0, 0, 1, 1], [], []>} : vector<10x32xf32>, vector<32x64xf32>, vector<10x64xf32> -> vector<10x64xf32>
    %536 = arith.addf %529, %535 : vector<10x64xf32>
    %c2_514 = arith.constant 2 : index
    %c0_515 = arith.constant 0 : index
    %c0_516 = arith.constant 0 : index
    %537 = vector.load %arg5[%c2_514, %c0_515, %c0_516] : memref<3x10x22xf32, #tpu.memory_space<vmem>>, vector<1x10x22xf32>
    %538 = vector.shape_cast %537 : vector<1x10x22xf32> to vector<10x22xf32>
    %cst_517 = arith.constant dense<0.000000e+00> : vector<10x32xf32>
    %539 = tpu.matmul %538, %522, %cst_517 {dimension_numbers = #tpu.dot_dimension_numbers<[1], [0], [0], [1], [0, 0, 1, 1], [], []>} : vector<10x22xf32>, vector<22x32xf32>, vector<10x32xf32> -> vector<10x32xf32>
    %c5_518 = arith.constant 5 : index
    %c0_519 = arith.constant 0 : index
    %c0_520 = arith.constant 0 : index
    %540 = vector.load %arg12[%c5_518, %c0_519, %c0_520] : memref<9x32x64xf32, #tpu.memory_space<vmem>>, vector<1x32x64xf32>
    %541 = vector.shape_cast %540 : vector<1x32x64xf32> to vector<32x64xf32>
    %cst_521 = arith.constant dense<0.000000e+00> : vector<10x64xf32>
    %542 = tpu.matmul %539, %541, %cst_521 {dimension_numbers = #tpu.dot_dimension_numbers<[1], [0], [0], [1], [0, 0, 1, 1], [], []>} : vector<10x32xf32>, vector<32x64xf32>, vector<10x64xf32> -> vector<10x64xf32>
    %543 = arith.addf %536, %542 : vector<10x64xf32>
    %c10_522 = arith.constant 10 : index
    %c0_523 = arith.constant 0 : index
    %c0_524 = arith.constant 0 : index
    %544 = vector.load %arg23[%c10_522, %c0_523, %c0_524] : memref<12x22x32xf32, #tpu.memory_space<vmem>>, vector<1x22x32xf32>
    %545 = vector.shape_cast %544 : vector<1x22x32xf32> to vector<22x32xf32>
    %c0_525 = arith.constant 0 : index
    %c0_526 = arith.constant 0 : index
    %c0_527 = arith.constant 0 : index
    %546 = vector.load %arg5[%c0_525, %c0_526, %c0_527] : memref<3x10x22xf32, #tpu.memory_space<vmem>>, vector<1x10x22xf32>
    %547 = vector.shape_cast %546 : vector<1x10x22xf32> to vector<10x22xf32>
    %cst_528 = arith.constant dense<0.000000e+00> : vector<10x32xf32>
    %548 = tpu.matmul %547, %545, %cst_528 {dimension_numbers = #tpu.dot_dimension_numbers<[1], [0], [0], [1], [0, 0, 1, 1], [], []>} : vector<10x22xf32>, vector<22x32xf32>, vector<10x32xf32> -> vector<10x32xf32>
    %c6_529 = arith.constant 6 : index
    %c0_530 = arith.constant 0 : index
    %c0_531 = arith.constant 0 : index
    %549 = vector.load %arg12[%c6_529, %c0_530, %c0_531] : memref<9x32x64xf32, #tpu.memory_space<vmem>>, vector<1x32x64xf32>
    %550 = vector.shape_cast %549 : vector<1x32x64xf32> to vector<32x64xf32>
    %cst_532 = arith.constant dense<0.000000e+00> : vector<10x64xf32>
    %551 = tpu.matmul %548, %550, %cst_532 {dimension_numbers = #tpu.dot_dimension_numbers<[1], [0], [0], [1], [0, 0, 1, 1], [], []>} : vector<10x32xf32>, vector<32x64xf32>, vector<10x64xf32> -> vector<10x64xf32>
    %552 = arith.addf %543, %551 : vector<10x64xf32>
    %c1_533 = arith.constant 1 : index
    %c0_534 = arith.constant 0 : index
    %c0_535 = arith.constant 0 : index
    %553 = vector.load %arg5[%c1_533, %c0_534, %c0_535] : memref<3x10x22xf32, #tpu.memory_space<vmem>>, vector<1x10x22xf32>
    %554 = vector.shape_cast %553 : vector<1x10x22xf32> to vector<10x22xf32>
    %cst_536 = arith.constant dense<0.000000e+00> : vector<10x32xf32>
    %555 = tpu.matmul %554, %545, %cst_536 {dimension_numbers = #tpu.dot_dimension_numbers<[1], [0], [0], [1], [0, 0, 1, 1], [], []>} : vector<10x22xf32>, vector<22x32xf32>, vector<10x32xf32> -> vector<10x32xf32>
    %c7_537 = arith.constant 7 : index
    %c0_538 = arith.constant 0 : index
    %c0_539 = arith.constant 0 : index
    %556 = vector.load %arg12[%c7_537, %c0_538, %c0_539] : memref<9x32x64xf32, #tpu.memory_space<vmem>>, vector<1x32x64xf32>
    %557 = vector.shape_cast %556 : vector<1x32x64xf32> to vector<32x64xf32>
    %cst_540 = arith.constant dense<0.000000e+00> : vector<10x64xf32>
    %558 = tpu.matmul %555, %557, %cst_540 {dimension_numbers = #tpu.dot_dimension_numbers<[1], [0], [0], [1], [0, 0, 1, 1], [], []>} : vector<10x32xf32>, vector<32x64xf32>, vector<10x64xf32> -> vector<10x64xf32>
    %559 = arith.addf %552, %558 : vector<10x64xf32>
    %c2_541 = arith.constant 2 : index
    %c0_542 = arith.constant 0 : index
    %c0_543 = arith.constant 0 : index
    %560 = vector.load %arg5[%c2_541, %c0_542, %c0_543] : memref<3x10x22xf32, #tpu.memory_space<vmem>>, vector<1x10x22xf32>
    %561 = vector.shape_cast %560 : vector<1x10x22xf32> to vector<10x22xf32>
    %cst_544 = arith.constant dense<0.000000e+00> : vector<10x32xf32>
    %562 = tpu.matmul %561, %545, %cst_544 {dimension_numbers = #tpu.dot_dimension_numbers<[1], [0], [0], [1], [0, 0, 1, 1], [], []>} : vector<10x22xf32>, vector<22x32xf32>, vector<10x32xf32> -> vector<10x32xf32>
    %c8_545 = arith.constant 8 : index
    %c0_546 = arith.constant 0 : index
    %c0_547 = arith.constant 0 : index
    %563 = vector.load %arg12[%c8_545, %c0_546, %c0_547] : memref<9x32x64xf32, #tpu.memory_space<vmem>>, vector<1x32x64xf32>
    %564 = vector.shape_cast %563 : vector<1x32x64xf32> to vector<32x64xf32>
    %cst_548 = arith.constant dense<0.000000e+00> : vector<10x64xf32>
    %565 = tpu.matmul %562, %564, %cst_548 {dimension_numbers = #tpu.dot_dimension_numbers<[1], [0], [0], [1], [0, 0, 1, 1], [], []>} : vector<10x32xf32>, vector<32x64xf32>, vector<10x64xf32> -> vector<10x64xf32>
    %566 = arith.addf %559, %565 : vector<10x64xf32>
    %c0_549 = arith.constant 0 : index
    %c0_550 = arith.constant 0 : index
    %567 = vector.load %arg13[%c0_549, %c0_550] : memref<1x64xf32, #tpu.memory_space<vmem>>, vector<1x64xf32>
    %568 = vector.broadcast %567 : vector<1x64xf32> to vector<10x64xf32>
    %569 = arith.addf %566, %568 : vector<10x64xf32>
    %cst_551 = arith.constant 0.000000e+00 : f32
    %570 = vector.broadcast %cst_551 : f32 to vector<10x64xf32>
    %571 = arith.maximumf %569, %570 : vector<10x64xf32>
    %572 = vector.extract_strided_slice %571 {offsets = [0, 0], sizes = [1, 64], strides = [1, 1]} : vector<10x64xf32> to vector<1x64xf32>
    %c40 = arith.constant 40 : index
    %c0_552 = arith.constant 0 : index
    %c0_553 = arith.constant 0 : index
    %573 = vector.load %arg14[%c40, %c0_552, %c0_553] : memref<50x64x64xf32, #tpu.memory_space<vmem>>, vector<1x64x64xf32>
    %574 = vector.shape_cast %573 : vector<1x64x64xf32> to vector<64x64xf32>
    %cst_554 = arith.constant dense<0.000000e+00> : vector<1x64xf32>
    %575 = tpu.matmul %572, %574, %cst_554 {dimension_numbers = #tpu.dot_dimension_numbers<[1], [0], [0], [1], [0, 0, 1, 1], [], []>} : vector<1x64xf32>, vector<64x64xf32>, vector<1x64xf32> -> vector<1x64xf32>
    %576 = arith.addf %498, %575 : vector<1x64xf32>
    %577 = vector.extract_strided_slice %571 {offsets = [1, 0], sizes = [1, 64], strides = [1, 1]} : vector<10x64xf32> to vector<1x64xf32>
    %c41 = arith.constant 41 : index
    %c0_555 = arith.constant 0 : index
    %c0_556 = arith.constant 0 : index
    %578 = vector.load %arg14[%c41, %c0_555, %c0_556] : memref<50x64x64xf32, #tpu.memory_space<vmem>>, vector<1x64x64xf32>
    %579 = vector.shape_cast %578 : vector<1x64x64xf32> to vector<64x64xf32>
    %cst_557 = arith.constant dense<0.000000e+00> : vector<1x64xf32>
    %580 = tpu.matmul %577, %579, %cst_557 {dimension_numbers = #tpu.dot_dimension_numbers<[1], [0], [0], [1], [0, 0, 1, 1], [], []>} : vector<1x64xf32>, vector<64x64xf32>, vector<1x64xf32> -> vector<1x64xf32>
    %581 = arith.addf %576, %580 : vector<1x64xf32>
    %582 = vector.extract_strided_slice %571 {offsets = [2, 0], sizes = [1, 64], strides = [1, 1]} : vector<10x64xf32> to vector<1x64xf32>
    %c42 = arith.constant 42 : index
    %c0_558 = arith.constant 0 : index
    %c0_559 = arith.constant 0 : index
    %583 = vector.load %arg14[%c42, %c0_558, %c0_559] : memref<50x64x64xf32, #tpu.memory_space<vmem>>, vector<1x64x64xf32>
    %584 = vector.shape_cast %583 : vector<1x64x64xf32> to vector<64x64xf32>
    %cst_560 = arith.constant dense<0.000000e+00> : vector<1x64xf32>
    %585 = tpu.matmul %582, %584, %cst_560 {dimension_numbers = #tpu.dot_dimension_numbers<[1], [0], [0], [1], [0, 0, 1, 1], [], []>} : vector<1x64xf32>, vector<64x64xf32>, vector<1x64xf32> -> vector<1x64xf32>
    %586 = arith.addf %581, %585 : vector<1x64xf32>
    %587 = vector.extract_strided_slice %571 {offsets = [3, 0], sizes = [1, 64], strides = [1, 1]} : vector<10x64xf32> to vector<1x64xf32>
    %c43 = arith.constant 43 : index
    %c0_561 = arith.constant 0 : index
    %c0_562 = arith.constant 0 : index
    %588 = vector.load %arg14[%c43, %c0_561, %c0_562] : memref<50x64x64xf32, #tpu.memory_space<vmem>>, vector<1x64x64xf32>
    %589 = vector.shape_cast %588 : vector<1x64x64xf32> to vector<64x64xf32>
    %cst_563 = arith.constant dense<0.000000e+00> : vector<1x64xf32>
    %590 = tpu.matmul %587, %589, %cst_563 {dimension_numbers = #tpu.dot_dimension_numbers<[1], [0], [0], [1], [0, 0, 1, 1], [], []>} : vector<1x64xf32>, vector<64x64xf32>, vector<1x64xf32> -> vector<1x64xf32>
    %591 = arith.addf %586, %590 : vector<1x64xf32>
    %592 = vector.extract_strided_slice %571 {offsets = [4, 0], sizes = [1, 64], strides = [1, 1]} : vector<10x64xf32> to vector<1x64xf32>
    %c44 = arith.constant 44 : index
    %c0_564 = arith.constant 0 : index
    %c0_565 = arith.constant 0 : index
    %593 = vector.load %arg14[%c44, %c0_564, %c0_565] : memref<50x64x64xf32, #tpu.memory_space<vmem>>, vector<1x64x64xf32>
    %594 = vector.shape_cast %593 : vector<1x64x64xf32> to vector<64x64xf32>
    %cst_566 = arith.constant dense<0.000000e+00> : vector<1x64xf32>
    %595 = tpu.matmul %592, %594, %cst_566 {dimension_numbers = #tpu.dot_dimension_numbers<[1], [0], [0], [1], [0, 0, 1, 1], [], []>} : vector<1x64xf32>, vector<64x64xf32>, vector<1x64xf32> -> vector<1x64xf32>
    %596 = arith.addf %591, %595 : vector<1x64xf32>
    %597 = vector.extract_strided_slice %571 {offsets = [5, 0], sizes = [1, 64], strides = [1, 1]} : vector<10x64xf32> to vector<1x64xf32>
    %c45 = arith.constant 45 : index
    %c0_567 = arith.constant 0 : index
    %c0_568 = arith.constant 0 : index
    %598 = vector.load %arg14[%c45, %c0_567, %c0_568] : memref<50x64x64xf32, #tpu.memory_space<vmem>>, vector<1x64x64xf32>
    %599 = vector.shape_cast %598 : vector<1x64x64xf32> to vector<64x64xf32>
    %cst_569 = arith.constant dense<0.000000e+00> : vector<1x64xf32>
    %600 = tpu.matmul %597, %599, %cst_569 {dimension_numbers = #tpu.dot_dimension_numbers<[1], [0], [0], [1], [0, 0, 1, 1], [], []>} : vector<1x64xf32>, vector<64x64xf32>, vector<1x64xf32> -> vector<1x64xf32>
    %601 = arith.addf %596, %600 : vector<1x64xf32>
    %602 = vector.extract_strided_slice %571 {offsets = [6, 0], sizes = [1, 64], strides = [1, 1]} : vector<10x64xf32> to vector<1x64xf32>
    %c46 = arith.constant 46 : index
    %c0_570 = arith.constant 0 : index
    %c0_571 = arith.constant 0 : index
    %603 = vector.load %arg14[%c46, %c0_570, %c0_571] : memref<50x64x64xf32, #tpu.memory_space<vmem>>, vector<1x64x64xf32>
    %604 = vector.shape_cast %603 : vector<1x64x64xf32> to vector<64x64xf32>
    %cst_572 = arith.constant dense<0.000000e+00> : vector<1x64xf32>
    %605 = tpu.matmul %602, %604, %cst_572 {dimension_numbers = #tpu.dot_dimension_numbers<[1], [0], [0], [1], [0, 0, 1, 1], [], []>} : vector<1x64xf32>, vector<64x64xf32>, vector<1x64xf32> -> vector<1x64xf32>
    %606 = arith.addf %601, %605 : vector<1x64xf32>
    %607 = vector.extract_strided_slice %571 {offsets = [7, 0], sizes = [1, 64], strides = [1, 1]} : vector<10x64xf32> to vector<1x64xf32>
    %c47 = arith.constant 47 : index
    %c0_573 = arith.constant 0 : index
    %c0_574 = arith.constant 0 : index
    %608 = vector.load %arg14[%c47, %c0_573, %c0_574] : memref<50x64x64xf32, #tpu.memory_space<vmem>>, vector<1x64x64xf32>
    %609 = vector.shape_cast %608 : vector<1x64x64xf32> to vector<64x64xf32>
    %cst_575 = arith.constant dense<0.000000e+00> : vector<1x64xf32>
    %610 = tpu.matmul %607, %609, %cst_575 {dimension_numbers = #tpu.dot_dimension_numbers<[1], [0], [0], [1], [0, 0, 1, 1], [], []>} : vector<1x64xf32>, vector<64x64xf32>, vector<1x64xf32> -> vector<1x64xf32>
    %611 = arith.addf %606, %610 : vector<1x64xf32>
    %612 = vector.extract_strided_slice %571 {offsets = [8, 0], sizes = [1, 64], strides = [1, 1]} : vector<10x64xf32> to vector<1x64xf32>
    %c48 = arith.constant 48 : index
    %c0_576 = arith.constant 0 : index
    %c0_577 = arith.constant 0 : index
    %613 = vector.load %arg14[%c48, %c0_576, %c0_577] : memref<50x64x64xf32, #tpu.memory_space<vmem>>, vector<1x64x64xf32>
    %614 = vector.shape_cast %613 : vector<1x64x64xf32> to vector<64x64xf32>
    %cst_578 = arith.constant dense<0.000000e+00> : vector<1x64xf32>
    %615 = tpu.matmul %612, %614, %cst_578 {dimension_numbers = #tpu.dot_dimension_numbers<[1], [0], [0], [1], [0, 0, 1, 1], [], []>} : vector<1x64xf32>, vector<64x64xf32>, vector<1x64xf32> -> vector<1x64xf32>
    %616 = arith.addf %611, %615 : vector<1x64xf32>
    %617 = vector.extract_strided_slice %571 {offsets = [9, 0], sizes = [1, 64], strides = [1, 1]} : vector<10x64xf32> to vector<1x64xf32>
    %c49 = arith.constant 49 : index
    %c0_579 = arith.constant 0 : index
    %c0_580 = arith.constant 0 : index
    %618 = vector.load %arg14[%c49, %c0_579, %c0_580] : memref<50x64x64xf32, #tpu.memory_space<vmem>>, vector<1x64x64xf32>
    %619 = vector.shape_cast %618 : vector<1x64x64xf32> to vector<64x64xf32>
    %cst_581 = arith.constant dense<0.000000e+00> : vector<1x64xf32>
    %620 = tpu.matmul %617, %619, %cst_581 {dimension_numbers = #tpu.dot_dimension_numbers<[1], [0], [0], [1], [0, 0, 1, 1], [], []>} : vector<1x64xf32>, vector<64x64xf32>, vector<1x64xf32> -> vector<1x64xf32>
    %621 = arith.addf %616, %620 : vector<1x64xf32>
    %c0_582 = arith.constant 0 : index
    %c0_583 = arith.constant 0 : index
    %c0_584 = arith.constant 0 : index
    %622 = vector.load %arg2[%c0_582, %c0_583, %c0_584] : memref<1x1x2xf32, #tpu.memory_space<vmem>>, vector<1x1x2xf32>
    %623 = vector.shape_cast %622 : vector<1x1x2xf32> to vector<1x2xf32>
    %c0_585 = arith.constant 0 : index
    %c0_586 = arith.constant 0 : index
    %624 = vector.load %arg15[%c0_585, %c0_586] : memref<2x64xf32, #tpu.memory_space<vmem>>, vector<2x64xf32>
    %cst_587 = arith.constant dense<0.000000e+00> : vector<1x64xf32>
    %625 = tpu.matmul %623, %624, %cst_587 {dimension_numbers = #tpu.dot_dimension_numbers<[1], [0], [0], [1], [0, 0, 1, 1], [], []>} : vector<1x2xf32>, vector<2x64xf32>, vector<1x64xf32> -> vector<1x64xf32>
    %626 = arith.addf %621, %625 : vector<1x64xf32>
    %c0_588 = arith.constant 0 : index
    %c0_589 = arith.constant 0 : index
    %627 = vector.load %arg16[%c0_588, %c0_589] : memref<1x64xf32, #tpu.memory_space<vmem>>, vector<1x64xf32>
    %628 = arith.addf %626, %627 : vector<1x64xf32>
    %cst_590 = arith.constant 0.000000e+00 : f32
    %629 = vector.broadcast %cst_590 : f32 to vector<1x64xf32>
    %630 = arith.maximumf %628, %629 : vector<1x64xf32>
    %c0_591 = arith.constant 0 : index
    %c0_592 = arith.constant 0 : index
    %631 = vector.load %arg17[%c0_591, %c0_592] : memref<64x64xf32, #tpu.memory_space<vmem>>, vector<64x64xf32>
    %cst_593 = arith.constant dense<0.000000e+00> : vector<1x64xf32>
    %632 = tpu.matmul %630, %631, %cst_593 {dimension_numbers = #tpu.dot_dimension_numbers<[1], [0], [0], [1], [0, 0, 1, 1], [], []>} : vector<1x64xf32>, vector<64x64xf32>, vector<1x64xf32> -> vector<1x64xf32>
    %c0_594 = arith.constant 0 : index
    %c0_595 = arith.constant 0 : index
    %633 = vector.load %arg18[%c0_594, %c0_595] : memref<1x64xf32, #tpu.memory_space<vmem>>, vector<1x64xf32>
    %634 = arith.addf %632, %633 : vector<1x64xf32>
    %cst_596 = arith.constant 0.000000e+00 : f32
    %635 = vector.broadcast %cst_596 : f32 to vector<1x64xf32>
    %636 = arith.maximumf %634, %635 : vector<1x64xf32>
    %c0_597 = arith.constant 0 : index
    %c0_598 = arith.constant 0 : index
    %637 = vector.load %arg19[%c0_597, %c0_598] : memref<64x1xf32, #tpu.memory_space<vmem>>, vector<64x1xf32>
    %cst_599 = arith.constant dense<0.000000e+00> : vector<1x1xf32>
    %638 = tpu.matmul %636, %637, %cst_599 {dimension_numbers = #tpu.dot_dimension_numbers<[1], [0], [0], [1], [0, 0, 1, 1], [], []>} : vector<1x64xf32>, vector<64x1xf32>, vector<1x1xf32> -> vector<1x1xf32>
    %c0_600 = arith.constant 0 : index
    %c0_601 = arith.constant 0 : index
    %639 = vector.load %arg20[%c0_600, %c0_601] : memref<1x1xf32, #tpu.memory_space<vmem>>, vector<1x1xf32>
    %640 = arith.addf %638, %639 : vector<1x1xf32>
    %c0_602 = arith.constant 0 : index
    %c0_603 = arith.constant 0 : index
    %c0_604 = arith.constant 0 : index
    %641 = vector.load %arg21[%c0_602, %c0_603, %c0_604] : memref<1x1x1xf32, #tpu.memory_space<vmem>>, vector<1x1x1xf32>
    %642 = vector.shape_cast %641 : vector<1x1x1xf32> to vector<1x1xf32>
    %643 = vector.shape_cast %640 : vector<1x1xf32> to vector<1x1x1xf32>
    tpu.vector_store %arg21[%c0_602, %c0_603, %c0_604], %643 {strides = array<i32>} : memref<1x1x1xf32, #tpu.memory_space<vmem>>, vector<1x1x1xf32>,
    return
  }
  func.func @transform_0(%arg0: i32) -> (i32, i32, i32, i32) {
    %c0_i32 = arith.constant 0 : i32
    %c0_i32_0 = arith.constant 0 : i32
    %c0_i32_1 = arith.constant 0 : i32
    %c0_i32_2 = arith.constant 0 : i32
    return %arg0, %c0_i32, %c0_i32_0, %c0_i32_1 : i32, i32, i32, i32
  }
  func.func @transform_1(%arg0: i32) -> (i32, i32, i32) {
    %c0_i32 = arith.constant 0 : i32
    %c0_i32_0 = arith.constant 0 : i32
    %c0_i32_1 = arith.constant 0 : i32
    return %arg0, %c0_i32, %c0_i32_0 : i32, i32, i32
  }
  func.func @transform_2(%arg0: i32) -> (i32, i32, i32) {
    %c0_i32 = arith.constant 0 : i32
    %c0_i32_0 = arith.constant 0 : i32
    %c0_i32_1 = arith.constant 0 : i32
    %c0_i32_2 = arith.constant 0 : i32
    return %c0_i32, %c0_i32_0, %c0_i32_1 : i32, i32, i32
  }
  func.func @transform_3(%arg0: i32) -> (i32, i32, i32) {
    %c0_i32 = arith.constant 0 : i32
    %c0_i32_0 = arith.constant 0 : i32
    %c0_i32_1 = arith.constant 0 : i32
    %c0_i32_2 = arith.constant 0 : i32
    return %c0_i32, %c0_i32_0, %c0_i32_1 : i32, i32, i32
  }
  func.func @transform_4(%arg0: i32) -> (i32, i32, i32) {
    %c0_i32 = arith.constant 0 : i32
    %c0_i32_0 = arith.constant 0 : i32
    %c0_i32_1 = arith.constant 0 : i32
    %c0_i32_2 = arith.constant 0 : i32
    return %c0_i32, %c0_i32_0, %c0_i32_1 : i32, i32, i32
  }
  func.func @transform_5(%arg0: i32) -> (i32, i32) {
    %c0_i32 = arith.constant 0 : i32
    %c0_i32_0 = arith.constant 0 : i32
    %c0_i32_1 = arith.constant 0 : i32
    return %c0_i32, %c0_i32_0 : i32, i32
  }
  func.func @transform_6(%arg0: i32) -> (i32, i32) {
    %c0_i32 = arith.constant 0 : i32
    %c0_i32_0 = arith.constant 0 : i32
    %c0_i32_1 = arith.constant 0 : i32
    return %c0_i32, %c0_i32_0 : i32, i32
  }
  func.func @transform_7(%arg0: i32) -> (i32, i32, i32) {
    %c0_i32 = arith.constant 0 : i32
    %c0_i32_0 = arith.constant 0 : i32
    %c0_i32_1 = arith.constant 0 : i32
    %c0_i32_2 = arith.constant 0 : i32
    return %c0_i32, %c0_i32_0, %c0_i32_1 : i32, i32, i32
  }
  func.func @transform_8(%arg0: i32) -> (i32, i32) {
    %c0_i32 = arith.constant 0 : i32
    %c0_i32_0 = arith.constant 0 : i32
    %c0_i32_1 = arith.constant 0 : i32
    return %c0_i32, %c0_i32_0 : i32, i32
  }
  func.func @transform_9(%arg0: i32) -> (i32, i32, i32) {
    %c0_i32 = arith.constant 0 : i32
    %c0_i32_0 = arith.constant 0 : i32
    %c0_i32_1 = arith.constant 0 : i32
    %c0_i32_2 = arith.constant 0 : i32
    return %c0_i32, %c0_i32_0, %c0_i32_1 : i32, i32, i32
  }
  func.func @transform_10(%arg0: i32) -> (i32, i32) {
    %c0_i32 = arith.constant 0 : i32
    %c0_i32_0 = arith.constant 0 : i32
    %c0_i32_1 = arith.constant 0 : i32
    return %c0_i32, %c0_i32_0 : i32, i32
  }
  func.func @transform_11(%arg0: i32) -> (i32, i32, i32) {
    %c0_i32 = arith.constant 0 : i32
    %c0_i32_0 = arith.constant 0 : i32
    %c0_i32_1 = arith.constant 0 : i32
    %c0_i32_2 = arith.constant 0 : i32
    return %c0_i32, %c0_i32_0, %c0_i32_1 : i32, i32, i32
  }
  func.func @transform_12(%arg0: i32) -> (i32, i32) {
    %c0_i32 = arith.constant 0 : i32
    %c0_i32_0 = arith.constant 0 : i32
    %c0_i32_1 = arith.constant 0 : i32
    return %c0_i32, %c0_i32_0 : i32, i32
  }
  func.func @transform_13(%arg0: i32) -> (i32, i32, i32) {
    %c0_i32 = arith.constant 0 : i32
    %c0_i32_0 = arith.constant 0 : i32
    %c0_i32_1 = arith.constant 0 : i32
    %c0_i32_2 = arith.constant 0 : i32
    return %c0_i32, %c0_i32_0, %c0_i32_1 : i32, i32, i32
  }
  func.func @transform_14(%arg0: i32) -> (i32, i32) {
    %c0_i32 = arith.constant 0 : i32
    %c0_i32_0 = arith.constant 0 : i32
    %c0_i32_1 = arith.constant 0 : i32
    return %c0_i32, %c0_i32_0 : i32, i32
  }
  func.func @transform_15(%arg0: i32) -> (i32, i32) {
    %c0_i32 = arith.constant 0 : i32
    %c0_i32_0 = arith.constant 0 : i32
    %c0_i32_1 = arith.constant 0 : i32
    return %c0_i32, %c0_i32_0 : i32, i32
  }
  func.func @transform_16(%arg0: i32) -> (i32, i32) {
    %c0_i32 = arith.constant 0 : i32
    %c0_i32_0 = arith.constant 0 : i32
    %c0_i32_1 = arith.constant 0 : i32
    return %c0_i32, %c0_i32_0 : i32, i32
  }
  func.func @transform_17(%arg0: i32) -> (i32, i32) {
    %c0_i32 = arith.constant 0 : i32
    %c0_i32_0 = arith.constant 0 : i32
    %c0_i32_1 = arith.constant 0 : i32
    return %c0_i32, %c0_i32_0 : i32, i32
  }
  func.func @transform_18(%arg0: i32) -> (i32, i32) {
    %c0_i32 = arith.constant 0 : i32
    %c0_i32_0 = arith.constant 0 : i32
    %c0_i32_1 = arith.constant 0 : i32
    return %c0_i32, %c0_i32_0 : i32, i32
  }
  func.func @transform_19(%arg0: i32) -> (i32, i32) {
    %c0_i32 = arith.constant 0 : i32
    %c0_i32_0 = arith.constant 0 : i32
    %c0_i32_1 = arith.constant 0 : i32
    return %c0_i32, %c0_i32_0 : i32, i32
  }
  func.func @transform_20(%arg0: i32) -> (i32, i32, i32) {
    %c0_i32 = arith.constant 0 : i32
    %c0_i32_0 = arith.constant 0 : i32
    %c0_i32_1 = arith.constant 0 : i32
    return %arg0, %c0_i32, %c0_i32_0 : i32, i32, i32
  }
}

</mosaic_0001>

<bundles_post_ra>
// kernel: critic_forward.1
= control target key start
LH: loop header
LB: loop body
LE: loop exit
PB: predicated region body
PF: predicated region fallthrough
CT: control target
= control target key end

     0   :  { %s21913_s23 = smov 0   ;;  %s25960_s0 = inlined_call_operand.vmem [shape: f32[2,42,82,8], index: 0, kind: input, shape index: {}]   ;;  %s25961_s1 = inlined_call_operand.vmem [shape: f32[2,1,2], index: 1, kind: input, shape index: {}]   ;;  %s25962_s2 = inlined_call_operand.vmem [shape: f32[3,40,82], index: 2, kind: input, shape index: {}]   ;;  %s25963_s3 = inlined_call_operand.vmem [shape: f32[3,20,42], index: 3, kind: input, shape index: {}]   ;;  %s25964_s4 = inlined_call_operand.vmem [shape: f32[3,10,22], index: 4, kind: input, shape index: {}]   ;;  %s25965_s5 = inlined_call_operand.vmem [shape: f32[42,40], index: 5, kind: input, shape index: {}]   ;;  %s25966_s6 = inlined_call_operand.vmem [shape: f32[22,20], index: 6, kind: input, shape index: {}]   ;;  %s25967_s7 = inlined_call_operand.vmem [shape: f32[9,8,16], index: 7, kind: input, shape index: {}]   ;;  %s25968_s8 = inlined_call_operand.vmem [shape: f32[1,16], index: 8, kind: input, shape index: {}]   ;;  %s25969_s9 = inlined_call_operand.vmem [shape: f32[9,16,32], index: 9, kind: input, shape index: {}]   ;;  %s25970_s10 = inlined_call_operand.vmem [shape: f32[1,32], index: 10, kind: input, shape index: {}]   ;;  %s25971_s11 = inlined_call_operand.vmem [shape: f32[9,32,64], index: 11, kind: input, shape index: {}]   ;;  %s25972_s12 = inlined_call_operand.vmem [shape: f32[1,64], index: 12, kind: input, shape index: {}]   ;;  %s25973_s13 = inlined_call_operand.vmem [shape: f32[50,64,64], index: 13, kind: input, shape index: {}]   ;;  %s25974_s14 = inlined_call_operand.vmem [shape: f32[2,64], index: 14, kind: input, shape index: {}]   ;;  %s25975_s15 = inlined_call_operand.vmem [shape: f32[1,64], index: 15, kind: input, shape index: {}]   ;;  %s25976_s16 = inlined_call_operand.vmem [shape: f32[64,64], index: 16, kind: input, shape index: {}]   ;;  %s25977_s17 = inlined_call_operand.vmem [shape: f32[1,64], index: 17, kind: input, shape index: {}]   ;;  %s25978_s18 = inlined_call_operand.vmem [shape: f32[64,1], index: 18, kind: input, shape index: {}]   ;;  %s25979_s19 = inlined_call_operand.<no memory space> [shape: f32[1,1], index: 19, kind: input, shape index: {}]   ;;  %s25980_s20 = inlined_call_operand.vmem [shape: f32[2,1,1], index: 20, kind: output, shape index: {}]  }
   0x1   :  { %25984 = sst [smem:[#allocation5_spill]] %s25960_s0  ;;  %v25_v0 = vstv %s25979_s19 }
   0x2   :  { %25985 = sst [smem:[#allocation6_spill]] %s25961_s1  ;;  %26 = vst [vmem:[#allocation4] sm:$0x1] %v25_v0 }
   0x3   :  { %25986 = sst [smem:[#allocation7_spill]] %s25962_s2 }
   0x4   :  { %25987 = sst [smem:[#allocation8_spill]] %s25963_s3 }
   0x5   :  { %25988 = sst [smem:[#allocation9_spill]] %s25964_s4 }
   0x6 LB: > { %s15439_s24 = sadd.s32 4294967295, %s21785_s23   ;;  %p15443_p0 = scmp.ge.s32.totalorder %s21785_s23, 1  ;;  %s21785_s23 = sphi %s21913_s23, %s32_s23  }
   0x7   : > { %p572_p1 = scmp.lt.s32.totalorder %s21785_s23, 3 }
   0x9   : > { %p573_p2 = pnand %p15443_p0, %p572_p1 }
   0xa   : > { %p21923_p3 = scmp.lt.s32.totalorder (!%p573_p2), %s15439_s24, 1  ;;  %vm642_vm0 = vcmask (!%p573_p2), 130048   ;;  %vm648_vm1 = vcmask (!%p573_p2), 123904   ;;  %vm776_vm2 = vcmask (!%p573_p2), 261120   ;;  %v21795_v1 = vmov (!%p573_p2), 0.0   ;;  %s25991_s21 = sld [smem:[#allocation5_spill]] (!%p573_p2) }
   0xb   : > { %576 = sbr.rel (%p573_p2) target bundleno = 7016 (0x1b68), region = 100  ;;  %643 = vst.msk [vmem:[#allocation2] sm:$0xff] (!%p573_p2), %vm642_vm0, %v21795_v1  ;;  %644 = vst.msk [vmem:[#allocation2 + $0x8] sm:$0xff] (!%p573_p2), %vm642_vm0, %v21795_v1  ;;  %vm779_vm3 = vcmask (!%p573_p2), 259072   ;;  %s22277_s22 = smov (!%p573_p2), 0  }
   0xc   : > { %645 = vst.msk [vmem:[#allocation2 + $0x10] sm:$0xff] (!%p573_p2), %vm642_vm0, %v21795_v1  ;;  %646 = vst.msk [vmem:[#allocation2 + $0x18] sm:$0xff] (!%p573_p2), %vm642_vm0, %v21795_v1 }
   0xd   : > { %647 = vst.msk [vmem:[#allocation2 + $0x20] sm:$0xff] (!%p573_p2), %vm642_vm0, %v21795_v1  ;;  %650 = vst.msk [vmem:[#allocation2 + $0x30] sm:$0xff] (!%p573_p2), %vm642_vm0, %v21795_v1 }
   0xe   : > { %651 = vst.msk [vmem:[#allocation2 + $0x38] sm:$0xff] (!%p573_p2), %vm642_vm0, %v21795_v1  ;;  %652 = vst.msk [vmem:[#allocation2 + $0x40] sm:$0xff] (!%p573_p2), %vm642_vm0, %v21795_v1 }
   0xf   : > { %653 = vst.msk [vmem:[#allocation2 + $0x48] sm:$0xff] (!%p573_p2), %vm642_vm0, %v21795_v1  ;;  %654 = vst.msk [vmem:[#allocation2 + $0x50] sm:$0xff] (!%p573_p2), %vm642_vm0, %v21795_v1 }
  0x10   : > { %656 = vst.msk [vmem:[#allocation2 + $0x60] sm:$0xff] (!%p573_p2), %vm642_vm0, %v21795_v1  ;;  %657 = vst.msk [vmem:[#allocation2 + $0x68] sm:$0xff] (!%p573_p2), %vm642_vm0, %v21795_v1 }
  0x11   : > { %658 = vst.msk [vmem:[#allocation2 + $0x70] sm:$0xff] (!%p573_p2), %vm642_vm0, %v21795_v1  ;;  %659 = vst.msk [vmem:[#allocation2 + $0x78] sm:$0xff] (!%p573_p2), %vm642_vm0, %v21795_v1 }
  0x12   : > { %660 = vst.msk [vmem:[#allocation2 + $0x80] sm:$0xff] %vm642_vm0, %v21795_v1  ;;  %662 = vst.msk [vmem:[#allocation2 + $0x90] sm:$0xff] %vm642_vm0, %v21795_v1  ;;  %s26001_s24 = smov (!%p21923_p3, %s15439_s24), 1 }
  0x13   : > { %663 = vst.msk [vmem:[#allocation2 + $0x98] sm:$0xff] %vm642_vm0, %v21795_v1  ;;  %664 = vst.msk [vmem:[#allocation2 + $0xa0] sm:$0xff] %vm642_vm0, %v21795_v1  ;;  %s21722_s2 = smul.u32 3696, %s26001_s24 }
  0x14   : > { %665 = vst.msk [vmem:[#allocation2 + $0xa8] sm:$0xff] %vm642_vm0, %v21795_v1  ;;  %666 = vst.msk [vmem:[#allocation2 + $0xb0] sm:$0xff] %vm642_vm0, %v21795_v1 }
  0x15   : > { %668 = vst.msk [vmem:[#allocation2 + $0xc0] sm:$0xff] %vm642_vm0, %v21795_v1  ;;  %669 = vst.msk [vmem:[#allocation2 + $0xc8] sm:$0xff] %vm642_vm0, %v21795_v1  ;;  %s22275_s1 = scalar_lea.vmem %s25991_s21, %s21722_s2 }
  0x16   : > { %670 = vst.msk [vmem:[#allocation2 + $0xd0] sm:$0xff] %vm642_vm0, %v21795_v1  ;;  %671 = vst.msk [vmem:[#allocation2 + $0xd8] sm:$0xff] %vm642_vm0, %v21795_v1 }
  0x17   : > { %672 = vst.msk [vmem:[#allocation2 + $0xe0] sm:$0xff] %vm642_vm0, %v21795_v1  ;;  %674 = vst.msk [vmem:[#allocation2 + $0xf0] sm:$0xff] %vm642_vm0, %v21795_v1 }
  0x18   : > { %675 = vst.msk [vmem:[#allocation2 + $0xf8] sm:$0xff] %vm642_vm0, %v21795_v1  ;;  %676 = vst.msk [vmem:[#allocation2 + $0x100] sm:$0xff] %vm642_vm0, %v21795_v1 }
  0x19   : > { %677 = vst.msk [vmem:[#allocation2 + $0x108] sm:$0xff] %vm642_vm0, %v21795_v1  ;;  %678 = vst.msk [vmem:[#allocation2 + $0x110] sm:$0xff] %vm642_vm0, %v21795_v1 }
  0x1a   : > { %680 = vst.msk [vmem:[#allocation2 + $0x120] sm:$0xff] %vm642_vm0, %v21795_v1  ;;  %681 = vst.msk [vmem:[#allocation2 + $0x128] sm:$0xff] %vm642_vm0, %v21795_v1 }
  0x1b   : > { %682 = vst.msk [vmem:[#allocation2 + $0x130] sm:$0xff] %vm642_vm0, %v21795_v1  ;;  %683 = vst.msk [vmem:[#allocation2 + $0x138] sm:$0xff] %vm642_vm0, %v21795_v1 }
  0x1c   : > { %684 = vst.msk [vmem:[#allocation2 + $0x140] sm:$0xff] %vm642_vm0, %v21795_v1  ;;  %686 = vst.msk [vmem:[#allocation2 + $0x150] sm:$0xff] %vm642_vm0, %v21795_v1 }
  0x1d   : > { %687 = vst.msk [vmem:[#allocation2 + $0x158] sm:$0xff] %vm642_vm0, %v21795_v1  ;;  %688 = vst.msk [vmem:[#allocation2 + $0x160] sm:$0xff] %vm642_vm0, %v21795_v1 }
  0x1e   : > { %689 = vst.msk [vmem:[#allocation2 + $0x168] sm:$0xff] %vm642_vm0, %v21795_v1  ;;  %690 = vst.msk [vmem:[#allocation2 + $0x170] sm:$0xff] %vm642_vm0, %v21795_v1 }
  0x1f   : > { %692 = vst.msk [vmem:[#allocation2 + $0x180] sm:$0xff] %vm642_vm0, %v21795_v1  ;;  %693 = vst.msk [vmem:[#allocation2 + $0x188] sm:$0xff] %vm642_vm0, %v21795_v1 }
  0x20   : > { %694 = vst.msk [vmem:[#allocation2 + $0x190] sm:$0xff] %vm642_vm0, %v21795_v1  ;;  %695 = vst.msk [vmem:[#allocation2 + $0x198] sm:$0xff] %vm642_vm0, %v21795_v1 }
  0x21   : > { %696 = vst.msk [vmem:[#allocation2 + $0x1a0] sm:$0xff] %vm642_vm0, %v21795_v1  ;;  %698 = vst.msk [vmem:[#allocation2 + $0x1b0] sm:$0xff] %vm642_vm0, %v21795_v1 }
  0x22   : > { %699 = vst.msk [vmem:[#allocation2 + $0x1b8] sm:$0xff] %vm642_vm0, %v21795_v1  ;;  %700 = vst.msk [vmem:[#allocation2 + $0x1c0] sm:$0xff] %vm642_vm0, %v21795_v1 }
  0x23   : > { %701 = vst.msk [vmem:[#allocation2 + $0x1c8] sm:$0xff] %vm642_vm0, %v21795_v1  ;;  %702 = vst.msk [vmem:[#allocation2 + $0x1d0] sm:$0xff] %vm642_vm0, %v21795_v1 }
  0x24   : > { %704 = vst.msk [vmem:[#allocation2 + $0x1e0] sm:$0xff] %vm642_vm0, %v21795_v1  ;;  %705 = vst.msk [vmem:[#allocation2 + $0x1e8] sm:$0xff] %vm642_vm0, %v21795_v1 }
  0x25   : > { %706 = vst.msk [vmem:[#allocation2 + $0x1f0] sm:$0xff] %vm642_vm0, %v21795_v1  ;;  %707 = vst.msk [vmem:[#allocation2 + $0x1f8] sm:$0xff] %vm642_vm0, %v21795_v1 }
  0x26   : > { %708 = vst.msk [vmem:[#allocation2 + $0x200] sm:$0xff] %vm642_vm0, %v21795_v1  ;;  %710 = vst.msk [vmem:[#allocation2 + $0x210] sm:$0xff] %vm642_vm0, %v21795_v1 }
  0x27   : > { %711 = vst.msk [vmem:[#allocation2 + $0x218] sm:$0xff] %vm642_vm0, %v21795_v1  ;;  %712 = vst.msk [vmem:[#allocation2 + $0x220] sm:$0xff] %vm642_vm0, %v21795_v1 }
  0x28   : > { %713 = vst.msk [vmem:[#allocation2 + $0x228] sm:$0xff] %vm642_vm0, %v21795_v1  ;;  %714 = vst.msk [vmem:[#allocation2 + $0x230] sm:$0xff] %vm642_vm0, %v21795_v1 }
  0x29   : > { %716 = vst.msk [vmem:[#allocation2 + $0x240] sm:$0xff] %vm642_vm0, %v21795_v1  ;;  %717 = vst.msk [vmem:[#allocation2 + $0x248] sm:$0xff] %vm642_vm0, %v21795_v1 }
  0x2a   : > { %718 = vst.msk [vmem:[#allocation2 + $0x250] sm:$0xff] %vm642_vm0, %v21795_v1  ;;  %719 = vst.msk [vmem:[#allocation2 + $0x258] sm:$0xff] %vm642_vm0, %v21795_v1 }
  0x2b   : > { %720 = vst.msk [vmem:[#allocation2 + $0x260] sm:$0xff] %vm642_vm0, %v21795_v1  ;;  %722 = vst.msk [vmem:[#allocation2 + $0x270] sm:$0xff] %vm642_vm0, %v21795_v1 }
  0x2c   : > { %723 = vst.msk [vmem:[#allocation2 + $0x278] sm:$0xff] %vm642_vm0, %v21795_v1  ;;  %724 = vst.msk [vmem:[#allocation2 + $0x280] sm:$0xff] %vm642_vm0, %v21795_v1 }
  0x2d   : > { %725 = vst.msk [vmem:[#allocation2 + $0x288] sm:$0xff] %vm642_vm0, %v21795_v1  ;;  %726 = vst.msk [vmem:[#allocation2 + $0x290] sm:$0xff] %vm642_vm0, %v21795_v1 }
  0x2e   : > { %728 = vst.msk [vmem:[#allocation2 + $0x2a0] sm:$0xff] %vm642_vm0, %v21795_v1  ;;  %729 = vst.msk [vmem:[#allocation2 + $0x2a8] sm:$0xff] %vm642_vm0, %v21795_v1 }
  0x2f   : > { %730 = vst.msk [vmem:[#allocation2 + $0x2b0] sm:$0xff] %vm642_vm0, %v21795_v1  ;;  %731 = vst.msk [vmem:[#allocation2 + $0x2b8] sm:$0xff] %vm642_vm0, %v21795_v1 }
  0x30   : > { %732 = vst.msk [vmem:[#allocation2 + $0x2c0] sm:$0xff] %vm642_vm0, %v21795_v1  ;;  %734 = vst.msk [vmem:[#allocation2 + $0x2d0] sm:$0xff] %vm642_vm0, %v21795_v1 }
  0x31   : > { %735 = vst.msk [vmem:[#allocation2 + $0x2d8] sm:$0xff] %vm642_vm0, %v21795_v1  ;;  %736 = vst.msk [vmem:[#allocation2 + $0x2e0] sm:$0xff] %vm642_vm0, %v21795_v1 }
  0x32   : > { %737 = vst.msk [vmem:[#allocation2 + $0x2e8] sm:$0xff] %vm642_vm0, %v21795_v1  ;;  %738 = vst.msk [vmem:[#allocation2 + $0x2f0] sm:$0xff] %vm642_vm0, %v21795_v1 }
  0x33   : > { %740 = vst.msk [vmem:[#allocation2 + $0x300] sm:$0xff] %vm642_vm0, %v21795_v1  ;;  %741 = vst.msk [vmem:[#allocation2 + $0x308] sm:$0xff] %vm642_vm0, %v21795_v1 }
  0x34   : > { %742 = vst.msk [vmem:[#allocation2 + $0x310] sm:$0xff] %vm642_vm0, %v21795_v1  ;;  %743 = vst.msk [vmem:[#allocation2 + $0x318] sm:$0xff] %vm642_vm0, %v21795_v1 }
  0x35   : > { %744 = vst.msk [vmem:[#allocation2 + $0x320] sm:$0xff] %vm642_vm0, %v21795_v1  ;;  %746 = vst.msk [vmem:[#allocation2 + $0x330] sm:$0xff] %vm642_vm0, %v21795_v1 }
  0x36   : > { %747 = vst.msk [vmem:[#allocation2 + $0x338] sm:$0xff] %vm642_vm0, %v21795_v1  ;;  %748 = vst.msk [vmem:[#allocation2 + $0x340] sm:$0xff] %vm642_vm0, %v21795_v1 }
  0x37   : > { %749 = vst.msk [vmem:[#allocation2 + $0x348] sm:$0xff] %vm642_vm0, %v21795_v1  ;;  %750 = vst.msk [vmem:[#allocation2 + $0x350] sm:$0xff] %vm642_vm0, %v21795_v1 }
  0x38   : > { %752 = vst.msk [vmem:[#allocation2 + $0x360] sm:$0xff] %vm642_vm0, %v21795_v1  ;;  %753 = vst.msk [vmem:[#allocation2 + $0x368] sm:$0xff] %vm642_vm0, %v21795_v1 }
  0x39   : > { %754 = vst.msk [vmem:[#allocation2 + $0x370] sm:$0xff] %vm642_vm0, %v21795_v1  ;;  %755 = vst.msk [vmem:[#allocation2 + $0x378] sm:$0xff] %vm642_vm0, %v21795_v1 }
  0x3a   : > { %756 = vst.msk [vmem:[#allocation2 + $0x380] sm:$0xff] %vm642_vm0, %v21795_v1  ;;  %758 = vst.msk [vmem:[#allocation2 + $0x390] sm:$0xff] %vm642_vm0, %v21795_v1 }
  0x3b   : > { %759 = vst.msk [vmem:[#allocation2 + $0x398] sm:$0xff] %vm642_vm0, %v21795_v1  ;;  %760 = vst.msk [vmem:[#allocation2 + $0x3a0] sm:$0xff] %vm642_vm0, %v21795_v1 }
  0x3c   : > { %761 = vst.msk [vmem:[#allocation2 + $0x3a8] sm:$0xff] %vm642_vm0, %v21795_v1  ;;  %762 = vst.msk [vmem:[#allocation2 + $0x3b0] sm:$0xff] %vm642_vm0, %v21795_v1 }
  0x3d   : > { %764 = vst.msk [vmem:[#allocation2 + $0x3c0] sm:$0xff] %vm642_vm0, %v21795_v1  ;;  %765 = vst.msk [vmem:[#allocation2 + $0x3c8] sm:$0xff] %vm642_vm0, %v21795_v1 }
  0x3e   : > { %766 = vst.msk [vmem:[#allocation2 + $0x3d0] sm:$0xff] %vm642_vm0, %v21795_v1  ;;  %767 = vst.msk [vmem:[#allocation2 + $0x3d8] sm:$0xff] %vm642_vm0, %v21795_v1 }
  0x3f   : > { %768 = vst.msk [vmem:[#allocation2 + $0x3e0] sm:$0xff] %vm642_vm0, %v21795_v1  ;;  %770 = vst.msk [vmem:[#allocation2 + $0x3f0] sm:$0xff] %vm642_vm0, %v21795_v1 }
  0x40   : > { %771 = vst.msk [vmem:[#allocation2 + $0x3f8] sm:$0xff] %vm642_vm0, %v21795_v1  ;;  %772 = vst.msk [vmem:[#allocation2 + $0x400] sm:$0xff] %vm642_vm0, %v21795_v1 }
  0x41   : > { %773 = vst.msk [vmem:[#allocation2 + $0x408] sm:$0xff] %vm642_vm0, %v21795_v1  ;;  %774 = vst.msk [vmem:[#allocation2 + $0x410] sm:$0xff] %vm642_vm0, %v21795_v1 }
  0x42   : > { %649 = vst.msk [vmem:[#allocation2 + $0x28] sm:$0x3] %vm648_vm1, %v21795_v1  ;;  %655 = vst.msk [vmem:[#allocation2 + $0x58] sm:$0x3] %vm648_vm1, %v21795_v1 }
  0x43   : > { %661 = vst.msk [vmem:[#allocation2 + $0x88] sm:$0x3] %vm648_vm1, %v21795_v1  ;;  %667 = vst.msk [vmem:[#allocation2 + $0xb8] sm:$0x3] %vm648_vm1, %v21795_v1 }
  0x44   : > { %673 = vst.msk [vmem:[#allocation2 + $0xe8] sm:$0x3] %vm648_vm1, %v21795_v1  ;;  %679 = vst.msk [vmem:[#allocation2 + $0x118] sm:$0x3] %vm648_vm1, %v21795_v1 }
  0x45   : > { %685 = vst.msk [vmem:[#allocation2 + $0x148] sm:$0x3] %vm648_vm1, %v21795_v1  ;;  %691 = vst.msk [vmem:[#allocation2 + $0x178] sm:$0x3] %vm648_vm1, %v21795_v1 }
  0x46   : > { %697 = vst.msk [vmem:[#allocation2 + $0x1a8] sm:$0x3] %vm648_vm1, %v21795_v1  ;;  %703 = vst.msk [vmem:[#allocation2 + $0x1d8] sm:$0x3] %vm648_vm1, %v21795_v1 }
  0x47   : > { %709 = vst.msk [vmem:[#allocation2 + $0x208] sm:$0x3] %vm648_vm1, %v21795_v1  ;;  %715 = vst.msk [vmem:[#allocation2 + $0x238] sm:$0x3] %vm648_vm1, %v21795_v1 }
  0x48   : > { %721 = vst.msk [vmem:[#allocation2 + $0x268] sm:$0x3] %vm648_vm1, %v21795_v1  ;;  %727 = vst.msk [vmem:[#allocation2 + $0x298] sm:$0x3] %vm648_vm1, %v21795_v1 }
  0x49   : > { %733 = vst.msk [vmem:[#allocation2 + $0x2c8] sm:$0x3] %vm648_vm1, %v21795_v1  ;;  %739 = vst.msk [vmem:[#allocation2 + $0x2f8] sm:$0x3] %vm648_vm1, %v21795_v1 }
  0x4a   : > { %745 = vst.msk [vmem:[#allocation2 + $0x328] sm:$0x3] %vm648_vm1, %v21795_v1  ;;  %751 = vst.msk [vmem:[#allocation2 + $0x358] sm:$0x3] %vm648_vm1, %v21795_v1 }
  0x4b   : > { %757 = vst.msk [vmem:[#allocation2 + $0x388] sm:$0x3] %vm648_vm1, %v21795_v1  ;;  %763 = vst.msk [vmem:[#allocation2 + $0x3b8] sm:$0x3] %vm648_vm1, %v21795_v1 }
  0x4c   : > { %769 = vst.msk [vmem:[#allocation2 + $0x3e8] sm:$0x3] %vm648_vm1, %v21795_v1  ;;  %775 = vst.msk [vmem:[#allocation2 + $0x418] sm:$0x3] %vm648_vm1, %v21795_v1 }
  0x4d   : > { %777 = vst.msk [vmem:[#allocation3] sm:$0xff] %vm776_vm2, %v21795_v1  ;;  %778 = vst.msk [vmem:[#allocation3 + $0x8] sm:$0xff] %vm776_vm2, %v21795_v1 }
  0x4e   : > { %781 = vst.msk [vmem:[#allocation3 + $0x18] sm:$0xff] %vm776_vm2, %v21795_v1  ;;  %782 = vst.msk [vmem:[#allocation3 + $0x20] sm:$0xff] %vm776_vm2, %v21795_v1 }
  0x4f   : > { %784 = vst.msk [vmem:[#allocation3 + $0x30] sm:$0xff] %vm776_vm2, %v21795_v1  ;;  %785 = vst.msk [vmem:[#allocation3 + $0x38] sm:$0xff] %vm776_vm2, %v21795_v1 }
  0x50   : > { %787 = vst.msk [vmem:[#allocation3 + $0x48] sm:$0xff] %vm776_vm2, %v21795_v1  ;;  %788 = vst.msk [vmem:[#allocation3 + $0x50] sm:$0xff] %vm776_vm2, %v21795_v1 }
  0x51   : > { %790 = vst.msk [vmem:[#allocation3 + $0x60] sm:$0xff] %vm776_vm2, %v21795_v1  ;;  %791 = vst.msk [vmem:[#allocation3 + $0x68] sm:$0xff] %vm776_vm2, %v21795_v1 }
  0x52   : > { %793 = vst.msk [vmem:[#allocation3 + $0x78] sm:$0xff] %vm776_vm2, %v21795_v1  ;;  %794 = vst.msk [vmem:[#allocation3 + $0x80] sm:$0xff] %vm776_vm2, %v21795_v1 }
  0x53   : > { %796 = vst.msk [vmem:[#allocation3 + $0x90] sm:$0xff] %vm776_vm2, %v21795_v1  ;;  %797 = vst.msk [vmem:[#allocation3 + $0x98] sm:$0xff] %vm776_vm2, %v21795_v1 }
  0x54   : > { %799 = vst.msk [vmem:[#allocation3 + $0xa8] sm:$0xff] %vm776_vm2, %v21795_v1  ;;  %800 = vst.msk [vmem:[#allocation3 + $0xb0] sm:$0xff] %vm776_vm2, %v21795_v1 }
  0x55   : > { %802 = vst.msk [vmem:[#allocation3 + $0xc0] sm:$0xff] %vm776_vm2, %v21795_v1  ;;  %803 = vst.msk [vmem:[#allocation3 + $0xc8] sm:$0xff] %vm776_vm2, %v21795_v1 }
  0x56   : > { %805 = vst.msk [vmem:[#allocation3 + $0xd8] sm:$0xff] %vm776_vm2, %v21795_v1  ;;  %806 = vst.msk [vmem:[#allocation3 + $0xe0] sm:$0xff] %vm776_vm2, %v21795_v1 }
  0x57   : > { %808 = vst.msk [vmem:[#allocation3 + $0xf0] sm:$0xff] %vm776_vm2, %v21795_v1  ;;  %809 = vst.msk [vmem:[#allocation3 + $0xf8] sm:$0xff] %vm776_vm2, %v21795_v1 }
  0x58   : > { %780 = vst.msk [vmem:[#allocation3 + $0x10] sm:$0x3f] %vm779_vm3, %v21795_v1  ;;  %783 = vst.msk [vmem:[#allocation3 + $0x28] sm:$0x3f] %vm779_vm3, %v21795_v1 }
  0x59   : > { %786 = vst.msk [vmem:[#allocation3 + $0x40] sm:$0x3f] %vm779_vm3, %v21795_v1  ;;  %789 = vst.msk [vmem:[#allocation3 + $0x58] sm:$0x3f] %vm779_vm3, %v21795_v1 }
  0x5a   : > { %792 = vst.msk [vmem:[#allocation3 + $0x70] sm:$0x3f] %vm779_vm3, %v21795_v1  ;;  %795 = vst.msk [vmem:[#allocation3 + $0x88] sm:$0x3f] %vm779_vm3, %v21795_v1 }
  0x5b   : > { %798 = vst.msk [vmem:[#allocation3 + $0xa0] sm:$0x3f] %vm779_vm3, %v21795_v1  ;;  %801 = vst.msk [vmem:[#allocation3 + $0xb8] sm:$0x3f] %vm779_vm3, %v21795_v1 }
  0x5c   : > { %804 = vst.msk [vmem:[#allocation3 + $0xd0] sm:$0x3f] %vm779_vm3, %v21795_v1  ;;  %807 = vst.msk [vmem:[#allocation3 + $0xe8] sm:$0x3f] %vm779_vm3, %v21795_v1 }
  0x5d   : > { %810 = vst.msk [vmem:[#allocation3 + $0x100] sm:$0x3f] %vm779_vm3, %v21795_v1 }
  0x5e LB: >> { %v21796_v2 = vmov 0.0|0.0   ;;  %vm21797_vm4 = vmmov 0   ;;  %v21798_v3 = vmov 0.0   ;;  %s15446_s19 = smul.u32 176, %s21789_s22  ;;  %vm855_vm5 = vcmask 1041408   ;;  %s25992_s26 = sld [smem:[#allocation7_spill]]  ;;  %s21789_s22 = sphi %s22277_s22, %s819_s22  }
  0x5f   : >> { %20245 = vmatprep.subr.bf16.mxu0 %v21796_v2  ;;  %17656 = vmatprep.mubr.msk.f32.mxu0 %vm21797_vm4, %v21798_v3  ;;  %vm839_vm6 = vcmask 670720   ;;  %v949_v30 = vld [vmem:[%s25967_s7] sm:$0xff]  ;;  %v15464_v31 = vld [vmem:[%s25967_s7 + $0x8] sm:$0xff]  ;;  %vm1063_vm7 = vcmask 64512   ;;  %v15486_v57 = vld [vmem:[%s25967_s7 + $0x10] sm:$0xff]  ;;  %vm2766_vm8 = vcmask 326656  }
  0x60   : >> { %21624 = vmatprep.subr.bf16.mxu1 %v21796_v2  ;;  %17696 = vmatprep.mubr.msk.f32.mxu1 %vm21797_vm4, %v21798_v3  ;;  %s22290_s2 = scalar_lea.vmem %s22275_s1, %s15446_s19  ;;  %s15385_s4 = smul.u32 48, %s21789_s22 }
  0x61   : >> { %v823_v4 = vld [vmem:[%s22290_s2] sm:$0xff]  ;;  %v824_v5 = vld [vmem:[%s22290_s2 + $0x8] sm:$0xff]  ;;  %v825_v6 = vld [vmem:[%s22290_s2 + $0x10] sm:$0xff]  ;;  %s819_s22 = sadd.s32 1, %s21789_s22  }
  0x62   : >> { %v22295_v7 = vpack.c.bf16 %v824_v5, %v823_v4  ;;  %v826_v8 = vld [vmem:[%s22290_s2 + $0x18] sm:$0xff]  ;;  %v827_v10 = vld [vmem:[%s22290_s2 + $0x20] sm:$0xff]  ;;  %v828_v11 = vld [vmem:[%s22290_s2 + $0x28] sm:$0xff]  ;;  %s15386_s30 = scalar_lea.vmem [#allocation2], %s15385_s4  ;;  %p816_p4 = scmp.ge.s32.totalorder %s819_s22, 20  }
  0x63   : >> { %v22299_v9 = vpack.c.bf16 %v826_v8, %v825_v6  ;;  %v22307_v12 = vpack.c.bf16 %v828_v11, %v827_v10  ;;  %v829_v13 = vld [vmem:[%s22290_s2 + $0x30] sm:$0xff]  ;;  %v830_v14 = vld [vmem:[%s22290_s2 + $0x38] sm:$0xff]  ;;  %v831_v16 = vld [vmem:[%s22290_s2 + $0x40] sm:$0xff]  ;;  %s22978_s0 = smov (%p816_p4), 0  }
  0x64   : >> { %20247 = vmatpush3.bf16.msra.mxu0 %v22295_v7  ;;  %21630 = vmatpush3.bf16.msra.mxu1 %v22295_v7  ;;  %v22315_v15 = vpack.c.bf16 %v830_v14, %v829_v13  ;;  %v832_v17 = vld [vmem:[%s22290_s2 + $0x48] sm:$0xff]  ;;  %v22332_v19 = vld [vmem:[%s22290_s2 + $0x50] sm:$0x3]  ;;  %v22338_v20 = vld [vmem:[%s25992_s26] sm:$0xff] }
  0x65   : >> { %20248 = vmatprep.subr.bf16.mxu0 %v21796_v2  ;;  %21625 = vmatprep.subr.bf16.mxu1 %v21796_v2  ;;  %v22323_v18 = vpack.c.bf16 %v832_v17, %v831_v16  ;;  %v22347_v21 = vld [vmem:[%s25992_s26 + $0x30] sm:$0xff]  ;;  %v22358_v22 = vld [vmem:[%s25992_s26 + $0x8] sm:$0xff]  ;;  %v22368_v23 = vld [vmem:[%s25992_s26 + $0x38] sm:$0xff] }
  0x66   : >> { %v22379_v24 = vld [vmem:[%s25992_s26 + $0x10] sm:$0xff]  ;;  %v22389_v25 = vld [vmem:[%s25992_s26 + $0x40] sm:$0xff]  ;;  %v22399_v26 = vld [vmem:[%s25992_s26 + $0x18] sm:$0xff] }
  0x67   : >> { %v22409_v27 = vld [vmem:[%s25992_s26 + $0x48] sm:$0xff]  ;;  %v22419_v28 = vld [vmem:[%s25992_s26 + $0x20] sm:$0xff]  ;;  %v22495_v52 = vld [vmem:[%s25992_s26 + $0x50] sm:$0xff] }
  0x68   : >> { %20250 = vmatpush3.bf16.msra.mxu0 %v22299_v9  ;;  %21631 = vmatpush3.bf16.msra.mxu1 %v22299_v9  ;;  %v22435_v29 = vld [vmem:[%s25992_s26 + $0x28] sm:$0xff]  ;;  %v22507_v53 = vld [vmem:[%s25992_s26 + $0x58] sm:$0xff]  ;;  %v22516_v54 = vld [vmem:[%s25992_s26 + $0x60] sm:$0xff] }
  0x69   : >> { %20251 = vmatprep.subr.bf16.mxu0 %v21796_v2  ;;  %21626 = vmatprep.subr.bf16.mxu1 %v21796_v2  ;;  %v22525_v55 = vld [vmem:[%s25992_s26 + $0x68] sm:$0xff]  ;;  %v22534_v56 = vld [vmem:[%s25992_s26 + $0x70] sm:$0xff] }
  0x6c   : >> { %20253 = vmatpush3.bf16.msra.mxu0 %v22307_v12  ;;  %21632 = vmatpush3.bf16.msra.mxu1 %v22307_v12 }
  0x6d   : >> { %20254 = vmatprep.subr.bf16.mxu0 %v21796_v2  ;;  %21627 = vmatprep.subr.bf16.mxu1 %v21796_v2 }
  0x70   : >> { %20256 = vmatpush3.bf16.msra.mxu0 %v22315_v15  ;;  %21633 = vmatpush3.bf16.msra.mxu1 %v22315_v15 }
  0x71   : >> { %20257 = vmatprep.subr.bf16.mxu0 %v21796_v2  ;;  %21628 = vmatprep.subr.bf16.mxu1 %v21796_v2 }
  0x74   : >> { %20259 = vmatpush3.bf16.msra.mxu0 %v22323_v18  ;;  %21634 = vmatpush3.bf16.msra.mxu1 %v22323_v18 }
  0x75   : >> { %17654 = vmatprep.subr.mxu0 %v21798_v3  ;;  %21629 = vmatprep.subr.mxu1 %v21798_v3 }
  0x78   : >> { %17655 = vmatpush3.msk.msra.mxu0 %vm855_vm5, %v22332_v19  ;;  %21635 = vmatpush3.msk.msra.mxu1 %vm855_vm5, %v22332_v19 }
  0x79   : >> { %17657 = vmatmul.mubr.msk.f32.vlgmr.msra.gmra.mrb[0].mxu0 %vm839_vm6, %v22338_v20  ;;  %20260 = vmatprep.subr.bf16.mxu0 %v21796_v2 }
  0x7a   : >> { %20262 = vmatpush3.bf16.msra.mxu0 %v22295_v7  ;;  %17659 = vmatprep.mubr.msk.f32.mxu0 %vm21797_vm4, %v21798_v3 }
  0x7b   : >> { %20263 = vmatprep.subr.bf16.mxu0 %v21796_v2  ;;  %17697 = vmatmul.mubr.msk.f32.vlgmr.msra.gmra.mrb[0].mxu1 %vm839_vm6, %v22347_v21 }
  0x7c   : >> { %17699 = vmatprep.mubr.msk.f32.mxu1 %vm21797_vm4, %v21798_v3  ;;  %17725 = vmatprep.subr.mxu1 %v21798_v3 }
  0x7d   : >> { %17660 = vmatmul.mubr.msk.f32.gmra.mrb[2].mxu0 %vm839_vm6, %v22358_v22  ;;  %17726 = vmatpush3.msra.mxu1 %v949_v30 }
  0x7e   : >> { %20265 = vmatpush3.bf16.msra.mxu0 %v22299_v9  ;;  %17662 = vmatprep.mubr.msk.f32.mxu0 %vm21797_vm4, %v21798_v3 }
  0x7f   : >> { %20266 = vmatprep.subr.bf16.mxu0 %v21796_v2  ;;  %17700 = vmatmul.mubr.msk.f32.gmra.mrb[2].mxu1 %vm839_vm6, %v22368_v23 }
  0x80   : >> { %17702 = vmatprep.mubr.msk.f32.mxu1 %vm21797_vm4, %v21798_v3  ;;  %17779 = vmatprep.subr.mxu1 %v21798_v3 }
  0x81   : >> { %17663 = vmatmul.mubr.msk.f32.gmra.mrb[4].mxu0 %vm839_vm6, %v22379_v24 }
  0x82   : >> { %20268 = vmatpush3.bf16.msra.mxu0 %v22307_v12  ;;  %17665 = vmatprep.mubr.msk.f32.mxu0 %vm21797_vm4, %v21798_v3 }
  0x83   : >> { %20269 = vmatprep.subr.bf16.mxu0 %v21796_v2  ;;  %17703 = vmatmul.mubr.msk.f32.gmra.mrb[4].mxu1 %vm839_vm6, %v22389_v25 }
  0x84   : >> { %17705 = vmatprep.mubr.msk.f32.mxu1 %vm21797_vm4, %v21798_v3 }
  0x85   : >> { %17666 = vmatmul.mubr.msk.f32.gmra.mrb[6].mxu0 %vm839_vm6, %v22399_v26 }
  0x86   : >> { %20271 = vmatpush3.bf16.msra.mxu0 %v22315_v15  ;;  %17668 = vmatprep.mubr.msk.f32.mxu0 %vm21797_vm4, %v21798_v3 }
  0x87   : >> { %20272 = vmatprep.subr.bf16.mxu0 %v21796_v2  ;;  %17706 = vmatmul.mubr.msk.f32.gmra.mrb[6].mxu1 %vm839_vm6, %v22409_v27 }
  0x88   : >> { %17727 = vmatprep.mubr.msk.f32.mxu1 %vm21797_vm4, %v21798_v3 }
  0x89   : >> { %17669 = vmatmul.mubr.msk.f32.gmra.mrb[8].mxu0 %vm839_vm6, %v22419_v28 }
  0x8a   : >> { %20274 = vmatpush3.bf16.msra.mxu0 %v22323_v18  ;;  %17693 = vmatprep.mubr.msk.f32.mxu0 %vm21797_vm4, %v21798_v3 }
  0x8b   : >> { %17691 = vmatprep.subr.mxu0 %v21798_v3 }
  0x8e   : >> { %17692 = vmatpush3.msk.msra.mxu0 %vm855_vm5, %v22332_v19 }
  0x8f   : >> { %17694 = vmatmul.mubr.msk.f32.vlgmr.msra.gmra.mrb[10].mxu0 %vm839_vm6, %v22435_v29  ;;  %17708 = vmatprep.subr.mxu0 %v21798_v3 }
  0x90   : >> { %17710 = vmatprep.mubr.msk.f32.mxu0 %vm21797_vm4, %v21798_v3  ;;  %17709 = vmatpush3.msra.mxu0 %v15464_v31 }
  0x91   : >> { %20275 = vmatprep.subr.bf16.mxu0 %v21796_v2 }
 0x14c   : >> { %v925_v32 = vpop.f32.mrb[0].mxu0 }
 0x14d   : >> { %v17658_v33 = vpop.f32.mrb[1].mxu0  ;;  %17728 = vmatmul.mubr.msk.f32.vlgmr.msra.gmra.mrb[8].mxu1 %vm1063_vm7, %v925_v32  ;;  %v15494_v32 = vld [vmem:[%s22290_s2 + $0x58] sm:$0xff] }
 0x14e   : >> { %17730 = vmatprep.mubr.msk.f32.mxu1 %vm21797_vm4, %v21798_v3  ;;  %v1042_v34 = vpop.f32.mrb[0].mxu1  ;;  %17780 = vmatpush3.msra.mxu1 %v15486_v57  ;;  %v15495_v33 = vld [vmem:[%s22290_s2 + $0x60] sm:$0xff] }
 0x14f   : >> { %v17698_v35 = vpop.f32.mrb[1].mxu1  ;;  %20290 = vmatprep.subr.bf16.mxu1 %v21796_v2 }
 0x150   : >> { %v930_v36 = vpop.f32.mrb[2].mxu0  ;;  %v15496_v35 = vld [vmem:[%s22290_s2 + $0x68] sm:$0xff] }
 0x151   : >> { %v17661_v37 = vpop.f32.mrb[3].mxu0  ;;  %17731 = vmatmul.mubr.msk.f32.gmra.mrb[10].mxu1 %vm1063_vm7, %v930_v36  ;;  %v15497_v36 = vld [vmem:[%s22290_s2 + $0x70] sm:$0xff] }
 0x152   : >> { %17733 = vmatprep.mubr.msk.f32.mxu1 %vm21797_vm4, %v21798_v3  ;;  %v1047_v38 = vpop.f32.mrb[2].mxu1 }
 0x153   : >> { %v17701_v39 = vpop.f32.mrb[3].mxu1 }
 0x154   : >> { %v935_v40 = vpop.f32.mrb[4].mxu0  ;;  %v22564_v39 = vpack.c.bf16 %v15497_v36, %v15496_v35 }
 0x155   : >> { %v17664_v41 = vpop.f32.mrb[5].mxu0  ;;  %17734 = vmatmul.mubr.msk.f32.gmra.mrb[12].mxu1 %vm1063_vm7, %v935_v40  ;;  %v15498_v40 = vld [vmem:[%s22290_s2 + $0x78] sm:$0xff] }
 0x156   : >> { %17736 = vmatprep.mubr.msk.f32.mxu1 %vm21797_vm4, %v21798_v3  ;;  %v1052_v42 = vpop.f32.mrb[4].mxu1  ;;  %v15499_v41 = vld [vmem:[%s22290_s2 + $0x80] sm:$0xff] }
 0x157   : >> { %v17704_v43 = vpop.f32.mrb[5].mxu1 }
 0x158   : >> { %v940_v44 = vpop.f32.mrb[6].mxu0 }
 0x159   : >> { %v17667_v45 = vpop.f32.mrb[7].mxu0  ;;  %17737 = vmatmul.mubr.msk.f32.gmra.mrb[14].mxu1 %vm1063_vm7, %v940_v44  ;;  %v22573_v44 = vpack.c.bf16 %v15499_v41, %v15498_v40  ;;  %v15523_v40 = vld [vmem:[%s25967_s7 + $0x20] sm:$0xff] }
 0x15a   : >> { %17739 = vmatprep.mubr.msk.f32.mxu1 %vm21797_vm4, %v21798_v3  ;;  %v1057_v46 = vpop.f32.mrb[6].mxu1  ;;  %v15500_v45 = vld [vmem:[%s22290_s2 + $0x88] sm:$0xff] }
 0x15b   : >> { %v17707_v47 = vpop.f32.mrb[7].mxu1 }
 0x15c   : >> { %v945_v48 = vpop.f32.mrb[8].mxu0 }
 0x15d   : >> { %v17670_v49 = vpop.f32.mrb[9].mxu0  ;;  %17740 = vmatmul.mubr.msk.f32.gmra.mrb[16].mxu1 %vm1063_vm7, %v945_v48 }
 0x15e   : >> { %17781 = vmatprep.mubr.msk.f32.mxu1 %vm21797_vm4, %v21798_v3 }
 0x162   : >> { %v1037_v50 = vpop.f32.mrb[10].mxu0 }
 0x163   : >> { %v17695_v51 = vpop.f32.mrb[11].mxu0  ;;  %17711 = vmatmul.mubr.msk.f32.vlgmr.msra.gmra.mrb[12].mxu0 %vm1063_vm7, %v1037_v50  ;;  %v15502_v50 = vld [vmem:[%s22290_s2 + $0x98] sm:$0xff] }
 0x164   : >> { %20277 = vmatpush3.bf16.msra.mxu0 %v22295_v7  ;;  %17713 = vmatprep.mubr.msk.f32.mxu0 %vm21797_vm4, %v21798_v3  ;;  %v15503_v51 = vld [vmem:[%s22290_s2 + $0xa0] sm:$0xff] }
 0x165   : >> { %20278 = vmatprep.subr.bf16.mxu0 %v21796_v2 }
 0x167   : >> { %17714 = vmatmul.mubr.msk.f32.gmra.mrb[14].mxu0 %vm1063_vm7, %v1042_v34  ;;  %v22556_v34 = vpack.c.bf16 %v15495_v33, %v15494_v32 }
 0x168   : >> { %20280 = vmatpush3.bf16.msra.mxu0 %v22299_v9  ;;  %17716 = vmatprep.mubr.msk.f32.mxu0 %vm21797_vm4, %v21798_v3 }
 0x169   : >> { %20281 = vmatprep.subr.bf16.mxu0 %v21796_v2 }
 0x16b   : >> { %17717 = vmatmul.mubr.msk.f32.gmra.mrb[16].mxu0 %vm1063_vm7, %v1047_v38 }
 0x16c   : >> { %20283 = vmatpush3.bf16.msra.mxu0 %v22307_v12  ;;  %17719 = vmatprep.mubr.msk.f32.mxu0 %vm21797_vm4, %v21798_v3 }
 0x16d   : >> { %20284 = vmatprep.subr.bf16.mxu0 %v21796_v2 }
 0x16f   : >> { %17720 = vmatmul.mubr.msk.f32.gmra.mrb[18].mxu0 %vm1063_vm7, %v1052_v42 }
 0x170   : >> { %20286 = vmatpush3.bf16.msra.mxu0 %v22315_v15  ;;  %17722 = vmatprep.mubr.msk.f32.mxu0 %vm21797_vm4, %v21798_v3 }
 0x171   : >> { %20287 = vmatprep.subr.bf16.mxu0 %v21796_v2 }
 0x173   : >> { %17723 = vmatmul.mubr.msk.f32.gmra.mrb[20].mxu0 %vm1063_vm7, %v1057_v46  ;;  %v15501_v46 = vld [vmem:[%s22290_s2 + $0x90] sm:$0xff] }
 0x174   : >> { %20289 = vmatpush3.bf16.msra.mxu0 %v22323_v18  ;;  %17764 = vmatprep.mubr.msk.f32.mxu0 %vm21797_vm4, %v21798_v3  ;;  %v22582_v49 = vpack.c.bf16 %v15501_v46, %v15500_v45 }
 0x175   : >> { %17762 = vmatprep.subr.mxu0 %v21798_v3 }
 0x178   : >> { %17763 = vmatpush3.msk.msra.mxu0 %vm855_vm5, %v22332_v19 }
 0x179   : >> { %17765 = vmatmul.mubr.msk.f32.vlgmr.msra.gmra.mrb[22].mxu0 %vm839_vm6, %v22495_v52  ;;  %17833 = vmatprep.subr.mxu0 %v21798_v3 }
 0x17a   : >> { %17767 = vmatprep.mubr.msk.f32.mxu0 %vm21797_vm4, %v21798_v3 }
 0x17d   : >> { %17768 = vmatmul.mubr.msk.f32.gmra.mrb[24].mxu0 %vm839_vm6, %v22507_v53 }
 0x17e   : >> { %17770 = vmatprep.mubr.msk.f32.mxu0 %vm21797_vm4, %v21798_v3 }
 0x181   : >> { %17771 = vmatmul.mubr.msk.f32.gmra.mrb[26].mxu0 %vm839_vm6, %v22516_v54 }
 0x182   : >> { %17773 = vmatprep.mubr.msk.f32.mxu0 %vm21797_vm4, %v21798_v3 }
 0x185   : >> { %17774 = vmatmul.mubr.msk.f32.gmra.mrb[28].mxu0 %vm839_vm6, %v22525_v55 }
 0x186   : >> { %17776 = vmatprep.mubr.msk.f32.mxu0 %vm21797_vm4, %v21798_v3 }
 0x189   : >> { %17777 = vmatmul.mubr.msk.f32.gmra.mrb[30].mxu0 %vm839_vm6, %v22534_v56 }
 0x18a   : >> { %17835 = vmatprep.mubr.msk.f32.mxu0 %vm21797_vm4, %v21798_v3 }
 0x220   : >> { %v1250_v58 = vpop.f32.mrb[8].mxu1 }
 0x221   : >> { %v17729_v59 = vpop.f32.mrb[9].mxu1 }
 0x222   : >> { %v22591_v59 = vpack.c.bf16 %v15503_v51, %v15502_v50 }
 0x224   : >> { %v1255_v60 = vpop.f32.mrb[10].mxu1 }
 0x225   : >> { %v17732_v61 = vpop.f32.mrb[11].mxu1 }
 0x228   : >> { %v1260_v62 = vpop.f32.mrb[12].mxu1 }
 0x229   : >> { %v17735_v63 = vpop.f32.mrb[13].mxu1 }
 0x22a   : >> { %v15511_v63 = vld [vmem:[%s25967_s7 + $0x18] sm:$0xff] }
 0x22b   : >> { %17834 = vmatpush3.msra.mxu0 %v15511_v63 }
 0x22c   : >> { %v1265_v0 = vpop.f32.mrb[14].mxu1  ;;  %20305 = vmatprep.subr.bf16.mxu0 %v21796_v2 }
 0x22d   : >> { %v17738_v4 = vpop.f32.mrb[15].mxu1 }
 0x230   : >> { %v1270_v5 = vpop.f32.mrb[16].mxu1 }
 0x231   : >> { %v17741_v6 = vpop.f32.mrb[17].mxu1 }
 0x236   : >> { %v1145_v7 = vpop.f32.mrb[12].mxu0 }
 0x237   : >> { %v22544_v8 = vadd.f32 %v1250_v58, %v1145_v7  ;;  %v17712_v9 = vpop.f32.mrb[13].mxu0 }
 0x23a   : >> { %v1150_v10 = vpop.f32.mrb[14].mxu0 }
 0x23b   : >> { %v22546_v11 = vadd.f32 %v1255_v60, %v1150_v10  ;;  %v17715_v12 = vpop.f32.mrb[15].mxu0 }
 0x23e   : >> { %v1155_v13 = vpop.f32.mrb[16].mxu0 }
 0x23f   : >> { %v22548_v14 = vadd.f32 %v1260_v62, %v1155_v13  ;;  %v17718_v15 = vpop.f32.mrb[17].mxu0  ;;  %v22600_v62 = vld [vmem:[%s22290_s2 + $0xa8] sm:$0x3] }
 0x242   : >> { %v1160_v16 = vpop.f32.mrb[18].mxu0 }
 0x243   : >> { %v22550_v17 = vadd.f32 %v1265_v0, %v1160_v16  ;;  %v17721_v18 = vpop.f32.mrb[19].mxu0 }
 0x246   : >> { %v1165_v19 = vpop.f32.mrb[20].mxu0 }
 0x247   : >> { %v22552_v30 = vadd.f32 %v1270_v5, %v1165_v19  ;;  %v17724_v31 = vpop.f32.mrb[21].mxu0 }
 0x24c   : >> { %v1361_v37 = vpop.f32.mrb[22].mxu0 }
 0x24d   : >> { %v17766_v38 = vpop.f32.mrb[23].mxu0  ;;  %17782 = vmatmul.mubr.msk.f32.vlgmr.msra.gmra.mrb[18].mxu1 %vm1063_vm7, %v1361_v37 }
 0x24e   : >> { %20292 = vmatpush3.bf16.msra.mxu1 %v22556_v34  ;;  %17784 = vmatprep.mubr.msk.f32.mxu1 %vm21797_vm4, %v21798_v3 }
 0x24f   : >> { %20293 = vmatprep.subr.bf16.mxu1 %v21796_v2 }
 0x250   : >> { %v1366_v42 = vpop.f32.mrb[24].mxu0 }
 0x251   : >> { %v17769_v43 = vpop.f32.mrb[25].mxu0  ;;  %17785 = vmatmul.mubr.msk.f32.gmra.mrb[20].mxu1 %vm1063_vm7, %v1366_v42 }
 0x252   : >> { %20295 = vmatpush3.bf16.msra.mxu1 %v22564_v39  ;;  %17787 = vmatprep.mubr.msk.f32.mxu1 %vm21797_vm4, %v21798_v3 }
 0x253   : >> { %20296 = vmatprep.subr.bf16.mxu1 %v21796_v2 }
 0x254   : >> { %v1371_v47 = vpop.f32.mrb[26].mxu0 }
 0x255   : >> { %v17772_v48 = vpop.f32.mrb[27].mxu0  ;;  %17788 = vmatmul.mubr.msk.f32.gmra.mrb[22].mxu1 %vm1063_vm7, %v1371_v47 }
 0x256   : >> { %20298 = vmatpush3.bf16.msra.mxu1 %v22573_v44  ;;  %17790 = vmatprep.mubr.msk.f32.mxu1 %vm21797_vm4, %v21798_v3 }
 0x257   : >> { %20299 = vmatprep.subr.bf16.mxu1 %v21796_v2 }
 0x258   : >> { %v1376_v57 = vpop.f32.mrb[28].mxu0 }
 0x259   : >> { %v17775_v58 = vpop.f32.mrb[29].mxu0  ;;  %17791 = vmatmul.mubr.msk.f32.gmra.mrb[24].mxu1 %vm1063_vm7, %v1376_v57 }
 0x25a   : >> { %20301 = vmatpush3.bf16.msra.mxu1 %v22582_v49  ;;  %17793 = vmatprep.mubr.msk.f32.mxu1 %vm21797_vm4, %v21798_v3 }
 0x25b   : >> { %20302 = vmatprep.subr.bf16.mxu1 %v21796_v2 }
 0x25c   : >> { %v1381_v60 = vpop.f32.mrb[30].mxu0 }
 0x25d   : >> { %v17778_v61 = vpop.f32.mrb[31].mxu0  ;;  %17794 = vmatmul.mubr.msk.f32.gmra.mrb[26].mxu1 %vm1063_vm7, %v1381_v60 }
 0x25e   : >> { %20304 = vmatpush3.bf16.msra.mxu1 %v22591_v59  ;;  %17818 = vmatprep.mubr.msk.f32.mxu1 %vm21797_vm4, %v21798_v3 }
 0x25f   : >> { %17816 = vmatprep.subr.mxu1 %v21798_v3 }
 0x262   : >> { %17817 = vmatpush3.msk.msra.mxu1 %vm855_vm5, %v22600_v62 }
 0x263   : >> { %17819 = vmatmul.mubr.msk.f32.vlgmr.msra.gmra.mrb[28].mxu1 %vm839_vm6, %v22338_v20  ;;  %17887 = vmatprep.subr.mxu1 %v21798_v3 }
 0x264   : >> { %17821 = vmatprep.mubr.msk.f32.mxu1 %vm21797_vm4, %v21798_v3  ;;  %17888 = vmatpush3.msra.mxu1 %v15523_v40  ;;  %v15546_v40 = vld [vmem:[%s22290_s2 + $0xc8] sm:$0xff] }
 0x265   : >> { %20320 = vmatprep.subr.bf16.mxu1 %v21796_v2 }
 0x267   : >> { %17822 = vmatmul.mubr.msk.f32.gmra.mrb[30].mxu1 %vm839_vm6, %v22358_v22 }
 0x268   : >> { %17824 = vmatprep.mubr.msk.f32.mxu1 %vm21797_vm4, %v21798_v3 }
 0x26b   : >> { %17825 = vmatmul.mubr.msk.f32.gmra.mrb[32].mxu1 %vm839_vm6, %v22379_v24 }
 0x26c   : >> { %17827 = vmatprep.mubr.msk.f32.mxu1 %vm21797_vm4, %v21798_v3 }
 0x26f   : >> { %17828 = vmatmul.mubr.msk.f32.gmra.mrb[34].mxu1 %vm839_vm6, %v22399_v26 }
 0x270   : >> { %17830 = vmatprep.mubr.msk.f32.mxu1 %vm21797_vm4, %v21798_v3 }
 0x273   : >> { %17831 = vmatmul.mubr.msk.f32.gmra.mrb[36].mxu1 %vm839_vm6, %v22419_v28 }
 0x274   : >> { %17889 = vmatprep.mubr.msk.f32.mxu1 %vm21797_vm4, %v21798_v3 }
 0x320   : >> { %v1468_v0 = vpop.f32.mrb[18].mxu1 }
 0x321   : >> { %v1492_v4 = vadd.f32 %v1468_v0, %v22544_v8  ;;  %v17783_v5 = vpop.f32.mrb[19].mxu1 }
 0x324   : >> { %v1473_v6 = vpop.f32.mrb[20].mxu1 }
 0x325   : >> { %v1493_v7 = vadd.f32 %v1473_v6, %v22546_v11  ;;  %v17786_v9 = vpop.f32.mrb[21].mxu1 }
 0x328   : >> { %v1478_v10 = vpop.f32.mrb[22].mxu1 }
 0x329   : >> { %v1494_v12 = vadd.f32 %v1478_v10, %v22548_v14  ;;  %v17789_v13 = vpop.f32.mrb[23].mxu1 }
 0x32c   : >> { %v1483_v15 = vpop.f32.mrb[24].mxu1 }
 0x32d   : >> { %v1495_v16 = vadd.f32 %v1483_v15, %v22550_v17  ;;  %v17792_v18 = vpop.f32.mrb[25].mxu1 }
 0x330   : >> { %v1488_v19 = vpop.f32.mrb[26].mxu1 }
 0x331   : >> { %v1496_v31 = vadd.f32 %v1488_v19, %v22552_v30  ;;  %v17795_v32 = vpop.f32.mrb[27].mxu1 }
 0x336   : >> { %v1580_v33 = vpop.f32.mrb[28].mxu1 }
 0x337   : >> { %v17820_v35 = vpop.f32.mrb[29].mxu1  ;;  %17836 = vmatmul.mubr.msk.f32.vlgmr.msra.gmra.mrb[32].mxu0 %vm1063_vm7, %v1580_v33 }
 0x338   : >> { %20307 = vmatpush3.bf16.msra.mxu0 %v22556_v34  ;;  %17838 = vmatprep.mubr.msk.f32.mxu0 %vm21797_vm4, %v21798_v3 }
 0x339   : >> { %20308 = vmatprep.subr.bf16.mxu0 %v21796_v2 }
 0x33a   : >> { %v1585_v8 = vpop.f32.mrb[30].mxu1 }
 0x33b   : >> { %v17823_v11 = vpop.f32.mrb[31].mxu1  ;;  %17839 = vmatmul.mubr.msk.f32.gmra.mrb[34].mxu0 %vm1063_vm7, %v1585_v8 }
 0x33c   : >> { %20310 = vmatpush3.bf16.msra.mxu0 %v22564_v39  ;;  %17841 = vmatprep.mubr.msk.f32.mxu0 %vm21797_vm4, %v21798_v3 }
 0x33d   : >> { %20311 = vmatprep.subr.bf16.mxu0 %v21796_v2 }
 0x33e   : >> { %v1590_v14 = vpop.f32.mrb[32].mxu1 }
 0x33f   : >> { %v17826_v17 = vpop.f32.mrb[33].mxu1  ;;  %17842 = vmatmul.mubr.msk.f32.gmra.mrb[36].mxu0 %vm1063_vm7, %v1590_v14 }
 0x340   : >> { %20313 = vmatpush3.bf16.msra.mxu0 %v22573_v44  ;;  %17844 = vmatprep.mubr.msk.f32.mxu0 %vm21797_vm4, %v21798_v3 }
 0x341   : >> { %20314 = vmatprep.subr.bf16.mxu0 %v21796_v2 }
 0x342   : >> { %v1595_v30 = vpop.f32.mrb[34].mxu1 }
 0x343   : >> { %v17829_v36 = vpop.f32.mrb[35].mxu1  ;;  %17845 = vmatmul.mubr.msk.f32.gmra.mrb[38].mxu0 %vm1063_vm7, %v1595_v30  ;;  %v15543_v30 = vld [vmem:[%s22290_s2 + $0xb0] sm:$0xff] }
 0x344   : >> { %20316 = vmatpush3.bf16.msra.mxu0 %v22582_v49  ;;  %17847 = vmatprep.mubr.msk.f32.mxu0 %vm21797_vm4, %v21798_v3  ;;  %v15544_v36 = vld [vmem:[%s22290_s2 + $0xb8] sm:$0xff] }
 0x345   : >> { %20317 = vmatprep.subr.bf16.mxu0 %v21796_v2 }
 0x346   : >> { %v1600_v37 = vpop.f32.mrb[36].mxu1 }
 0x347   : >> { %v17832_v38 = vpop.f32.mrb[37].mxu1  ;;  %17848 = vmatmul.mubr.msk.f32.gmra.mrb[40].mxu0 %vm1063_vm7, %v1600_v37  ;;  %v22750_v37 = vpack.c.bf16 %v15544_v36, %v15543_v30 }
 0x348   : >> { %20319 = vmatpush3.bf16.msra.mxu0 %v22591_v59  ;;  %17872 = vmatprep.mubr.msk.f32.mxu0 %vm21797_vm4, %v21798_v3  ;;  %v15545_v38 = vld [vmem:[%s22290_s2 + $0xc0] sm:$0xff] }
 0x349   : >> { %17870 = vmatprep.subr.mxu0 %v21798_v3 }
 0x34c   : >> { %17871 = vmatpush3.msk.msra.mxu0 %vm855_vm5, %v22600_v62 }
 0x34d   : >> { %17873 = vmatmul.mubr.msk.f32.vlgmr.msra.gmra.mrb[42].mxu0 %vm839_vm6, %v22435_v29  ;;  %17941 = vmatprep.subr.mxu0 %v21798_v3 }
 0x34e   : >> { %17875 = vmatprep.mubr.msk.f32.mxu0 %vm21797_vm4, %v21798_v3 }
 0x351   : >> { %17876 = vmatmul.mubr.msk.f32.gmra.mrb[44].mxu0 %vm839_vm6, %v22347_v21 }
 0x352   : >> { %17878 = vmatprep.mubr.msk.f32.mxu0 %vm21797_vm4, %v21798_v3 }
 0x355   : >> { %17879 = vmatmul.mubr.msk.f32.gmra.mrb[46].mxu0 %vm839_vm6, %v22368_v23 }
 0x356   : >> { %17881 = vmatprep.mubr.msk.f32.mxu0 %vm21797_vm4, %v21798_v3 }
 0x359   : >> { %17882 = vmatmul.mubr.msk.f32.gmra.mrb[48].mxu0 %vm839_vm6, %v22389_v25 }
 0x35a   : >> { %17884 = vmatprep.mubr.msk.f32.mxu0 %vm21797_vm4, %v21798_v3 }
 0x35d   : >> { %17885 = vmatmul.mubr.msk.f32.gmra.mrb[50].mxu0 %vm839_vm6, %v22409_v27 }
 0x35e   : >> { %17943 = vmatprep.mubr.msk.f32.mxu0 %vm21797_vm4, %v21798_v3 }
 0x40a   : >> { %v1687_v41 = vpop.f32.mrb[32].mxu0 }
 0x40b   : >> { %v1711_v42 = vadd.f32 %v1687_v41, %v1492_v4  ;;  %v17837_v43 = vpop.f32.mrb[33].mxu0 }
 0x40c   : >> { %v22758_v43 = vpack.c.bf16 %v15546_v40, %v15545_v38 }
 0x40e   : >> { %v1692_v45 = vpop.f32.mrb[34].mxu0 }
 0x40f   : >> { %v1712_v46 = vadd.f32 %v1692_v45, %v1493_v7  ;;  %v17840_v47 = vpop.f32.mrb[35].mxu0  ;;  %v15547_v45 = vld [vmem:[%s22290_s2 + $0xd0] sm:$0xff] }
 0x412   : >> { %v1697_v48 = vpop.f32.mrb[36].mxu0 }
 0x413   : >> { %v1713_v50 = vadd.f32 %v1697_v48, %v1494_v12  ;;  %v17843_v51 = vpop.f32.mrb[37].mxu0 }
 0x414   : >> { %v15549_v51 = vld [vmem:[%s22290_s2 + $0xe0] sm:$0xff] }
 0x416   : >> { %v1702_v57 = vpop.f32.mrb[38].mxu0 }
 0x417   : >> { %v1714_v58 = vadd.f32 %v1702_v57, %v1495_v16  ;;  %v17846_v60 = vpop.f32.mrb[39].mxu0  ;;  %v15550_v57 = vld [vmem:[%s22290_s2 + $0xe8] sm:$0xff] }
 0x41a   : >> { %v1707_v61 = vpop.f32.mrb[40].mxu0 }
 0x41b   : >> { %v1715_v63 = vadd.f32 %v1707_v61, %v1496_v31  ;;  %v17849_v0 = vpop.f32.mrb[41].mxu0  ;;  %v22776_v61 = vpack.c.bf16 %v15550_v57, %v15549_v51 }
 0x41c   : >> { %v15552_v0 = vld [vmem:[%s22290_s2 + $0xf8] sm:$0xff] }
 0x420   : >> { %v1782_v5 = vpop.f32.mrb[42].mxu0 }
 0x421   : >> { %v17874_v6 = vpop.f32.mrb[43].mxu0  ;;  %17890 = vmatmul.mubr.msk.f32.vlgmr.msra.gmra.mrb[38].mxu1 %vm1063_vm7, %v1782_v5 }
 0x422   : >> { %20322 = vmatpush3.bf16.msra.mxu1 %v22556_v34  ;;  %17892 = vmatprep.mubr.msk.f32.mxu1 %vm21797_vm4, %v21798_v3 }
 0x423   : >> { %20323 = vmatprep.subr.bf16.mxu1 %v21796_v2 }
 0x424   : >> { %v1787_v4 = vpop.f32.mrb[44].mxu0 }
 0x425   : >> { %v17877_v7 = vpop.f32.mrb[45].mxu0  ;;  %17893 = vmatmul.mubr.msk.f32.gmra.mrb[40].mxu1 %vm1063_vm7, %v1787_v4 }
 0x426   : >> { %20325 = vmatpush3.bf16.msra.mxu1 %v22564_v39  ;;  %17895 = vmatprep.mubr.msk.f32.mxu1 %vm21797_vm4, %v21798_v3 }
 0x427   : >> { %20326 = vmatprep.subr.bf16.mxu1 %v21796_v2 }
 0x428   : >> { %v1792_v9 = vpop.f32.mrb[46].mxu0 }
 0x429   : >> { %v17880_v10 = vpop.f32.mrb[47].mxu0  ;;  %17896 = vmatmul.mubr.msk.f32.gmra.mrb[42].mxu1 %vm1063_vm7, %v1792_v9 }
 0x42a   : >> { %20328 = vmatpush3.bf16.msra.mxu1 %v22573_v44  ;;  %17898 = vmatprep.mubr.msk.f32.mxu1 %vm21797_vm4, %v21798_v3  ;;  %v15535_v44 = vld [vmem:[%s25967_s7 + $0x28] sm:$0xff]  ;;  %v22794_v10 = vld [vmem:[%s22290_s2 + $0x100] sm:$0x3] }
 0x42b   : >> { %20329 = vmatprep.subr.bf16.mxu1 %v21796_v2  ;;  %17942 = vmatpush3.msra.mxu0 %v15535_v44 }
 0x42c   : >> { %v1797_v34 = vpop.f32.mrb[48].mxu0  ;;  %20335 = vmatprep.subr.bf16.mxu0 %v21796_v2 }
 0x42d   : >> { %v17883_v12 = vpop.f32.mrb[49].mxu0  ;;  %17899 = vmatmul.mubr.msk.f32.gmra.mrb[44].mxu1 %vm1063_vm7, %v1797_v34 }
 0x42e   : >> { %20331 = vmatpush3.bf16.msra.mxu1 %v22582_v49  ;;  %17901 = vmatprep.mubr.msk.f32.mxu1 %vm21797_vm4, %v21798_v3 }
 0x42f   : >> { %20332 = vmatprep.subr.bf16.mxu1 %v21796_v2 }
 0x430   : >> { %v1802_v39 = vpop.f32.mrb[50].mxu0 }
 0x431   : >> { %v17886_v13 = vpop.f32.mrb[51].mxu0  ;;  %17902 = vmatmul.mubr.msk.f32.gmra.mrb[46].mxu1 %vm1063_vm7, %v1802_v39 }
 0x432   : >> { %20334 = vmatpush3.bf16.msra.mxu1 %v22591_v59  ;;  %17926 = vmatprep.mubr.msk.f32.mxu1 %vm21797_vm4, %v21798_v3 }
 0x433   : >> { %17924 = vmatprep.subr.mxu1 %v21798_v3 }
 0x436   : >> { %17925 = vmatpush3.msk.msra.mxu1 %vm855_vm5, %v22600_v62 }
 0x437   : >> { %17927 = vmatmul.mubr.msk.f32.vlgmr.msra.gmra.mrb[48].mxu1 %vm839_vm6, %v22495_v52  ;;  %17995 = vmatprep.subr.mxu1 %v21798_v3 }
 0x438   : >> { %17929 = vmatprep.mubr.msk.f32.mxu1 %vm21797_vm4, %v21798_v3 }
 0x43b   : >> { %17930 = vmatmul.mubr.msk.f32.gmra.mrb[50].mxu1 %vm839_vm6, %v22507_v53 }
 0x43c   : >> { %17932 = vmatprep.mubr.msk.f32.mxu1 %vm21797_vm4, %v21798_v3 }
 0x43f   : >> { %17933 = vmatmul.mubr.msk.f32.gmra.mrb[52].mxu1 %vm839_vm6, %v22516_v54 }
 0x440   : >> { %17935 = vmatprep.mubr.msk.f32.mxu1 %vm21797_vm4, %v21798_v3 }
 0x443   : >> { %17936 = vmatmul.mubr.msk.f32.gmra.mrb[54].mxu1 %vm839_vm6, %v22525_v55 }
 0x444   : >> { %17938 = vmatprep.mubr.msk.f32.mxu1 %vm21797_vm4, %v21798_v3 }
 0x447   : >> { %17939 = vmatmul.mubr.msk.f32.gmra.mrb[56].mxu1 %vm839_vm6, %v22534_v56 }
 0x448   : >> { %17997 = vmatprep.mubr.msk.f32.mxu1 %vm21797_vm4, %v21798_v3 }
 0x4f4   : >> { %v1889_v49 = vpop.f32.mrb[38].mxu1 }
 0x4f5   : >> { %v22738_v59 = vadd.f32 %v1889_v49, %v1711_v42  ;;  %v17891_v62 = vpop.f32.mrb[39].mxu1 }
 0x4f8   : >> { %v1894_v15 = vpop.f32.mrb[40].mxu1 }
 0x4f9   : >> { %v22740_v16 = vadd.f32 %v1894_v15, %v1712_v46  ;;  %v17894_v18 = vpop.f32.mrb[41].mxu1  ;;  %v15548_v46 = vld [vmem:[%s22290_s2 + $0xd8] sm:$0xff] }
 0x4fc   : >> { %v1899_v19 = vpop.f32.mrb[42].mxu1 }
 0x4fd   : >> { %v22742_v31 = vadd.f32 %v1899_v19, %v1713_v50  ;;  %v17897_v32 = vpop.f32.mrb[43].mxu1  ;;  %v22767_v50 = vpack.c.bf16 %v15548_v46, %v15547_v45 }
 0x500   : >> { %v1904_v33 = vpop.f32.mrb[44].mxu1 }
 0x501   : >> { %v22744_v35 = vadd.f32 %v1904_v33, %v1714_v58  ;;  %v17900_v8 = vpop.f32.mrb[45].mxu1 }
 0x504   : >> { %v1909_v11 = vpop.f32.mrb[46].mxu1 }
 0x505   : >> { %v22746_v14 = vadd.f32 %v1909_v11, %v1715_v63  ;;  %v17903_v17 = vpop.f32.mrb[47].mxu1  ;;  %v15551_v63 = vld [vmem:[%s22290_s2 + $0xf0] sm:$0xff] }
 0x506   : >> { %v22785_v4 = vpack.c.bf16 %v15552_v0, %v15551_v63 }
 0x50a   : >> { %v1984_v41 = vpop.f32.mrb[48].mxu1 }
 0x50b   : >> { %v17928_v42 = vpop.f32.mrb[49].mxu1  ;;  %17944 = vmatmul.mubr.msk.f32.vlgmr.msra.gmra.mrb[52].mxu0 %vm1063_vm7, %v1984_v41 }
 0x50c   : >> { %20337 = vmatpush3.bf16.msra.mxu0 %v22750_v37  ;;  %17946 = vmatprep.mubr.msk.f32.mxu0 %vm21797_vm4, %v21798_v3 }
 0x50d   : >> { %20338 = vmatprep.subr.bf16.mxu0 %v21796_v2 }
 0x50e   : >> { %v1989_v47 = vpop.f32.mrb[50].mxu1 }
 0x50f   : >> { %v17931_v48 = vpop.f32.mrb[51].mxu1  ;;  %17947 = vmatmul.mubr.msk.f32.gmra.mrb[54].mxu0 %vm1063_vm7, %v1989_v47 }
 0x510   : >> { %20340 = vmatpush3.bf16.msra.mxu0 %v22758_v43  ;;  %17949 = vmatprep.mubr.msk.f32.mxu0 %vm21797_vm4, %v21798_v3 }
 0x511   : >> { %20341 = vmatprep.subr.bf16.mxu0 %v21796_v2 }
 0x512   : >> { %v1994_v58 = vpop.f32.mrb[52].mxu1 }
 0x513   : >> { %v17934_v60 = vpop.f32.mrb[53].mxu1  ;;  %17950 = vmatmul.mubr.msk.f32.gmra.mrb[56].mxu0 %vm1063_vm7, %v1994_v58 }
 0x514   : >> { %20343 = vmatpush3.bf16.msra.mxu0 %v22767_v50  ;;  %17952 = vmatprep.mubr.msk.f32.mxu0 %vm21797_vm4, %v21798_v3 }
 0x515   : >> { %20344 = vmatprep.subr.bf16.mxu0 %v21796_v2 }
 0x516   : >> { %v1999_v5 = vpop.f32.mrb[54].mxu1 }
 0x517   : >> { %v17937_v6 = vpop.f32.mrb[55].mxu1  ;;  %17953 = vmatmul.mubr.msk.f32.gmra.mrb[58].mxu0 %vm1063_vm7, %v1999_v5 }
 0x518   : >> { %20346 = vmatpush3.bf16.msra.mxu0 %v22776_v61  ;;  %17955 = vmatprep.mubr.msk.f32.mxu0 %vm21797_vm4, %v21798_v3 }
 0x519   : >> { %20347 = vmatprep.subr.bf16.mxu0 %v21796_v2 }
 0x51a   : >> { %v2004_v7 = vpop.f32.mrb[56].mxu1 }
 0x51b   : >> { %v17940_v9 = vpop.f32.mrb[57].mxu1  ;;  %17956 = vmatmul.mubr.msk.f32.gmra.mrb[60].mxu0 %vm1063_vm7, %v2004_v7 }
 0x51c   : >> { %20349 = vmatpush3.bf16.msra.mxu0 %v22785_v4  ;;  %17980 = vmatprep.mubr.msk.f32.mxu0 %vm21797_vm4, %v21798_v3 }
 0x51d   : >> { %17978 = vmatprep.subr.mxu0 %v21798_v3 }
 0x520   : >> { %17979 = vmatpush3.msk.msra.mxu0 %vm855_vm5, %v22794_v10 }
 0x521   : >> { %17981 = vmatmul.mubr.msk.f32.vlgmr.msra.gmra.mrb[62].mxu0 %vm839_vm6, %v22338_v20  ;;  %18049 = vmatprep.subr.mxu0 %v21798_v3  ;;  %v15560_v20 = vld [vmem:[%s25967_s7 + $0x30] sm:$0xff] }
 0x522   : >> { %17983 = vmatprep.mubr.msk.f32.mxu0 %vm21797_vm4, %v21798_v3  ;;  %17996 = vmatpush3.msra.mxu1 %v15560_v20 }
 0x523   : >> { %20350 = vmatprep.subr.bf16.mxu1 %v21796_v2 }
 0x525   : >> { %17984 = vmatmul.mubr.msk.f32.gmra.mrb[64].mxu0 %vm839_vm6, %v22358_v22 }
 0x526   : >> { %17986 = vmatprep.mubr.msk.f32.mxu0 %vm21797_vm4, %v21798_v3 }
 0x529   : >> { %17987 = vmatmul.mubr.msk.f32.gmra.mrb[66].mxu0 %vm839_vm6, %v22379_v24 }
 0x52a   : >> { %17989 = vmatprep.mubr.msk.f32.mxu0 %vm21797_vm4, %v21798_v3 }
 0x52d   : >> { %17990 = vmatmul.mubr.msk.f32.gmra.mrb[68].mxu0 %vm839_vm6, %v22399_v26 }
 0x52e   : >> { %17992 = vmatprep.mubr.msk.f32.mxu0 %vm21797_vm4, %v21798_v3 }
 0x531   : >> { %17993 = vmatmul.mubr.msk.f32.gmra.mrb[70].mxu0 %vm839_vm6, %v22419_v28 }
 0x532   : >> { %18051 = vmatprep.mubr.msk.f32.mxu0 %vm21797_vm4, %v21798_v3 }
 0x5de   : >> { %v2091_v22 = vpop.f32.mrb[52].mxu0 }
 0x5df   : >> { %v2115_v24 = vadd.f32 %v2091_v22, %v22738_v59  ;;  %v17945_v26 = vpop.f32.mrb[53].mxu0 }
 0x5e2   : >> { %v2096_v34 = vpop.f32.mrb[54].mxu0 }
 0x5e3   : >> { %v2116_v12 = vadd.f32 %v2096_v34, %v22740_v16  ;;  %v17948_v39 = vpop.f32.mrb[55].mxu0 }
 0x5e6   : >> { %v2101_v13 = vpop.f32.mrb[56].mxu0 }
 0x5e7   : >> { %v2117_v28 = vadd.f32 %v2101_v13, %v22742_v31  ;;  %v17951_v44 = vpop.f32.mrb[57].mxu0 }
 0x5ea   : >> { %v2106_v49 = vpop.f32.mrb[58].mxu0 }
 0x5eb   : >> { %v2118_v62 = vadd.f32 %v2106_v49, %v22744_v35  ;;  %v17954_v15 = vpop.f32.mrb[59].mxu0 }
 0x5ee   : >> { %v2111_v18 = vpop.f32.mrb[60].mxu0 }
 0x5ef   : >> { %v2119_v19 = vadd.f32 %v2111_v18, %v22746_v14  ;;  %v17957_v32 = vpop.f32.mrb[61].mxu0 }
 0x5f4   : >> { %v2203_v33 = vpop.f32.mrb[62].mxu0 }
 0x5f5   : >> { %v17982_v8 = vpop.f32.mrb[63].mxu0  ;;  %17998 = vmatmul.mubr.msk.f32.vlgmr.msra.gmra.mrb[58].mxu1 %vm1063_vm7, %v2203_v33  ;;  %v2760_v33 = vld [vmem:[%s25965_s5] sm:$0xff] }
 0x5f6   : >> { %20352 = vmatpush3.bf16.msra.mxu1 %v22750_v37  ;;  %18000 = vmatprep.mubr.msk.f32.mxu1 %vm21797_vm4, %v21798_v3 }
 0x5f7   : >> { %20353 = vmatprep.subr.bf16.mxu1 %v21796_v2 }
 0x5f8   : >> { %v2208_v59 = vpop.f32.mrb[64].mxu0 }
 0x5f9   : >> { %v17985_v16 = vpop.f32.mrb[65].mxu0  ;;  %18001 = vmatmul.mubr.msk.f32.gmra.mrb[60].mxu1 %vm1063_vm7, %v2208_v59 }
 0x5fa   : >> { %20355 = vmatpush3.bf16.msra.mxu1 %v22758_v43  ;;  %18003 = vmatprep.mubr.msk.f32.mxu1 %vm21797_vm4, %v21798_v3 }
 0x5fb   : >> { %20356 = vmatprep.subr.bf16.mxu1 %v21796_v2 }
 0x5fc   : >> { %v2213_v31 = vpop.f32.mrb[66].mxu0 }
 0x5fd   : >> { %v17988_v35 = vpop.f32.mrb[67].mxu0  ;;  %18004 = vmatmul.mubr.msk.f32.gmra.mrb[62].mxu1 %vm1063_vm7, %v2213_v31  ;;  %v15590_v31 = vld [vmem:[%s25968_s8] ss:$0 sm:$0xff] }
 0x5fe   : >> { %20358 = vmatpush3.bf16.msra.mxu1 %v22767_v50  ;;  %18006 = vmatprep.mubr.msk.f32.mxu1 %vm21797_vm4, %v21798_v3 }
 0x5ff   : >> { %20359 = vmatprep.subr.bf16.mxu1 %v21796_v2 }
 0x600   : >> { %v2218_v11 = vpop.f32.mrb[68].mxu0 }
 0x601   : >> { %v17991_v14 = vpop.f32.mrb[69].mxu0  ;;  %18007 = vmatmul.mubr.msk.f32.gmra.mrb[64].mxu1 %vm1063_vm7, %v2218_v11 }
 0x602   : >> { %20361 = vmatpush3.bf16.msra.mxu1 %v22776_v61  ;;  %18009 = vmatprep.mubr.msk.f32.mxu1 %vm21797_vm4, %v21798_v3 }
 0x603   : >> { %20362 = vmatprep.subr.bf16.mxu1 %v21796_v2 }
 0x604   : >> { %v2223_v17 = vpop.f32.mrb[70].mxu0 }
 0x605   : >> { %v17994_v30 = vpop.f32.mrb[71].mxu0  ;;  %18010 = vmatmul.mubr.msk.f32.gmra.mrb[66].mxu1 %vm1063_vm7, %v2223_v17 }
 0x606   : >> { %20364 = vmatpush3.bf16.msra.mxu1 %v22785_v4  ;;  %18034 = vmatprep.mubr.msk.f32.mxu1 %vm21797_vm4, %v21798_v3 }
 0x607   : >> { %18032 = vmatprep.subr.mxu1 %v21798_v3 }
 0x60a   : >> { %18033 = vmatpush3.msk.msra.mxu1 %vm855_vm5, %v22794_v10 }
 0x60b   : >> { %18035 = vmatmul.mubr.msk.f32.vlgmr.msra.gmra.mrb[68].mxu1 %vm839_vm6, %v22435_v29  ;;  %18103 = vmatprep.subr.mxu1 %v21798_v3 }
 0x60c   : >> { %18037 = vmatprep.mubr.msk.f32.mxu1 %vm21797_vm4, %v21798_v3 }
 0x60f   : >> { %18038 = vmatmul.mubr.msk.f32.gmra.mrb[70].mxu1 %vm839_vm6, %v22347_v21  ;;  %v15572_v21 = vld [vmem:[%s25967_s7 + $0x38] sm:$0xff] }
 0x610   : >> { %18040 = vmatprep.mubr.msk.f32.mxu1 %vm21797_vm4, %v21798_v3  ;;  %18050 = vmatpush3.msra.mxu0 %v15572_v21 }
 0x611   : >> { %20365 = vmatprep.subr.bf16.mxu0 %v21796_v2 }
 0x613   : >> { %18041 = vmatmul.mubr.msk.f32.gmra.mrb[72].mxu1 %vm839_vm6, %v22368_v23 }
 0x614   : >> { %18043 = vmatprep.mubr.msk.f32.mxu1 %vm21797_vm4, %v21798_v3 }
 0x617   : >> { %18044 = vmatmul.mubr.msk.f32.gmra.mrb[74].mxu1 %vm839_vm6, %v22389_v25 }
 0x618   : >> { %18046 = vmatprep.mubr.msk.f32.mxu1 %vm21797_vm4, %v21798_v3 }
 0x61b   : >> { %18047 = vmatmul.mubr.msk.f32.gmra.mrb[76].mxu1 %vm839_vm6, %v22409_v27 }
 0x61c   : >> { %18105 = vmatprep.mubr.msk.f32.mxu1 %vm21797_vm4, %v21798_v3 }
 0x6c8   : >> { %v2310_v23 = vpop.f32.mrb[58].mxu1 }
 0x6c9   : >> { %v2334_v29 = vadd.f32 %v2310_v23, %v2115_v24  ;;  %v17999_v36 = vpop.f32.mrb[59].mxu1 }
 0x6cc   : >> { %v2315_v25 = vpop.f32.mrb[60].mxu1 }
 0x6cd   : >> { %v2335_v38 = vadd.f32 %v2315_v25, %v2116_v12  ;;  %v18002_v40 = vpop.f32.mrb[61].mxu1 }
 0x6d0   : >> { %v2320_v41 = vpop.f32.mrb[62].mxu1 }
 0x6d1   : >> { %v2336_v42 = vadd.f32 %v2320_v41, %v2117_v28  ;;  %v18005_v45 = vpop.f32.mrb[63].mxu1 }
 0x6d4   : >> { %v2325_v27 = vpop.f32.mrb[64].mxu1 }
 0x6d5   : >> { %v2337_v46 = vadd.f32 %v2325_v27, %v2118_v62  ;;  %v18008_v47 = vpop.f32.mrb[65].mxu1 }
 0x6d8   : >> { %v2330_v48 = vpop.f32.mrb[66].mxu1 }
 0x6d9   : >> { %v2338_v51 = vadd.f32 %v2330_v48, %v2119_v19  ;;  %v18011_v57 = vpop.f32.mrb[67].mxu1 }
 0x6de   : >> { %v2405_v58 = vpop.f32.mrb[68].mxu1 }
 0x6df   : >> { %v18036_v60 = vpop.f32.mrb[69].mxu1  ;;  %18052 = vmatmul.mubr.msk.f32.vlgmr.msra.gmra.mrb[72].mxu0 %vm1063_vm7, %v2405_v58 }
 0x6e0   : >> { %20367 = vmatpush3.bf16.msra.mxu0 %v22750_v37  ;;  %18054 = vmatprep.mubr.msk.f32.mxu0 %vm21797_vm4, %v21798_v3 }
 0x6e1   : >> { %20368 = vmatprep.subr.bf16.mxu0 %v21796_v2 }
 0x6e2   : >> { %v2410_v63 = vpop.f32.mrb[70].mxu1 }
 0x6e3   : >> { %v18039_v0 = vpop.f32.mrb[71].mxu1  ;;  %18055 = vmatmul.mubr.msk.f32.gmra.mrb[74].mxu0 %vm1063_vm7, %v2410_v63  ;;  %v2761_v63 = vld [vmem:[%s25965_s5 + $0x8] sm:$0xff] }
 0x6e4   : >> { %20370 = vmatpush3.bf16.msra.mxu0 %v22758_v43  ;;  %18057 = vmatprep.mubr.msk.f32.mxu0 %vm21797_vm4, %v21798_v3  ;;  %v2762_v0 = vld [vmem:[%s25965_s5 + $0x10] sm:$0xff] }
 0x6e5   : >> { %20371 = vmatprep.subr.bf16.mxu0 %v21796_v2 }
 0x6e6   : >> { %v2415_v5 = vpop.f32.mrb[72].mxu1 }
 0x6e7   : >> { %v18042_v6 = vpop.f32.mrb[73].mxu1  ;;  %18058 = vmatmul.mubr.msk.f32.gmra.mrb[76].mxu0 %vm1063_vm7, %v2415_v5  ;;  %v2763_v5 = vld [vmem:[%s25965_s5 + $0x18] sm:$0xff] }
 0x6e8   : >> { %20373 = vmatpush3.bf16.msra.mxu0 %v22767_v50  ;;  %18060 = vmatprep.mubr.msk.f32.mxu0 %vm21797_vm4, %v21798_v3  ;;  %v2764_v6 = vld [vmem:[%s25965_s5 + $0x20] sm:$0xff] }
 0x6e9   : >> { %20374 = vmatprep.subr.bf16.mxu0 %v21796_v2 }
 0x6ea   : >> { %v2420_v37 = vpop.f32.mrb[74].mxu1 }
 0x6eb   : >> { %v18045_v7 = vpop.f32.mrb[75].mxu1  ;;  %18061 = vmatmul.mubr.msk.f32.gmra.mrb[78].mxu0 %vm1063_vm7, %v2420_v37  ;;  %v2765_v37 = vld [vmem:[%s25965_s5 + $0x28] sm:$0x3] }
 0x6ec   : >> { %20376 = vmatpush3.bf16.msra.mxu0 %v22776_v61  ;;  %18063 = vmatprep.mubr.msk.f32.mxu0 %vm21797_vm4, %v21798_v3 }
 0x6ed   : >> { %20377 = vmatprep.subr.bf16.mxu0 %v21796_v2  ;;  %v15584_v2 = vld [vmem:[%s25967_s7 + $0x40] sm:$0xff] }
 0x6ee   : >> { %v2425_v43 = vpop.f32.mrb[76].mxu1  ;;  %18104 = vmatpush3.msra.mxu1 %v15584_v2 }
 0x6ef   : >> { %v18048_v9 = vpop.f32.mrb[77].mxu1  ;;  %18064 = vmatmul.mubr.msk.f32.gmra.mrb[80].mxu0 %vm1063_vm7, %v2425_v43 }
 0x6f0   : >> { %20379 = vmatpush3.bf16.msra.mxu0 %v22785_v4  ;;  %18088 = vmatprep.mubr.msk.f32.mxu0 %vm21797_vm4, %v21798_v3 }
 0x6f1   : >> { %18086 = vmatprep.subr.mxu0 %v21798_v3 }
 0x6f4   : >> { %18087 = vmatpush3.msk.msra.mxu0 %vm855_vm5, %v22794_v10 }
 0x6f5   : >> { %18089 = vmatmul.mubr.msk.f32.vlgmr.msra.gmra.mrb[82].mxu0 %vm839_vm6, %v22495_v52 }
 0x6f6   : >> { %18091 = vmatprep.mubr.msk.f32.mxu0 %vm21797_vm4, %v21798_v3 }
 0x6f9   : >> { %18092 = vmatmul.mubr.msk.f32.gmra.mrb[84].mxu0 %vm839_vm6, %v22507_v53 }
 0x6fa   : >> { %18094 = vmatprep.mubr.msk.f32.mxu0 %vm21797_vm4, %v21798_v3 }
 0x6fd   : >> { %18095 = vmatmul.mubr.msk.f32.gmra.mrb[86].mxu0 %vm839_vm6, %v22516_v54 }
 0x6fe   : >> { %18097 = vmatprep.mubr.msk.f32.mxu0 %vm21797_vm4, %v21798_v3 }
 0x701   : >> { %18098 = vmatmul.mubr.msk.f32.gmra.mrb[88].mxu0 %vm839_vm6, %v22525_v55 }
 0x702   : >> { %18100 = vmatprep.mubr.msk.f32.mxu0 %vm21797_vm4, %v21798_v3 }
 0x705   : >> { %18101 = vmatmul.mubr.msk.f32.gmra.mrb[90].mxu0 %vm839_vm6, %v22534_v56 }
 0x7b2   : >> { %v2512_v52 = vpop.f32.mrb[72].mxu0 }
 0x7b3   : >> { %v2536_v53 = vadd.f32 %v2512_v52, %v2334_v29  ;;  %v18053_v54 = vpop.f32.mrb[73].mxu0 }
 0x7b6   : >> { %v2517_v50 = vpop.f32.mrb[74].mxu0 }
 0x7b7   : >> { %v2537_v61 = vadd.f32 %v2517_v50, %v2335_v38  ;;  %v18056_v4 = vpop.f32.mrb[75].mxu0 }
 0x7ba   : >> { %v2522_v10 = vpop.f32.mrb[76].mxu0 }
 0x7bb   : >> { %v2538_v20 = vadd.f32 %v2522_v10, %v2336_v42  ;;  %v18059_v55 = vpop.f32.mrb[77].mxu0 }
 0x7be   : >> { %v2527_v22 = vpop.f32.mrb[78].mxu0 }
 0x7bf   : >> { %v2539_v24 = vadd.f32 %v2527_v22, %v2337_v46  ;;  %v18062_v26 = vpop.f32.mrb[79].mxu0 }
 0x7c2   : >> { %v2532_v34 = vpop.f32.mrb[80].mxu0 }
 0x7c3   : >> { %v2540_v12 = vadd.f32 %v2532_v34, %v2338_v51  ;;  %v18065_v56 = vpop.f32.mrb[81].mxu0 }
 0x7c8   : >> { %v2607_v39 = vpop.f32.mrb[82].mxu0 }
 0x7c9   : >> { %v18090_v13 = vpop.f32.mrb[83].mxu0  ;;  %18106 = vmatmul.mubr.msk.f32.vlgmr.msra.gmra.mrb[78].mxu1 %vm1063_vm7, %v2607_v39 }
 0x7ca   : >> { %18108 = vmatprep.mubr.msk.f32.mxu1 %vm21797_vm4, %v21798_v3 }
 0x7cc   : >> { %v2612_v28 = vpop.f32.mrb[84].mxu0 }
 0x7cd   : >> { %v18093_v44 = vpop.f32.mrb[85].mxu0  ;;  %18109 = vmatmul.mubr.msk.f32.gmra.mrb[80].mxu1 %vm1063_vm7, %v2612_v28 }
 0x7ce   : >> { %18111 = vmatprep.mubr.msk.f32.mxu1 %vm21797_vm4, %v21798_v3 }
 0x7d0   : >> { %v2617_v49 = vpop.f32.mrb[86].mxu0 }
 0x7d1   : >> { %v18096_v62 = vpop.f32.mrb[87].mxu0  ;;  %18112 = vmatmul.mubr.msk.f32.gmra.mrb[82].mxu1 %vm1063_vm7, %v2617_v49 }
 0x7d2   : >> { %18114 = vmatprep.mubr.msk.f32.mxu1 %vm21797_vm4, %v21798_v3 }
 0x7d4   : >> { %v2622_v15 = vpop.f32.mrb[88].mxu0 }
 0x7d5   : >> { %v18099_v18 = vpop.f32.mrb[89].mxu0  ;;  %18115 = vmatmul.mubr.msk.f32.gmra.mrb[84].mxu1 %vm1063_vm7, %v2622_v15 }
 0x7d6   : >> { %18117 = vmatprep.mubr.msk.f32.mxu1 %vm21797_vm4, %v21798_v3 }
 0x7d8   : >> { %v2627_v19 = vpop.f32.mrb[90].mxu0 }
 0x7d9   : >> { %18118 = vmatmul.mubr.msk.f32.gmra.mrb[86].mxu1 %vm1063_vm7, %v2627_v19  ;;  %v18102_v32 = vpop.f32.mrb[91].mxu0 }
 0x7da   : >> { %18130 = vmatprep.mubr.msk.f32.mxu1 %vm2766_vm8, %v2760_v33 }
 0x89c   : >> { %v2714_v8 = vpop.f32.mrb[78].mxu1 }
 0x89d   : >> { %v2738_v59 = vadd.f32 %v2714_v8, %v2536_v53  ;;  %v18107_v16 = vpop.f32.mrb[79].mxu1 }
 0x89f   : >> { %v2750_v3 = vadd.f32 %v15590_v31, %v2738_v59 }
 0x8a0   : >> { %v2719_v35 = vpop.f32.mrb[80].mxu1 }
 0x8a1   : >> { %v2739_v11 = vadd.f32 %v2719_v35, %v2537_v61  ;;  %v18110_v14 = vpop.f32.mrb[81].mxu1  ;;  %v2755_v21 = vmax.f32 %v2750_v3, 0.0 }
 0x8a3   : >> { %v2751_v17 = vadd.f32 %v15590_v31, %v2739_v11 }
 0x8a4   : >> { %v2724_v30 = vpop.f32.mrb[82].mxu1 }
 0x8a5   : >> { %v2756_v23 = vmax.f32 %v2751_v17, 0.0  ;;  %v2740_v29 = vadd.f32 %v2724_v30, %v2538_v20  ;;  %v18113_v36 = vpop.f32.mrb[83].mxu1 }
 0x8a7   : >> { %v20380_v25 = vpack.c.bf16 %v2756_v23, %v2755_v21  ;;  %v2752_v40 = vadd.f32 %v15590_v31, %v2740_v29 }
 0x8a8   : >> { %v2729_v38 = vpop.f32.mrb[84].mxu1 }
 0x8a9   : >> { %v2741_v41 = vadd.f32 %v2729_v38, %v2539_v24  ;;  %v18116_v42 = vpop.f32.mrb[85].mxu1  ;;  %20381 = vmatprep.subr.bf16.mxu1 %v20380_v25  ;;  %v2757_v46 = vmax.f32 %v2752_v40, 0.0 }
 0x8aa   : >> { %20383 = vmatpush3.bf16.msra.mxu1 %v20380_v25 }
 0x8ab   : >> { %v2753_v45 = vadd.f32 %v15590_v31, %v2741_v41 }
 0x8ac   : >> { %v2734_v27 = vpop.f32.mrb[86].mxu1 }
 0x8ad   : >> { %v2758_v47 = vmax.f32 %v2753_v45, 0.0  ;;  %v2742_v48 = vadd.f32 %v2734_v27, %v2540_v12  ;;  %v18119_v51 = vpop.f32.mrb[87].mxu1 }
 0x8af   : >> { %v2754_v57 = vadd.f32 %v15590_v31, %v2742_v48  ;;  %v20384_v58 = vpack.c.bf16 %v2758_v47, %v2757_v46 }
 0x8b1   : >> { %v2759_v60 = vmax.f32 %v2754_v57, 0.0  ;;  %20385 = vmatprep.subr.bf16.mxu1 %v20384_v58 }
 0x8b2   : >> { %20387 = vmatpush3.bf16.msra.mxu1 %v20384_v58 }
 0x8b3   : >> { %18128 = vmatprep.subr.mxu1 %v2759_v60 }
 0x8b6   : >> { %18129 = vmatpush3.msra.mxu1 %v2759_v60 }
 0x8b7   : >> { %18131 = vmatmul.mubr.msk.f32.vlgmr.msra.gmra.mrb[88].mxu1 %vm2766_vm8, %v2761_v63 }
 0x8b8   : >> { %18133 = vmatprep.mubr.msk.f32.mxu1 %vm2766_vm8, %v2762_v0 }
 0x8bb   : >> { %18134 = vmatmul.mubr.msk.f32.gmra.mrb[90].mxu1 %vm2766_vm8, %v2763_v5 }
 0x8bc   : >> { %18136 = vmatprep.mubr.msk.f32.mxu1 %vm2766_vm8, %v2764_v6 }
 0x8bf   : >> { %18137 = vmatmul.mubr.msk.f32.gmra.mrb[92].mxu1 %vm2766_vm8, %v2765_v37 }
 0x98a   : >> { %v18132_v7 = vpop.f32.mrb[88].mxu1 }
 0x98b   : >> { %15598 = vst.msk [vmem:[%s15386_s30 + $0x38] sm:$0xff] %vm642_vm0, %v18132_v7  ;;  %v2851_v43 = vpop.f32.mrb[89].mxu1 }
 0x98c   : >> { %15597 = vst.msk [vmem:[%s15386_s30 + $0x30] sm:$0xff] %vm642_vm0, %v2851_v43 }
 0x98e   : >> { %v18135_v9 = vpop.f32.mrb[90].mxu1  ;;  %818 = sbr.rel (!%p816_p4) target bundleno = 94 (0x5e), region = 244 }
 0x98f   : >> { %15600 = vst.msk [vmem:[%s15386_s30 + $0x48] sm:$0xff] %vm642_vm0, %v18135_v9  ;;  %v2861_v2 = vpop.f32.mrb[91].mxu1 }
 0x990   : >> { %15599 = vst.msk [vmem:[%s15386_s30 + $0x40] sm:$0xff] %vm642_vm0, %v2861_v2 }
 0x992   : >> { %v18138_v52 = vpop.f32.mrb[92].mxu1 }
 0x993   : >> { %15602 = vst.msk [vmem:[%s15386_s30 + $0x58] sm:$0x3] %vm648_vm1, %v18138_v52  ;;  %v2871_v53 = vpop.f32.mrb[93].mxu1 }
 0x994   : >> { %15601 = vst.msk [vmem:[%s15386_s30 + $0x50] sm:$0xff] %vm642_vm0, %v2871_v53 }
 0x995 LB: >> { %v21799_v54 = vmov 0.0|0.0   ;;  %s15604_s21 = smul.u32 96, %s21793_s0  ;;  %vm21800_vm9 = vmmov 0   ;;  %v21801_v50 = vmov 0.0   ;;  %vm21802_vm10 = vmmov 1   ;;  %v15616_v56 = vld [vmem:[%s25969_s9 + $0x10] sm:$0xff]  ;;  %s21793_s0 = sphi %s22978_s0, %s2894_s0  }
 0x996   : >> { %20388 = vmatprep.subr.bf16.mxu0 %v21799_v54  ;;  %20398 = vmatprep.subr.bf16.mxu1 %v21799_v54  ;;  %vm23005_vm11 = vmpackc.low %vm855_vm5, %vm21802_vm10  ;;  %v15617_v39 = vld [vmem:[%s25969_s9 + $0x18] sm:$0xff]  ;;  %v3001_v13 = vld [vmem:[%s25969_s9] sm:$0xff]  ;;  %s25995_s19 = sld [smem:[#allocation8_spill]]  ;;  %vm2907_vm12 = vcmask 343040   ;;  %vm4565_vm13 = vcmask 1043456   ;;  %vm4555_vm14 = vcmask 162816  }
 0x997   : >> { %18151 = vmatprep.mubr.msk.f32.mxu0 %vm21800_vm9, %v21801_v50  ;;  %18172 = vmatprep.mubr.msk.f32.mxu1 %vm21800_vm9, %v21801_v50  ;;  %s22990_s1 = scalar_lea.vmem [#allocation2], %s15604_s21  ;;  %v3002_v28 = vld [vmem:[%s25969_s9 + $0x8] sm:$0xff]  ;;  %v20409_v62 = vpack.c.bf16 %v15617_v39, %v15616_v56  ;;  %v15631_v7 = vld [vmem:[%s25969_s9 + $0x20] sm:$0xff] }
 0x998   : >> { %v20412_v15 = vpack.c.bf16 %v3002_v28, %v3001_v13  ;;  %v15632_v43 = vld [vmem:[%s25969_s9 + $0x28] sm:$0xff] }
 0x999   : >> { %v20425_v9 = vpack.c.bf16 %v15632_v43, %v15631_v7 }
 0x99b   : >> { %v2898_v61 = vld [vmem:[%s22990_s1] sm:$0xff]  ;;  %v2899_v4 = vld [vmem:[%s22990_s1 + $0x8] sm:$0xff]  ;;  %v2900_v10 = vld [vmem:[%s22990_s1 + $0x10] sm:$0xff] }
 0x99c   : >> { %v20389_v20 = vpack.c.bf16 %v2899_v4, %v2898_v61  ;;  %v2901_v55 = vld [vmem:[%s22990_s1 + $0x18] sm:$0xff]  ;;  %v2902_v24 = vld [vmem:[%s22990_s1 + $0x20] sm:$0xff]  ;;  %v2903_v26 = vld [vmem:[%s22990_s1 + $0x28] sm:$0x3] }
 0x99d   : >> { %v20392_v22 = vpack.c.bf16 %v2901_v55, %v2900_v10  ;;  %v23000_v34 = vpack.c.bf16 %v2903_v26, %v2902_v24  ;;  %v23030_v44 = vld [vmem:[%s25995_s19] sm:$0xff]  ;;  %v23035_v49 = vld [vmem:[%s25995_s19 + $0x18] sm:$0xff]  ;;  %v23050_v18 = vld [vmem:[%s25995_s19 + $0x8] sm:$0xff] }
 0x99e   : >> { %20390 = vmatpush3.bf16.msra.mxu0 %v20389_v20  ;;  %20400 = vmatpush3.bf16.msra.mxu1 %v20389_v20  ;;  %v23055_v19 = vld [vmem:[%s25995_s19 + $0x20] sm:$0xff]  ;;  %v23070_v32 = vld [vmem:[%s25995_s19 + $0x10] sm:$0xf]  ;;  %v23075_v33 = vld [vmem:[%s25995_s19 + $0x28] sm:$0xf] }
 0x99f   : >> { %20391 = vmatprep.subr.bf16.mxu0 %v21799_v54  ;;  %20401 = vmatprep.subr.bf16.mxu1 %v21799_v54  ;;  %v15638_v17 = vld [vmem:[%s22990_s1 + $0x30] sm:$0xff]  ;;  %v15639_v30 = vld [vmem:[%s22990_s1 + $0x38] sm:$0xff]  ;;  %v15640_v40 = vld [vmem:[%s22990_s1 + $0x40] sm:$0xff] }
 0x9a0   : >> { %v23111_v25 = vld [vmem:[%s25995_s19 + $0x30] sm:$0xff]  ;;  %v20428_v38 = vpack.c.bf16 %v15639_v30, %v15638_v17  ;;  %v15641_v41 = vld [vmem:[%s22990_s1 + $0x48] sm:$0xff]  ;;  %v23125_v42 = vld [vmem:[%s25995_s19 + $0x38] sm:$0xff] }
 0x9a1   : >> { %v20431_v45 = vpack.c.bf16 %v15641_v41, %v15640_v40  ;;  %v15642_v27 = vld [vmem:[%s22990_s1 + $0x50] sm:$0xff]  ;;  %v15643_v46 = vld [vmem:[%s22990_s1 + $0x58] sm:$0x3]  ;;  %v23137_v47 = vld [vmem:[%s25995_s19 + $0x40] sm:$0xf] }
 0x9a2   : >> { %20393 = vmatpush3.bf16.msra.mxu0 %v20392_v22  ;;  %20403 = vmatpush3.bf16.msra.mxu1 %v20392_v22  ;;  %v20434_v48 = vpack.c.bf16 %v15643_v46, %v15642_v27  ;;  %v15673_v51 = vld [vmem:[%s22990_s1 + $0x60] sm:$0xff]  ;;  %v15674_v57 = vld [vmem:[%s22990_s1 + $0x68] sm:$0xff]  ;;  %v15675_v60 = vld [vmem:[%s22990_s1 + $0x70] sm:$0xff] }
 0x9a3   : >> { %20394 = vmatprep.subr.bf16.mxu0 %v21799_v54  ;;  %20404 = vmatprep.subr.bf16.mxu1 %v21799_v54  ;;  %v23182_v58 = vpack.c.bf16 %v15674_v57, %v15673_v51  ;;  %v15676_v63 = vld [vmem:[%s22990_s1 + $0x78] sm:$0xff]  ;;  %v15677_v5 = vld [vmem:[%s22990_s1 + $0x80] sm:$0xff]  ;;  %v15678_v6 = vld [vmem:[%s22990_s1 + $0x88] sm:$0x3]  ;;  %s15398_s1 = smul.u32 24, %s21793_s0  ;;  %s2894_s0 = sadd.s32 1, %s21793_s0  }
 0x9a4   : >> { %v23192_v0 = vpack.c.bf16 %v15676_v63, %v15675_v60  ;;  %v23202_v37 = vpack.c.bf16 %v15678_v6, %v15677_v5  ;;  %v15648_v26 = vld [vmem:[%s25969_s9 + $0x30] sm:$0xff]  ;;  %v15667_v17 = vld [vmem:[%s25969_s9 + $0x58] sm:$0xff]  ;;  %v15683_v40 = vld [vmem:[%s25969_s9 + $0x60] sm:$0xff]  ;;  %p2891_p5 = scmp.ge.s32.totalorder %s2894_s0, 10  }
 0x9a5   : >> { %v15684_v41 = vld [vmem:[%s25969_s9 + $0x68] sm:$0xff]  ;;  %v15692_v60 = vld [vmem:[%s25969_s9 + $0x70] sm:$0xff]  ;;  %v15693_v63 = vld [vmem:[%s25969_s9 + $0x78] sm:$0xff]  ;;  %s15399_s25 = scalar_lea.vmem [#allocation3], %s15398_s1  ;;  %vm4660_vm15 = vcmask (%p2891_p5), 179200   ;;  %s25996_s28 = sld [smem:[#allocation9_spill]] (%p2891_p5) }
 0x9a6   : >> { %20397 = vmatpush3.bf16.msk.msra.mxu0 %vm23005_vm11, %v23000_v34  ;;  %20407 = vmatpush3.bf16.msk.msra.mxu1 %vm23005_vm11, %v23000_v34  ;;  %v20477_v27 = vpack.c.bf16 %v15684_v41, %v15683_v40  ;;  %v20490_v7 = vpack.c.bf16 %v15693_v63, %v15692_v60  ;;  %vm4667_vm1 = vcmask (%p2891_p5), 1045504   ;;  %s25997_s21 = sld [smem:[#allocation6_spill]] (%p2891_p5)  ;;  %vm15345_vm4 = vcmask (%p2891_p5), 0   ;;  %s25999_s2 = scalar_lea.vmem (%p2891_p5), %s25980_s20, %s26001_s24 }
 0x9a7   : >> { %20408 = vmatprep.subr.bf16.mxu0 %v21799_v54  ;;  %20411 = vmatprep.subr.bf16.mxu1 %v21799_v54 }
 0x9a9   : >> { %18152 = vmatmul.mubr.msk.f32.vlgmr.msra.gmra.mrb[0].mxu0 %vm2907_vm12, %v23030_v44  ;;  %18173 = vmatmul.mubr.msk.f32.vlgmr.msra.gmra.mrb[0].mxu1 %vm2907_vm12, %v23035_v49 }
 0x9aa   : >> { %18154 = vmatprep.mubr.msk.f32.mxu0 %vm21800_vm9, %v21801_v50  ;;  %18175 = vmatprep.mubr.msk.f32.mxu1 %vm21800_vm9, %v21801_v50 }
 0x9ab   : >> { %20410 = vmatpush3.bf16.msra.mxu0 %v20409_v62  ;;  %20413 = vmatpush3.bf16.msra.mxu1 %v20412_v15 }
 0x9ac   : >> { %20414 = vmatprep.subr.bf16.mxu0 %v21799_v54  ;;  %20424 = vmatprep.subr.bf16.mxu1 %v21799_v54  ;;  %s25998_s22 = scalar_lea.vmem (%p2891_p5), %s25997_s21, %s26001_s24 }
 0x9ad   : >> { %18155 = vmatmul.mubr.msk.f32.gmra.mrb[2].mxu0 %vm2907_vm12, %v23050_v18  ;;  %18176 = vmatmul.mubr.msk.f32.gmra.mrb[2].mxu1 %vm2907_vm12, %v23055_v19 }
 0x9ae   : >> { %18157 = vmatprep.mubr.msk.f32.mxu0 %vm21800_vm9, %v21801_v50  ;;  %18178 = vmatprep.mubr.msk.f32.mxu1 %vm21800_vm9, %v21801_v50 }
 0x9b1   : >> { %18158 = vmatmul.mubr.msk.f32.gmra.mrb[4].mxu0 %vm2907_vm12, %v23070_v32  ;;  %18179 = vmatmul.mubr.msk.f32.gmra.mrb[4].mxu1 %vm2907_vm12, %v23075_v33 }
 0x9b2   : >> { %18185 = vmatprep.mubr.msk.f32.mxu0 %vm21800_vm9, %v21801_v50  ;;  %18198 = vmatprep.mubr.msk.f32.mxu1 %vm21800_vm9, %v21801_v50 }
 0xa7c   : >> { %v2987_v8 = vpop.f32.mrb[0].mxu0  ;;  %v3082_v59 = vpop.f32.mrb[0].mxu1 }
 0xa7d   : >> { %v18174_v16 = vpop.f32.mrb[1].mxu1  ;;  %18186 = vmatmul.mubr.msk.f32.vlgmr.msra.gmra.mrb[6].mxu0 %vm642_vm0, %v3082_v59  ;;  %18199 = vmatmul.mubr.msk.f32.vlgmr.msra.gmra.mrb[6].mxu1 %vm642_vm0, %v2987_v8  ;;  %v18153_v31 = vpop.f32.mrb[1].mxu0 }
 0xa7e   : >> { %20416 = vmatpush3.bf16.msra.mxu0 %v20389_v20  ;;  %18188 = vmatprep.mubr.msk.f32.mxu0 %vm21800_vm9, %v21801_v50 }
 0xa7f   : >> { %18201 = vmatprep.mubr.msk.f32.mxu1 %vm21800_vm9, %v21801_v50  ;;  %20417 = vmatprep.subr.bf16.mxu0 %v21799_v54 }
 0xa80   : >> { %v2992_v35 = vpop.f32.mrb[2].mxu0  ;;  %v3087_v3 = vpop.f32.mrb[2].mxu1  ;;  %20426 = vmatpush3.bf16.msra.mxu1 %v20425_v9 }
 0xa81   : >> { %v18177_v11 = vpop.f32.mrb[3].mxu1  ;;  %18189 = vmatmul.mubr.msk.f32.gmra.mrb[8].mxu0 %vm642_vm0, %v3087_v3  ;;  %18202 = vmatmul.mubr.msk.f32.gmra.mrb[8].mxu1 %vm642_vm0, %v2992_v35  ;;  %v18156_v14 = vpop.f32.mrb[3].mxu0 }
 0xa82   : >> { %20419 = vmatpush3.bf16.msra.mxu0 %v20392_v22  ;;  %18191 = vmatprep.mubr.msk.f32.mxu0 %vm21800_vm9, %v21801_v50  ;;  %v15666_v14 = vld [vmem:[%s25969_s9 + $0x50] sm:$0xff] }
 0xa83   : >> { %18204 = vmatprep.mubr.msk.f32.mxu1 %vm21800_vm9, %v21801_v50  ;;  %20420 = vmatprep.subr.bf16.mxu0 %v21799_v54 }
 0xa84   : >> { %v2997_v21 = vpop.f32.mrb[4].mxu0  ;;  %v3092_v23 = vpop.f32.mrb[4].mxu1  ;;  %20437 = vmatprep.subr.bf16.mxu1 %v21799_v54 }
 0xa85   : >> { %v18180_v29 = vpop.f32.mrb[5].mxu1  ;;  %18192 = vmatmul.mubr.msk.f32.gmra.mrb[10].mxu0 %vm642_vm0, %v3092_v23  ;;  %18205 = vmatmul.mubr.msk.f32.gmra.mrb[10].mxu1 %vm642_vm0, %v2997_v21  ;;  %v18159_v36 = vpop.f32.mrb[5].mxu0  ;;  %v20464_v23 = vpack.c.bf16 %v15667_v17, %v15666_v14 }
 0xa86   : >> { %20423 = vmatpush3.bf16.msk.msra.mxu0 %vm23005_vm11, %v23000_v34  ;;  %18219 = vmatprep.mubr.msk.f32.mxu0 %vm21800_vm9, %v21801_v50  ;;  %v15649_v34 = vld [vmem:[%s25969_s9 + $0x38] sm:$0xff] }
 0xa87   : >> { %20427 = vmatprep.subr.bf16.mxu0 %v21799_v54  ;;  %18232 = vmatprep.mubr.msk.f32.mxu1 %vm21800_vm9, %v21801_v50 }
 0xa89   : >> { %18220 = vmatmul.mubr.msk.f32.vlgmr.msra.gmra.mrb[12].mxu0 %vm2907_vm12, %v23111_v25 }
 0xa8a   : >> { %20429 = vmatpush3.bf16.msra.mxu0 %v20428_v38  ;;  %18222 = vmatprep.mubr.msk.f32.mxu0 %vm21800_vm9, %v21801_v50 }
 0xa8b   : >> { %20430 = vmatprep.subr.bf16.mxu0 %v21799_v54 }
 0xa8d   : >> { %18223 = vmatmul.mubr.msk.f32.gmra.mrb[14].mxu0 %vm2907_vm12, %v23125_v42 }
 0xa8e   : >> { %20432 = vmatpush3.bf16.msra.mxu0 %v20431_v45  ;;  %18225 = vmatprep.mubr.msk.f32.mxu0 %vm21800_vm9, %v21801_v50 }
 0xa8f   : >> { %20433 = vmatprep.subr.bf16.mxu0 %v21799_v54 }
 0xa91   : >> { %18226 = vmatmul.mubr.msk.f32.gmra.mrb[16].mxu0 %vm2907_vm12, %v23137_v47 }
 0xa92   : >> { %20436 = vmatpush3.bf16.msk.msra.mxu0 %vm23005_vm11, %v20434_v48  ;;  %18253 = vmatprep.mubr.msk.f32.mxu0 %vm21800_vm9, %v21801_v50 }
 0xa93   : >> { %20440 = vmatprep.subr.bf16.mxu0 %v21799_v54 }
 0xa95   : >> { %18254 = vmatmul.mubr.msk.f32.vlgmr.msra.gmra.mrb[18].mxu0 %vm2907_vm12, %v23030_v44 }
 0xa96   : >> { %20442 = vmatpush3.bf16.msra.mxu0 %v20428_v38  ;;  %18256 = vmatprep.mubr.msk.f32.mxu0 %vm21800_vm9, %v21801_v50 }
 0xa97   : >> { %20443 = vmatprep.subr.bf16.mxu0 %v21799_v54 }
 0xa99   : >> { %18257 = vmatmul.mubr.msk.f32.gmra.mrb[20].mxu0 %vm2907_vm12, %v23050_v18 }
 0xa9a   : >> { %20445 = vmatpush3.bf16.msra.mxu0 %v20431_v45  ;;  %18259 = vmatprep.mubr.msk.f32.mxu0 %vm21800_vm9, %v21801_v50 }
 0xa9b   : >> { %20446 = vmatprep.subr.bf16.mxu0 %v21799_v54 }
 0xa9d   : >> { %18260 = vmatmul.mubr.msk.f32.gmra.mrb[22].mxu0 %vm2907_vm12, %v23070_v32 }
 0xa9e   : >> { %20449 = vmatpush3.bf16.msk.msra.mxu0 %vm23005_vm11, %v20434_v48  ;;  %18287 = vmatprep.mubr.msk.f32.mxu0 %vm21800_vm9, %v21801_v50 }
 0xa9f   : >> { %20453 = vmatprep.subr.bf16.mxu0 %v21799_v54 }
 0xaa1   : >> { %18288 = vmatmul.mubr.msk.f32.vlgmr.msra.gmra.mrb[24].mxu0 %vm2907_vm12, %v23035_v49 }
 0xaa2   : >> { %20455 = vmatpush3.bf16.msra.mxu0 %v20428_v38  ;;  %18290 = vmatprep.mubr.msk.f32.mxu0 %vm21800_vm9, %v21801_v50 }
 0xaa3   : >> { %20456 = vmatprep.subr.bf16.mxu0 %v21799_v54 }
 0xaa5   : >> { %18291 = vmatmul.mubr.msk.f32.gmra.mrb[26].mxu0 %vm2907_vm12, %v23055_v19 }
 0xaa6   : >> { %20458 = vmatpush3.bf16.msra.mxu0 %v20431_v45  ;;  %18293 = vmatprep.mubr.msk.f32.mxu0 %vm21800_vm9, %v21801_v50 }
 0xaa7   : >> { %20459 = vmatprep.subr.bf16.mxu0 %v21799_v54 }
 0xaa9   : >> { %18294 = vmatmul.mubr.msk.f32.gmra.mrb[28].mxu0 %vm2907_vm12, %v23075_v33 }
 0xaaa   : >> { %20462 = vmatpush3.bf16.msk.msra.mxu0 %vm23005_vm11, %v20434_v48  ;;  %18321 = vmatprep.mubr.msk.f32.mxu0 %vm21800_vm9, %v21801_v50 }
 0xaab   : >> { %20466 = vmatprep.subr.bf16.mxu0 %v21799_v54 }
 0xaad   : >> { %18322 = vmatmul.mubr.msk.f32.vlgmr.msra.gmra.mrb[30].mxu0 %vm2907_vm12, %v23111_v25 }
 0xaae   : >> { %20468 = vmatpush3.bf16.msra.mxu0 %v23182_v58  ;;  %18324 = vmatprep.mubr.msk.f32.mxu0 %vm21800_vm9, %v21801_v50 }
 0xaaf   : >> { %20469 = vmatprep.subr.bf16.mxu0 %v21799_v54 }
 0xab1   : >> { %18325 = vmatmul.mubr.msk.f32.gmra.mrb[32].mxu0 %vm2907_vm12, %v23125_v42 }
 0xab2   : >> { %20471 = vmatpush3.bf16.msra.mxu0 %v23192_v0  ;;  %18327 = vmatprep.mubr.msk.f32.mxu0 %vm21800_vm9, %v21801_v50 }
 0xab3   : >> { %20472 = vmatprep.subr.bf16.mxu0 %v21799_v54 }
 0xab5   : >> { %18328 = vmatmul.mubr.msk.f32.gmra.mrb[34].mxu0 %vm2907_vm12, %v23137_v47 }
 0xab6   : >> { %20475 = vmatpush3.bf16.msk.msra.mxu0 %vm23005_vm11, %v23202_v37  ;;  %18355 = vmatprep.mubr.msk.f32.mxu0 %vm21800_vm9, %v21801_v50 }
 0xab7   : >> { %20479 = vmatprep.subr.bf16.mxu0 %v21799_v54 }
 0xab9   : >> { %18356 = vmatmul.mubr.msk.f32.vlgmr.msra.gmra.mrb[36].mxu0 %vm2907_vm12, %v23030_v44 }
 0xaba   : >> { %20481 = vmatpush3.bf16.msra.mxu0 %v23182_v58  ;;  %18358 = vmatprep.mubr.msk.f32.mxu0 %vm21800_vm9, %v21801_v50 }
 0xabb   : >> { %20482 = vmatprep.subr.bf16.mxu0 %v21799_v54 }
 0xabd   : >> { %18359 = vmatmul.mubr.msk.f32.gmra.mrb[38].mxu0 %vm2907_vm12, %v23050_v18 }
 0xabe   : >> { %20484 = vmatpush3.bf16.msra.mxu0 %v23192_v0  ;;  %18361 = vmatprep.mubr.msk.f32.mxu0 %vm21800_vm9, %v21801_v50 }
 0xabf   : >> { %20485 = vmatprep.subr.bf16.mxu0 %v21799_v54 }
 0xac1   : >> { %18362 = vmatmul.mubr.msk.f32.gmra.mrb[40].mxu0 %vm2907_vm12, %v23070_v32  ;;  %v15657_v32 = vld [vmem:[%s25969_s9 + $0x40] sm:$0xff] }
 0xac2   : >> { %20488 = vmatpush3.bf16.msk.msra.mxu0 %vm23005_vm11, %v23202_v37  ;;  %18389 = vmatprep.mubr.msk.f32.mxu0 %vm21800_vm9, %v21801_v50 }
 0xac3   : >> { %20492 = vmatprep.subr.bf16.mxu0 %v21799_v54 }
 0xac5   : >> { %18390 = vmatmul.mubr.msk.f32.vlgmr.msra.gmra.mrb[42].mxu0 %vm2907_vm12, %v23035_v49  ;;  %v20438_v49 = vpack.c.bf16 %v15649_v34, %v15648_v26  ;;  %v15702_v26 = vld [vmem:[%s25969_s9 + $0x88] sm:$0xff] }
 0xac6   : >> { %18392 = vmatprep.mubr.msk.f32.mxu0 %vm21800_vm9, %v21801_v50  ;;  %20494 = vmatpush3.bf16.msra.mxu0 %v23182_v58 }
 0xac7   : >> { %20495 = vmatprep.subr.bf16.mxu0 %v21799_v54 }
 0xac9   : >> { %18393 = vmatmul.mubr.msk.f32.gmra.mrb[44].mxu0 %vm2907_vm12, %v23055_v19 }
 0xaca   : >> { %18395 = vmatprep.mubr.msk.f32.mxu0 %vm21800_vm9, %v21801_v50  ;;  %20497 = vmatpush3.bf16.msra.mxu0 %v23192_v0 }
 0xacb   : >> { %20498 = vmatprep.subr.bf16.mxu0 %v21799_v54 }
 0xacd   : >> { %18396 = vmatmul.mubr.msk.f32.gmra.mrb[46].mxu0 %vm2907_vm12, %v23075_v33  ;;  %v15658_v33 = vld [vmem:[%s25969_s9 + $0x48] sm:$0xff] }
 0xace   : >> { %20501 = vmatpush3.bf16.msk.msra.mxu0 %vm23005_vm11, %v23202_v37  ;;  %18423 = vmatprep.mubr.msk.f32.mxu0 %vm21800_vm9, %v21801_v50  ;;  %v20451_v16 = vpack.c.bf16 %v15658_v33, %v15657_v32 }
 0xacf   : >> { %20505 = vmatprep.subr.bf16.mxu0 %v21799_v54 }
 0xad1   : >> { %18424 = vmatmul.mubr.msk.f32.vlgmr.msra.gmra.mrb[48].mxu0 %vm2907_vm12, %v23111_v25 }
 0xad2   : >> { %18426 = vmatprep.mubr.msk.f32.mxu0 %vm21800_vm9, %v21801_v50 }
 0xad5   : >> { %18427 = vmatmul.mubr.msk.f32.gmra.mrb[50].mxu0 %vm2907_vm12, %v23125_v42 }
 0xad6   : >> { %18451 = vmatprep.mubr.msk.f32.mxu0 %vm21800_vm9, %v21801_v50 }
 0xb50   : >> { %v3174_v2 = vpop.f32.mrb[6].mxu0  ;;  %v3263_v52 = vpop.f32.mrb[6].mxu1 }
 0xb51   : >> { %v23268_v53 = vadd.f32 %v3263_v52, %v3174_v2  ;;  %v18187_v61 = vpop.f32.mrb[7].mxu0  ;;  %v18200_v4 = vpop.f32.mrb[7].mxu1 }
 0xb54   : >> { %v3179_v10 = vpop.f32.mrb[8].mxu0  ;;  %v3268_v20 = vpop.f32.mrb[8].mxu1 }
 0xb55   : >> { %v23270_v55 = vadd.f32 %v3268_v20, %v3179_v10  ;;  %v18190_v22 = vpop.f32.mrb[9].mxu0  ;;  %v18203_v24 = vpop.f32.mrb[9].mxu1 }
 0xb58   : >> { %v3184_v56 = vpop.f32.mrb[10].mxu0  ;;  %v3273_v39 = vpop.f32.mrb[10].mxu1 }
 0xb59   : >> { %v23278_v13 = vadd.f32 %v3273_v39, %v3184_v56  ;;  %v18193_v28 = vpop.f32.mrb[11].mxu0  ;;  %v18206_v44 = vpop.f32.mrb[11].mxu1 }
 0xb5c   : >> { %v3356_v62 = vpop.f32.mrb[12].mxu0 }
 0xb5d   : >> { %v18221_v15 = vpop.f32.mrb[13].mxu0  ;;  %18233 = vmatmul.mubr.msk.f32.vlgmr.msra.gmra.mrb[12].mxu1 %vm642_vm0, %v3356_v62 }
 0xb5e   : >> { %18235 = vmatprep.mubr.msk.f32.mxu1 %vm21800_vm9, %v21801_v50  ;;  %20439 = vmatpush3.bf16.msra.mxu1 %v20438_v49 }
 0xb5f   : >> { %20450 = vmatprep.subr.bf16.mxu1 %v21799_v54 }
 0xb60   : >> { %v3361_v18 = vpop.f32.mrb[14].mxu0 }
 0xb61   : >> { %v18224_v19 = vpop.f32.mrb[15].mxu0  ;;  %18236 = vmatmul.mubr.msk.f32.gmra.mrb[14].mxu1 %vm642_vm0, %v3361_v18 }
 0xb62   : >> { %18238 = vmatprep.mubr.msk.f32.mxu1 %vm21800_vm9, %v21801_v50 }
 0xb64   : >> { %v3366_v8 = vpop.f32.mrb[16].mxu0 }
 0xb65   : >> { %v18227_v59 = vpop.f32.mrb[17].mxu0  ;;  %18239 = vmatmul.mubr.msk.f32.gmra.mrb[16].mxu1 %vm642_vm0, %v3366_v8 }
 0xb66   : >> { %18266 = vmatprep.mubr.msk.f32.mxu1 %vm21800_vm9, %v21801_v50 }
 0xb68   : >> { %v3543_v31 = vpop.f32.mrb[18].mxu0 }
 0xb69   : >> { %v18255_v35 = vpop.f32.mrb[19].mxu0  ;;  %18267 = vmatmul.mubr.msk.f32.vlgmr.msra.gmra.mrb[18].mxu1 %vm642_vm0, %v3543_v31 }
 0xb6a   : >> { %18269 = vmatprep.mubr.msk.f32.mxu1 %vm21800_vm9, %v21801_v50  ;;  %20452 = vmatpush3.bf16.msra.mxu1 %v20451_v16 }
 0xb6b   : >> { %20463 = vmatprep.subr.bf16.mxu1 %v21799_v54 }
 0xb6c   : >> { %v3548_v3 = vpop.f32.mrb[20].mxu0 }
 0xb6d   : >> { %v18258_v11 = vpop.f32.mrb[21].mxu0  ;;  %18270 = vmatmul.mubr.msk.f32.gmra.mrb[20].mxu1 %vm642_vm0, %v3548_v3 }
 0xb6e   : >> { %18272 = vmatprep.mubr.msk.f32.mxu1 %vm21800_vm9, %v21801_v50 }
 0xb70   : >> { %v3553_v30 = vpop.f32.mrb[22].mxu0 }
 0xb71   : >> { %v18261_v21 = vpop.f32.mrb[23].mxu0  ;;  %18273 = vmatmul.mubr.msk.f32.gmra.mrb[22].mxu1 %vm642_vm0, %v3553_v30 }
 0xb72   : >> { %18300 = vmatprep.mubr.msk.f32.mxu1 %vm21800_vm9, %v21801_v50 }
 0xb74   : >> { %v3718_v29 = vpop.f32.mrb[24].mxu0 }
 0xb75   : >> { %v18289_v36 = vpop.f32.mrb[25].mxu0  ;;  %18301 = vmatmul.mubr.msk.f32.vlgmr.msra.gmra.mrb[24].mxu1 %vm642_vm0, %v3718_v29 }
 0xb76   : >> { %18303 = vmatprep.mubr.msk.f32.mxu1 %vm21800_vm9, %v21801_v50  ;;  %20465 = vmatpush3.bf16.msra.mxu1 %v20464_v23 }
 0xb77   : >> { %20476 = vmatprep.subr.bf16.mxu1 %v21799_v54 }
 0xb78   : >> { %v3723_v25 = vpop.f32.mrb[26].mxu0 }
 0xb79   : >> { %v18292_v38 = vpop.f32.mrb[27].mxu0  ;;  %18304 = vmatmul.mubr.msk.f32.gmra.mrb[26].mxu1 %vm642_vm0, %v3723_v25 }
 0xb7a   : >> { %18306 = vmatprep.mubr.msk.f32.mxu1 %vm21800_vm9, %v21801_v50 }
 0xb7c   : >> { %v3728_v42 = vpop.f32.mrb[28].mxu0 }
 0xb7d   : >> { %v18295_v45 = vpop.f32.mrb[29].mxu0  ;;  %18307 = vmatmul.mubr.msk.f32.gmra.mrb[28].mxu1 %vm642_vm0, %v3728_v42 }
 0xb7e   : >> { %18334 = vmatprep.mubr.msk.f32.mxu1 %vm21800_vm9, %v21801_v50 }
 0xb80   : >> { %v3893_v46 = vpop.f32.mrb[30].mxu0 }
 0xb81   : >> { %v18323_v48 = vpop.f32.mrb[31].mxu0  ;;  %18335 = vmatmul.mubr.msk.f32.vlgmr.msra.gmra.mrb[30].mxu1 %vm642_vm0, %v3893_v46 }
 0xb82   : >> { %18337 = vmatprep.mubr.msk.f32.mxu1 %vm21800_vm9, %v21801_v50  ;;  %20478 = vmatpush3.bf16.msra.mxu1 %v20477_v27 }
 0xb83   : >> { %20489 = vmatprep.subr.bf16.mxu1 %v21799_v54 }
 0xb84   : >> { %v3898_v51 = vpop.f32.mrb[32].mxu0 }
 0xb85   : >> { %v18326_v57 = vpop.f32.mrb[33].mxu0  ;;  %18338 = vmatmul.mubr.msk.f32.gmra.mrb[32].mxu1 %vm642_vm0, %v3898_v51 }
 0xb86   : >> { %18340 = vmatprep.mubr.msk.f32.mxu1 %vm21800_vm9, %v21801_v50 }
 0xb88   : >> { %v3903_v5 = vpop.f32.mrb[34].mxu0 }
 0xb89   : >> { %v18329_v6 = vpop.f32.mrb[35].mxu0  ;;  %18341 = vmatmul.mubr.msk.f32.gmra.mrb[34].mxu1 %vm642_vm0, %v3903_v5 }
 0xb8a   : >> { %18368 = vmatprep.mubr.msk.f32.mxu1 %vm21800_vm9, %v21801_v50 }
 0xb8c   : >> { %v4080_v43 = vpop.f32.mrb[36].mxu0 }
 0xb8d   : >> { %v18357_v9 = vpop.f32.mrb[37].mxu0  ;;  %18369 = vmatmul.mubr.msk.f32.vlgmr.msra.gmra.mrb[36].mxu1 %vm642_vm0, %v4080_v43 }
 0xb8e   : >> { %18371 = vmatprep.mubr.msk.f32.mxu1 %vm21800_vm9, %v21801_v50  ;;  %20491 = vmatpush3.bf16.msra.mxu1 %v20490_v7 }
 0xb8f   : >> { %21636 = vmatprep.subr.bf16.mxu1 %v21799_v54 }
 0xb90   : >> { %v4085_v2 = vpop.f32.mrb[38].mxu0 }
 0xb91   : >> { %v18360_v52 = vpop.f32.mrb[39].mxu0  ;;  %18372 = vmatmul.mubr.msk.f32.gmra.mrb[38].mxu1 %vm642_vm0, %v4085_v2 }
 0xb92   : >> { %18374 = vmatprep.mubr.msk.f32.mxu1 %vm21800_vm9, %v21801_v50 }
 0xb94   : >> { %v4090_v61 = vpop.f32.mrb[40].mxu0 }
 0xb95   : >> { %v18363_v4 = vpop.f32.mrb[41].mxu0  ;;  %18375 = vmatmul.mubr.msk.f32.gmra.mrb[40].mxu1 %vm642_vm0, %v4090_v61 }
 0xb96   : >> { %18402 = vmatprep.mubr.msk.f32.mxu1 %vm21800_vm9, %v21801_v50 }
 0xb98   : >> { %v4255_v10 = vpop.f32.mrb[42].mxu0 }
 0xb99   : >> { %v18391_v20 = vpop.f32.mrb[43].mxu0  ;;  %18403 = vmatmul.mubr.msk.f32.vlgmr.msra.gmra.mrb[42].mxu1 %vm642_vm0, %v4255_v10 }
 0xb9a   : >> { %21639 = vmatpush3.bf16.msra.mxu1 %v23182_v58  ;;  %18405 = vmatprep.mubr.msk.f32.mxu1 %vm21800_vm9, %v21801_v50  ;;  %v15701_v58 = vld [vmem:[%s25969_s9 + $0x80] sm:$0xff] }
 0xb9b   : >> { %21637 = vmatprep.subr.bf16.mxu1 %v21799_v54 }
 0xb9c   : >> { %v4260_v22 = vpop.f32.mrb[44].mxu0 }
 0xb9d   : >> { %v18394_v24 = vpop.f32.mrb[45].mxu0  ;;  %18406 = vmatmul.mubr.msk.f32.gmra.mrb[44].mxu1 %vm642_vm0, %v4260_v22 }
 0xb9e   : >> { %21640 = vmatpush3.bf16.msra.mxu1 %v23192_v0  ;;  %18408 = vmatprep.mubr.msk.f32.mxu1 %vm21800_vm9, %v21801_v50  ;;  %v20503_v0 = vpack.c.bf16 %v15702_v26, %v15701_v58 }
 0xb9f   : >> { %21638 = vmatprep.subr.bf16.mxu1 %v21799_v54 }
 0xba0   : >> { %v4265_v34 = vpop.f32.mrb[46].mxu0 }
 0xba1   : >> { %v18397_v56 = vpop.f32.mrb[47].mxu0  ;;  %18409 = vmatmul.mubr.msk.f32.gmra.mrb[46].mxu1 %vm642_vm0, %v4265_v34 }
 0xba2   : >> { %21641 = vmatpush3.bf16.msk.msra.mxu1 %vm23005_vm11, %v23202_v37  ;;  %18429 = vmatprep.mubr.msk.f32.mxu1 %vm21800_vm9, %v21801_v50 }
 0xba3   : >> { %20502 = vmatprep.subr.bf16.mxu1 %v21799_v54 }
 0xba4   : >> { %v4430_v39 = vpop.f32.mrb[48].mxu0 }
 0xba5   : >> { %18430 = vmatmul.mubr.msk.f32.vlgmr.msra.gmra.mrb[48].mxu1 %vm2907_vm12, %v23137_v47  ;;  %v18425_v28 = vpop.f32.mrb[49].mxu0 }
 0xba6   : >> { %20504 = vmatpush3.bf16.msra.mxu1 %v20503_v0  ;;  %18436 = vmatprep.mubr.msk.f32.mxu1 %vm21800_vm9, %v21801_v50  ;;  %v15706_v28 = vld [vmem:[%s25970_s10] ss:$0 sm:$0xff] }
 0xba8   : >> { %v4435_v44 = vpop.f32.mrb[50].mxu0 }
 0xba9   : >> { %18437 = vmatmul.mubr.msk.f32.vlgmr.msra.gmra.mrb[50].mxu1 %vm642_vm0, %v4430_v39  ;;  %v18428_v12 = vpop.f32.mrb[51].mxu0 }
 0xbaa   : >> { %18439 = vmatprep.mubr.msk.f32.mxu1 %vm21800_vm9, %v21801_v50 }
 0xbad   : >> { %18440 = vmatmul.mubr.msk.f32.gmra.mrb[52].mxu1 %vm642_vm0, %v4435_v44 }
 0xbae   : >> { %18442 = vmatprep.mubr.msk.f32.mxu1 %vm21800_vm9, %v21801_v50 }
 0xc30   : >> { %v3448_v54 = vpop.f32.mrb[12].mxu1 }
 0xc31   : >> { %v3462_v47 = vadd.f32 %v3448_v54, %v23268_v53  ;;  %v18234_v37 = vpop.f32.mrb[13].mxu1 }
 0xc34   : >> { %v3453_v49 = vpop.f32.mrb[14].mxu1 }
 0xc35   : >> { %v3463_v62 = vadd.f32 %v3453_v49, %v23270_v55  ;;  %v18237_v15 = vpop.f32.mrb[15].mxu1 }
 0xc38   : >> { %v3458_v18 = vpop.f32.mrb[16].mxu1 }
 0xc39   : >> { %v3464_v19 = vadd.f32 %v3458_v18, %v23278_v13  ;;  %v18240_v32 = vpop.f32.mrb[17].mxu1 }
 0xc3c   : >> { %v3635_v33 = vpop.f32.mrb[18].mxu1 }
 0xc3d   : >> { %v3649_v8 = vadd.f32 %v3635_v33, %v3462_v47  ;;  %v18268_v59 = vpop.f32.mrb[19].mxu1 }
 0xc3e   : >> { %v4552_v59 = vld [vmem:[%s25966_s6] sm:$0xff] }
 0xc40   : >> { %v3640_v16 = vpop.f32.mrb[20].mxu1 }
 0xc41   : >> { %v3650_v31 = vadd.f32 %v3640_v16, %v3463_v62  ;;  %v18271_v35 = vpop.f32.mrb[21].mxu1  ;;  %v4553_v16 = vld [vmem:[%s25966_s6 + $0x8] sm:$0xff] }
 0xc44   : >> { %v3645_v3 = vpop.f32.mrb[22].mxu1 }
 0xc45   : >> { %v3651_v11 = vadd.f32 %v3645_v3, %v3464_v19  ;;  %v18274_v14 = vpop.f32.mrb[23].mxu1 }
 0xc48   : >> { %v3810_v17 = vpop.f32.mrb[24].mxu1 }
 0xc49   : >> { %v3824_v53 = vadd.f32 %v3810_v17, %v3649_v8  ;;  %v18302_v30 = vpop.f32.mrb[25].mxu1 }
 0xc4c   : >> { %v3815_v21 = vpop.f32.mrb[26].mxu1 }
 0xc4d   : >> { %v3825_v23 = vadd.f32 %v3815_v21, %v3650_v31  ;;  %v18305_v55 = vpop.f32.mrb[27].mxu1  ;;  %v4554_v31 = vld [vmem:[%s25966_s6 + $0x10] sm:$0x3f] }
 0xc4e   : > { %v23423_v55 = vld [vmem:[%s25996_s28] sm:$0xff] (%p2891_p5) }
 0xc50   : >> { %v3820_v29 = vpop.f32.mrb[28].mxu1 }
 0xc51   : >> { %v3826_v36 = vadd.f32 %v3820_v29, %v3651_v11  ;;  %v18308_v25 = vpop.f32.mrb[29].mxu1 }
 0xc52   : > { %v15722_v25 = vld [vmem:[%s25971_s11 + $0x20] sm:$0xff] (%p2891_p5) }
 0xc54   : >> { %v3985_v13 = vpop.f32.mrb[30].mxu1 }
 0xc55   : >> { %v3999_v38 = vadd.f32 %v3985_v13, %v3824_v53  ;;  %v18336_v40 = vpop.f32.mrb[31].mxu1  ;;  %v15723_v13 = vld [vmem:[%s25971_s11 + $0x28] sm:$0xff] (%p2891_p5) }
 0xc56   : > { %v15724_v40 = vld [vmem:[%s25971_s11 + $0x30] sm:$0xff] (%p2891_p5) }
 0xc58   : >> { %v3990_v41 = vpop.f32.mrb[32].mxu1 }
 0xc59   : >> { %v4000_v42 = vadd.f32 %v3990_v41, %v3825_v23  ;;  %v18339_v45 = vpop.f32.mrb[33].mxu1  ;;  %v23418_v23 = vld [vmem:[%s25996_s28 + $0x10] sm:$0xff] (%p2891_p5)  ;;  %v15725_v41 = vld [vmem:[%s25971_s11 + $0x38] sm:$0xff] (%p2891_p5) }
 0xc5a   : > { %v23458_v45 = vpack.c.bf16 (%p2891_p5), %v15723_v13, %v15722_v25  ;;  %v15763_v25 = vld [vmem:[%s25971_s11 + $0xa8] sm:$0xff] (%p2891_p5) }
 0xc5c   : >> { %v3995_v27 = vpop.f32.mrb[34].mxu1 }
 0xc5d   : >> { %v4001_v46 = vadd.f32 %v3995_v27, %v3826_v36  ;;  %v18342_v48 = vpop.f32.mrb[35].mxu1  ;;  %v23433_v36 = vld [vmem:[%s25996_s28 + $0x18] sm:$0x3] (%p2891_p5) }
 0xc5e   : > { %v23466_v48 = vpack.c.bf16 (%p2891_p5), %v15725_v41, %v15724_v40  ;;  %v15764_v41 = vld [vmem:[%s25971_s11 + $0xb0] sm:$0xff] (%p2891_p5) }
 0xc60   : >> { %v4172_v51 = vpop.f32.mrb[36].mxu1 }
 0xc61   : >> { %v4186_v57 = vadd.f32 %v4172_v51, %v3999_v38  ;;  %v18370_v60 = vpop.f32.mrb[37].mxu1  ;;  %v23445_v38 = vld [vmem:[%s25996_s28 + $0x8] sm:$0x3] (%p2891_p5) }
 0xc64   : >> { %v4177_v63 = vpop.f32.mrb[38].mxu1 }
 0xc65   : >> { %v4187_v5 = vadd.f32 %v4177_v63, %v4000_v42  ;;  %v18373_v6 = vpop.f32.mrb[39].mxu1  ;;  %v23456_v42 = vld [vmem:[%s25996_s28 + $0x20] sm:$0xff] (%p2891_p5) }
 0xc68   : >> { %v4182_v7 = vpop.f32.mrb[40].mxu1 }
 0xc69   : >> { %v4188_v43 = vadd.f32 %v4182_v7, %v4001_v46  ;;  %v18376_v9 = vpop.f32.mrb[41].mxu1 }
 0xc6a   : > { %v4747_v9 = vld [vmem:[%s25971_s11 + $0x8] sm:$0xff] (%p2891_p5) }
 0xc6c   : >> { %v4347_v2 = vpop.f32.mrb[42].mxu1 }
 0xc6d   : >> { %v4361_v52 = vadd.f32 %v4347_v2, %v4186_v57  ;;  %v18404_v61 = vpop.f32.mrb[43].mxu1  ;;  %v23476_v57 = vld [vmem:[%s25996_s28 + $0x28] sm:$0x3] (%p2891_p5) }
 0xc6e   : > { %v15797_v61 = vld [vmem:[%s25973_s13 + $0x48] sm:$0xff] (%p2891_p5) }
 0xc70   : >> { %v4352_v4 = vpop.f32.mrb[44].mxu1 }
 0xc71   : >> { %v4362_v10 = vadd.f32 %v4352_v4, %v4187_v5  ;;  %v18407_v20 = vpop.f32.mrb[45].mxu1  ;;  %v21803_v4 = vmov (%p2891_p5), 0.0|0.0  }
 0xc72   : > { %v15798_v20 = vld [vmem:[%s25973_s13 + $0x50] sm:$0xff] (%p2891_p5) }
 0xc74   : >> { %v4357_v22 = vpop.f32.mrb[46].mxu1 }
 0xc75   : >> { %v4363_v24 = vadd.f32 %v4357_v22, %v4188_v43  ;;  %v18410_v58 = vpop.f32.mrb[47].mxu1  ;;  %v4746_v43 = vld [vmem:[%s25971_s11] sm:$0xff] (%p2891_p5)  ;;  %v15799_v22 = vld [vmem:[%s25973_s13 + $0x58] sm:$0xff] (%p2891_p5) }
 0xc76   : > { %v23525_v2 = vpack.c.bf16 (%p2891_p5), %v4747_v9, %v4746_v43  ;;  %v4748_v58 = vld [vmem:[%s25971_s11 + $0x10] sm:$0xff] (%p2891_p5)  ;;  %v15774_v9 = vld [vmem:[%s25971_s11 + $0xd8] sm:$0xff] (%p2891_p5) }
 0xc77   : > { %v15773_v43 = vld [vmem:[%s25971_s11 + $0xd0] sm:$0xff] (%p2891_p5) }
 0xc78   : >> { %v4440_v26 = vpop.f32.mrb[48].mxu1 }
 0xc79   : >> { %v18431_v34 = vpop.f32.mrb[49].mxu1  ;;  %18443 = vmatmul.mubr.msk.f32.gmra.mrb[54].mxu1 %vm642_vm0, %v4440_v26  ;;  %v4749_v26 = vld [vmem:[%s25971_s11 + $0x18] sm:$0xff] (%p2891_p5)  ;;  %vm21804_vm0 = vmmov (%p2891_p5), 0  }
 0xc7a   : > { %18475 = vmatprep.mubr.msk.f32.mxu1 (%p2891_p5), %vm4660_vm15, %v23418_v23 }
 0xc7c   : >> { %v4522_v56 = vpop.f32.mrb[50].mxu1 }
 0xc7d   : >> { %v4536_v0 = vadd.f32 %v4522_v56, %v4361_v52  ;;  %v18438_v39 = vpop.f32.mrb[51].mxu1  ;;  %v15796_v52 = vld [vmem:[%s25973_s13 + $0x40] sm:$0xff] (%p2891_p5) }
 0xc7e   : > { %v23549_v39 = vpack.c.bf16 (%p2891_p5), %v4749_v26, %v4748_v58  ;;  %v15782_v26 = vld [vmem:[%s25971_s11 + $0xf0] sm:$0xff] (%p2891_p5) }
 0xc7f   : >> { %v4546_v12 = vadd.f32 %v15706_v28, %v4536_v0 }
 0xc80   : >> { %v4527_v44 = vpop.f32.mrb[52].mxu1 }
 0xc81   : >> { %v4537_v54 = vadd.f32 %v4527_v44, %v4362_v10  ;;  %v18441_v47 = vpop.f32.mrb[53].mxu1  ;;  %v4549_v49 = vmax.f32 %v4546_v12, 0.0  ;;  %v20617_v10 = vpack.c.bf16 (%p2891_p5), %v15797_v61, %v15796_v52  ;;  %v15735_v44 = vld [vmem:[%s25971_s11 + $0x40] sm:$0xff] (%p2891_p5)  ;;  %v15736_v12 = vld [vmem:[%s25971_s11 + $0x48] sm:$0xff] (%p2891_p5)  ;;  %v23668_v61 = vpack.c.bf16 (%p2891_p5), %v15774_v9, %v15773_v43 }
 0xc82   : > { %v15737_v47 = vld [vmem:[%s25971_s11 + $0x50] sm:$0xff] (%p2891_p5)  ;;  %v6177_v9 = vld [vmem:[%s25973_s13 + $0x8] sm:$0xff] (%p2891_p5) }
 0xc83   : >> { %v4547_v37 = vadd.f32 %v15706_v28, %v4537_v54  ;;  %v23562_v54 = vpack.c.bf16 (%p2891_p5), %v15736_v12, %v15735_v44  ;;  %v15791_v12 = vld [vmem:[%s25971_s11 + $0x110] sm:$0xff] (%p2891_p5) }
 0xc85   : >> { %v4550_v62 = vmax.f32 %v4547_v37, 0.0  ;;  %v15738_v37 = vld [vmem:[%s25971_s11 + $0x58] sm:$0xff] (%p2891_p5) }
 0xc87   : >> { %v20506_v15 = vpack.c.bf16 %v4550_v62, %v4549_v49 }
 0xc89   : >> { %20507 = vmatpush3.bf16.msra.mxu0 %v20506_v15  ;;  %v23572_v15 = vpack.c.bf16 (%p2891_p5), %v15738_v37, %v15737_v47  ;;  %v15792_v47 = vld [vmem:[%s25971_s11 + $0x118] sm:$0xff] (%p2891_p5) }
 0xc8a   : >> { %18449 = vmatprep.subr.mxu0 %v21801_v50  ;;  %v23719_v37 = vpack.c.bf16 (%p2891_p5), %v15792_v47, %v15791_v12 }
 0xd4c   : >> { %v4532_v18 = vpop.f32.mrb[54].mxu1 }
 0xd4d   : >> { %v4538_v19 = vadd.f32 %v4532_v18, %v4363_v24  ;;  %v18444_v32 = vpop.f32.mrb[55].mxu1  ;;  %v20620_v24 = vpack.c.bf16 (%p2891_p5), %v15799_v22, %v15798_v20  ;;  %v15744_v18 = vld [vmem:[%s25971_s11 + $0x60] sm:$0xff] (%p2891_p5)  ;;  %v15781_v20 = vld [vmem:[%s25971_s11 + $0xe8] sm:$0xff] (%p2891_p5) }
 0xd4f   : >> { %v4548_v33 = vadd.f32 %v15706_v28, %v4538_v19  ;;  %v15745_v19 = vld [vmem:[%s25971_s11 + $0x68] sm:$0xff] (%p2891_p5) }
 0xd50   : > { %v23584_v32 = vpack.c.bf16 (%p2891_p5), %v15745_v19, %v15744_v18  ;;  %v15808_v19 = vld [vmem:[%s25973_s13 + $0x90] sm:$0xff] (%p2891_p5) }
 0xd51   : >> { %v4551_v8 = vmax.f32 %v4548_v33, 0.0 }
 0xd53   : >> { %18450 = vmatpush3.msk.msra.mxu0 %vm4565_vm13, %v4551_v8  ;;  %v15746_v8 = vld [vmem:[%s25971_s11 + $0x70] sm:$0xff] (%p2891_p5) }
 0xd54   : >> { %18452 = vmatmul.mubr.msk.f32.vlgmr.msra.gmra.mrb[52].mxu0 %vm4555_vm14, %v4552_v59  ;;  %v15747_v59 = vld [vmem:[%s25971_s11 + $0x78] sm:$0xff] (%p2891_p5) }
 0xd55   : >> { %18454 = vmatprep.mubr.msk.f32.mxu0 %vm21800_vm9, %v21801_v50 }
 0xd58   : >> { %18455 = vmatmul.mubr.msk.f32.gmra.mrb[54].mxu0 %vm4555_vm14, %v4553_v16 }
 0xd59   : >> { %18457 = vmatprep.mubr.msk.f32.mxu0 %vm21800_vm9, %v21801_v50 }
 0xd5c   : >> { %18458 = vmatmul.mubr.msk.f32.gmra.mrb[56].mxu0 %vm4555_vm14, %v4554_v31  ;;  %v23594_v31 = vpack.c.bf16 (%p2891_p5), %v15747_v59, %v15746_v8  ;;  %v15800_v59 = vld [vmem:[%s25973_s13 + $0x60] sm:$0xff] (%p2891_p5) }
 0xd5d   : > { %18466 = vmatprep.mubr.msk.f32.mxu0 (%p2891_p5), %vm4660_vm15, %v23423_v55 }
 0xe27   : >> { %v4635_v35 = vpop.f32.mrb[52].mxu0 }
 0xe28   : >> { %15711 = vst.msk [vmem:[%s15399_s25 + $0x18] sm:$0xff] %vm776_vm2, %v4635_v35  ;;  %v18453_v3 = vpop.f32.mrb[53].mxu0  ;;  %v15753_v35 = vld [vmem:[%s25971_s11 + $0x80] sm:$0xff] (%p2891_p5) }
 0xe29   : > { %v15754_v3 = vld [vmem:[%s25971_s11 + $0x88] sm:$0xff] (%p2891_p5) }
 0xe2a   : > { %2893 = sbr.rel (!%p2891_p5) target bundleno = 2453 (0x995), region = 255 }
 0xe2b   : >> { %v4640_v11 = vpop.f32.mrb[54].mxu0 }
 0xe2c   : >> { %15712 = vst.msk [vmem:[%s15399_s25 + $0x20] sm:$0xff] %vm776_vm2, %v4640_v11  ;;  %v18456_v14 = vpop.f32.mrb[55].mxu0 }
 0xe2f   : >> { %v4645_v17 = vpop.f32.mrb[56].mxu0 }
 0xe30   : >> { %15713 = vst.msk [vmem:[%s15399_s25 + $0x28] sm:$0x3f] %vm779_vm3, %v4645_v17  ;;  %v18459_v53 = vpop.f32.mrb[57].mxu0  ;;  %v23606_v17 = vpack.c.bf16 (%p2891_p5), %v15754_v3, %v15753_v35  ;;  %v15810_v35 = vld [vmem:[%s25973_s13 + $0xa0] sm:$0xff] (%p2891_p5)  ;;  %vm6195_vm3 = vcmask (%p2891_p5), 523264  }
 0xe31   : > { %v15755_v53 = vld [vmem:[%s25971_s11 + $0x90] sm:$0xff] }
 0xe37   : > { %v4655_v50 = vld [vmem:[#allocation3] sm:$0xff]  ;;  %v4656_v30 = vld [vmem:[#allocation3 + $0x8] sm:$0xff]  ;;  %v4657_v29 = vld [vmem:[#allocation3 + $0x10] sm:$0x3f] }
 0xe38   : > { %v20508_v21 = vpack.c.bf16 %v4656_v30, %v4655_v50  ;;  %v5174_v27 = vld [vmem:[#allocation3 + $0x18] sm:$0xff]  ;;  %v5175_v46 = vld [vmem:[#allocation3 + $0x20] sm:$0xff]  ;;  %v5176_v60 = vld [vmem:[#allocation3 + $0x28] sm:$0x3f] }
 0xe39   : > { %v20544_v51 = vpack.c.bf16 %v5175_v46, %v5174_v27  ;;  %v5670_v63 = vld [vmem:[#allocation3 + $0x30] sm:$0xff]  ;;  %v5671_v5 = vld [vmem:[#allocation3 + $0x38] sm:$0xff]  ;;  %v5672_v7 = vld [vmem:[#allocation3 + $0x40] sm:$0x3f] }
 0xe3a   : > { %20513 = vmatprep.subr.bf16.mxu1 %v20508_v21  ;;  %20509 = vmatprep.subr.bf16.mxu0 %v20508_v21  ;;  %v20580_v6 = vpack.c.bf16 %v5671_v5, %v5670_v63  ;;  %v15756_v50 = vld [vmem:[%s25971_s11 + $0x98] sm:$0xff]  ;;  %v15771_v63 = vld [vmem:[%s25971_s11 + $0xc0] sm:$0xff]  ;;  %v15772_v5 = vld [vmem:[%s25971_s11 + $0xc8] sm:$0xff] }
 0xe3b   : > { %20515 = vmatpush3.bf16.msra.mxu1 %v20508_v21  ;;  %20511 = vmatpush3.bf16.msra.mxu0 %v20508_v21  ;;  %v23616_v30 = vpack.c.bf16 %v15756_v50, %v15755_v53  ;;  %v15765_v27 = vld [vmem:[%s25971_s11 + $0xb8] sm:$0xff]  ;;  %v15802_v53 = vld [vmem:[%s25973_s13 + $0x70] sm:$0xff] }
 0xe3c   : > { %18473 = vmatprep.subr.msk.mxu1 %vm4667_vm1, %v4657_v29  ;;  %18464 = vmatprep.subr.msk.mxu0 %vm4667_vm1, %v4657_v29  ;;  %v15803_v50 = vld [vmem:[%s25973_s13 + $0x78] sm:$0xff] }
 0xe3f   : > { %18474 = vmatpush3.msk.msra.mxu1 %vm4667_vm1, %v4657_v29  ;;  %18465 = vmatpush3.msk.msra.mxu0 %vm4667_vm1, %v4657_v29 }
 0xe40   : > { %18476 = vmatmul.mubr.msk.f32.vlgmr.msra.gmra.mrb[0].mxu1 %vm4660_vm15, %v23433_v36  ;;  %18467 = vmatmul.mubr.msk.f32.vlgmr.msra.gmra.mrb[0].mxu0 %vm4660_vm15, %v23445_v38 }
 0xe41   : > { %20533 = vmatprep.subr.bf16.mxu1 %v20508_v21  ;;  %18506 = vmatprep.mubr.msk.f32.mxu1 %vm4660_vm15, %v23456_v42 }
 0xe42   : > { %20535 = vmatpush3.bf16.msra.mxu1 %v20508_v21  ;;  %20517 = vmatprep.subr.bf16.mxu0 %v23458_v45 }
 0xe43   : > { %18504 = vmatprep.subr.msk.mxu1 %vm4667_vm1, %v4657_v29  ;;  %20519 = vmatpush3.bf16.msra.mxu0 %v23458_v45 }
 0xe44   : > { %20521 = vmatprep.subr.bf16.mxu0 %v23466_v48 }
 0xe46   : > { %18505 = vmatpush3.msk.msra.mxu1 %vm4667_vm1, %v4657_v29  ;;  %v15762_v29 = vld [vmem:[%s25971_s11 + $0xa0] sm:$0xff] }
 0xe47   : > { %18507 = vmatmul.mubr.msk.f32.vlgmr.msra.gmra.mrb[2].mxu1 %vm4660_vm15, %v23476_v57  ;;  %20545 = vmatprep.subr.bf16.mxu1 %v20544_v51  ;;  %v23628_v40 = vpack.c.bf16 %v15763_v25, %v15762_v29  ;;  %v20626_v29 = vpack.c.bf16 %v15803_v50, %v15802_v53  ;;  %v15813_v25 = vld [vmem:[%s25973_s13 + $0xb8] sm:$0xff]  ;;  %v15830_v50 = vld [vmem:[%s25973_s13 + $0x130] sm:$0xff] }
 0xe48   : > { %20547 = vmatpush3.bf16.msra.mxu1 %v20544_v51  ;;  %18526 = vmatprep.mubr.msk.f32.mxu1 %vm4660_vm15, %v23423_v55  ;;  %v6183_v53 = vld [vmem:[%s25973_s13 + $0x38] sm:$0xff] }
 0xe49   : > { %18524 = vmatprep.subr.msk.mxu1 %vm4667_vm1, %v5176_v60  ;;  %20523 = vmatpush3.bf16.msra.mxu0 %v23466_v48 }
 0xe4a   : > { %20525 = vmatprep.subr.bf16.mxu0 %v23525_v2 }
 0xe4c   : > { %18525 = vmatpush3.msk.msra.mxu1 %vm4667_vm1, %v5176_v60 }
 0xe4d   : > { %18527 = vmatmul.mubr.msk.f32.vlgmr.msra.gmra.mrb[4].mxu1 %vm4660_vm15, %v23445_v38  ;;  %20557 = vmatprep.subr.bf16.mxu1 %v20544_v51 }
 0xe4e   : > { %20559 = vmatpush3.bf16.msra.mxu1 %v20544_v51  ;;  %18546 = vmatprep.mubr.msk.f32.mxu1 %vm4660_vm15, %v23418_v23 }
 0xe4f   : > { %18544 = vmatprep.subr.msk.mxu1 %vm4667_vm1, %v5176_v60 }
 0xe52   : > { %18545 = vmatpush3.msk.msra.mxu1 %vm4667_vm1, %v5176_v60 }
 0xe53   : > { %18547 = vmatmul.mubr.msk.f32.vlgmr.msra.gmra.mrb[6].mxu1 %vm4660_vm15, %v23433_v36  ;;  %20569 = vmatprep.subr.bf16.mxu1 %v20544_v51 }
 0xe54   : > { %20571 = vmatpush3.bf16.msra.mxu1 %v20544_v51  ;;  %18566 = vmatprep.mubr.msk.f32.mxu1 %vm4660_vm15, %v23456_v42 }
 0xe55   : > { %18564 = vmatprep.subr.msk.mxu1 %vm4667_vm1, %v5176_v60 }
 0xe58   : > { %18565 = vmatpush3.msk.msra.mxu1 %vm4667_vm1, %v5176_v60  ;;  %v23642_v60 = vpack.c.bf16 %v15765_v27, %v15764_v41  ;;  %v23780_v41 = vld [vmem:[%s25972_s12] ss:$0 sm:$0xff] }
 0xe59   : > { %18567 = vmatmul.mubr.msk.f32.vlgmr.msra.gmra.mrb[8].mxu1 %vm4660_vm15, %v23476_v57  ;;  %20581 = vmatprep.subr.bf16.mxu1 %v20580_v6 }
 0xe5a   : > { %20583 = vmatpush3.bf16.msra.mxu1 %v20580_v6  ;;  %18586 = vmatprep.mubr.msk.f32.mxu1 %vm4660_vm15, %v23423_v55 }
 0xe5b   : > { %18584 = vmatprep.subr.msk.mxu1 %vm4667_vm1, %v5672_v7 }
 0xe5e   : > { %18585 = vmatpush3.msk.msra.mxu1 %vm4667_vm1, %v5672_v7 }
 0xe5f   : > { %18587 = vmatmul.mubr.msk.f32.vlgmr.msra.gmra.mrb[10].mxu1 %vm4660_vm15, %v23445_v38  ;;  %20593 = vmatprep.subr.bf16.mxu1 %v20580_v6 }
 0xe60   : > { %20595 = vmatpush3.bf16.msra.mxu1 %v20580_v6  ;;  %18606 = vmatprep.mubr.msk.f32.mxu1 %vm4660_vm15, %v23418_v23 }
 0xe61   : > { %18604 = vmatprep.subr.msk.mxu1 %vm4667_vm1, %v5672_v7 }
 0xe64   : > { %18605 = vmatpush3.msk.msra.mxu1 %vm4667_vm1, %v5672_v7 }
 0xe65   : > { %18607 = vmatmul.mubr.msk.f32.vlgmr.msra.gmra.mrb[12].mxu1 %vm4660_vm15, %v23433_v36  ;;  %20605 = vmatprep.subr.bf16.mxu1 %v20580_v6 }
 0xe66   : > { %20607 = vmatpush3.bf16.msra.mxu1 %v20580_v6  ;;  %18626 = vmatprep.mubr.msk.f32.mxu1 %vm4660_vm15, %v23456_v42  ;;  %v23654_v6 = vpack.c.bf16 %v15772_v5, %v15771_v63  ;;  %v6176_v5 = vld [vmem:[%s25973_s13] sm:$0xff] }
 0xe67   : > { %18624 = vmatprep.subr.msk.mxu1 %vm4667_vm1, %v5672_v7 }
 0xe6a   : > { %18625 = vmatpush3.msk.msra.mxu1 %vm4667_vm1, %v5672_v7 }
 0xe6b   : > { %18627 = vmatmul.mubr.msk.f32.vlgmr.msra.gmra.mrb[14].mxu1 %vm4660_vm15, %v23476_v57  ;;  %20616 = vmatprep.subr.bf16.mxu1 %v21803_v4 }
 0xe6c   : > { %20618 = vmatpush3.bf16.msra.mxu1 %v20617_v10  ;;  %v15780_v10 = vld [vmem:[%s25971_s11 + $0xe0] sm:$0xff]  ;;  %18656 = vmatprep.mubr.msk.f32.mxu1 %vm21804_vm0, %v21795_v1 }
 0xe6d   : > { %20619 = vmatprep.subr.bf16.mxu1 %v21803_v4  ;;  %v23685_v58 = vpack.c.bf16 %v15781_v20, %v15780_v10  ;;  %v15824_v10 = vld [vmem:[%s25973_s13 + $0x100] sm:$0xff]  ;;  %v15825_v20 = vld [vmem:[%s25973_s13 + $0x108] sm:$0xff] }
 0xe70   : > { %20621 = vmatpush3.bf16.msra.mxu1 %v20620_v24 }
 0xe71   : > { %20622 = vmatprep.subr.bf16.mxu1 %v21803_v4 }
 0xf13   : > { %v18477_v34 = vpop.f32.mrb[0].mxu1  ;;  %v18468_v56 = vpop.f32.mrb[0].mxu0 }
 0xf14   : > { %v4825_v0 = vpop.f32.mrb[1].mxu1  ;;  %v4737_v28 = vpop.f32.mrb[1].mxu0 }
 0xf15   : > { %18486 = vmatprep.mubr.msk.f32.mxu0 %vm776_vm2, %v4825_v0  ;;  %v15789_v0 = vld [vmem:[%s25971_s11 + $0x100] sm:$0xff] }
 0xf16   : > { %18487 = vmatmul.mubr.msk.f32.vlgmr.msra.gmra.mrb[2].mxu0 %vm776_vm2, %v18477_v34  ;;  %v15783_v34 = vld [vmem:[%s25971_s11 + $0xf8] sm:$0xff] }
 0xf17   : > { %20527 = vmatpush3.bf16.msra.mxu0 %v23525_v2  ;;  %18497 = vmatprep.mubr.msk.f32.mxu0 %vm776_vm2, %v4737_v28  ;;  %v15790_v28 = vld [vmem:[%s25971_s11 + $0x108] sm:$0xff] }
 0xf18   : > { %20529 = vmatprep.subr.bf16.mxu0 %v23549_v39  ;;  %v23709_v44 = vpack.c.bf16 %v15790_v28, %v15789_v0  ;;  %v20665_v0 = vpack.c.bf16 %v15825_v20, %v15824_v10  ;;  %v6178_v28 = vld [vmem:[%s25973_s13 + $0x10] sm:$0xff] }
 0xf19   : > { %v15817_v20 = vld [vmem:[%s25973_s13 + $0xd0] sm:$0xff] }
 0xf1a   : > { %v18508_v49 = vpop.f32.mrb[2].mxu1 }
 0xf1b   : > { %20531 = vmatpush3.bf16.msra.mxu0 %v23549_v39  ;;  %v5076_v62 = vpop.f32.mrb[3].mxu1 }
 0xf1c   : > { %20537 = vmatprep.subr.bf16.mxu0 %v23562_v54 }
 0xf1e   : > { %18498 = vmatmul.mubr.msk.f32.vlgmr.msra.gmra.mrb[2].mxu0 %vm776_vm2, %v18468_v56  ;;  %v23695_v56 = vpack.c.bf16 %v15783_v34, %v15782_v26  ;;  %v20629_v34 = vpack.c.bf16 %v6177_v9, %v6176_v5  ;;  %v15842_v5 = vld [vmem:[%s25973_s13 + $0x180] sm:$0xff] }
 0xf1f   : > { %20539 = vmatpush3.bf16.msra.mxu0 %v23562_v54  ;;  %18517 = vmatprep.mubr.msk.f32.mxu0 %vm776_vm2, %v5076_v62  ;;  %v15807_v62 = vld [vmem:[%s25973_s13 + $0x88] sm:$0xff] }
 0xf20   : > { %20541 = vmatprep.subr.bf16.mxu0 %v23572_v15  ;;  %v18528_v33 = vpop.f32.mrb[4].mxu1 }
 0xf21   : > { %v5246_v16 = vpop.f32.mrb[5].mxu1 }
 0xf23   : > { %20543 = vmatpush3.bf16.msra.mxu0 %v23572_v15 }
 0xf24   : > { %20549 = vmatprep.subr.bf16.mxu0 %v23584_v32 }
 0xf26   : > { %18518 = vmatmul.mubr.msk.f32.vlgmr.msra.gmra.mrb[2].mxu0 %vm776_vm2, %v18508_v49  ;;  %v18548_v11 = vpop.f32.mrb[6].mxu1  ;;  %v15806_v49 = vld [vmem:[%s25973_s13 + $0x80] sm:$0xff] }
 0xf27   : > { %20551 = vmatpush3.bf16.msra.mxu0 %v23584_v32  ;;  %18537 = vmatprep.mubr.msk.f32.mxu0 %vm776_vm2, %v5246_v16  ;;  %v5409_v14 = vpop.f32.mrb[7].mxu1  ;;  %v20641_v18 = vpack.c.bf16 %v15807_v62, %v15806_v49  ;;  %v15801_v16 = vld [vmem:[%s25973_s13 + $0x68] sm:$0xff]  ;;  %v6179_v49 = vld [vmem:[%s25973_s13 + $0x18] sm:$0xff]  ;;  %v15826_v62 = vld [vmem:[%s25973_s13 + $0x110] sm:$0xff] }
 0xf28   : > { %20553 = vmatprep.subr.bf16.mxu0 %v23594_v31  ;;  %v20623_v3 = vpack.c.bf16 %v15801_v16, %v15800_v59  ;;  %v6181_v59 = vld [vmem:[%s25973_s13 + $0x28] sm:$0xff]  ;;  %v15828_v16 = vld [vmem:[%s25973_s13 + $0x120] sm:$0xff] }
 0xf2a   : > { %20624 = vmatpush3.bf16.msra.mxu1 %v20623_v3 }
 0xf2b   : > { %20555 = vmatpush3.bf16.msra.mxu0 %v23594_v31  ;;  %20625 = vmatprep.subr.bf16.mxu1 %v21803_v4 }
 0xf2c   : > { %20561 = vmatprep.subr.bf16.mxu0 %v23606_v17  ;;  %v18568_v21 = vpop.f32.mrb[8].mxu1 }
 0xf2d   : > { %v5572_v13 = vpop.f32.mrb[9].mxu1 }
 0xf2e   : > { %18538 = vmatmul.mubr.msk.f32.vlgmr.msra.gmra.mrb[2].mxu0 %vm776_vm2, %v18528_v33  ;;  %v15809_v33 = vld [vmem:[%s25973_s13 + $0x98] sm:$0xff]  ;;  %20627 = vmatpush3.bf16.msra.mxu1 %v20626_v29 }
 0xf2f   : > { %20563 = vmatpush3.bf16.msra.mxu0 %v23606_v17  ;;  %18557 = vmatprep.mubr.msk.f32.mxu0 %vm776_vm2, %v5409_v14  ;;  %v20644_v8 = vpack.c.bf16 %v15809_v33, %v15808_v19  ;;  %v20632_v19 = vpack.c.bf16 %v6179_v49, %v6178_v28  ;;  %v15844_v28 = vld [vmem:[%s25973_s13 + $0x190] sm:$0xff] }
 0xf30   : > { %20565 = vmatprep.subr.bf16.mxu0 %v23616_v30  ;;  %20628 = vmatprep.subr.bf16.mxu1 %v21803_v4 }
 0xf32   : > { %v23636_v46 = vpop.f32.mrb[10].mxu1 }
 0xf33   : > { %20567 = vmatpush3.bf16.msra.mxu0 %v23616_v30  ;;  %v23639_v51 = vpop.f32.mrb[11].mxu1 }
 0xf34   : > { %20573 = vmatprep.subr.bf16.mxu0 %v23628_v40 }
 0xf36   : > { %18558 = vmatmul.mubr.msk.f32.vlgmr.msra.gmra.mrb[2].mxu0 %vm776_vm2, %v18548_v11  ;;  %v15811_v11 = vld [vmem:[%s25973_s13 + $0xa8] sm:$0xff] }
 0xf37   : > { %20575 = vmatpush3.bf16.msra.mxu0 %v23628_v40  ;;  %18577 = vmatprep.mubr.msk.f32.mxu0 %vm776_vm2, %v5572_v13  ;;  %v20647_v14 = vpack.c.bf16 %v15811_v11, %v15810_v35  ;;  %v15829_v35 = vld [vmem:[%s25973_s13 + $0x128] sm:$0xff] }
 0xf38   : > { %20577 = vmatprep.subr.bf16.mxu0 %v23642_v60  ;;  %v23656_v7 = vpop.f32.mrb[12].mxu1  ;;  %v20671_v11 = vpack.c.bf16 %v15829_v35, %v15828_v16  ;;  %v15821_v16 = vld [vmem:[%s25973_s13 + $0xf0] sm:$0xff]  ;;  %v15822_v35 = vld [vmem:[%s25973_s13 + $0xf8] sm:$0xff] }
 0xf39   : > { %v23664_v52 = vpop.f32.mrb[13].mxu1 }
 0xf3b   : > { %20579 = vmatpush3.bf16.msra.mxu0 %v23642_v60 }
 0xf3c   : > { %20585 = vmatprep.subr.bf16.mxu0 %v23654_v6 }
 0xf3e   : > { %18578 = vmatmul.mubr.msk.f32.vlgmr.msra.gmra.mrb[2].mxu0 %vm776_vm2, %v18568_v21  ;;  %v23677_v22 = vpop.f32.mrb[14].mxu1  ;;  %v15812_v21 = vld [vmem:[%s25973_s13 + $0xb0] sm:$0xff] }
 0xf3f   : > { %20587 = vmatpush3.bf16.msra.mxu0 %v23654_v6  ;;  %18597 = vmatprep.mubr.msk.f32.mxu0 %vm776_vm2, %v23639_v51  ;;  %v23682_v24 = vpop.f32.mrb[15].mxu1  ;;  %v20650_v13 = vpack.c.bf16 %v15813_v25, %v15812_v21  ;;  %v15831_v21 = vld [vmem:[%s25973_s13 + $0x138] sm:$0xff] }
 0xf40   : > { %20589 = vmatprep.subr.bf16.mxu0 %v23668_v61  ;;  %v20674_v25 = vpack.c.bf16 %v15831_v21, %v15830_v50  ;;  %v15833_v50 = vld [vmem:[%s25973_s13 + $0x140] sm:$0xff]  ;;  %v15834_v21 = vld [vmem:[%s25973_s13 + $0x148] sm:$0xff] }
 0xf43   : > { %20591 = vmatpush3.bf16.msra.mxu0 %v23668_v61 }
 0xf44   : > { %20597 = vmatprep.subr.bf16.mxu0 %v23685_v58 }
 0xf46   : > { %18598 = vmatmul.mubr.msk.f32.vlgmr.msra.gmra.mrb[2].mxu0 %vm776_vm2, %v23636_v46 }
 0xf47   : > { %20599 = vmatpush3.bf16.msra.mxu0 %v23685_v58  ;;  %18617 = vmatprep.mubr.msk.f32.mxu0 %vm776_vm2, %v23664_v52 }
 0xf48   : > { %20601 = vmatprep.subr.bf16.mxu0 %v23695_v56 }
 0xf4b   : > { %20603 = vmatpush3.bf16.msra.mxu0 %v23695_v56 }
 0xf4c   : > { %20609 = vmatprep.subr.bf16.mxu0 %v23709_v44 }
 0xf4e   : > { %18618 = vmatmul.mubr.msk.f32.vlgmr.msra.gmra.mrb[2].mxu0 %vm776_vm2, %v23656_v7 }
 0xf4f   : > { %20611 = vmatpush3.bf16.msra.mxu0 %v23709_v44  ;;  %18637 = vmatprep.mubr.msk.f32.mxu0 %vm776_vm2, %v23682_v24 }
 0xf50   : > { %20613 = vmatprep.subr.bf16.mxu0 %v23719_v37 }
 0xf53   : > { %20615 = vmatpush3.bf16.msra.mxu0 %v23719_v37 }
 0xf54   : > { %20640 = vmatprep.subr.bf16.mxu0 %v21803_v4 }
 0xf56   : > { %18638 = vmatmul.mubr.msk.f32.vlgmr.msra.gmra.mrb[2].mxu0 %vm776_vm2, %v23677_v22 }
 0xf57   : > { %20642 = vmatpush3.bf16.msra.mxu0 %v20641_v18  ;;  %18694 = vmatprep.mubr.msk.f32.mxu0 %vm21804_vm0, %v21795_v1  ;;  %v15827_v18 = vld [vmem:[%s25973_s13 + $0x118] sm:$0xff] }
 0xf58   : > { %20643 = vmatprep.subr.bf16.mxu0 %v21803_v4  ;;  %v20668_v33 = vpack.c.bf16 %v15827_v18, %v15826_v62  ;;  %v15819_v62 = vld [vmem:[%s25973_s13 + $0xe0] sm:$0xff]  ;;  %v15820_v18 = vld [vmem:[%s25973_s13 + $0xe8] sm:$0xff] }
 0xf5b   : > { %20645 = vmatpush3.bf16.msra.mxu0 %v20644_v8  ;;  %v6180_v8 = vld [vmem:[%s25973_s13 + $0x20] sm:$0xff] }
 0xf5c   : > { %20646 = vmatprep.subr.bf16.mxu0 %v21803_v4  ;;  %v20635_v3 = vpack.c.bf16 %v6181_v59, %v6180_v8  ;;  %v20659_v8 = vpack.c.bf16 %v15820_v18, %v15819_v62  ;;  %v15865_v62 = vld [vmem:[%s25973_s13 + $0x228] sm:$0xff] }
 0xf5f   : > { %20648 = vmatpush3.bf16.msra.mxu0 %v20647_v14  ;;  %v6182_v14 = vld [vmem:[%s25973_s13 + $0x30] sm:$0xff] }
 0xf60   : > { %20649 = vmatprep.subr.bf16.mxu0 %v21803_v4  ;;  %v20638_v29 = vpack.c.bf16 %v6183_v53, %v6182_v14  ;;  %v20662_v14 = vpack.c.bf16 %v15822_v35, %v15821_v16  ;;  %v15867_v16 = vld [vmem:[%s25973_s13 + $0x238] sm:$0xff] }
 0xf63   : > { %20651 = vmatpush3.bf16.msra.mxu0 %v20650_v13  ;;  %v15815_v13 = vld [vmem:[%s25973_s13 + $0xc0] sm:$0xff] }
 0xf64   : > { %20664 = vmatprep.subr.bf16.mxu0 %v21803_v4 }
0x1029   : > { %v23782_v27 = vpop.f32.mrb[2].mxu0 }
0x102a   : > { %v6154_v63 = vpop.f32.mrb[3].mxu0 }
0x102b   : > { %v6172_v43 = vadd.f32 %v23780_v41, %v6154_v63  ;;  %v15816_v63 = vld [vmem:[%s25973_s13 + $0xc8] sm:$0xff] }
0x102c   : > { %v20653_v9 = vpack.c.bf16 %v15816_v63, %v15815_v13  ;;  %v20677_v13 = vpack.c.bf16 %v15834_v21, %v15833_v50 }
0x102d   : > { %v23797_v26 = vmax.f32 %v6172_v43, 0.0  ;;  %v15843_v43 = vld [vmem:[%s25973_s13 + $0x188] sm:$0xff] }
0x102e   : > { %v20689_v10 = vpack.c.bf16 %v15843_v43, %v15842_v5  ;;  %v15835_v5 = vld [vmem:[%s25973_s13 + $0x150] sm:$0xff] }
0x102f   : > { %v6194_v12 = vrot.slane %v23797_v26, 1  ;;  %v6349_v47 = vrot.slane %v23797_v26, 2  ;;  %v6432_v43 = vrot.slane %v23797_v26, 3 }
0x1031   : > { %18657 = vmatmul.mubr.msk.f32.vlgmr.msra.gmra.mrb[16].mxu1 %vm6195_vm3, %v6194_v12  ;;  %18695 = vmatmul.mubr.msk.f32.vlgmr.msra.gmra.mrb[4].mxu0 %vm6195_vm3, %v6349_v47  ;;  %v15845_v12 = vld [vmem:[%s25973_s13 + $0x198] sm:$0xff] }
0x1032   : > { %20630 = vmatpush3.bf16.msra.mxu1 %v20629_v34  ;;  %20666 = vmatpush3.bf16.msra.mxu0 %v20665_v0  ;;  %v6515_v34 = vrot.slane %v23797_v26, 4  ;;  %v15818_v0 = vld [vmem:[%s25973_s13 + $0xd8] sm:$0xff]  ;;  %v20692_v49 = vpack.c.bf16 %v15845_v12, %v15844_v28  ;;  %v15837_v12 = vld [vmem:[%s25973_s13 + $0x160] sm:$0xff] }
0x1033   : > { %20631 = vmatprep.subr.bf16.mxu1 %v21803_v4  ;;  %20667 = vmatprep.subr.bf16.mxu0 %v21803_v4  ;;  %v20656_v47 = vpack.c.bf16 %v15818_v0, %v15817_v20  ;;  %v15862_v20 = vld [vmem:[%s25973_s13 + $0x210] sm:$0xff] }
0x1034   : > { %18675 = vmatprep.mubr.msk.f32.mxu1 %vm21804_vm0, %v21795_v1  ;;  %18732 = vmatprep.mubr.msk.f32.mxu0 %vm21804_vm0, %v21795_v1 }
0x1036   : > { %20633 = vmatpush3.bf16.msra.mxu1 %v20632_v19  ;;  %20669 = vmatpush3.bf16.msra.mxu0 %v20668_v33  ;;  %v15846_v19 = vld [vmem:[%s25973_s13 + $0x1a0] sm:$0xff]  ;;  %v15847_v33 = vld [vmem:[%s25973_s13 + $0x1a8] sm:$0xff] }
0x1037   : > { %20634 = vmatprep.subr.bf16.mxu1 %v21803_v4  ;;  %20670 = vmatprep.subr.bf16.mxu0 %v21803_v4  ;;  %v20695_v59 = vpack.c.bf16 %v15847_v33, %v15846_v19  ;;  %v15839_v33 = vld [vmem:[%s25973_s13 + $0x170] sm:$0xff] }
0x103a   : > { %20636 = vmatpush3.bf16.msra.mxu1 %v20635_v3  ;;  %20672 = vmatpush3.bf16.msra.mxu0 %v20671_v11  ;;  %v15848_v3 = vld [vmem:[%s25973_s13 + $0x1b0] sm:$0xff]  ;;  %v15849_v11 = vld [vmem:[%s25973_s13 + $0x1b8] sm:$0xff] }
0x103b   : > { %20637 = vmatprep.subr.bf16.mxu1 %v21803_v4  ;;  %20673 = vmatprep.subr.bf16.mxu0 %v21803_v4  ;;  %v20698_v53 = vpack.c.bf16 %v15849_v11, %v15848_v3  ;;  %v23977_v11 = vadd.f32 %v23782_v27, %v23780_v41  ;;  %v6598_v27 = vrot.slane %v23797_v26, 5 }
0x103d   : > { %v6175_v21 = vmax.f32 %v23977_v11, 0.0  ;;  %v15915_v11 = vld [vmem:[%s25973_s13 + $0x288] sm:$0xff] }
0x103e   : > { %20639 = vmatpush3.bf16.msra.mxu1 %v20638_v29  ;;  %20675 = vmatpush3.bf16.msra.mxu0 %v20674_v25  ;;  %v15860_v29 = vld [vmem:[%s25973_s13 + $0x200] sm:$0xff]  ;;  %v15861_v25 = vld [vmem:[%s25973_s13 + $0x208] sm:$0xff] }
0x103f   : > { %20652 = vmatprep.subr.bf16.mxu1 %v21803_v4  ;;  %20688 = vmatprep.subr.bf16.mxu0 %v21803_v4  ;;  %v20713_v63 = vpack.c.bf16 %v15861_v25, %v15860_v29  ;;  %v15853_v29 = vld [vmem:[%s25973_s13 + $0x1d0] sm:$0xff]  ;;  %v15854_v25 = vld [vmem:[%s25973_s13 + $0x1d8] sm:$0xff] }
0x1041   : > { %18676 = vmatmul.mubr.msk.f32.vlgmr.msra.gmra.mrb[18].mxu1 %vm6195_vm3, %v23797_v26  ;;  %18733 = vmatmul.mubr.msk.f32.vlgmr.msra.gmra.mrb[6].mxu0 %vm6195_vm3, %v6515_v34  ;;  %v15863_v34 = vld [vmem:[%s25973_s13 + $0x218] sm:$0xff] }
0x1042   : > { %20654 = vmatpush3.bf16.msra.mxu1 %v20653_v9  ;;  %20690 = vmatpush3.bf16.msra.mxu0 %v20689_v10  ;;  %v6681_v9 = vrot.slane %v23797_v26, 6  ;;  %v15836_v10 = vld [vmem:[%s25973_s13 + $0x158] sm:$0xff]  ;;  %v20716_v28 = vpack.c.bf16 %v15863_v34, %v15862_v20  ;;  %v15869_v20 = vld [vmem:[%s25973_s13 + $0x240] sm:$0xff]  ;;  %v15870_v34 = vld [vmem:[%s25973_s13 + $0x248] sm:$0xff] }
0x1043   : > { %20655 = vmatprep.subr.bf16.mxu1 %v21803_v4  ;;  %20691 = vmatprep.subr.bf16.mxu0 %v21803_v4  ;;  %v20680_v0 = vpack.c.bf16 %v15836_v10, %v15835_v5  ;;  %v15856_v5 = vld [vmem:[%s25973_s13 + $0x1e8] sm:$0xff] }
0x1044   : > { %18713 = vmatprep.mubr.msk.f32.mxu1 %vm21804_vm0, %v21795_v1  ;;  %18770 = vmatprep.mubr.msk.f32.mxu0 %vm21804_vm0, %v21795_v1 }
0x1046   : > { %20657 = vmatpush3.bf16.msra.mxu1 %v20656_v47  ;;  %20693 = vmatpush3.bf16.msra.mxu0 %v20692_v49  ;;  %v15838_v47 = vld [vmem:[%s25973_s13 + $0x168] sm:$0xff]  ;;  %v15864_v49 = vld [vmem:[%s25973_s13 + $0x220] sm:$0xff] }
0x1047   : > { %20658 = vmatprep.subr.bf16.mxu1 %v21803_v4  ;;  %20694 = vmatprep.subr.bf16.mxu0 %v21803_v4  ;;  %v20683_v18 = vpack.c.bf16 %v15838_v47, %v15837_v12  ;;  %v20719_v19 = vpack.c.bf16 %v15865_v62, %v15864_v49  ;;  %v15873_v12 = vld [vmem:[%s25973_s13 + $0x260] sm:$0xff]  ;;  %v15874_v47 = vld [vmem:[%s25973_s13 + $0x268] sm:$0xff]  ;;  %v15876_v49 = vld [vmem:[%s25973_s13 + $0x278] sm:$0xff] }
0x1048   : > { %v7232_v62 = vld [vmem:[#allocation3 + $0x48] sm:$0xff] }
0x104a   : > { %20660 = vmatpush3.bf16.msra.mxu1 %v20659_v8  ;;  %20696 = vmatpush3.bf16.msra.mxu0 %v20695_v59  ;;  %v15840_v8 = vld [vmem:[%s25973_s13 + $0x178] sm:$0xff]  ;;  %v15866_v59 = vld [vmem:[%s25973_s13 + $0x230] sm:$0xff] }
0x104b   : > { %20661 = vmatprep.subr.bf16.mxu1 %v21803_v4  ;;  %20697 = vmatprep.subr.bf16.mxu0 %v21803_v4  ;;  %v20686_v35 = vpack.c.bf16 %v15840_v8, %v15839_v33  ;;  %v20722_v3 = vpack.c.bf16 %v15867_v16, %v15866_v59  ;;  %v6930_v8 = vrot.slane %v6175_v21, 1  ;;  %v7234_v59 = vld [vmem:[#allocation3 + $0x58] sm:$0x3f]  ;;  %v7714_v16 = vld [vmem:[#allocation3 + $0x68] sm:$0xff] }
0x104e   : > { %20663 = vmatpush3.bf16.msra.mxu1 %v20662_v14  ;;  %20699 = vmatpush3.bf16.msra.mxu0 %v20698_v53  ;;  %v15851_v14 = vld [vmem:[%s25973_s13 + $0x1c0] sm:$0xff]  ;;  %v15852_v53 = vld [vmem:[%s25973_s13 + $0x1c8] sm:$0xff] }
0x104f   : > { %20676 = vmatprep.subr.bf16.mxu1 %v21803_v4  ;;  %20712 = vmatprep.subr.bf16.mxu0 %v21803_v4  ;;  %v20701_v50 = vpack.c.bf16 %v15852_v53, %v15851_v14  ;;  %v15917_v53 = vld [vmem:[%s25973_s13 + $0x298] sm:$0xff] }
0x1051   : > { %18714 = vmatmul.mubr.msk.f32.vlgmr.msra.gmra.mrb[20].mxu1 %vm6195_vm3, %v6432_v43  ;;  %18771 = vmatmul.mubr.msk.f32.vlgmr.msra.gmra.mrb[8].mxu0 %vm6195_vm3, %v6681_v9  ;;  %v15858_v9 = vld [vmem:[%s25973_s13 + $0x1f8] sm:$0xff] }
0x1052   : > { %20678 = vmatpush3.bf16.msra.mxu1 %v20677_v13  ;;  %20714 = vmatpush3.bf16.msra.mxu0 %v20713_v63  ;;  %v20704_v13 = vpack.c.bf16 %v15854_v25, %v15853_v29  ;;  %v15855_v63 = vld [vmem:[%s25973_s13 + $0x1e0] sm:$0xff] }
0x1053   : > { %20679 = vmatprep.subr.bf16.mxu1 %v21803_v4  ;;  %20715 = vmatprep.subr.bf16.mxu0 %v21803_v4  ;;  %v20707_v43 = vpack.c.bf16 %v15856_v5, %v15855_v63 }
0x1054   : > { %18751 = vmatprep.mubr.msk.f32.mxu1 %vm21804_vm0, %v21795_v1  ;;  %18808 = vmatprep.mubr.msk.f32.mxu0 %vm21804_vm0, %v21795_v1 }
0x1056   : > { %20681 = vmatpush3.bf16.msra.mxu1 %v20680_v0  ;;  %20717 = vmatpush3.bf16.msra.mxu0 %v20716_v28  ;;  %v6764_v0 = vrot.slane %v23797_v26, 7  ;;  %v15872_v28 = vld [vmem:[%s25973_s13 + $0x258] sm:$0xff] }
0x1057   : > { %20682 = vmatprep.subr.bf16.mxu1 %v21803_v4  ;;  %20718 = vmatprep.subr.bf16.mxu0 %v21803_v4 }
0x105a   : > { %20684 = vmatpush3.bf16.msra.mxu1 %v20683_v18  ;;  %20720 = vmatpush3.bf16.msra.mxu0 %v20719_v19  ;;  %v7233_v18 = vld [vmem:[#allocation3 + $0x50] sm:$0xff] }
0x105b   : > { %20685 = vmatprep.subr.bf16.mxu1 %v21803_v4  ;;  %20721 = vmatprep.subr.bf16.mxu0 %v21803_v4  ;;  %v20760_v33 = vpack.c.bf16 %v7233_v18, %v7232_v62 }
0x105e   : > { %20687 = vmatpush3.bf16.msra.mxu1 %v20686_v35  ;;  %20723 = vmatpush3.bf16.msra.mxu0 %v20722_v3  ;;  %v7715_v3 = vld [vmem:[#allocation3 + $0x70] sm:$0x3f] }
0x105f   : > { %20700 = vmatprep.subr.bf16.mxu1 %v21803_v4  ;;  %20737 = vmatprep.subr.bf16.mxu0 %v23458_v45 }
0x1061   : > { %18752 = vmatmul.mubr.msk.f32.vlgmr.msra.gmra.mrb[22].mxu1 %vm6195_vm3, %v6598_v27  ;;  %18809 = vmatmul.mubr.msk.f32.vlgmr.msra.gmra.mrb[10].mxu0 %vm6195_vm3, %v6175_v21  ;;  %v15918_v21 = vld [vmem:[%s25973_s13 + $0x2a0] sm:$0xff]  ;;  %v15919_v27 = vld [vmem:[%s25973_s13 + $0x2a8] sm:$0xff] }
0x1062   : > { %20702 = vmatpush3.bf16.msra.mxu1 %v20701_v50  ;;  %20739 = vmatpush3.bf16.msra.mxu0 %v23458_v45  ;;  %v20839_v29 = vpack.c.bf16 %v15919_v27, %v15918_v21  ;;  %v15943_v21 = vld [vmem:[%s25973_s13 + $0x350] sm:$0xff]  ;;  %v15944_v27 = vld [vmem:[%s25973_s13 + $0x358] sm:$0xff] }
0x1063   : > { %18838 = vmatprep.mubr.msk.f32.mxu0 %vm776_vm2, %v23664_v52  ;;  %20703 = vmatprep.subr.bf16.mxu1 %v21803_v4  ;;  %v15857_v52 = vld [vmem:[%s25973_s13 + $0x1f0] sm:$0xff] }
0x1064   : > { %20741 = vmatprep.subr.bf16.mxu0 %v23466_v48  ;;  %18789 = vmatprep.mubr.msk.f32.mxu1 %vm21804_vm0, %v21795_v1  ;;  %v20710_v10 = vpack.c.bf16 %v15858_v9, %v15857_v52 }
0x1066   : > { %20705 = vmatpush3.bf16.msra.mxu1 %v20704_v13  ;;  %20743 = vmatpush3.bf16.msra.mxu0 %v23466_v48 }
0x1067   : > { %20706 = vmatprep.subr.bf16.mxu1 %v21803_v4  ;;  %20745 = vmatprep.subr.bf16.mxu0 %v23525_v2 }
0x1069   : > { %18839 = vmatmul.mubr.msk.f32.vlgmr.msra.gmra.mrb[12].mxu0 %vm776_vm2, %v23656_v7  ;;  %v20725_v7 = vpack.c.bf16 %v15870_v34, %v15869_v20 }
0x106a   : > { %20708 = vmatpush3.bf16.msra.mxu1 %v20707_v43  ;;  %20747 = vmatpush3.bf16.msra.mxu0 %v23525_v2 }
0x106b   : > { %18849 = vmatprep.mubr.msk.f32.mxu0 %vm776_vm2, %v23639_v51  ;;  %20709 = vmatprep.subr.bf16.mxu1 %v21803_v4  ;;  %v15871_v51 = vld [vmem:[%s25973_s13 + $0x250] sm:$0xff] }
0x106c   : > { %20749 = vmatprep.subr.bf16.mxu0 %v23549_v39  ;;  %v20728_v26 = vpack.c.bf16 %v15872_v28, %v15871_v51 }
0x106e   : > { %20711 = vmatpush3.bf16.msra.mxu1 %v20710_v10  ;;  %20751 = vmatpush3.bf16.msra.mxu0 %v23549_v39 }
0x106f   : > { %20724 = vmatprep.subr.bf16.mxu1 %v21803_v4  ;;  %20753 = vmatprep.subr.bf16.mxu0 %v23562_v54 }
0x1071   : > { %18790 = vmatmul.mubr.msk.f32.vlgmr.msra.gmra.mrb[24].mxu1 %vm6195_vm3, %v6764_v0  ;;  %18850 = vmatmul.mubr.msk.f32.vlgmr.msra.gmra.mrb[12].mxu0 %vm776_vm2, %v23636_v46  ;;  %v20731_v46 = vpack.c.bf16 %v15874_v47, %v15873_v12 }
0x1072   : > { %20726 = vmatpush3.bf16.msra.mxu1 %v20725_v7  ;;  %20755 = vmatpush3.bf16.msra.mxu0 %v23562_v54 }
0x1073   : > { %18860 = vmatprep.mubr.msk.f32.mxu0 %vm776_vm2, %v23682_v24  ;;  %20727 = vmatprep.subr.bf16.mxu1 %v21803_v4  ;;  %v15875_v24 = vld [vmem:[%s25973_s13 + $0x270] sm:$0xff] }
0x1074   : > { %20757 = vmatprep.subr.bf16.mxu0 %v23572_v15  ;;  %18827 = vmatprep.mubr.msk.f32.mxu1 %vm21804_vm0, %v21795_v1  ;;  %v20734_v19 = vpack.c.bf16 %v15876_v49, %v15875_v24 }
0x1076   : > { %20729 = vmatpush3.bf16.msra.mxu1 %v20728_v26  ;;  %20759 = vmatpush3.bf16.msra.mxu0 %v23572_v15 }
0x1077   : > { %20730 = vmatprep.subr.bf16.mxu1 %v21803_v4  ;;  %20765 = vmatprep.subr.bf16.mxu0 %v23584_v32 }
0x1079   : > { %18861 = vmatmul.mubr.msk.f32.vlgmr.msra.gmra.mrb[12].mxu0 %vm776_vm2, %v23677_v22  ;;  %v7713_v22 = vld [vmem:[#allocation3 + $0x60] sm:$0xff] }
0x107a   : > { %20732 = vmatpush3.bf16.msra.mxu1 %v20731_v46  ;;  %20767 = vmatpush3.bf16.msra.mxu0 %v23584_v32  ;;  %v20796_v35 = vpack.c.bf16 %v7714_v16, %v7713_v22 }
0x107b   : > { %20733 = vmatprep.subr.bf16.mxu1 %v21803_v4  ;;  %20769 = vmatprep.subr.bf16.mxu0 %v23594_v31 }
0x107e   : > { %20735 = vmatpush3.bf16.msra.mxu1 %v20734_v19  ;;  %20771 = vmatpush3.bf16.msra.mxu0 %v23594_v31 }
0x107f   : > { %20761 = vmatprep.subr.bf16.mxu1 %v20760_v33  ;;  %20777 = vmatprep.subr.bf16.mxu0 %v23606_v17 }
0x1081   : > { %18828 = vmatmul.mubr.msk.f32.vlgmr.msra.gmra.mrb[26].mxu1 %vm6195_vm3, %v6930_v8 }
0x1082   : > { %20763 = vmatpush3.bf16.msra.mxu1 %v20760_v33  ;;  %18869 = vmatprep.mubr.msk.f32.mxu1 %vm4660_vm15, %v23423_v55 }
0x1083   : > { %18867 = vmatprep.subr.msk.mxu1 %vm4667_vm1, %v7234_v59 }
0x1086   : > { %18868 = vmatpush3.msk.msra.mxu1 %vm4667_vm1, %v7234_v59 }
0x1087   : > { %18870 = vmatmul.mubr.msk.f32.vlgmr.msra.gmra.mrb[28].mxu1 %vm4660_vm15, %v23445_v38  ;;  %20773 = vmatprep.subr.bf16.mxu1 %v20760_v33 }
0x1088   : > { %20775 = vmatpush3.bf16.msra.mxu1 %v20760_v33  ;;  %18889 = vmatprep.mubr.msk.f32.mxu1 %vm4660_vm15, %v23418_v23 }
0x1089   : > { %18887 = vmatprep.subr.msk.mxu1 %vm4667_vm1, %v7234_v59 }
0x108c   : > { %18888 = vmatpush3.msk.msra.mxu1 %vm4667_vm1, %v7234_v59 }
0x108d   : > { %18890 = vmatmul.mubr.msk.f32.vlgmr.msra.gmra.mrb[30].mxu1 %vm4660_vm15, %v23433_v36  ;;  %20785 = vmatprep.subr.bf16.mxu1 %v20760_v33 }
0x108e   : > { %20787 = vmatpush3.bf16.msra.mxu1 %v20760_v33  ;;  %18909 = vmatprep.mubr.msk.f32.mxu1 %vm4660_vm15, %v23456_v42 }
0x108f   : > { %18907 = vmatprep.subr.msk.mxu1 %vm4667_vm1, %v7234_v59 }
0x1092   : > { %18908 = vmatpush3.msk.msra.mxu1 %vm4667_vm1, %v7234_v59 }
0x1093   : > { %18910 = vmatmul.mubr.msk.f32.vlgmr.msra.gmra.mrb[32].mxu1 %vm4660_vm15, %v23476_v57  ;;  %20797 = vmatprep.subr.bf16.mxu1 %v20796_v35 }
0x1094   : > { %20799 = vmatpush3.bf16.msra.mxu1 %v20796_v35  ;;  %18929 = vmatprep.mubr.msk.f32.mxu1 %vm4660_vm15, %v23423_v55 }
0x1095   : > { %18927 = vmatprep.subr.msk.mxu1 %vm4667_vm1, %v7715_v3 }
0x1098   : > { %18928 = vmatpush3.msk.msra.mxu1 %vm4667_vm1, %v7715_v3 }
0x1099   : > { %18930 = vmatmul.mubr.msk.f32.vlgmr.msra.gmra.mrb[34].mxu1 %vm4660_vm15, %v23445_v38  ;;  %20809 = vmatprep.subr.bf16.mxu1 %v20796_v35 }
0x109a   : > { %20811 = vmatpush3.bf16.msra.mxu1 %v20796_v35  ;;  %18949 = vmatprep.mubr.msk.f32.mxu1 %vm4660_vm15, %v23418_v23 }
0x109b   : > { %18947 = vmatprep.subr.msk.mxu1 %vm4667_vm1, %v7715_v3 }
0x109e   : > { %18948 = vmatpush3.msk.msra.mxu1 %vm4667_vm1, %v7715_v3 }
0x109f   : > { %18950 = vmatmul.mubr.msk.f32.vlgmr.msra.gmra.mrb[36].mxu1 %vm4660_vm15, %v23433_v36  ;;  %20821 = vmatprep.subr.bf16.mxu1 %v20796_v35 }
0x10a0   : > { %20823 = vmatpush3.bf16.msra.mxu1 %v20796_v35  ;;  %18969 = vmatprep.mubr.msk.f32.mxu1 %vm4660_vm15, %v23456_v42  ;;  %v15914_v42 = vld [vmem:[%s25973_s13 + $0x280] sm:$0xff] }
0x10a1   : > { %18967 = vmatprep.subr.msk.mxu1 %vm4667_vm1, %v7715_v3  ;;  %v20833_v14 = vpack.c.bf16 %v15915_v11, %v15914_v42 }
0x10a4   : > { %18968 = vmatpush3.msk.msra.mxu1 %vm4667_vm1, %v7715_v3 }
0x10a5   : > { %18970 = vmatmul.mubr.msk.f32.vlgmr.msra.gmra.mrb[38].mxu1 %vm4660_vm15, %v23476_v57  ;;  %20832 = vmatprep.subr.bf16.mxu1 %v21803_v4  ;;  %v15916_v57 = vld [vmem:[%s25973_s13 + $0x290] sm:$0xff] }
0x10a6   : > { %18999 = vmatprep.mubr.msk.f32.mxu1 %vm21804_vm0, %v21795_v1  ;;  %20834 = vmatpush3.bf16.msra.mxu1 %v20833_v14  ;;  %v20836_v50 = vpack.c.bf16 %v15917_v53, %v15916_v57  ;;  %v15941_v57 = vld [vmem:[%s25973_s13 + $0x340] sm:$0xff]  ;;  %v15942_v53 = vld [vmem:[%s25973_s13 + $0x348] sm:$0xff] }
0x10a7   : > { %20835 = vmatprep.subr.bf16.mxu1 %v21803_v4 }
0x10aa   : > { %20837 = vmatpush3.bf16.msra.mxu1 %v20836_v50  ;;  %v20869_v50 = vpack.c.bf16 %v15942_v53, %v15941_v57  ;;  %v15929_v53 = vld [vmem:[%s25973_s13 + $0x2f0] sm:$0xff] }
0x10ab   : > { %20838 = vmatprep.subr.bf16.mxu1 %v21803_v4 }
0x10ae   : > { %20840 = vmatpush3.bf16.msra.mxu1 %v20839_v29  ;;  %v20872_v29 = vpack.c.bf16 %v15944_v27, %v15943_v21  ;;  %v15965_v27 = vld [vmem:[%s25973_s13 + $0x3f0] sm:$0xff] }
0x10af   : > { %20841 = vmatprep.subr.bf16.mxu1 %v21803_v4 }
0x1104   : > { %v6264_v23 = vpop.f32.mrb[16].mxu1  ;;  %v6418_v55 = vpop.f32.mrb[4].mxu0 }
0x1105   : > { %v18658_v36 = vpop.f32.mrb[17].mxu1  ;;  %v18696_v38 = vpop.f32.mrb[5].mxu0 }
0x1114   : > { %v6336_v25 = vpop.f32.mrb[18].mxu1  ;;  %v6584_v13 = vpop.f32.mrb[6].mxu0 }
0x1115   : > { %v6337_v63 = vadd.f32 %v6336_v25, %v6264_v23  ;;  %v18677_v5 = vpop.f32.mrb[19].mxu1  ;;  %v18734_v43 = vpop.f32.mrb[7].mxu0  ;;  %v15945_v25 = vld [vmem:[%s25973_s13 + $0x360] sm:$0xff] }
0x1116   : > { %v15920_v5 = vld [vmem:[%s25973_s13 + $0x2b0] sm:$0xff]  ;;  %v15921_v43 = vld [vmem:[%s25973_s13 + $0x2b8] sm:$0xff] }
0x1117   : > { %v6422_v52 = vadd.f32 %v6418_v55, %v6337_v63 }
0x1124   : > { %v6501_v9 = vpop.f32.mrb[20].mxu1  ;;  %v6750_v10 = vpop.f32.mrb[8].mxu0 }
0x1125   : > { %v6505_v20 = vadd.f32 %v6501_v9, %v6422_v52  ;;  %v18715_v34 = vpop.f32.mrb[21].mxu1  ;;  %v18772_v7 = vpop.f32.mrb[9].mxu0  ;;  %v20842_v52 = vpack.c.bf16 %v15921_v43, %v15920_v5  ;;  %v15947_v9 = vld [vmem:[%s25973_s13 + $0x370] sm:$0xff]  ;;  %v15977_v43 = vld [vmem:[%s25973_s13 + $0x440] sm:$0xff] }
0x1126   : > { %v15923_v7 = vld [vmem:[%s25973_s13 + $0x2c0] sm:$0xff] }
0x1127   : > { %v6588_v0 = vadd.f32 %v6584_v13, %v6505_v20  ;;  %v15946_v13 = vld [vmem:[%s25973_s13 + $0x368] sm:$0xff]  ;;  %20843 = vmatpush3.bf16.msra.mxu1 %v20842_v52 }
0x1128   : > { %v20875_v63 = vpack.c.bf16 %v15946_v13, %v15945_v25  ;;  %20844 = vmatprep.subr.bf16.mxu1 %v21803_v4  ;;  %v15932_v13 = vld [vmem:[%s25973_s13 + $0x300] sm:$0xff]  ;;  %v15978_v52 = vld [vmem:[%s25973_s13 + $0x448] sm:$0xff] }
0x1134   : > { %v6667_v51 = vpop.f32.mrb[22].mxu1  ;;  %v6916_v28 = vpop.f32.mrb[10].mxu0 }
0x1135   : > { %v6671_v26 = vadd.f32 %v6667_v51, %v6588_v0  ;;  %v18753_v12 = vpop.f32.mrb[23].mxu1  ;;  %v18810_v47 = vpop.f32.mrb[11].mxu0  ;;  %v15924_v0 = vld [vmem:[%s25973_s13 + $0x2c8] sm:$0xff] }
0x1136   : > { %v15960_v12 = vld [vmem:[%s25973_s13 + $0x3c8] sm:$0xff]  ;;  %v20845_v47 = vpack.c.bf16 %v15924_v0, %v15923_v7  ;;  %v15935_v7 = vld [vmem:[%s25973_s13 + $0x318] sm:$0xff]  ;;  %v20917_v0 = vpack.c.bf16 %v15978_v52, %v15977_v43  ;;  %v15997_v43 = vld [vmem:[%s25973_s13 + $0x4d0] sm:$0xff] }
0x1137   : > { %v6754_v46 = vadd.f32 %v6750_v10, %v6671_v26  ;;  %v15948_v10 = vld [vmem:[%s25973_s13 + $0x378] sm:$0xff]  ;;  %v15959_v26 = vld [vmem:[%s25973_s13 + $0x3c0] sm:$0xff] }
0x1138   : > { %v20878_v20 = vpack.c.bf16 %v15948_v10, %v15947_v9  ;;  %v15998_v52 = vld [vmem:[%s25973_s13 + $0x4d8] sm:$0xff] }
0x1144   : > { %v6833_v24 = vpop.f32.mrb[24].mxu1 }
0x1145   : > { %v6837_v49 = vadd.f32 %v6833_v24, %v6754_v46  ;;  %v18791_v62 = vpop.f32.mrb[25].mxu1  ;;  %v15925_v24 = vld [vmem:[%s25973_s13 + $0x2d0] sm:$0xff] }
0x1146   : > { %v20893_v62 = vpack.c.bf16 %v15960_v12, %v15959_v26  ;;  %v15980_v26 = vld [vmem:[%s25973_s13 + $0x458] sm:$0xff] }
0x1147   : > { %v6920_v18 = vadd.f32 %v6916_v28, %v6837_v49  ;;  %v15926_v49 = vld [vmem:[%s25973_s13 + $0x2d8] sm:$0xff] }
0x1154   : > { %v6999_v19 = vpop.f32.mrb[26].mxu1 }
0x1155   : > { %v24141_v33 = vadd.f32 %v6999_v19, %v6920_v18  ;;  %v18829_v8 = vpop.f32.mrb[27].mxu1  ;;  %v15961_v19 = vld [vmem:[%s25973_s13 + $0x3d0] sm:$0xff] }
0x1156   : > { %v15962_v8 = vld [vmem:[%s25973_s13 + $0x3d8] sm:$0xff] }
0x115a   : > { %v18871_v59 = vpop.f32.mrb[28].mxu1 }
0x115b   : > { %v7304_v22 = vpop.f32.mrb[29].mxu1 }
0x115c   : > { %18880 = vmatprep.mubr.msk.f32.mxu0 %vm776_vm2, %v7304_v22  ;;  %v15927_v22 = vld [vmem:[%s25973_s13 + $0x2e0] sm:$0xff] }
0x115d   : > { %18881 = vmatmul.mubr.msk.f32.vlgmr.msra.gmra.mrb[12].mxu0 %vm776_vm2, %v18871_v59  ;;  %v20848_v59 = vpack.c.bf16 %v15926_v49, %v15925_v24  ;;  %v15937_v24 = vld [vmem:[%s25973_s13 + $0x328] sm:$0xff] }
0x115e   : > { %20779 = vmatpush3.bf16.msra.mxu0 %v23606_v17 }
0x115f   : > { %20781 = vmatprep.subr.bf16.mxu0 %v23616_v30 }
0x1160   : > { %v18891_v16 = vpop.f32.mrb[30].mxu1 }
0x1161   : > { %v7462_v35 = vpop.f32.mrb[31].mxu1 }
0x1162   : > { %20783 = vmatpush3.bf16.msra.mxu0 %v23616_v30  ;;  %18900 = vmatprep.mubr.msk.f32.mxu0 %vm776_vm2, %v7462_v35  ;;  %v20896_v35 = vpack.c.bf16 %v15962_v8, %v15961_v19  ;;  %v15938_v8 = vld [vmem:[%s25973_s13 + $0x330] sm:$0xff] }
0x1163   : > { %20789 = vmatprep.subr.bf16.mxu0 %v23628_v40 }
0x1165   : > { %18901 = vmatmul.mubr.msk.f32.vlgmr.msra.gmra.mrb[12].mxu0 %vm776_vm2, %v18891_v16  ;;  %v15928_v16 = vld [vmem:[%s25973_s13 + $0x2e8] sm:$0xff] }
0x1166   : > { %20791 = vmatpush3.bf16.msra.mxu0 %v23628_v40  ;;  %v18911_v3 = vpop.f32.mrb[32].mxu1  ;;  %v20851_v57 = vpack.c.bf16 %v15928_v16, %v15927_v22  ;;  %v15983_v16 = vld [vmem:[%s25973_s13 + $0x470] sm:$0xff] }
0x1167   : > { %20793 = vmatprep.subr.bf16.mxu0 %v23642_v60  ;;  %v7620_v23 = vpop.f32.mrb[33].mxu1 }
0x1168   : > { %18920 = vmatprep.mubr.msk.f32.mxu0 %vm776_vm2, %v7620_v23  ;;  %v15964_v23 = vld [vmem:[%s25973_s13 + $0x3e8] sm:$0xff] }
0x116a   : > { %20795 = vmatpush3.bf16.msra.mxu0 %v23642_v60 }
0x116b   : > { %20801 = vmatprep.subr.bf16.mxu0 %v23654_v6 }
0x116c   : > { %v24156_v55 = vpop.f32.mrb[34].mxu1 }
0x116d   : > { %18921 = vmatmul.mubr.msk.f32.vlgmr.msra.gmra.mrb[12].mxu0 %vm776_vm2, %v18911_v3  ;;  %v24159_v36 = vpop.f32.mrb[35].mxu1  ;;  %v15963_v3 = vld [vmem:[%s25973_s13 + $0x3e0] sm:$0xff] }
0x116e   : > { %20803 = vmatpush3.bf16.msra.mxu0 %v23654_v6  ;;  %18940 = vmatprep.mubr.msk.f32.mxu0 %vm776_vm2, %v24159_v36  ;;  %v20899_v21 = vpack.c.bf16 %v15964_v23, %v15963_v3  ;;  %v15950_v23 = vld [vmem:[%s25973_s13 + $0x380] sm:$0xff] }
0x116f   : > { %20805 = vmatprep.subr.bf16.mxu0 %v23668_v61 }
0x1172   : > { %20807 = vmatpush3.bf16.msra.mxu0 %v23668_v61  ;;  %v24166_v38 = vpop.f32.mrb[36].mxu1 }
0x1173   : > { %20813 = vmatprep.subr.bf16.mxu0 %v23685_v58  ;;  %v24169_v42 = vpop.f32.mrb[37].mxu1 }
0x1175   : > { %18941 = vmatmul.mubr.msk.f32.vlgmr.msra.gmra.mrb[12].mxu0 %vm776_vm2, %v24156_v55 }
0x1176   : > { %20815 = vmatpush3.bf16.msra.mxu0 %v23685_v58  ;;  %18960 = vmatprep.mubr.msk.f32.mxu0 %vm776_vm2, %v24169_v42 }
0x1177   : > { %20817 = vmatprep.subr.bf16.mxu0 %v23695_v56 }
0x1178   : > { %v24177_v11 = vpop.f32.mrb[38].mxu1 }
0x1179   : > { %v24179_v14 = vpop.f32.mrb[39].mxu1 }
0x117a   : > { %20819 = vmatpush3.bf16.msra.mxu0 %v23695_v56 }
0x117b   : > { %20825 = vmatprep.subr.bf16.mxu0 %v23709_v44 }
0x117d   : > { %18961 = vmatmul.mubr.msk.f32.vlgmr.msra.gmra.mrb[12].mxu0 %vm776_vm2, %v24166_v38 }
0x117e   : > { %20827 = vmatpush3.bf16.msra.mxu0 %v23709_v44  ;;  %18980 = vmatprep.mubr.msk.f32.mxu0 %vm776_vm2, %v24179_v14 }
0x117f   : > { %20829 = vmatprep.subr.bf16.mxu0 %v23719_v37 }
0x1182   : > { %20831 = vmatpush3.bf16.msra.mxu0 %v23719_v37 }
0x1183   : > { %20868 = vmatprep.subr.bf16.mxu0 %v21803_v4 }
0x1185   : > { %18981 = vmatmul.mubr.msk.f32.vlgmr.msra.gmra.mrb[12].mxu0 %vm776_vm2, %v24177_v11 }
0x1186   : > { %20870 = vmatpush3.bf16.msra.mxu0 %v20869_v50  ;;  %19056 = vmatprep.mubr.msk.f32.mxu0 %vm21804_vm0, %v21795_v1  ;;  %v15930_v50 = vld [vmem:[%s25973_s13 + $0x2f8] sm:$0xff] }
0x1187   : > { %20871 = vmatprep.subr.bf16.mxu0 %v21803_v4  ;;  %v20854_v25 = vpack.c.bf16 %v15930_v50, %v15929_v53  ;;  %v15995_v50 = vld [vmem:[%s25973_s13 + $0x4c0] sm:$0xff] }
0x118a   : > { %20873 = vmatpush3.bf16.msra.mxu0 %v20872_v29  ;;  %v15966_v29 = vld [vmem:[%s25973_s13 + $0x3f8] sm:$0xff] }
0x118b   : > { %20874 = vmatprep.subr.bf16.mxu0 %v21803_v4  ;;  %v20902_v5 = vpack.c.bf16 %v15966_v29, %v15965_v27 }
0x118e   : > { %20876 = vmatpush3.bf16.msra.mxu0 %v20875_v63  ;;  %v15933_v63 = vld [vmem:[%s25973_s13 + $0x308] sm:$0xff] }
0x118f   : > { %20877 = vmatprep.subr.bf16.mxu0 %v21803_v4  ;;  %v20857_v9 = vpack.c.bf16 %v15933_v63, %v15932_v13  ;;  %v15953_v13 = vld [vmem:[%s25973_s13 + $0x398] sm:$0xff] }
0x1192   : > { %20879 = vmatpush3.bf16.msra.mxu0 %v20878_v20  ;;  %v15934_v20 = vld [vmem:[%s25973_s13 + $0x310] sm:$0xff] }
0x1193   : > { %20892 = vmatprep.subr.bf16.mxu0 %v21803_v4  ;;  %v20860_v12 = vpack.c.bf16 %v15935_v7, %v15934_v20  ;;  %v15955_v20 = vld [vmem:[%s25973_s13 + $0x3a8] sm:$0xff]  ;;  %v20944_v7 = vpack.c.bf16 %v15998_v52, %v15997_v43 }
0x1194   : > { %v24476_v43 = vld [vmem:[%s25996_s28 + $0x8] sm:$0x3] }
0x1258   : > { %v24230_v34 = vpop.f32.mrb[12].mxu0 }
0x1259   : > { %v8182_v51 = vpop.f32.mrb[13].mxu0 }
0x125a   : > { %v8193_v28 = vadd.f32 %v23780_v41, %v8182_v51 }
0x125c   : > { %v24245_v46 = vmax.f32 %v8193_v28, 0.0  ;;  %v15979_v28 = vld [vmem:[%s25973_s13 + $0x450] sm:$0xff] }
0x125d   : > { %v20920_v49 = vpack.c.bf16 %v15980_v26, %v15979_v28  ;;  %v15956_v26 = vld [vmem:[%s25973_s13 + $0x3b0] sm:$0xff] }
0x125e   : > { %19000 = vmatmul.mubr.msk.f32.vlgmr.msra.gmra.mrb[40].mxu1 %vm6195_vm3, %v24245_v46  ;;  %v8455_v18 = vrot.slane %v24245_v46, 3  ;;  %v8289_v10 = vrot.slane %v24245_v46, 1  ;;  %v8621_v51 = vrot.slane %v24245_v46, 5  ;;  %v8372_v29 = vrot.slane %v24245_v46, 2 }
0x125f   : > { %20846 = vmatpush3.bf16.msra.mxu1 %v20845_v47  ;;  %19018 = vmatprep.mubr.msk.f32.mxu1 %vm21804_vm0, %v21795_v1  ;;  %v15936_v47 = vld [vmem:[%s25973_s13 + $0x320] sm:$0xff] }
0x1260   : > { %19057 = vmatmul.mubr.msk.f32.vlgmr.msra.gmra.mrb[14].mxu0 %vm6195_vm3, %v8455_v18  ;;  %20847 = vmatprep.subr.bf16.mxu1 %v21803_v4  ;;  %v15982_v18 = vld [vmem:[%s25973_s13 + $0x468] sm:$0xff]  ;;  %v20863_v19 = vpack.c.bf16 %v15937_v24, %v15936_v47  ;;  %v24418_v24 = vadd.f32 %v24230_v34, %v23780_v41  ;;  %v15968_v41 = vld [vmem:[%s25973_s13 + $0x400] sm:$0xff] }
0x1261   : > { %20894 = vmatpush3.bf16.msra.mxu0 %v20893_v62  ;;  %19094 = vmatprep.mubr.msk.f32.mxu0 %vm21804_vm0, %v21795_v1  ;;  %v15981_v62 = vld [vmem:[%s25973_s13 + $0x460] sm:$0xff]  ;;  %v15969_v34 = vld [vmem:[%s25973_s13 + $0x408] sm:$0xff] }
0x1262   : > { %20895 = vmatprep.subr.bf16.mxu0 %v21803_v4  ;;  %v20923_v22 = vpack.c.bf16 %v15982_v18, %v15981_v62  ;;  %v16002_v62 = vld [vmem:[%s25973_s13 + $0x4f8] sm:$0xff] }
0x1263   : > { %20849 = vmatpush3.bf16.msra.mxu1 %v20848_v59  ;;  %v15939_v59 = vld [vmem:[%s25973_s13 + $0x338] sm:$0xff] }
0x1264   : > { %20850 = vmatprep.subr.bf16.mxu1 %v21803_v4  ;;  %v20866_v3 = vpack.c.bf16 %v15939_v59, %v15938_v8  ;;  %v9256_v8 = vld [vmem:[#allocation3 + $0x80] sm:$0xff] }
0x1265   : > { %20897 = vmatpush3.bf16.msra.mxu0 %v20896_v35  ;;  %v15984_v35 = vld [vmem:[%s25973_s13 + $0x478] sm:$0xff] }
0x1266   : > { %20898 = vmatprep.subr.bf16.mxu0 %v21803_v4  ;;  %v20926_v53 = vpack.c.bf16 %v15984_v35, %v15983_v16  ;;  %v20905_v35 = vpack.c.bf16 %v15969_v34, %v15968_v41  ;;  %v9738_v34 = vld [vmem:[#allocation3 + $0xa0] sm:$0x3f] }
0x1267   : > { %20852 = vmatpush3.bf16.msra.mxu1 %v20851_v57  ;;  %v15951_v57 = vld [vmem:[%s25973_s13 + $0x388] sm:$0xff] }
0x1268   : > { %20853 = vmatprep.subr.bf16.mxu1 %v21803_v4  ;;  %v20881_v27 = vpack.c.bf16 %v15951_v57, %v15950_v23  ;;  %v15970_v23 = vld [vmem:[%s25973_s13 + $0x410] sm:$0xff]  ;;  %v15971_v57 = vld [vmem:[%s25973_s13 + $0x418] sm:$0xff] }
0x1269   : > { %20900 = vmatpush3.bf16.msra.mxu0 %v20899_v21  ;;  %v15996_v21 = vld [vmem:[%s25973_s13 + $0x4c8] sm:$0xff] }
0x126a   : > { %20901 = vmatprep.subr.bf16.mxu0 %v21803_v4  ;;  %v20941_v63 = vpack.c.bf16 %v15996_v21, %v15995_v50  ;;  %v20908_v50 = vpack.c.bf16 %v15971_v57, %v15970_v23  ;;  %v9257_v21 = vld [vmem:[#allocation3 + $0x88] sm:$0x3f] }
0x126b   : > { %20855 = vmatpush3.bf16.msra.mxu1 %v20854_v25  ;;  %v15952_v25 = vld [vmem:[%s25973_s13 + $0x390] sm:$0xff] }
0x126c   : > { %20856 = vmatprep.subr.bf16.mxu1 %v21803_v4 }
0x126d   : > { %20903 = vmatpush3.bf16.msra.mxu0 %v20902_v5  ;;  %v8787_v5 = vrot.slane %v24245_v46, 7 }
0x126e   : > { %19019 = vmatmul.mubr.msk.f32.vlgmr.msra.gmra.mrb[42].mxu1 %vm6195_vm3, %v8289_v10  ;;  %20916 = vmatprep.subr.bf16.mxu0 %v21803_v4  ;;  %v15954_v10 = vld [vmem:[%s25973_s13 + $0x3a0] sm:$0xff] }
0x126f   : > { %20858 = vmatpush3.bf16.msra.mxu1 %v20857_v9  ;;  %19037 = vmatprep.mubr.msk.f32.mxu1 %vm21804_vm0, %v21795_v1  ;;  %v20884_v9 = vpack.c.bf16 %v15953_v13, %v15952_v25  ;;  %v20887_v28 = vpack.c.bf16 %v15955_v20, %v15954_v10  ;;  %v24460_v25 = vld [vmem:[%s25996_s28] sm:$0xff]  ;;  %v15987_v10 = vld [vmem:[%s25973_s13 + $0x488] sm:$0xff]  ;;  %v24491_v20 = vld [vmem:[%s25996_s28 + $0x10] sm:$0xff] }
0x1270   : > { %19095 = vmatmul.mubr.msk.f32.vlgmr.msra.gmra.mrb[16].mxu0 %vm6195_vm3, %v8621_v51  ;;  %20859 = vmatprep.subr.bf16.mxu1 %v21803_v4  ;;  %v16000_v51 = vld [vmem:[%s25973_s13 + $0x4e8] sm:$0xff] }
0x1271   : > { %20918 = vmatpush3.bf16.msra.mxu0 %v20917_v0  ;;  %19132 = vmatprep.mubr.msk.f32.mxu0 %vm21804_vm0, %v21795_v1  ;;  %v15999_v0 = vld [vmem:[%s25973_s13 + $0x4e0] sm:$0xff] }
0x1272   : > { %20919 = vmatprep.subr.bf16.mxu0 %v21803_v4  ;;  %v20947_v47 = vpack.c.bf16 %v16000_v51, %v15999_v0  ;;  %v24499_v0 = vld [vmem:[%s25996_s28 + $0x18] sm:$0x3]  ;;  %v8704_v51 = vrot.slane %v24245_v46, 6 }
0x1273   : > { %20861 = vmatpush3.bf16.msra.mxu1 %v20860_v12  ;;  %v15957_v12 = vld [vmem:[%s25973_s13 + $0x3b8] sm:$0xff] }
0x1274   : > { %20862 = vmatprep.subr.bf16.mxu1 %v21803_v4  ;;  %v20890_v18 = vpack.c.bf16 %v15957_v12, %v15956_v26  ;;  %v15989_v26 = vld [vmem:[%s25973_s13 + $0x498] sm:$0xff]  ;;  %v24514_v12 = vld [vmem:[%s25996_s28 + $0x20] sm:$0xff] }
0x1275   : > { %20921 = vmatpush3.bf16.msra.mxu0 %v20920_v49  ;;  %v16001_v49 = vld [vmem:[%s25973_s13 + $0x4f0] sm:$0xff] }
0x1276   : > { %20922 = vmatprep.subr.bf16.mxu0 %v21803_v4  ;;  %v20950_v59 = vpack.c.bf16 %v16002_v62, %v16001_v49  ;;  %v15990_v62 = vld [vmem:[%s25973_s13 + $0x4a0] sm:$0xff] }
0x1277   : > { %20864 = vmatpush3.bf16.msra.mxu1 %v20863_v19  ;;  %v9255_v19 = vld [vmem:[#allocation3 + $0x78] sm:$0xff] }
0x1278   : > { %20865 = vmatprep.subr.bf16.mxu1 %v21803_v4  ;;  %v20976_v16 = vpack.c.bf16 %v9256_v8, %v9255_v19  ;;  %v24533_v8 = vld [vmem:[%s25996_s28 + $0x28] sm:$0x3] }
0x1279   : > { %20924 = vmatpush3.bf16.msra.mxu0 %v20923_v22  ;;  %v8196_v22 = vmax.f32 %v24418_v24, 0.0  ;;  %v16044_v24 = vld [vmem:[%s25973_s13 + $0x520] sm:$0xff] }
0x127a   : > { %20925 = vmatprep.subr.bf16.mxu0 %v21803_v4 }
0x127b   : > { %20867 = vmatpush3.bf16.msra.mxu1 %v20866_v3  ;;  %v8538_v3 = vrot.slane %v24245_v46, 4  ;;  %v9736_v46 = vld [vmem:[#allocation3 + $0x90] sm:$0xff] }
0x127c   : > { %20880 = vmatprep.subr.bf16.mxu1 %v21803_v4 }
0x127d   : > { %20927 = vmatpush3.bf16.msra.mxu0 %v20926_v53  ;;  %v8953_v53 = vrot.slane %v8196_v22, 1 }
0x127e   : > { %19038 = vmatmul.mubr.msk.f32.vlgmr.msra.gmra.mrb[44].mxu1 %vm6195_vm3, %v8372_v29  ;;  %20940 = vmatprep.subr.bf16.mxu0 %v21803_v4  ;;  %v15973_v29 = vld [vmem:[%s25973_s13 + $0x428] sm:$0xff] }
0x127f   : > { %20882 = vmatpush3.bf16.msra.mxu1 %v20881_v27  ;;  %19075 = vmatprep.mubr.msk.f32.mxu1 %vm21804_vm0, %v21795_v1  ;;  %v15972_v27 = vld [vmem:[%s25973_s13 + $0x420] sm:$0xff] }
0x1280   : > { %19133 = vmatmul.mubr.msk.f32.vlgmr.msra.gmra.mrb[18].mxu0 %vm6195_vm3, %v8787_v5  ;;  %20883 = vmatprep.subr.bf16.mxu1 %v21803_v4  ;;  %v20911_v13 = vpack.c.bf16 %v15973_v29, %v15972_v27  ;;  %v15975_v5 = vld [vmem:[%s25973_s13 + $0x438] sm:$0xff] }
0x1281   : > { %20942 = vmatpush3.bf16.msra.mxu0 %v20941_v63  ;;  %19170 = vmatprep.mubr.msk.f32.mxu0 %vm21804_vm0, %v21795_v1  ;;  %v15974_v63 = vld [vmem:[%s25973_s13 + $0x430] sm:$0xff] }
0x1282   : > { %20943 = vmatprep.subr.bf16.mxu0 %v21803_v4  ;;  %v20914_v52 = vpack.c.bf16 %v15975_v5, %v15974_v63 }
0x1283   : > { %20885 = vmatpush3.bf16.msra.mxu1 %v20884_v9  ;;  %v15986_v9 = vld [vmem:[%s25973_s13 + $0x480] sm:$0xff] }
0x1284   : > { %20886 = vmatprep.subr.bf16.mxu1 %v21803_v4 }
0x1285   : > { %20945 = vmatpush3.bf16.msra.mxu0 %v20944_v7  ;;  %v20929_v7 = vpack.c.bf16 %v15987_v10, %v15986_v9 }
0x1286   : > { %20946 = vmatprep.subr.bf16.mxu0 %v21803_v4 }
0x1287   : > { %20888 = vmatpush3.bf16.msra.mxu1 %v20887_v28  ;;  %v15988_v28 = vld [vmem:[%s25973_s13 + $0x490] sm:$0xff] }
0x1288   : > { %20889 = vmatprep.subr.bf16.mxu1 %v21803_v4  ;;  %v20932_v49 = vpack.c.bf16 %v15989_v26, %v15988_v28 }
0x1289   : > { %20948 = vmatpush3.bf16.msra.mxu0 %v20947_v47  ;;  %v9737_v47 = vld [vmem:[#allocation3 + $0x98] sm:$0xff] }
0x128a   : > { %20949 = vmatprep.subr.bf16.mxu0 %v21803_v4  ;;  %v21012_v19 = vpack.c.bf16 %v9737_v47, %v9736_v46 }
0x128b   : > { %20891 = vmatpush3.bf16.msra.mxu1 %v20890_v18  ;;  %v15991_v18 = vld [vmem:[%s25973_s13 + $0x4a8] sm:$0xff] }
0x128c   : > { %20904 = vmatprep.subr.bf16.mxu1 %v21803_v4  ;;  %v20935_v41 = vpack.c.bf16 %v15991_v18, %v15990_v62 }
0x128d   : > { %20951 = vmatpush3.bf16.msra.mxu0 %v20950_v59  ;;  %v15992_v59 = vld [vmem:[%s25973_s13 + $0x4b0] sm:$0xff] }
0x128e   : > { %19076 = vmatmul.mubr.msk.f32.vlgmr.msra.gmra.mrb[46].mxu1 %vm6195_vm3, %v8538_v3  ;;  %20977 = vmatprep.subr.bf16.mxu0 %v20976_v16 }
0x128f   : > { %20906 = vmatpush3.bf16.msra.mxu1 %v20905_v35  ;;  %19113 = vmatprep.mubr.msk.f32.mxu1 %vm21804_vm0, %v21795_v1 }
0x1290   : > { %19171 = vmatmul.mubr.msk.f32.vlgmr.msra.gmra.mrb[20].mxu0 %vm6195_vm3, %v8953_v53  ;;  %20907 = vmatprep.subr.bf16.mxu1 %v21803_v4 }
0x1291   : > { %20979 = vmatpush3.bf16.msra.mxu0 %v20976_v16  ;;  %19212 = vmatprep.mubr.msk.f32.mxu0 %vm4660_vm15, %v24460_v25 }
0x1292   : > { %19210 = vmatprep.subr.msk.mxu0 %vm4667_vm1, %v9257_v21 }
0x1293   : > { %20909 = vmatpush3.bf16.msra.mxu1 %v20908_v50 }
0x1294   : > { %20910 = vmatprep.subr.bf16.mxu1 %v21803_v4 }
0x1295   : > { %19211 = vmatpush3.msk.msra.mxu0 %vm4667_vm1, %v9257_v21 }
0x1296   : > { %19213 = vmatmul.mubr.msk.f32.vlgmr.msra.gmra.mrb[22].mxu0 %vm4660_vm15, %v24476_v43  ;;  %20989 = vmatprep.subr.bf16.mxu0 %v20976_v16 }
0x1297   : > { %20912 = vmatpush3.bf16.msra.mxu1 %v20911_v13  ;;  %20991 = vmatpush3.bf16.msra.mxu0 %v20976_v16 }
0x1298   : > { %20913 = vmatprep.subr.bf16.mxu1 %v21803_v4  ;;  %19230 = vmatprep.subr.msk.mxu0 %vm4667_vm1, %v9257_v21 }
0x1299   : > { %19232 = vmatprep.mubr.msk.f32.mxu0 %vm4660_vm15, %v24491_v20 }
0x129b   : > { %20915 = vmatpush3.bf16.msra.mxu1 %v20914_v52  ;;  %19231 = vmatpush3.msk.msra.mxu0 %vm4667_vm1, %v9257_v21 }
0x129c   : > { %19233 = vmatmul.mubr.msk.f32.vlgmr.msra.gmra.mrb[24].mxu0 %vm4660_vm15, %v24499_v0  ;;  %20928 = vmatprep.subr.bf16.mxu1 %v21803_v4 }
0x129d   : > { %21001 = vmatprep.subr.bf16.mxu0 %v20976_v16  ;;  %19252 = vmatprep.mubr.msk.f32.mxu0 %vm4660_vm15, %v24514_v12 }
0x129e   : > { %19114 = vmatmul.mubr.msk.f32.vlgmr.msra.gmra.mrb[48].mxu1 %vm6195_vm3, %v8704_v51  ;;  %21003 = vmatpush3.bf16.msra.mxu0 %v20976_v16  ;;  %v15993_v16 = vld [vmem:[%s25973_s13 + $0x4b8] sm:$0xff] }
0x129f   : > { %20930 = vmatpush3.bf16.msra.mxu1 %v20929_v7  ;;  %19250 = vmatprep.subr.msk.mxu0 %vm4667_vm1, %v9257_v21  ;;  %v20938_v35 = vpack.c.bf16 %v15993_v16, %v15992_v59 }
0x12a0   : > { %20931 = vmatprep.subr.bf16.mxu1 %v21803_v4  ;;  %19151 = vmatprep.mubr.msk.f32.mxu1 %vm21804_vm0, %v21795_v1 }
0x12a2   : > { %19251 = vmatpush3.msk.msra.mxu0 %vm4667_vm1, %v9257_v21 }
0x12a3   : > { %20933 = vmatpush3.bf16.msra.mxu1 %v20932_v49  ;;  %19253 = vmatmul.mubr.msk.f32.vlgmr.msra.gmra.mrb[26].mxu0 %vm4660_vm15, %v24533_v8 }
0x12a4   : > { %20934 = vmatprep.subr.bf16.mxu1 %v21803_v4  ;;  %21013 = vmatprep.subr.bf16.mxu0 %v21012_v19 }
0x12a5   : > { %21015 = vmatpush3.bf16.msra.mxu0 %v21012_v19  ;;  %19272 = vmatprep.mubr.msk.f32.mxu0 %vm4660_vm15, %v24460_v25 }
0x12a6   : > { %19270 = vmatprep.subr.msk.mxu0 %vm4667_vm1, %v9738_v34 }
0x12a7   : > { %20936 = vmatpush3.bf16.msra.mxu1 %v20935_v41 }
0x12a8   : > { %20937 = vmatprep.subr.bf16.mxu1 %v21803_v4 }
0x12a9   : > { %19271 = vmatpush3.msk.msra.mxu0 %vm4667_vm1, %v9738_v34 }
0x12aa   : > { %19273 = vmatmul.mubr.msk.f32.vlgmr.msra.gmra.mrb[28].mxu0 %vm4660_vm15, %v24476_v43  ;;  %21025 = vmatprep.subr.bf16.mxu0 %v21012_v19 }
0x12ab   : > { %20939 = vmatpush3.bf16.msra.mxu1 %v20938_v35  ;;  %21027 = vmatpush3.bf16.msra.mxu0 %v21012_v19 }
0x12ac   : > { %20953 = vmatprep.subr.bf16.mxu1 %v23458_v45  ;;  %19290 = vmatprep.subr.msk.mxu0 %vm4667_vm1, %v9738_v34 }
0x12ad   : > { %19292 = vmatprep.mubr.msk.f32.mxu0 %vm4660_vm15, %v24491_v20 }
0x12ae   : > { %19152 = vmatmul.mubr.msk.f32.vlgmr.msra.gmra.mrb[50].mxu1 %vm6195_vm3, %v8196_v22  ;;  %v16045_v22 = vld [vmem:[%s25973_s13 + $0x528] sm:$0xff] }
0x12af   : > { %20955 = vmatpush3.bf16.msra.mxu1 %v23458_v45  ;;  %19181 = vmatprep.mubr.msk.f32.mxu1 %vm776_vm2, %v24169_v42  ;;  %v16042_v42 = vld [vmem:[%s25973_s13 + $0x510] sm:$0xff]  ;;  %v21055_v3 = vpack.c.bf16 %v16045_v22, %v16044_v24 }
0x12b0   : > { %20957 = vmatprep.subr.bf16.mxu1 %v23466_v48  ;;  %19291 = vmatpush3.msk.msra.mxu0 %vm4667_vm1, %v9738_v34 }
0x12b1   : > { %19293 = vmatmul.mubr.msk.f32.vlgmr.msra.gmra.mrb[30].mxu0 %vm4660_vm15, %v24499_v0  ;;  %21037 = vmatprep.subr.bf16.mxu0 %v21012_v19 }
0x12b2   : > { %21039 = vmatpush3.bf16.msra.mxu0 %v21012_v19  ;;  %19312 = vmatprep.mubr.msk.f32.mxu0 %vm4660_vm15, %v24514_v12 }
0x12b3   : > { %20959 = vmatpush3.bf16.msra.mxu1 %v23466_v48  ;;  %19310 = vmatprep.subr.msk.mxu0 %vm4667_vm1, %v9738_v34 }
0x12b4   : > { %20961 = vmatprep.subr.bf16.mxu1 %v23525_v2 }
0x12b6   : > { %19182 = vmatmul.mubr.msk.f32.vlgmr.msra.gmra.mrb[52].mxu1 %vm776_vm2, %v24166_v38  ;;  %19311 = vmatpush3.msk.msra.mxu0 %vm4667_vm1, %v9738_v34 }
0x12b7   : > { %20963 = vmatpush3.bf16.msra.mxu1 %v23525_v2  ;;  %19192 = vmatprep.mubr.msk.f32.mxu1 %vm776_vm2, %v24159_v36  ;;  %v16041_v36 = vld [vmem:[%s25973_s13 + $0x508] sm:$0xff] }
0x12b8   : > { %20965 = vmatprep.subr.bf16.mxu1 %v23549_v39  ;;  %19313 = vmatmul.mubr.msk.f32.vlgmr.msra.gmra.mrb[32].mxu0 %vm4660_vm15, %v24533_v8 }
0x12b9   : > { %21048 = vmatprep.subr.bf16.mxu0 %v21803_v4  ;;  %19342 = vmatprep.mubr.msk.f32.mxu0 %vm21804_vm0, %v21795_v1 }
0x12bb   : > { %20967 = vmatpush3.bf16.msra.mxu1 %v23549_v39 }
0x12bc   : > { %20969 = vmatprep.subr.bf16.mxu1 %v23562_v54 }
0x12be   : > { %19193 = vmatmul.mubr.msk.f32.vlgmr.msra.gmra.mrb[52].mxu1 %vm776_vm2, %v24156_v55  ;;  %v16040_v55 = vld [vmem:[%s25973_s13 + $0x500] sm:$0xff] }
0x12bf   : > { %20971 = vmatpush3.bf16.msra.mxu1 %v23562_v54  ;;  %19203 = vmatprep.mubr.msk.f32.mxu1 %vm776_vm2, %v24179_v14  ;;  %v21049_v38 = vpack.c.bf16 %v16041_v36, %v16040_v55 }
0x12c0   : > { %20973 = vmatprep.subr.bf16.mxu1 %v23572_v15 }
0x12c1   : > { %21050 = vmatpush3.bf16.msra.mxu0 %v21049_v38 }
0x12c2   : > { %21051 = vmatprep.subr.bf16.mxu0 %v21803_v4 }
0x12c3   : > { %20975 = vmatpush3.bf16.msra.mxu1 %v23572_v15 }
0x12c4   : > { %20981 = vmatprep.subr.bf16.mxu1 %v23584_v32 }
0x12c6   : > { %19204 = vmatmul.mubr.msk.f32.vlgmr.msra.gmra.mrb[52].mxu1 %vm776_vm2, %v24177_v11  ;;  %v16043_v11 = vld [vmem:[%s25973_s13 + $0x518] sm:$0xff] }
0x12c7   : > { %20983 = vmatpush3.bf16.msra.mxu1 %v23584_v32  ;;  %v21052_v14 = vpack.c.bf16 %v16043_v11, %v16042_v42 }
0x12c8   : > { %20985 = vmatprep.subr.bf16.mxu1 %v23594_v31 }
0x12c9   : > { %21053 = vmatpush3.bf16.msra.mxu0 %v21052_v14 }
0x12ca   : > { %21054 = vmatprep.subr.bf16.mxu0 %v21803_v4 }
0x12cb   : > { %20987 = vmatpush3.bf16.msra.mxu1 %v23594_v31 }
0x12cc   : > { %20993 = vmatprep.subr.bf16.mxu1 %v23606_v17 }
0x12cd   : > { %21056 = vmatpush3.bf16.msra.mxu0 %v21055_v3 }
0x12ce   : > { %21057 = vmatprep.subr.bf16.mxu0 %v21803_v4 }
0x1331   : > { %v8275_v23 = vpop.f32.mrb[40].mxu1 }
0x1332   : > { %v8279_v57 = vadd.f32 %v8275_v23, %v24141_v33  ;;  %v19001_v53 = vpop.f32.mrb[41].mxu1 }
0x1333   : > { %v8524_v50 = vpop.f32.mrb[14].mxu0 }
0x1334   : > { %v19058_v21 = vpop.f32.mrb[15].mxu0 }
0x1335   : > { %v16067_v21 = vld [vmem:[%s25973_s13 + $0x5c0] sm:$0xff] }
0x1341   : > { %v8358_v27 = vpop.f32.mrb[42].mxu1 }
0x1342   : > { %v8362_v29 = vadd.f32 %v8358_v27, %v8279_v57  ;;  %v19020_v13 = vpop.f32.mrb[43].mxu1  ;;  %v16068_v27 = vld [vmem:[%s25973_s13 + $0x5c8] sm:$0xff] }
0x1343   : > { %v8690_v63 = vpop.f32.mrb[16].mxu0  ;;  %v16069_v13 = vld [vmem:[%s25973_s13 + $0x5d0] sm:$0xff] }
0x1344   : > { %v19096_v5 = vpop.f32.mrb[17].mxu0 }
0x1351   : > { %v8441_v52 = vpop.f32.mrb[44].mxu1 }
0x1352   : > { %v8445_v9 = vadd.f32 %v8441_v52, %v8362_v29  ;;  %v19039_v10 = vpop.f32.mrb[45].mxu1  ;;  %v21085_v29 = vpack.c.bf16 %v16068_v27, %v16067_v21  ;;  %v16071_v52 = vld [vmem:[%s25973_s13 + $0x5e0] sm:$0xff] }
0x1353   : > { %v8856_v7 = vpop.f32.mrb[18].mxu0  ;;  %v16053_v27 = vld [vmem:[%s25973_s13 + $0x560] sm:$0xff] }
0x1354   : > { %v19134_v51 = vpop.f32.mrb[19].mxu0  ;;  %v8528_v28 = vadd.f32 %v8524_v50, %v8445_v9  ;;  %v16072_v9 = vld [vmem:[%s25973_s13 + $0x5e8] sm:$0xff] }
0x1355   : > { %v21091_v10 = vpack.c.bf16 %v16072_v9, %v16071_v52  ;;  %v16047_v51 = vld [vmem:[%s25973_s13 + $0x538] sm:$0xff]  ;;  %v16055_v9 = vld [vmem:[%s25973_s13 + $0x570] sm:$0xff] }
0x1361   : > { %v8607_v26 = vpop.f32.mrb[46].mxu1 }
0x1362   : > { %v8611_v46 = vadd.f32 %v8607_v26, %v8528_v28  ;;  %v19077_v47 = vpop.f32.mrb[47].mxu1  ;;  %v16073_v26 = vld [vmem:[%s25973_s13 + $0x5f0] sm:$0xff] }
0x1363   : > { %v9022_v49 = vpop.f32.mrb[20].mxu0 }
0x1364   : > { %v19172_v62 = vpop.f32.mrb[21].mxu0  ;;  %v8694_v33 = vadd.f32 %v8690_v63, %v8611_v46  ;;  %v16070_v63 = vld [vmem:[%s25973_s13 + $0x5d8] sm:$0xff] }
0x1365   : > { %v21088_v5 = vpack.c.bf16 %v16070_v63, %v16069_v13  ;;  %v16074_v46 = vld [vmem:[%s25973_s13 + $0x5f8] sm:$0xff]  ;;  %v16049_v62 = vld [vmem:[%s25973_s13 + $0x540] sm:$0xff] }
0x1366   : > { %v21094_v47 = vpack.c.bf16 %v16074_v46, %v16073_v26  ;;  %v16089_v63 = vld [vmem:[%s25973_s13 + $0x660] sm:$0xff] }
0x1367   : > { %v16058_v46 = vld [vmem:[%s25973_s13 + $0x580] sm:$0xff] }
0x1369   : > { %v19214_v18 = vpop.f32.mrb[22].mxu0 }
0x136a   : > { %v9327_v19 = vpop.f32.mrb[23].mxu0 }
0x136b   : > { %19223 = vmatprep.mubr.msk.f32.mxu1 %vm776_vm2, %v9327_v19  ;;  %v24720_v19 = vld [vmem:[%s25972_s12] ss:$0 sm:$0xff] }
0x136c   : > { %19224 = vmatmul.mubr.msk.f32.vlgmr.msra.gmra.mrb[52].mxu1 %vm776_vm2, %v19214_v18 }
0x136d   : > { %20995 = vmatpush3.bf16.msra.mxu1 %v23606_v17 }
0x136e   : > { %20997 = vmatprep.subr.bf16.mxu1 %v23616_v30 }
0x136f   : > { %v19234_v41 = vpop.f32.mrb[24].mxu0 }
0x1370   : > { %v9485_v34 = vpop.f32.mrb[25].mxu0 }
0x1371   : > { %v8773_v59 = vpop.f32.mrb[48].mxu1  ;;  %20999 = vmatpush3.bf16.msra.mxu1 %v23616_v30  ;;  %19243 = vmatprep.mubr.msk.f32.mxu1 %vm776_vm2, %v9485_v34  ;;  %v16085_v34 = vld [vmem:[%s25973_s13 + $0x640] sm:$0xff] }
0x1372   : > { %v8777_v16 = vadd.f32 %v8773_v59, %v8694_v33  ;;  %v19115_v35 = vpop.f32.mrb[49].mxu1  ;;  %21005 = vmatprep.subr.bf16.mxu1 %v23628_v40  ;;  %v16050_v33 = vld [vmem:[%s25973_s13 + $0x548] sm:$0xff] }
0x1373   : > { %v16086_v59 = vld [vmem:[%s25973_s13 + $0x648] sm:$0xff] }
0x1374   : > { %19244 = vmatmul.mubr.msk.f32.vlgmr.msra.gmra.mrb[52].mxu1 %vm776_vm2, %v19234_v41  ;;  %v8860_v55 = vadd.f32 %v8856_v7, %v8777_v16  ;;  %v16046_v7 = vld [vmem:[%s25973_s13 + $0x530] sm:$0xff]  ;;  %v21061_v16 = vpack.c.bf16 %v16050_v33, %v16049_v62  ;;  %v16103_v33 = vld [vmem:[%s25973_s13 + $0x6c0] sm:$0xff] }
0x1375   : > { %21007 = vmatpush3.bf16.msra.mxu1 %v23628_v40  ;;  %v21058_v28 = vpack.c.bf16 %v16047_v51, %v16046_v7  ;;  %v16091_v51 = vld [vmem:[%s25973_s13 + $0x670] sm:$0xff] }
0x1376   : > { %v19254_v36 = vpop.f32.mrb[26].mxu0  ;;  %21009 = vmatprep.subr.bf16.mxu1 %v23642_v60 }
0x1377   : > { %v9643_v38 = vpop.f32.mrb[27].mxu0  ;;  %21059 = vmatpush3.bf16.msra.mxu0 %v21058_v28  ;;  %v16092_v28 = vld [vmem:[%s25973_s13 + $0x678] sm:$0xff] }
0x1378   : > { %19263 = vmatprep.mubr.msk.f32.mxu1 %vm776_vm2, %v9643_v38  ;;  %21060 = vmatprep.subr.bf16.mxu0 %v21803_v4  ;;  %v21109_v38 = vpack.c.bf16 %v16086_v59, %v16085_v34  ;;  %v21118_v62 = vpack.c.bf16 %v16092_v28, %v16091_v51  ;;  %v16060_v59 = vld [vmem:[%s25973_s13 + $0x590] sm:$0xff]  ;;  %v16076_v28 = vld [vmem:[%s25973_s13 + $0x600] sm:$0xff] }
0x1379   : > { %21011 = vmatpush3.bf16.msra.mxu1 %v23642_v60 }
0x137a   : > { %21017 = vmatprep.subr.bf16.mxu1 %v23654_v6 }
0x137c   : > { %19264 = vmatmul.mubr.msk.f32.vlgmr.msra.gmra.mrb[52].mxu1 %vm776_vm2, %v19254_v36  ;;  %v16052_v36 = vld [vmem:[%s25973_s13 + $0x558] sm:$0xff] }
0x137d   : > { %21019 = vmatpush3.bf16.msra.mxu1 %v23654_v6  ;;  %v24635_v42 = vpop.f32.mrb[28].mxu0 }
0x137e   : > { %21021 = vmatprep.subr.bf16.mxu1 %v23668_v61  ;;  %v24638_v11 = vpop.f32.mrb[29].mxu0 }
0x137f   : > { %19283 = vmatprep.mubr.msk.f32.mxu1 %vm776_vm2, %v24638_v11 }
0x1381   : > { %v8939_v14 = vpop.f32.mrb[50].mxu1  ;;  %21023 = vmatpush3.bf16.msra.mxu1 %v23668_v61 }
0x1382   : > { %v8943_v24 = vadd.f32 %v8939_v14, %v8860_v55  ;;  %v19153_v22 = vpop.f32.mrb[51].mxu1  ;;  %21029 = vmatprep.subr.bf16.mxu1 %v23685_v58  ;;  %v16051_v55 = vld [vmem:[%s25973_s13 + $0x550] sm:$0xff] }
0x1383   : > { %v16088_v22 = vld [vmem:[%s25973_s13 + $0x658] sm:$0xff]  ;;  %v21064_v21 = vpack.c.bf16 %v16052_v36, %v16051_v55 }
0x1384   : > { %19284 = vmatmul.mubr.msk.f32.vlgmr.msra.gmra.mrb[52].mxu1 %vm776_vm2, %v24635_v42  ;;  %v24646_v3 = vpop.f32.mrb[30].mxu0  ;;  %v24648_v23 = vadd.f32 %v9022_v49, %v8943_v24  ;;  %v16087_v24 = vld [vmem:[%s25973_s13 + $0x650] sm:$0xff] }
0x1385   : > { %21031 = vmatpush3.bf16.msra.mxu1 %v23685_v58  ;;  %v24651_v57 = vpop.f32.mrb[31].mxu0  ;;  %v21112_v13 = vpack.c.bf16 %v16088_v22, %v16087_v24  ;;  %v16062_v22 = vld [vmem:[%s25973_s13 + $0x5a0] sm:$0xff] }
0x1386   : > { %21033 = vmatprep.subr.bf16.mxu1 %v23695_v56  ;;  %19303 = vmatprep.mubr.msk.f32.mxu1 %vm776_vm2, %v24651_v57 }
0x1389   : > { %21035 = vmatpush3.bf16.msra.mxu1 %v23695_v56 }
0x138a   : > { %21041 = vmatprep.subr.bf16.mxu1 %v23709_v44 }
0x138b   : > { %v24658_v53 = vpop.f32.mrb[32].mxu0 }
0x138c   : > { %19304 = vmatmul.mubr.msk.f32.vlgmr.msra.gmra.mrb[52].mxu1 %vm776_vm2, %v24646_v3  ;;  %v24662_v50 = vpop.f32.mrb[33].mxu0 }
0x138d   : > { %21043 = vmatpush3.bf16.msra.mxu1 %v23709_v44  ;;  %19323 = vmatprep.mubr.msk.f32.mxu1 %vm776_vm2, %v24662_v50 }
0x138e   : > { %21045 = vmatprep.subr.bf16.mxu1 %v23719_v37 }
0x1391   : > { %21047 = vmatpush3.bf16.msra.mxu1 %v23719_v37 }
0x1392   : > { %21084 = vmatprep.subr.bf16.mxu1 %v21803_v4 }
0x1394   : > { %19324 = vmatmul.mubr.msk.f32.vlgmr.msra.gmra.mrb[52].mxu1 %vm776_vm2, %v24658_v53 }
0x1395   : > { %21086 = vmatpush3.bf16.msra.mxu1 %v21085_v29  ;;  %19399 = vmatprep.mubr.msk.f32.mxu1 %vm21804_vm0, %v21795_v1  ;;  %v16054_v29 = vld [vmem:[%s25973_s13 + $0x568] sm:$0xff] }
0x1396   : > { %21087 = vmatprep.subr.bf16.mxu1 %v21803_v4  ;;  %v21067_v52 = vpack.c.bf16 %v16054_v29, %v16053_v27  ;;  %v16107_v29 = vld [vmem:[%s25973_s13 + $0x6e0] sm:$0xff] }
0x1399   : > { %21089 = vmatpush3.bf16.msra.mxu1 %v21088_v5  ;;  %v16090_v5 = vld [vmem:[%s25973_s13 + $0x668] sm:$0xff] }
0x139a   : > { %21090 = vmatprep.subr.bf16.mxu1 %v21803_v4  ;;  %v21115_v7 = vpack.c.bf16 %v16090_v5, %v16089_v63  ;;  %v16064_v5 = vld [vmem:[%s25973_s13 + $0x5b0] sm:$0xff] }
0x139d   : > { %21092 = vmatpush3.bf16.msra.mxu1 %v21091_v10  ;;  %v16056_v10 = vld [vmem:[%s25973_s13 + $0x578] sm:$0xff] }
0x139e   : > { %21093 = vmatprep.subr.bf16.mxu1 %v21803_v4  ;;  %v21070_v26 = vpack.c.bf16 %v16056_v10, %v16055_v9  ;;  %v16109_v10 = vld [vmem:[%s25973_s13 + $0x6f0] sm:$0xff] }
0x13a1   : > { %21095 = vmatpush3.bf16.msra.mxu1 %v21094_v47  ;;  %v16059_v47 = vld [vmem:[%s25973_s13 + $0x588] sm:$0xff] }
0x13a2   : > { %21108 = vmatprep.subr.bf16.mxu1 %v21803_v4 }
0x1467   : > { %v24709_v49 = vpop.f32.mrb[52].mxu1 }
0x1468   : > { %v10205_v18 = vpop.f32.mrb[53].mxu1 }
0x1469   : > { %v10216_v41 = vadd.f32 %v24720_v19, %v10205_v18  ;;  %v16104_v18 = vld [vmem:[%s25973_s13 + $0x6c8] sm:$0xff] }
0x146a   : > { %v21133_v55 = vpack.c.bf16 %v16104_v18, %v16103_v33 }
0x146b   : > { %v24729_v35 = vmax.f32 %v10216_v41, 0.0  ;;  %v21073_v41 = vpack.c.bf16 %v16059_v47, %v16058_v46  ;;  %v16121_v47 = vld [vmem:[%s25973_s13 + $0x740] sm:$0xff] }
0x146d   : > { %19343 = vmatmul.mubr.msk.f32.vlgmr.msra.gmra.mrb[34].mxu0 %vm6195_vm3, %v24729_v35  ;;  %v10478_v14 = vrot.slane %v24729_v35, 3  ;;  %v10312_v34 = vrot.slane %v24729_v35, 1  ;;  %v10644_v36 = vrot.slane %v24729_v35, 5  ;;  %v10395_v18 = vrot.slane %v24729_v35, 2 }
0x146e   : > { %21062 = vmatpush3.bf16.msra.mxu0 %v21061_v16  ;;  %19361 = vmatprep.mubr.msk.f32.mxu0 %vm21804_vm0, %v21795_v1  ;;  %v16061_v16 = vld [vmem:[%s25973_s13 + $0x598] sm:$0xff] }
0x146f   : > { %19400 = vmatmul.mubr.msk.f32.vlgmr.msra.gmra.mrb[54].mxu1 %vm6195_vm3, %v10478_v14  ;;  %21063 = vmatprep.subr.bf16.mxu0 %v21803_v4  ;;  %v16106_v14 = vld [vmem:[%s25973_s13 + $0x6d8] sm:$0xff]  ;;  %v21076_v24 = vpack.c.bf16 %v16061_v16, %v16060_v59  ;;  %v10810_v16 = vrot.slane %v24729_v35, 7 }
0x1470   : > { %21110 = vmatpush3.bf16.msra.mxu1 %v21109_v38  ;;  %19437 = vmatprep.mubr.msk.f32.mxu1 %vm21804_vm0, %v21795_v1  ;;  %v16105_v38 = vld [vmem:[%s25973_s13 + $0x6d0] sm:$0xff] }
0x1471   : > { %21111 = vmatprep.subr.bf16.mxu1 %v21803_v4  ;;  %v21136_v27 = vpack.c.bf16 %v16106_v14, %v16105_v38  ;;  %v16080_v14 = vld [vmem:[%s25973_s13 + $0x620] sm:$0xff] }
0x1472   : > { %21065 = vmatpush3.bf16.msra.mxu0 %v21064_v21  ;;  %v16063_v21 = vld [vmem:[%s25973_s13 + $0x5a8] sm:$0xff] }
0x1473   : > { %21066 = vmatprep.subr.bf16.mxu0 %v21803_v4  ;;  %v21079_v63 = vpack.c.bf16 %v16063_v21, %v16062_v22  ;;  %v16125_v21 = vld [vmem:[%s25973_s13 + $0x760] sm:$0xff] }
0x1474   : > { %21113 = vmatpush3.bf16.msra.mxu1 %v21112_v13  ;;  %v16108_v13 = vld [vmem:[%s25973_s13 + $0x6e8] sm:$0xff] }
0x1475   : > { %21114 = vmatprep.subr.bf16.mxu1 %v21803_v4  ;;  %v21139_v9 = vpack.c.bf16 %v16108_v13, %v16107_v29  ;;  %v16082_v13 = vld [vmem:[%s25973_s13 + $0x630] sm:$0xff] }
0x1476   : > { %21068 = vmatpush3.bf16.msra.mxu0 %v21067_v52  ;;  %v16065_v52 = vld [vmem:[%s25973_s13 + $0x5b8] sm:$0xff] }
0x1477   : > { %21069 = vmatprep.subr.bf16.mxu0 %v21803_v4  ;;  %v21082_v51 = vpack.c.bf16 %v16065_v52, %v16064_v5  ;;  %v24902_v52 = vadd.f32 %v24720_v19, %v24709_v49  ;;  %v16094_v49 = vld [vmem:[%s25973_s13 + $0x680] sm:$0xff] }
0x1478   : > { %21116 = vmatpush3.bf16.msra.mxu1 %v21115_v7  ;;  %v16110_v7 = vld [vmem:[%s25973_s13 + $0x6f8] sm:$0xff] }
0x1479   : > { %21117 = vmatprep.subr.bf16.mxu1 %v21803_v4  ;;  %v21142_v46 = vpack.c.bf16 %v16110_v7, %v16109_v10  ;;  %v16128_v10 = vld [vmem:[%s25973_s13 + $0x778] sm:$0xff] }
0x147a   : > { %21071 = vmatpush3.bf16.msra.mxu0 %v21070_v26  ;;  %v16077_v26 = vld [vmem:[%s25973_s13 + $0x608] sm:$0xff] }
0x147b   : > { %21072 = vmatprep.subr.bf16.mxu0 %v21803_v4  ;;  %v21097_v33 = vpack.c.bf16 %v16077_v26, %v16076_v28  ;;  %v11279_v28 = vld [vmem:[#allocation3 + $0xb0] sm:$0xff]  ;;  %v16095_v26 = vld [vmem:[%s25973_s13 + $0x688] sm:$0xff] }
0x147c   : > { %21119 = vmatpush3.bf16.msra.mxu1 %v21118_v62  ;;  %v16122_v62 = vld [vmem:[%s25973_s13 + $0x748] sm:$0xff] }
0x147d   : > { %19362 = vmatmul.mubr.msk.f32.vlgmr.msra.gmra.mrb[36].mxu0 %vm6195_vm3, %v10312_v34  ;;  %21132 = vmatprep.subr.bf16.mxu1 %v21803_v4  ;;  %v16079_v34 = vld [vmem:[%s25973_s13 + $0x618] sm:$0xff]  ;;  %v21157_v59 = vpack.c.bf16 %v16122_v62, %v16121_v47  ;;  %v10219_v47 = vmax.f32 %v24902_v52, 0.0 }
0x147e   : > { %21074 = vmatpush3.bf16.msra.mxu0 %v21073_v41  ;;  %19380 = vmatprep.mubr.msk.f32.mxu0 %vm21804_vm0, %v21795_v1  ;;  %v16078_v41 = vld [vmem:[%s25973_s13 + $0x610] sm:$0xff] }
0x147f   : > { %19438 = vmatmul.mubr.msk.f32.vlgmr.msra.gmra.mrb[56].mxu1 %vm6195_vm3, %v10644_v36  ;;  %21075 = vmatprep.subr.bf16.mxu0 %v21803_v4  ;;  %v16124_v36 = vld [vmem:[%s25973_s13 + $0x758] sm:$0xff]  ;;  %v21100_v38 = vpack.c.bf16 %v16079_v34, %v16078_v41  ;;  %v16096_v41 = vld [vmem:[%s25973_s13 + $0x690] sm:$0xff] }
0x1480   : > { %21134 = vmatpush3.bf16.msra.mxu1 %v21133_v55  ;;  %19475 = vmatprep.mubr.msk.f32.mxu1 %vm21804_vm0, %v21795_v1  ;;  %v16123_v55 = vld [vmem:[%s25973_s13 + $0x750] sm:$0xff]  ;;  %v16097_v34 = vld [vmem:[%s25973_s13 + $0x698] sm:$0xff] }
0x1481   : > { %21135 = vmatprep.subr.bf16.mxu1 %v21803_v4  ;;  %v21160_v22 = vpack.c.bf16 %v16124_v36, %v16123_v55  ;;  %v11280_v55 = vld [vmem:[#allocation3 + $0xb8] sm:$0x3f]  ;;  %v16098_v36 = vld [vmem:[%s25973_s13 + $0x6a0] sm:$0xff] }
0x1482   : > { %21077 = vmatpush3.bf16.msra.mxu0 %v21076_v24  ;;  %v16081_v24 = vld [vmem:[%s25973_s13 + $0x628] sm:$0xff] }
0x1483   : > { %21078 = vmatprep.subr.bf16.mxu0 %v21803_v4  ;;  %v21103_v29 = vpack.c.bf16 %v16081_v24, %v16080_v14  ;;  %v16100_v24 = vld [vmem:[%s25973_s13 + $0x6b0] sm:$0xff] }
0x1484   : > { %21137 = vmatpush3.bf16.msra.mxu1 %v21136_v27  ;;  %v16126_v27 = vld [vmem:[%s25973_s13 + $0x768] sm:$0xff] }
0x1485   : > { %21138 = vmatprep.subr.bf16.mxu1 %v21803_v4  ;;  %v21163_v5 = vpack.c.bf16 %v16126_v27, %v16125_v21  ;;  %v16112_v27 = vld [vmem:[%s25973_s13 + $0x700] sm:$0xff] }
0x1486   : > { %21080 = vmatpush3.bf16.msra.mxu0 %v21079_v63  ;;  %v16083_v63 = vld [vmem:[%s25973_s13 + $0x638] sm:$0xff] }
0x1487   : > { %21081 = vmatprep.subr.bf16.mxu0 %v21803_v4  ;;  %v21106_v7 = vpack.c.bf16 %v16083_v63, %v16082_v13  ;;  %v10727_v63 = vrot.slane %v24729_v35, 6 }
0x1488   : > { %21140 = vmatpush3.bf16.msra.mxu1 %v21139_v9  ;;  %v16127_v9 = vld [vmem:[%s25973_s13 + $0x770] sm:$0xff] }
0x1489   : > { %21141 = vmatprep.subr.bf16.mxu1 %v21803_v4 }
0x148a   : > { %21083 = vmatpush3.bf16.msra.mxu0 %v21082_v51  ;;  %v11278_v51 = vld [vmem:[#allocation3 + $0xa8] sm:$0xff] }
0x148b   : > { %21096 = vmatprep.subr.bf16.mxu0 %v21803_v4  ;;  %v21192_v62 = vpack.c.bf16 %v11279_v28, %v11278_v51  ;;  %v16116_v51 = vld [vmem:[%s25973_s13 + $0x720] sm:$0xff]  ;;  %v16117_v28 = vld [vmem:[%s25973_s13 + $0x728] sm:$0xff] }
0x148c   : > { %21143 = vmatpush3.bf16.msra.mxu1 %v21142_v46  ;;  %v21166_v46 = vpack.c.bf16 %v16128_v10, %v16127_v9  ;;  %v16115_v9 = vld [vmem:[%s25973_s13 + $0x718] sm:$0xff]  ;;  %v11759_v10 = vld [vmem:[#allocation3 + $0xc0] sm:$0xff] }
0x148d   : > { %19381 = vmatmul.mubr.msk.f32.vlgmr.msra.gmra.mrb[38].mxu0 %vm6195_vm3, %v10395_v18  ;;  %21156 = vmatprep.subr.bf16.mxu1 %v21803_v4  ;;  %v10561_v18 = vrot.slane %v24729_v35, 4 }
0x148e   : > { %21098 = vmatpush3.bf16.msra.mxu0 %v21097_v33  ;;  %19418 = vmatprep.mubr.msk.f32.mxu0 %vm21804_vm0, %v21795_v1  ;;  %v21121_v33 = vpack.c.bf16 %v16095_v26, %v16094_v49  ;;  %v21151_v26 = vpack.c.bf16 %v16117_v28, %v16116_v51 }
0x148f   : > { %19476 = vmatmul.mubr.msk.f32.vlgmr.msra.gmra.mrb[58].mxu1 %vm6195_vm3, %v10810_v16  ;;  %21099 = vmatprep.subr.bf16.mxu0 %v21803_v4  ;;  %v21124_v16 = vpack.c.bf16 %v16097_v34, %v16096_v41 }
0x1490   : > { %21158 = vmatpush3.bf16.msra.mxu1 %v21157_v59  ;;  %19513 = vmatprep.mubr.msk.f32.mxu1 %vm21804_vm0, %v21795_v1  ;;  %v10976_v59 = vrot.slane %v10219_v47, 1 }
0x1491   : > { %21159 = vmatprep.subr.bf16.mxu1 %v21803_v4 }
0x1492   : > { %21101 = vmatpush3.bf16.msra.mxu0 %v21100_v38  ;;  %v16099_v38 = vld [vmem:[%s25973_s13 + $0x6a8] sm:$0xff] }
0x1493   : > { %21102 = vmatprep.subr.bf16.mxu0 %v21803_v4  ;;  %v21127_v14 = vpack.c.bf16 %v16099_v38, %v16098_v36 }
0x1494   : > { %21161 = vmatpush3.bf16.msra.mxu1 %v21160_v22  ;;  %v16101_v22 = vld [vmem:[%s25973_s13 + $0x6b8] sm:$0xff] }
0x1495   : > { %21162 = vmatprep.subr.bf16.mxu1 %v21803_v4  ;;  %v21130_v21 = vpack.c.bf16 %v16101_v22, %v16100_v24 }
0x1496   : > { %21104 = vmatpush3.bf16.msra.mxu0 %v21103_v29  ;;  %v16113_v29 = vld [vmem:[%s25973_s13 + $0x708] sm:$0xff] }
0x1497   : > { %21105 = vmatprep.subr.bf16.mxu0 %v21803_v4  ;;  %v21145_v13 = vpack.c.bf16 %v16113_v29, %v16112_v27 }
0x1498   : > { %21164 = vmatpush3.bf16.msra.mxu1 %v21163_v5  ;;  %v16114_v5 = vld [vmem:[%s25973_s13 + $0x710] sm:$0xff] }
0x1499   : > { %21165 = vmatprep.subr.bf16.mxu1 %v21803_v4  ;;  %v21148_v35 = vpack.c.bf16 %v16115_v9, %v16114_v5 }
0x149a   : > { %21107 = vmatpush3.bf16.msra.mxu0 %v21106_v7  ;;  %v11760_v7 = vld [vmem:[#allocation3 + $0xc8] sm:$0xff] }
0x149b   : > { %21120 = vmatprep.subr.bf16.mxu0 %v21803_v4  ;;  %v21228_v49 = vpack.c.bf16 %v11760_v7, %v11759_v10 }
0x149c   : > { %21167 = vmatpush3.bf16.msra.mxu1 %v21166_v46  ;;  %v11761_v46 = vld [vmem:[#allocation3 + $0xd0] sm:$0x3f] }
0x149d   : > { %19419 = vmatmul.mubr.msk.f32.vlgmr.msra.gmra.mrb[40].mxu0 %vm6195_vm3, %v10561_v18  ;;  %21193 = vmatprep.subr.bf16.mxu1 %v21192_v62 }
0x149e   : > { %21122 = vmatpush3.bf16.msra.mxu0 %v21121_v33  ;;  %19456 = vmatprep.mubr.msk.f32.mxu0 %vm21804_vm0, %v21795_v1  ;;  %v16119_v33 = vld [vmem:[%s25973_s13 + $0x738] sm:$0xff] }
0x149f   : > { %19514 = vmatmul.mubr.msk.f32.vlgmr.msra.gmra.mrb[60].mxu1 %vm6195_vm3, %v10976_v59  ;;  %21123 = vmatprep.subr.bf16.mxu0 %v21803_v4 }
0x14a0   : > { %21195 = vmatpush3.bf16.msra.mxu1 %v21192_v62  ;;  %19555 = vmatprep.mubr.msk.f32.mxu1 %vm4660_vm15, %v24460_v25 }
0x14a1   : > { %19553 = vmatprep.subr.msk.mxu1 %vm4667_vm1, %v11280_v55 }
0x14a2   : > { %21125 = vmatpush3.bf16.msra.mxu0 %v21124_v16 }
0x14a3   : > { %21126 = vmatprep.subr.bf16.mxu0 %v21803_v4 }
0x14a4   : > { %19554 = vmatpush3.msk.msra.mxu1 %vm4667_vm1, %v11280_v55 }
0x14a5   : > { %19556 = vmatmul.mubr.msk.f32.vlgmr.msra.gmra.mrb[62].mxu1 %vm4660_vm15, %v24476_v43  ;;  %21205 = vmatprep.subr.bf16.mxu1 %v21192_v62 }
0x14a6   : > { %21128 = vmatpush3.bf16.msra.mxu0 %v21127_v14  ;;  %21207 = vmatpush3.bf16.msra.mxu1 %v21192_v62 }
0x14a7   : > { %21129 = vmatprep.subr.bf16.mxu0 %v21803_v4  ;;  %19573 = vmatprep.subr.msk.mxu1 %vm4667_vm1, %v11280_v55 }
0x14a8   : > { %19575 = vmatprep.mubr.msk.f32.mxu1 %vm4660_vm15, %v24491_v20 }
0x14aa   : > { %21131 = vmatpush3.bf16.msra.mxu0 %v21130_v21  ;;  %19574 = vmatpush3.msk.msra.mxu1 %vm4667_vm1, %v11280_v55 }
0x14ab   : > { %19576 = vmatmul.mubr.msk.f32.vlgmr.msra.gmra.mrb[64].mxu1 %vm4660_vm15, %v24499_v0  ;;  %21144 = vmatprep.subr.bf16.mxu0 %v21803_v4 }
0x14ac   : > { %21217 = vmatprep.subr.bf16.mxu1 %v21192_v62  ;;  %19595 = vmatprep.mubr.msk.f32.mxu1 %vm4660_vm15, %v24514_v12 }
0x14ad   : > { %19457 = vmatmul.mubr.msk.f32.vlgmr.msra.gmra.mrb[42].mxu0 %vm6195_vm3, %v10727_v63  ;;  %21219 = vmatpush3.bf16.msra.mxu1 %v21192_v62  ;;  %v16118_v62 = vld [vmem:[%s25973_s13 + $0x730] sm:$0xff] }
0x14ae   : > { %21146 = vmatpush3.bf16.msra.mxu0 %v21145_v13  ;;  %19593 = vmatprep.subr.msk.mxu1 %vm4667_vm1, %v11280_v55  ;;  %v21154_v18 = vpack.c.bf16 %v16119_v33, %v16118_v62 }
0x14af   : > { %21147 = vmatprep.subr.bf16.mxu0 %v21803_v4  ;;  %19494 = vmatprep.mubr.msk.f32.mxu0 %vm21804_vm0, %v21795_v1 }
0x14b1   : > { %19594 = vmatpush3.msk.msra.mxu1 %vm4667_vm1, %v11280_v55 }
0x14b2   : > { %21149 = vmatpush3.bf16.msra.mxu0 %v21148_v35  ;;  %19596 = vmatmul.mubr.msk.f32.vlgmr.msra.gmra.mrb[66].mxu1 %vm4660_vm15, %v24533_v8 }
0x14b3   : > { %21150 = vmatprep.subr.bf16.mxu0 %v21803_v4  ;;  %21229 = vmatprep.subr.bf16.mxu1 %v21228_v49 }
0x14b4   : > { %21231 = vmatpush3.bf16.msra.mxu1 %v21228_v49  ;;  %19615 = vmatprep.mubr.msk.f32.mxu1 %vm4660_vm15, %v24460_v25  ;;  %v16166_v25 = vld [vmem:[%s25973_s13 + $0x780] sm:$0xff] }
0x14b5   : > { %19613 = vmatprep.subr.msk.mxu1 %vm4667_vm1, %v11761_v46 }
0x14b6   : > { %21152 = vmatpush3.bf16.msra.mxu0 %v21151_v26 }
0x14b7   : > { %21153 = vmatprep.subr.bf16.mxu0 %v21803_v4 }
0x14b8   : > { %19614 = vmatpush3.msk.msra.mxu1 %vm4667_vm1, %v11761_v46 }
0x14b9   : > { %19616 = vmatmul.mubr.msk.f32.vlgmr.msra.gmra.mrb[68].mxu1 %vm4660_vm15, %v24476_v43  ;;  %21241 = vmatprep.subr.bf16.mxu1 %v21228_v49  ;;  %v16167_v43 = vld [vmem:[%s25973_s13 + $0x788] sm:$0xff] }
0x14ba   : > { %21155 = vmatpush3.bf16.msra.mxu0 %v21154_v18  ;;  %21243 = vmatpush3.bf16.msra.mxu1 %v21228_v49 }
0x14bb   : > { %21169 = vmatprep.subr.bf16.mxu0 %v23458_v45  ;;  %19633 = vmatprep.subr.msk.mxu1 %vm4667_vm1, %v11761_v46 }
0x14bc   : > { %19635 = vmatprep.mubr.msk.f32.mxu1 %vm4660_vm15, %v24491_v20  ;;  %v21265_v20 = vpack.c.bf16 %v16167_v43, %v16166_v25 }
0x14bd   : > { %19495 = vmatmul.mubr.msk.f32.vlgmr.msra.gmra.mrb[44].mxu0 %vm6195_vm3, %v10219_v47 }
0x14be   : > { %21171 = vmatpush3.bf16.msra.mxu0 %v23458_v45  ;;  %19524 = vmatprep.mubr.msk.f32.mxu0 %vm776_vm2, %v24651_v57 }
0x14bf   : > { %21173 = vmatprep.subr.bf16.mxu0 %v23466_v48  ;;  %19634 = vmatpush3.msk.msra.mxu1 %vm4667_vm1, %v11761_v46 }
0x14c0   : > { %19636 = vmatmul.mubr.msk.f32.vlgmr.msra.gmra.mrb[70].mxu1 %vm4660_vm15, %v24499_v0  ;;  %21253 = vmatprep.subr.bf16.mxu1 %v21228_v49  ;;  %v16168_v0 = vld [vmem:[%s25973_s13 + $0x790] sm:$0xff] }
0x14c1   : > { %21255 = vmatpush3.bf16.msra.mxu1 %v21228_v49  ;;  %19655 = vmatprep.mubr.msk.f32.mxu1 %vm4660_vm15, %v24514_v12  ;;  %v16169_v12 = vld [vmem:[%s25973_s13 + $0x798] sm:$0xff] }
0x14c2   : > { %21175 = vmatpush3.bf16.msra.mxu0 %v23466_v48  ;;  %19653 = vmatprep.subr.msk.mxu1 %vm4667_vm1, %v11761_v46 }
0x14c3   : > { %21177 = vmatprep.subr.bf16.mxu0 %v23525_v2 }
0x14c5   : > { %19525 = vmatmul.mubr.msk.f32.vlgmr.msra.gmra.mrb[46].mxu0 %vm776_vm2, %v24646_v3  ;;  %19654 = vmatpush3.msk.msra.mxu1 %vm4667_vm1, %v11761_v46 }
0x14c6   : > { %21179 = vmatpush3.bf16.msra.mxu0 %v23525_v2  ;;  %19535 = vmatprep.mubr.msk.f32.mxu0 %vm776_vm2, %v24638_v11  ;;  %v16171_v11 = vld [vmem:[%s25973_s13 + $0x7a8] sm:$0xff] }
0x14c7   : > { %21181 = vmatprep.subr.bf16.mxu0 %v23549_v39  ;;  %19656 = vmatmul.mubr.msk.f32.vlgmr.msra.gmra.mrb[72].mxu1 %vm4660_vm15, %v24533_v8  ;;  %v21268_v8 = vpack.c.bf16 %v16169_v12, %v16168_v0 }
0x14c8   : > { %21264 = vmatprep.subr.bf16.mxu1 %v21803_v4  ;;  %19685 = vmatprep.mubr.msk.f32.mxu1 %vm21804_vm0, %v21795_v1 }
0x14c9   : > { %21266 = vmatpush3.bf16.msra.mxu1 %v21265_v20 }
0x14ca   : > { %21183 = vmatpush3.bf16.msra.mxu0 %v23549_v39  ;;  %21267 = vmatprep.subr.bf16.mxu1 %v21803_v4 }
0x14cb   : > { %21185 = vmatprep.subr.bf16.mxu0 %v23562_v54 }
0x14cd   : > { %19536 = vmatmul.mubr.msk.f32.vlgmr.msra.gmra.mrb[46].mxu0 %vm776_vm2, %v24635_v42  ;;  %v16170_v42 = vld [vmem:[%s25973_s13 + $0x7a0] sm:$0xff]  ;;  %21269 = vmatpush3.bf16.msra.mxu1 %v21268_v8 }
0x14ce   : > { %21187 = vmatpush3.bf16.msra.mxu0 %v23562_v54  ;;  %19546 = vmatprep.mubr.msk.f32.mxu0 %vm776_vm2, %v24662_v50  ;;  %v21271_v3 = vpack.c.bf16 %v16171_v11, %v16170_v42 }
0x14cf   : > { %21189 = vmatprep.subr.bf16.mxu0 %v23572_v15  ;;  %21270 = vmatprep.subr.bf16.mxu1 %v21803_v4 }
0x14d1   : > { %21272 = vmatpush3.bf16.msra.mxu1 %v21271_v3  ;;  %v16193_v3 = vld [vmem:[%s25973_s13 + $0x840] sm:$0xff] }
0x14d2   : > { %21191 = vmatpush3.bf16.msra.mxu0 %v23572_v15  ;;  %21273 = vmatprep.subr.bf16.mxu1 %v21803_v4 }
0x14d3   : > { %21197 = vmatprep.subr.bf16.mxu0 %v23584_v32 }
0x14d5   : > { %19547 = vmatmul.mubr.msk.f32.vlgmr.msra.gmra.mrb[46].mxu0 %vm776_vm2, %v24658_v53 }
0x14d6   : > { %21199 = vmatpush3.bf16.msra.mxu0 %v23584_v32 }
0x14d7   : > { %21201 = vmatprep.subr.bf16.mxu0 %v23594_v31 }
0x14da   : > { %21203 = vmatpush3.bf16.msra.mxu0 %v23594_v31 }
0x14db   : > { %21209 = vmatprep.subr.bf16.mxu0 %v23606_v17 }
0x1540   : > { %v10298_v57 = vpop.f32.mrb[34].mxu0 }
0x1541   : > { %v10302_v53 = vadd.f32 %v10298_v57, %v24648_v23  ;;  %v19344_v50 = vpop.f32.mrb[35].mxu0  ;;  %v16194_v57 = vld [vmem:[%s25973_s13 + $0x848] sm:$0xff] }
0x1542   : > { %v10547_v52 = vpop.f32.mrb[54].mxu1  ;;  %v16195_v50 = vld [vmem:[%s25973_s13 + $0x850] sm:$0xff] }
0x1543   : > { %v19401_v47 = vpop.f32.mrb[55].mxu1 }
0x1550   : > { %v10381_v41 = vpop.f32.mrb[36].mxu0 }
0x1551   : > { %v10385_v34 = vadd.f32 %v10381_v41, %v10302_v53  ;;  %v19363_v59 = vpop.f32.mrb[37].mxu0  ;;  %v21301_v53 = vpack.c.bf16 %v16194_v57, %v16193_v3  ;;  %v16197_v41 = vld [vmem:[%s25973_s13 + $0x860] sm:$0xff]  ;;  %v16181_v57 = vld [vmem:[%s25973_s13 + $0x7f0] sm:$0xff] }
0x1552   : > { %v10713_v16 = vpop.f32.mrb[56].mxu1 }
0x1553   : > { %v19439_v55 = vpop.f32.mrb[57].mxu1 }
0x1554   : > { %v16173_v55 = vld [vmem:[%s25973_s13 + $0x7b8] sm:$0xff] }
0x1560   : > { %v10464_v36 = vpop.f32.mrb[38].mxu0 }
0x1561   : > { %v10468_v38 = vadd.f32 %v10464_v36, %v10385_v34  ;;  %v19382_v14 = vpop.f32.mrb[39].mxu0  ;;  %v16198_v34 = vld [vmem:[%s25973_s13 + $0x868] sm:$0xff] }
0x1562   : > { %v10879_v24 = vpop.f32.mrb[58].mxu1  ;;  %v21307_v59 = vpack.c.bf16 %v16198_v34, %v16197_v41  ;;  %v16200_v14 = vld [vmem:[%s25973_s13 + $0x878] sm:$0xff]  ;;  %v16184_v34 = vld [vmem:[%s25973_s13 + $0x800] sm:$0xff] }
0x1563   : > { %v19477_v22 = vpop.f32.mrb[59].mxu1  ;;  %v10551_v21 = vadd.f32 %v10547_v52, %v10468_v38  ;;  %v16196_v52 = vld [vmem:[%s25973_s13 + $0x858] sm:$0xff]  ;;  %v16199_v38 = vld [vmem:[%s25973_s13 + $0x870] sm:$0xff] }
0x1564   : > { %v21304_v47 = vpack.c.bf16 %v16196_v52, %v16195_v50  ;;  %v16217_v52 = vld [vmem:[%s25973_s13 + $0x8f0] sm:$0xff] }
0x1570   : > { %v10630_v27 = vpop.f32.mrb[40].mxu0 }
0x1571   : > { %v10634_v29 = vadd.f32 %v10630_v27, %v10551_v21  ;;  %v19420_v13 = vpop.f32.mrb[41].mxu0  ;;  %v16175_v21 = vld [vmem:[%s25973_s13 + $0x7c0] sm:$0xff]  ;;  %v16176_v27 = vld [vmem:[%s25973_s13 + $0x7c8] sm:$0xff] }
0x1572   : > { %v11045_v63 = vpop.f32.mrb[60].mxu1 }
0x1573   : > { %v19515_v5 = vpop.f32.mrb[61].mxu1  ;;  %v10717_v23 = vadd.f32 %v10713_v16, %v10634_v29  ;;  %v16172_v16 = vld [vmem:[%s25973_s13 + $0x7b0] sm:$0xff] }
0x1574   : > { %v21274_v36 = vpack.c.bf16 %v16173_v55, %v16172_v16  ;;  %v16212_v5 = vld [vmem:[%s25973_s13 + $0x8c8] sm:$0xff]  ;;  %v16229_v55 = vld [vmem:[%s25973_s13 + $0x940] sm:$0xff] }
0x1576   : > { %21275 = vmatpush3.bf16.msra.mxu1 %v21274_v36  ;;  %v16230_v36 = vld [vmem:[%s25973_s13 + $0x948] sm:$0xff] }
0x1577   : > { %21276 = vmatprep.subr.bf16.mxu1 %v21803_v4 }
0x1578   : > { %v19557_v9 = vpop.f32.mrb[62].mxu1 }
0x1579   : > { %v11350_v10 = vpop.f32.mrb[63].mxu1 }
0x157a   : > { %19566 = vmatprep.mubr.msk.f32.mxu0 %vm776_vm2, %v11350_v10  ;;  %v16177_v10 = vld [vmem:[%s25973_s13 + $0x7d0] sm:$0xff] }
0x157b   : > { %19567 = vmatmul.mubr.msk.f32.vlgmr.msra.gmra.mrb[46].mxu0 %vm776_vm2, %v19557_v9 }
0x157c   : > { %21211 = vmatpush3.bf16.msra.mxu0 %v23606_v17 }
0x157d   : > { %21213 = vmatprep.subr.bf16.mxu0 %v23616_v30 }
0x157e   : > { %v19577_v7 = vpop.f32.mrb[64].mxu1 }
0x157f   : > { %v11508_v35 = vpop.f32.mrb[65].mxu1 }
0x1580   : > { %v10796_v51 = vpop.f32.mrb[42].mxu0  ;;  %21215 = vmatpush3.bf16.msra.mxu0 %v23616_v30  ;;  %19586 = vmatprep.mubr.msk.f32.mxu0 %vm776_vm2, %v11508_v35 }
0x1581   : > { %v10800_v28 = vadd.f32 %v10796_v51, %v10717_v23  ;;  %v19458_v49 = vpop.f32.mrb[43].mxu0  ;;  %21221 = vmatprep.subr.bf16.mxu0 %v23628_v40  ;;  %v21277_v23 = vpack.c.bf16 %v16176_v27, %v16175_v21  ;;  %v16187_v21 = vld [vmem:[%s25973_s13 + $0x818] sm:$0xff]  ;;  %v21349_v27 = vpack.c.bf16 %v16230_v36, %v16229_v55  ;;  %v16249_v55 = vld [vmem:[%s25973_s13 + $0x9d0] sm:$0xff] }
0x1582   : > { %v16214_v49 = vld [vmem:[%s25973_s13 + $0x8d8] sm:$0xff] }
0x1583   : > { %19587 = vmatmul.mubr.msk.f32.vlgmr.msra.gmra.mrb[46].mxu0 %vm776_vm2, %v19577_v7  ;;  %v10883_v26 = vadd.f32 %v10879_v24, %v10800_v28  ;;  %v21310_v24 = vpack.c.bf16 %v16200_v14, %v16199_v38  ;;  %v16178_v7 = vld [vmem:[%s25973_s13 + $0x7d8] sm:$0xff]  ;;  %v16213_v28 = vld [vmem:[%s25973_s13 + $0x8d0] sm:$0xff] }
0x1584   : > { %21223 = vmatpush3.bf16.msra.mxu0 %v23628_v40  ;;  %v16250_v36 = vld [vmem:[%s25973_s13 + $0x9d8] sm:$0xff] }
0x1585   : > { %v19597_v46 = vpop.f32.mrb[66].mxu1  ;;  %21225 = vmatprep.subr.bf16.mxu0 %v23642_v60 }
0x1586   : > { %v11666_v62 = vpop.f32.mrb[67].mxu1 }
0x1587   : > { %19606 = vmatprep.mubr.msk.f32.mxu0 %vm776_vm2, %v11666_v62  ;;  %v16180_v62 = vld [vmem:[%s25973_s13 + $0x7e8] sm:$0xff] }
0x1588   : > { %21227 = vmatpush3.bf16.msra.mxu0 %v23642_v60 }
0x1589   : > { %21233 = vmatprep.subr.bf16.mxu0 %v23654_v6 }
0x158b   : > { %19607 = vmatmul.mubr.msk.f32.vlgmr.msra.gmra.mrb[46].mxu0 %vm776_vm2, %v19597_v46  ;;  %v16179_v46 = vld [vmem:[%s25973_s13 + $0x7e0] sm:$0xff] }
0x158c   : > { %21235 = vmatpush3.bf16.msra.mxu0 %v23654_v6  ;;  %v25089_v33 = vpop.f32.mrb[68].mxu1  ;;  %v21283_v3 = vpack.c.bf16 %v16180_v62, %v16179_v46  ;;  %v16235_v62 = vld [vmem:[%s25973_s13 + $0x970] sm:$0xff] }
0x158d   : > { %21237 = vmatprep.subr.bf16.mxu0 %v23668_v61  ;;  %v25092_v18 = vpop.f32.mrb[69].mxu1 }
0x158e   : > { %19626 = vmatprep.mubr.msk.f32.mxu0 %vm776_vm2, %v25092_v18 }
0x1590   : > { %v10962_v25 = vpop.f32.mrb[44].mxu0  ;;  %21239 = vmatpush3.bf16.msra.mxu0 %v23668_v61 }
0x1591   : > { %v10966_v43 = vadd.f32 %v10962_v25, %v10883_v26  ;;  %v19496_v20 = vpop.f32.mrb[45].mxu0  ;;  %21245 = vmatprep.subr.bf16.mxu0 %v23685_v58  ;;  %v21280_v26 = vpack.c.bf16 %v16178_v7, %v16177_v10  ;;  %v21328_v25 = vpack.c.bf16 %v16214_v49, %v16213_v28  ;;  %v16189_v10 = vld [vmem:[%s25973_s13 + $0x828] sm:$0xff]  ;;  %v16190_v49 = vld [vmem:[%s25973_s13 + $0x830] sm:$0xff] }
0x1592   : > { %v16216_v20 = vld [vmem:[%s25973_s13 + $0x8e8] sm:$0xff] }
0x1593   : > { %19627 = vmatmul.mubr.msk.f32.vlgmr.msra.gmra.mrb[46].mxu0 %vm776_vm2, %v25089_v33  ;;  %v25100_v0 = vpop.f32.mrb[70].mxu1  ;;  %v25102_v12 = vadd.f32 %v11045_v63, %v10966_v43  ;;  %v16211_v63 = vld [vmem:[%s25973_s13 + $0x8c0] sm:$0xff] }
0x1594   : > { %21247 = vmatpush3.bf16.msra.mxu0 %v23685_v58  ;;  %v25105_v8 = vpop.f32.mrb[71].mxu1  ;;  %v21325_v35 = vpack.c.bf16 %v16212_v5, %v16211_v63  ;;  %v16215_v43 = vld [vmem:[%s25973_s13 + $0x8e0] sm:$0xff]  ;;  %v16232_v63 = vld [vmem:[%s25973_s13 + $0x958] sm:$0xff] }
0x1595   : > { %21249 = vmatprep.subr.bf16.mxu0 %v23695_v56  ;;  %19646 = vmatprep.mubr.msk.f32.mxu0 %vm776_vm2, %v25105_v8  ;;  %v21331_v50 = vpack.c.bf16 %v16216_v20, %v16215_v43  ;;  %v16202_v20 = vld [vmem:[%s25973_s13 + $0x880] sm:$0xff] }
0x1598   : > { %21251 = vmatpush3.bf16.msra.mxu0 %v23695_v56 }
0x1599   : > { %21257 = vmatprep.subr.bf16.mxu0 %v23709_v44 }
0x159a   : > { %v25112_v42 = vpop.f32.mrb[72].mxu1 }
0x159b   : > { %19647 = vmatmul.mubr.msk.f32.vlgmr.msra.gmra.mrb[46].mxu0 %vm776_vm2, %v25100_v0  ;;  %v25116_v11 = vpop.f32.mrb[73].mxu1 }
0x159c   : > { %21259 = vmatpush3.bf16.msra.mxu0 %v23709_v44  ;;  %19666 = vmatprep.mubr.msk.f32.mxu0 %vm776_vm2, %v25116_v11 }
0x159d   : > { %21261 = vmatprep.subr.bf16.mxu0 %v23719_v37 }
0x15a0   : > { %21263 = vmatpush3.bf16.msra.mxu0 %v23719_v37 }
0x15a1   : > { %21300 = vmatprep.subr.bf16.mxu0 %v21803_v4 }
0x15a3   : > { %19667 = vmatmul.mubr.msk.f32.vlgmr.msra.gmra.mrb[46].mxu0 %vm776_vm2, %v25112_v42 }
0x15a4   : > { %21302 = vmatpush3.bf16.msra.mxu0 %v21301_v53  ;;  %19742 = vmatprep.mubr.msk.f32.mxu0 %vm21804_vm0, %v21795_v1  ;;  %v16182_v53 = vld [vmem:[%s25973_s13 + $0x7f8] sm:$0xff] }
0x15a5   : > { %21303 = vmatprep.subr.bf16.mxu0 %v21803_v4  ;;  %v21286_v41 = vpack.c.bf16 %v16182_v53, %v16181_v57  ;;  %v16247_v53 = vld [vmem:[%s25973_s13 + $0x9c0] sm:$0xff] }
0x15a8   : > { %21305 = vmatpush3.bf16.msra.mxu0 %v21304_v47  ;;  %v16218_v47 = vld [vmem:[%s25973_s13 + $0x8f8] sm:$0xff] }
0x15a9   : > { %21306 = vmatprep.subr.bf16.mxu0 %v21803_v4  ;;  %v21334_v16 = vpack.c.bf16 %v16218_v47, %v16217_v52 }
0x15ac   : > { %21308 = vmatpush3.bf16.msra.mxu0 %v21307_v59  ;;  %v16185_v59 = vld [vmem:[%s25973_s13 + $0x808] sm:$0xff] }
0x15ad   : > { %21309 = vmatprep.subr.bf16.mxu0 %v21803_v4  ;;  %v21289_v38 = vpack.c.bf16 %v16185_v59, %v16184_v34  ;;  %v16205_v34 = vld [vmem:[%s25973_s13 + $0x898] sm:$0xff] }
0x15b0   : > { %21311 = vmatpush3.bf16.msra.mxu0 %v21310_v24  ;;  %v16186_v24 = vld [vmem:[%s25973_s13 + $0x810] sm:$0xff] }
0x15b1   : > { %21324 = vmatprep.subr.bf16.mxu0 %v21803_v4  ;;  %v21292_v5 = vpack.c.bf16 %v16187_v21, %v16186_v24  ;;  %v16207_v24 = vld [vmem:[%s25973_s13 + $0x8a8] sm:$0xff]  ;;  %v21376_v21 = vpack.c.bf16 %v16250_v36, %v16249_v55 }
0x15b2   : > { %v21765_v55 = vld [vmem:[%s25996_s28 + $0x8] sm:$0x3] }
0x1676   : > { %v25163_v22 = vpop.f32.mrb[46].mxu0 }
0x1677   : > { %v12228_v29 = vpop.f32.mrb[47].mxu0 }
0x1678   : > { %v12239_v13 = vadd.f32 %v24720_v19, %v12228_v29 }
0x167a   : > { %v25178_v9 = vmax.f32 %v12239_v13, 0.0  ;;  %v16231_v13 = vld [vmem:[%s25973_s13 + $0x950] sm:$0xff] }
0x167b   : > { %v21352_v7 = vpack.c.bf16 %v16232_v63, %v16231_v13  ;;  %v16208_v63 = vld [vmem:[%s25973_s13 + $0x8b0] sm:$0xff] }
0x167c   : > { %19686 = vmatmul.mubr.msk.f32.vlgmr.msra.gmra.mrb[74].mxu1 %vm6195_vm3, %v25178_v9  ;;  %v12501_v51 = vrot.slane %v25178_v9, 3  ;;  %v12335_v14 = vrot.slane %v25178_v9, 1  ;;  %v12667_v29 = vrot.slane %v25178_v9, 5  ;;  %v12418_v47 = vrot.slane %v25178_v9, 2 }
0x167d   : > { %21278 = vmatpush3.bf16.msra.mxu1 %v21277_v23  ;;  %19704 = vmatprep.mubr.msk.f32.mxu1 %vm21804_vm0, %v21795_v1  ;;  %v16188_v23 = vld [vmem:[%s25973_s13 + $0x820] sm:$0xff] }
0x167e   : > { %19743 = vmatmul.mubr.msk.f32.vlgmr.msra.gmra.mrb[48].mxu0 %vm6195_vm3, %v12501_v51  ;;  %21279 = vmatprep.subr.bf16.mxu1 %v21803_v4  ;;  %v16234_v51 = vld [vmem:[%s25973_s13 + $0x968] sm:$0xff]  ;;  %v21295_v28 = vpack.c.bf16 %v16189_v10, %v16188_v23  ;;  %v25351_v10 = vadd.f32 %v24720_v19, %v25163_v22  ;;  %v16220_v19 = vld [vmem:[%s25973_s13 + $0x900] sm:$0xff] }
0x167f   : > { %21326 = vmatpush3.bf16.msra.mxu0 %v21325_v35  ;;  %19780 = vmatprep.mubr.msk.f32.mxu0 %vm21804_vm0, %v21795_v1  ;;  %v16233_v35 = vld [vmem:[%s25973_s13 + $0x960] sm:$0xff]  ;;  %v16221_v22 = vld [vmem:[%s25973_s13 + $0x908] sm:$0xff] }
0x1680   : > { %21327 = vmatprep.subr.bf16.mxu0 %v21803_v4  ;;  %v21355_v46 = vpack.c.bf16 %v16234_v51, %v16233_v35  ;;  %v16254_v35 = vld [vmem:[%s25973_s13 + $0x9f8] sm:$0xff] }
0x1681   : > { %21281 = vmatpush3.bf16.msra.mxu1 %v21280_v26  ;;  %v16191_v26 = vld [vmem:[%s25973_s13 + $0x838] sm:$0xff] }
0x1682   : > { %21282 = vmatprep.subr.bf16.mxu1 %v21803_v4  ;;  %v21298_v43 = vpack.c.bf16 %v16191_v26, %v16190_v49  ;;  %v13302_v49 = vld [vmem:[#allocation3 + $0xe0] sm:$0xff] }
0x1683   : > { %21329 = vmatpush3.bf16.msra.mxu0 %v21328_v25  ;;  %v16236_v25 = vld [vmem:[%s25973_s13 + $0x978] sm:$0xff] }
0x1684   : > { %21330 = vmatprep.subr.bf16.mxu0 %v21803_v4  ;;  %v21358_v57 = vpack.c.bf16 %v16236_v25, %v16235_v62  ;;  %v21337_v25 = vpack.c.bf16 %v16221_v22, %v16220_v19  ;;  %v13784_v22 = vld [vmem:[#allocation3 + $0x100] sm:$0x3f] }
0x1685   : > { %21284 = vmatpush3.bf16.msra.mxu1 %v21283_v3  ;;  %v16203_v3 = vld [vmem:[%s25973_s13 + $0x888] sm:$0xff] }
0x1686   : > { %21285 = vmatprep.subr.bf16.mxu1 %v21803_v4  ;;  %v21313_v52 = vpack.c.bf16 %v16203_v3, %v16202_v20  ;;  %v16222_v20 = vld [vmem:[%s25973_s13 + $0x910] sm:$0xff]  ;;  %v16223_v3 = vld [vmem:[%s25973_s13 + $0x918] sm:$0xff] }
0x1687   : > { %21332 = vmatpush3.bf16.msra.mxu0 %v21331_v50  ;;  %v16248_v50 = vld [vmem:[%s25973_s13 + $0x9c8] sm:$0xff] }
0x1688   : > { %21333 = vmatprep.subr.bf16.mxu0 %v21803_v4  ;;  %v21373_v59 = vpack.c.bf16 %v16248_v50, %v16247_v53  ;;  %v21340_v53 = vpack.c.bf16 %v16223_v3, %v16222_v20  ;;  %v13303_v50 = vld [vmem:[#allocation3 + $0xe8] sm:$0x3f] }
0x1689   : > { %21287 = vmatpush3.bf16.msra.mxu1 %v21286_v41  ;;  %v16204_v41 = vld [vmem:[%s25973_s13 + $0x890] sm:$0xff] }
0x168a   : > { %21288 = vmatprep.subr.bf16.mxu1 %v21803_v4 }
0x168b   : > { %21335 = vmatpush3.bf16.msra.mxu0 %v21334_v16  ;;  %v12833_v16 = vrot.slane %v25178_v9, 7 }
0x168c   : > { %19705 = vmatmul.mubr.msk.f32.vlgmr.msra.gmra.mrb[76].mxu1 %vm6195_vm3, %v12335_v14  ;;  %21348 = vmatprep.subr.bf16.mxu0 %v21803_v4  ;;  %v16206_v14 = vld [vmem:[%s25973_s13 + $0x8a0] sm:$0xff] }
0x168d   : > { %21290 = vmatpush3.bf16.msra.mxu1 %v21289_v38  ;;  %19723 = vmatprep.mubr.msk.f32.mxu1 %vm21804_vm0, %v21795_v1  ;;  %v21316_v38 = vpack.c.bf16 %v16205_v34, %v16204_v41  ;;  %v21319_v13 = vpack.c.bf16 %v16207_v24, %v16206_v14  ;;  %v21764_v41 = vld [vmem:[%s25996_s28] sm:$0xff]  ;;  %v16239_v14 = vld [vmem:[%s25973_s13 + $0x988] sm:$0xff]  ;;  %v21766_v24 = vld [vmem:[%s25996_s28 + $0x10] sm:$0xff] }
0x168e   : > { %19781 = vmatmul.mubr.msk.f32.vlgmr.msra.gmra.mrb[50].mxu0 %vm6195_vm3, %v12667_v29  ;;  %21291 = vmatprep.subr.bf16.mxu1 %v21803_v4  ;;  %v16252_v29 = vld [vmem:[%s25973_s13 + $0x9e8] sm:$0xff] }
0x168f   : > { %21350 = vmatpush3.bf16.msra.mxu0 %v21349_v27  ;;  %19818 = vmatprep.mubr.msk.f32.mxu0 %vm21804_vm0, %v21795_v1  ;;  %v16251_v27 = vld [vmem:[%s25973_s13 + $0x9e0] sm:$0xff] }
0x1690   : > { %21351 = vmatprep.subr.bf16.mxu0 %v21803_v4  ;;  %v21379_v23 = vpack.c.bf16 %v16252_v29, %v16251_v27  ;;  %v21767_v27 = vld [vmem:[%s25996_s28 + $0x18] sm:$0x3]  ;;  %v12750_v29 = vrot.slane %v25178_v9, 6 }
0x1691   : > { %21293 = vmatpush3.bf16.msra.mxu1 %v21292_v5  ;;  %v16209_v5 = vld [vmem:[%s25973_s13 + $0x8b8] sm:$0xff] }
0x1692   : > { %21294 = vmatprep.subr.bf16.mxu1 %v21803_v4  ;;  %v21322_v51 = vpack.c.bf16 %v16209_v5, %v16208_v63  ;;  %v16241_v63 = vld [vmem:[%s25973_s13 + $0x998] sm:$0xff]  ;;  %v21768_v5 = vld [vmem:[%s25996_s28 + $0x20] sm:$0xff] }
0x1693   : > { %21353 = vmatpush3.bf16.msra.mxu0 %v21352_v7  ;;  %v16253_v7 = vld [vmem:[%s25973_s13 + $0x9f0] sm:$0xff] }
0x1694   : > { %21354 = vmatprep.subr.bf16.mxu0 %v21803_v4  ;;  %v21382_v26 = vpack.c.bf16 %v16254_v35, %v16253_v7  ;;  %v13783_v7 = vld [vmem:[#allocation3 + $0xf8] sm:$0xff]  ;;  %v16242_v35 = vld [vmem:[%s25973_s13 + $0x9a0] sm:$0xff] }
0x1695   : > { %21296 = vmatpush3.bf16.msra.mxu1 %v21295_v28  ;;  %v13301_v28 = vld [vmem:[#allocation3 + $0xd8] sm:$0xff] }
0x1696   : > { %21297 = vmatprep.subr.bf16.mxu1 %v21803_v4  ;;  %v21408_v62 = vpack.c.bf16 %v13302_v49, %v13301_v28  ;;  %v21769_v49 = vld [vmem:[%s25996_s28 + $0x28] sm:$0x3] }
0x1697   : > { %21356 = vmatpush3.bf16.msra.mxu0 %v21355_v46  ;;  %v12242_v46 = vmax.f32 %v25351_v10, 0.0 }
0x1698   : > { %21357 = vmatprep.subr.bf16.mxu0 %v21803_v4 }
0x1699   : > { %21299 = vmatpush3.bf16.msra.mxu1 %v21298_v43  ;;  %v12584_v43 = vrot.slane %v25178_v9, 4 }
0x169a   : > { %21312 = vmatprep.subr.bf16.mxu1 %v21803_v4 }
0x169b   : > { %21359 = vmatpush3.bf16.msra.mxu0 %v21358_v57  ;;  %v12999_v57 = vrot.slane %v12242_v46, 1 }
0x169c   : > { %19724 = vmatmul.mubr.msk.f32.vlgmr.msra.gmra.mrb[78].mxu1 %vm6195_vm3, %v12418_v47  ;;  %21372 = vmatprep.subr.bf16.mxu0 %v21803_v4  ;;  %v16225_v47 = vld [vmem:[%s25973_s13 + $0x928] sm:$0xff] }
0x169d   : > { %21314 = vmatpush3.bf16.msra.mxu1 %v21313_v52  ;;  %19761 = vmatprep.mubr.msk.f32.mxu1 %vm21804_vm0, %v21795_v1  ;;  %v16224_v52 = vld [vmem:[%s25973_s13 + $0x920] sm:$0xff] }
0x169e   : > { %19819 = vmatmul.mubr.msk.f32.vlgmr.msra.gmra.mrb[52].mxu0 %vm6195_vm3, %v12833_v16  ;;  %21315 = vmatprep.subr.bf16.mxu1 %v21803_v4  ;;  %v21343_v34 = vpack.c.bf16 %v16225_v47, %v16224_v52  ;;  %v16227_v16 = vld [vmem:[%s25973_s13 + $0x938] sm:$0xff] }
0x169f   : > { %21374 = vmatpush3.bf16.msra.mxu0 %v21373_v59  ;;  %19856 = vmatprep.mubr.msk.f32.mxu0 %vm21804_vm0, %v21795_v1  ;;  %v16226_v59 = vld [vmem:[%s25973_s13 + $0x930] sm:$0xff] }
0x16a0   : > { %21375 = vmatprep.subr.bf16.mxu0 %v21803_v4  ;;  %v21346_v36 = vpack.c.bf16 %v16227_v16, %v16226_v59 }
0x16a1   : > { %21317 = vmatpush3.bf16.msra.mxu1 %v21316_v38  ;;  %v16238_v38 = vld [vmem:[%s25973_s13 + $0x980] sm:$0xff] }
0x16a2   : > { %21318 = vmatprep.subr.bf16.mxu1 %v21803_v4 }
0x16a3   : > { %21377 = vmatpush3.bf16.msra.mxu0 %v21376_v21  ;;  %v21361_v21 = vpack.c.bf16 %v16239_v14, %v16238_v38 }
0x16a4   : > { %21378 = vmatprep.subr.bf16.mxu0 %v21803_v4 }
0x16a5   : > { %21320 = vmatpush3.bf16.msra.mxu1 %v21319_v13  ;;  %v16240_v13 = vld [vmem:[%s25973_s13 + $0x990] sm:$0xff] }
0x16a6   : > { %21321 = vmatprep.subr.bf16.mxu1 %v21803_v4  ;;  %v21364_v9 = vpack.c.bf16 %v16241_v63, %v16240_v13 }
0x16a7   : > { %21380 = vmatpush3.bf16.msra.mxu0 %v21379_v23  ;;  %v13782_v23 = vld [vmem:[#allocation3 + $0xf0] sm:$0xff] }
0x16a8   : > { %21381 = vmatprep.subr.bf16.mxu0 %v21803_v4  ;;  %v21444_v28 = vpack.c.bf16 %v13783_v7, %v13782_v23 }
0x16a9   : > { %21323 = vmatpush3.bf16.msra.mxu1 %v21322_v51  ;;  %v16243_v51 = vld [vmem:[%s25973_s13 + $0x9a8] sm:$0xff] }
0x16aa   : > { %21336 = vmatprep.subr.bf16.mxu1 %v21803_v4  ;;  %v21367_v19 = vpack.c.bf16 %v16243_v51, %v16242_v35 }
0x16ab   : > { %21383 = vmatpush3.bf16.msra.mxu0 %v21382_v26  ;;  %v16244_v26 = vld [vmem:[%s25973_s13 + $0x9b0] sm:$0xff] }
0x16ac   : > { %19762 = vmatmul.mubr.msk.f32.vlgmr.msra.gmra.mrb[80].mxu1 %vm6195_vm3, %v12584_v43  ;;  %21409 = vmatprep.subr.bf16.mxu0 %v21408_v62 }
0x16ad   : > { %21338 = vmatpush3.bf16.msra.mxu1 %v21337_v25  ;;  %19799 = vmatprep.mubr.msk.f32.mxu1 %vm21804_vm0, %v21795_v1 }
0x16ae   : > { %19857 = vmatmul.mubr.msk.f32.vlgmr.msra.gmra.mrb[54].mxu0 %vm6195_vm3, %v12999_v57  ;;  %21339 = vmatprep.subr.bf16.mxu1 %v21803_v4 }
0x16af   : > { %21411 = vmatpush3.bf16.msra.mxu0 %v21408_v62  ;;  %19898 = vmatprep.mubr.msk.f32.mxu0 %vm4660_vm15, %v21764_v41 }
0x16b0   : > { %19896 = vmatprep.subr.msk.mxu0 %vm4667_vm1, %v13303_v50 }
0x16b1   : > { %21341 = vmatpush3.bf16.msra.mxu1 %v21340_v53 }
0x16b2   : > { %21342 = vmatprep.subr.bf16.mxu1 %v21803_v4 }
0x16b3   : > { %19897 = vmatpush3.msk.msra.mxu0 %vm4667_vm1, %v13303_v50 }
0x16b4   : > { %19899 = vmatmul.mubr.msk.f32.vlgmr.msra.gmra.mrb[56].mxu0 %vm4660_vm15, %v21765_v55  ;;  %21421 = vmatprep.subr.bf16.mxu0 %v21408_v62 }
0x16b5   : > { %21344 = vmatpush3.bf16.msra.mxu1 %v21343_v34  ;;  %21423 = vmatpush3.bf16.msra.mxu0 %v21408_v62 }
0x16b6   : > { %21345 = vmatprep.subr.bf16.mxu1 %v21803_v4  ;;  %19916 = vmatprep.subr.msk.mxu0 %vm4667_vm1, %v13303_v50 }
0x16b7   : > { %19918 = vmatprep.mubr.msk.f32.mxu0 %vm4660_vm15, %v21766_v24 }
0x16b9   : > { %21347 = vmatpush3.bf16.msra.mxu1 %v21346_v36  ;;  %19917 = vmatpush3.msk.msra.mxu0 %vm4667_vm1, %v13303_v50 }
0x16ba   : > { %19919 = vmatmul.mubr.msk.f32.vlgmr.msra.gmra.mrb[58].mxu0 %vm4660_vm15, %v21767_v27  ;;  %21360 = vmatprep.subr.bf16.mxu1 %v21803_v4 }
0x16bb   : > { %21433 = vmatprep.subr.bf16.mxu0 %v21408_v62  ;;  %19938 = vmatprep.mubr.msk.f32.mxu0 %vm4660_vm15, %v21768_v5 }
0x16bc   : > { %19800 = vmatmul.mubr.msk.f32.vlgmr.msra.gmra.mrb[82].mxu1 %vm6195_vm3, %v12750_v29  ;;  %21435 = vmatpush3.bf16.msra.mxu0 %v21408_v62  ;;  %v16245_v62 = vld [vmem:[%s25973_s13 + $0x9b8] sm:$0xff] }
0x16bd   : > { %21362 = vmatpush3.bf16.msra.mxu1 %v21361_v21  ;;  %19936 = vmatprep.subr.msk.mxu0 %vm4667_vm1, %v13303_v50  ;;  %v21370_v25 = vpack.c.bf16 %v16245_v62, %v16244_v26  ;;  %v16298_v62 = vld [vmem:[%s25973_s13 + $0xa30] sm:$0xff] }
0x16be   : > { %21363 = vmatprep.subr.bf16.mxu1 %v21803_v4  ;;  %19837 = vmatprep.mubr.msk.f32.mxu1 %vm21804_vm0, %v21795_v1 }
0x16c0   : > { %19937 = vmatpush3.msk.msra.mxu0 %vm4667_vm1, %v13303_v50 }
0x16c1   : > { %21365 = vmatpush3.bf16.msra.mxu1 %v21364_v9  ;;  %19939 = vmatmul.mubr.msk.f32.vlgmr.msra.gmra.mrb[60].mxu0 %vm4660_vm15, %v21769_v49 }
0x16c2   : > { %21366 = vmatprep.subr.bf16.mxu1 %v21803_v4  ;;  %21445 = vmatprep.subr.bf16.mxu0 %v21444_v28 }
0x16c3   : > { %21447 = vmatpush3.bf16.msra.mxu0 %v21444_v28  ;;  %19958 = vmatprep.mubr.msk.f32.mxu0 %vm4660_vm15, %v21764_v41 }
0x16c4   : > { %19956 = vmatprep.subr.msk.mxu0 %vm4667_vm1, %v13784_v22 }
0x16c5   : > { %21368 = vmatpush3.bf16.msra.mxu1 %v21367_v19 }
0x16c6   : > { %21369 = vmatprep.subr.bf16.mxu1 %v21803_v4 }
0x16c7   : > { %19957 = vmatpush3.msk.msra.mxu0 %vm4667_vm1, %v13784_v22 }
0x16c8   : > { %19959 = vmatmul.mubr.msk.f32.vlgmr.msra.gmra.mrb[62].mxu0 %vm4660_vm15, %v21765_v55  ;;  %21457 = vmatprep.subr.bf16.mxu0 %v21444_v28 }
0x16c9   : > { %21371 = vmatpush3.bf16.msra.mxu1 %v21370_v25  ;;  %21459 = vmatpush3.bf16.msra.mxu0 %v21444_v28  ;;  %v16299_v25 = vld [vmem:[%s25973_s13 + $0xa38] sm:$0xff] }
0x16ca   : > { %21385 = vmatprep.subr.bf16.mxu1 %v23458_v45  ;;  %19976 = vmatprep.subr.msk.mxu0 %vm4667_vm1, %v13784_v22 }
0x16cb   : > { %19978 = vmatprep.mubr.msk.f32.mxu0 %vm4660_vm15, %v21766_v24 }
0x16cc   : > { %19838 = vmatmul.mubr.msk.f32.vlgmr.msra.gmra.mrb[84].mxu1 %vm6195_vm3, %v12242_v46 }
0x16cd   : > { %21387 = vmatpush3.bf16.msra.mxu1 %v23458_v45  ;;  %19867 = vmatprep.mubr.msk.f32.mxu1 %vm776_vm2, %v25105_v8  ;;  %v16292_v45 = vld [vmem:[%s25973_s13 + $0xa00] sm:$0xff] }
0x16ce   : > { %21389 = vmatprep.subr.bf16.mxu1 %v23466_v48  ;;  %19977 = vmatpush3.msk.msra.mxu0 %vm4667_vm1, %v13784_v22 }
0x16cf   : > { %19979 = vmatmul.mubr.msk.f32.vlgmr.msra.gmra.mrb[64].mxu0 %vm4660_vm15, %v21767_v27  ;;  %21469 = vmatprep.subr.bf16.mxu0 %v21444_v28 }
0x16d0   : > { %21471 = vmatpush3.bf16.msra.mxu0 %v21444_v28  ;;  %19998 = vmatprep.mubr.msk.f32.mxu0 %vm4660_vm15, %v21768_v5 }
0x16d1   : > { %21391 = vmatpush3.bf16.msra.mxu1 %v23466_v48  ;;  %19996 = vmatprep.subr.msk.mxu0 %vm4667_vm1, %v13784_v22  ;;  %v16293_v48 = vld [vmem:[%s25973_s13 + $0xa08] sm:$0xff] }
0x16d2   : > { %21393 = vmatprep.subr.bf16.mxu1 %v23525_v2 }
0x16d4   : > { %19868 = vmatmul.mubr.msk.f32.vlgmr.msra.gmra.mrb[86].mxu1 %vm776_vm2, %v25100_v0  ;;  %19997 = vmatpush3.msk.msra.mxu0 %vm4667_vm1, %v13784_v22  ;;  %v16324_v22 = vld [vmem:[%s25973_s13 + $0xae8] sm:$0xff] }
0x16d5   : > { %21395 = vmatpush3.bf16.msra.mxu1 %v23525_v2  ;;  %19878 = vmatprep.mubr.msk.f32.mxu1 %vm776_vm2, %v25092_v18  ;;  %v21481_v2 = vpack.c.bf16 %v16293_v48, %v16292_v45  ;;  %v21490_v45 = vpack.c.bf16 %v16299_v25, %v16298_v62  ;;  %v16325_v48 = vld [vmem:[%s25973_s13 + $0xaf0] sm:$0xff]  ;;  %v16328_v62 = vld [vmem:[%s25973_s13 + $0xb00] sm:$0xff]  ;;  %v16329_v25 = vld [vmem:[%s25973_s13 + $0xb08] sm:$0xff] }
0x16d6   : > { %21397 = vmatprep.subr.bf16.mxu1 %v23549_v39  ;;  %19999 = vmatmul.mubr.msk.f32.vlgmr.msra.gmra.mrb[66].mxu0 %vm4660_vm15, %v21769_v49  ;;  %v16322_v49 = vld [vmem:[%s25973_s13 + $0xad8] sm:$0xff] }
0x16d7   : > { %21480 = vmatprep.subr.bf16.mxu0 %v21803_v4  ;;  %20028 = vmatprep.mubr.msk.f32.mxu0 %vm21804_vm0, %v21795_v1 }
0x16d8   : > { %21482 = vmatpush3.bf16.msra.mxu0 %v21481_v2  ;;  %v16326_v2 = vld [vmem:[%s25973_s13 + $0xaf8] sm:$0xff] }
0x16d9   : > { %21399 = vmatpush3.bf16.msra.mxu1 %v23549_v39  ;;  %v16294_v39 = vld [vmem:[%s25973_s13 + $0xa10] sm:$0xff]  ;;  %21483 = vmatprep.subr.bf16.mxu0 %v21803_v4 }
0x16da   : > { %21401 = vmatprep.subr.bf16.mxu1 %v23562_v54 }
0x16dc   : > { %19879 = vmatmul.mubr.msk.f32.vlgmr.msra.gmra.mrb[86].mxu1 %vm776_vm2, %v25089_v33 }
0x16dd   : > { %21403 = vmatpush3.bf16.msra.mxu1 %v23562_v54  ;;  %19889 = vmatprep.mubr.msk.f32.mxu1 %vm776_vm2, %v25116_v11  ;;  %v16295_v54 = vld [vmem:[%s25973_s13 + $0xa18] sm:$0xff] }
0x16de   : > { %21405 = vmatprep.subr.bf16.mxu1 %v23572_v15 }
0x16e1   : > { %21407 = vmatpush3.bf16.msra.mxu1 %v23572_v15  ;;  %v21484_v15 = vpack.c.bf16 %v16295_v54, %v16294_v39  ;;  %v21526_v39 = vpack.c.bf16 %v16326_v2, %v16325_v48  ;;  %v16373_v48 = vld [vmem:[%s25973_s13 + $0xc40] sm:$0xff]  ;;  %v16374_v2 = vld [vmem:[%s25973_s13 + $0xc48] sm:$0xff] }
0x16e2   : > { %21413 = vmatprep.subr.bf16.mxu1 %v23584_v32 }
0x16e3   : > { %21485 = vmatpush3.bf16.msra.mxu0 %v21484_v15  ;;  %v16301_v15 = vld [vmem:[%s25973_s13 + $0xa40] sm:$0xff] }
0x16e4   : > { %19890 = vmatmul.mubr.msk.f32.vlgmr.msra.gmra.mrb[86].mxu1 %vm776_vm2, %v25112_v42  ;;  %21486 = vmatprep.subr.bf16.mxu0 %v21803_v4 }
0x16e5   : > { %21415 = vmatpush3.bf16.msra.mxu1 %v23584_v32  ;;  %v16296_v32 = vld [vmem:[%s25973_s13 + $0xa20] sm:$0xff] }
0x16e6   : > { %21417 = vmatprep.subr.bf16.mxu1 %v23594_v31 }
0x16e9   : > { %21419 = vmatpush3.bf16.msra.mxu1 %v23594_v31  ;;  %v16297_v31 = vld [vmem:[%s25973_s13 + $0xa28] sm:$0xff] }
0x16ea   : > { %21425 = vmatprep.subr.bf16.mxu1 %v23606_v17  ;;  %v21487_v33 = vpack.c.bf16 %v16297_v31, %v16296_v32  ;;  %v16302_v32 = vld [vmem:[%s25973_s13 + $0xa48] sm:$0xff] }
0x16ec   : > { %21488 = vmatpush3.bf16.msra.mxu0 %v21487_v33  ;;  %v25611_v33 = vld [vmem:[%s25972_s12] ss:$0 sm:$0xff] }
0x16ed   : > { %21489 = vmatprep.subr.bf16.mxu0 %v21803_v4 }
0x16f0   : > { %21491 = vmatpush3.bf16.msra.mxu0 %v21490_v45 }
0x16f1   : > { %21492 = vmatprep.subr.bf16.mxu0 %v21803_v4 }
0x174f   : > { %v12321_v18 = vpop.f32.mrb[74].mxu1 }
0x1750   : > { %v12325_v0 = vadd.f32 %v12321_v18, %v25102_v12  ;;  %v19687_v8 = vpop.f32.mrb[75].mxu1 }
0x1751   : > { %v12570_v42 = vpop.f32.mrb[48].mxu0  ;;  %v16338_v8 = vld [vmem:[%s25973_s13 + $0xb48] sm:$0xff] }
0x1752   : > { %v19744_v11 = vpop.f32.mrb[49].mxu0 }
0x175f   : > { %v12404_v10 = vpop.f32.mrb[76].mxu1 }
0x1760   : > { %v12408_v46 = vadd.f32 %v12404_v10, %v12325_v0  ;;  %v19706_v43 = vpop.f32.mrb[77].mxu1  ;;  %v16337_v0 = vld [vmem:[%s25973_s13 + $0xb40] sm:$0xff]  ;;  %v16303_v10 = vld [vmem:[%s25973_s13 + $0xa50] sm:$0xff] }
0x1761   : > { %v12736_v20 = vpop.f32.mrb[50].mxu0  ;;  %v21541_v43 = vpack.c.bf16 %v16338_v8, %v16337_v0  ;;  %v16375_v8 = vld [vmem:[%s25973_s13 + $0xc50] sm:$0xff] }
0x1762   : > { %v19782_v3 = vpop.f32.mrb[51].mxu0 }
0x1763   : > { %v16339_v3 = vld [vmem:[%s25973_s13 + $0xb50] sm:$0xff] }
0x176f   : > { %v12487_v57 = vpop.f32.mrb[78].mxu1 }
0x1770   : > { %v12491_v53 = vadd.f32 %v12487_v57, %v12408_v46  ;;  %v19725_v50 = vpop.f32.mrb[79].mxu1  ;;  %v16304_v46 = vld [vmem:[%s25973_s13 + $0xa58] sm:$0xff] }
0x1771   : > { %v12902_v52 = vpop.f32.mrb[52].mxu0  ;;  %v16340_v57 = vld [vmem:[%s25973_s13 + $0xb58] sm:$0xff]  ;;  %v16305_v50 = vld [vmem:[%s25973_s13 + $0xa60] sm:$0xff] }
0x1772   : > { %v19820_v47 = vpop.f32.mrb[53].mxu0  ;;  %v12574_v41 = vadd.f32 %v12570_v42, %v12491_v53  ;;  %v21493_v42 = vpack.c.bf16 %v16302_v32, %v16301_v15  ;;  %v21496_v53 = vpack.c.bf16 %v16304_v46, %v16303_v10  ;;  %v16330_v32 = vld [vmem:[%s25973_s13 + $0xb10] sm:$0xff]  ;;  %v16332_v46 = vld [vmem:[%s25973_s13 + $0xb20] sm:$0xff] }
0x1773   : > { %v21544_v47 = vpack.c.bf16 %v16340_v57, %v16339_v3  ;;  %v16377_v3 = vld [vmem:[%s25973_s13 + $0xc60] sm:$0xff]  ;;  %v16378_v57 = vld [vmem:[%s25973_s13 + $0xc68] sm:$0xff] }
0x177f   : > { %v12653_v34 = vpop.f32.mrb[80].mxu1 }
0x1780   : > { %v12657_v59 = vadd.f32 %v12653_v34, %v12574_v41  ;;  %v19763_v16 = vpop.f32.mrb[81].mxu1  ;;  %v16341_v41 = vld [vmem:[%s25973_s13 + $0xb60] sm:$0xff]  ;;  %v16342_v34 = vld [vmem:[%s25973_s13 + $0xb68] sm:$0xff] }
0x1781   : > { %v13068_v55 = vpop.f32.mrb[54].mxu0  ;;  %v16307_v16 = vld [vmem:[%s25973_s13 + $0xa70] sm:$0xff] }
0x1782   : > { %v19858_v36 = vpop.f32.mrb[55].mxu0  ;;  %v12740_v12 = vadd.f32 %v12736_v20, %v12657_v59 }
0x1783   : > { %v21547_v36 = vpack.c.bf16 %v16342_v34, %v16341_v41  ;;  %v16379_v34 = vld [vmem:[%s25973_s13 + $0xc70] sm:$0xff] }
0x1787   : > { %v19900_v38 = vpop.f32.mrb[56].mxu0 }
0x1788   : > { %v13373_v14 = vpop.f32.mrb[57].mxu0 }
0x1789   : > { %19909 = vmatprep.mubr.msk.f32.mxu1 %vm776_vm2, %v13373_v14 }
0x178a   : > { %19910 = vmatmul.mubr.msk.f32.vlgmr.msra.gmra.mrb[86].mxu1 %vm776_vm2, %v19900_v38  ;;  %v16344_v38 = vld [vmem:[%s25973_s13 + $0xb78] sm:$0xff] }
0x178b   : > { %21427 = vmatpush3.bf16.msra.mxu1 %v23606_v17 }
0x178c   : > { %21429 = vmatprep.subr.bf16.mxu1 %v23616_v30 }
0x178d   : > { %v19920_v24 = vpop.f32.mrb[58].mxu0 }
0x178e   : > { %v13531_v21 = vpop.f32.mrb[59].mxu0 }
0x178f   : > { %v12819_v27 = vpop.f32.mrb[82].mxu1  ;;  %21431 = vmatpush3.bf16.msra.mxu1 %v23616_v30  ;;  %19929 = vmatprep.mubr.msk.f32.mxu1 %vm776_vm2, %v13531_v21  ;;  %v16311_v21 = vld [vmem:[%s25973_s13 + $0xa88] sm:$0xff] }
0x1790   : > { %v12823_v29 = vadd.f32 %v12819_v27, %v12740_v12  ;;  %v19801_v13 = vpop.f32.mrb[83].mxu1  ;;  %21437 = vmatprep.subr.bf16.mxu1 %v23628_v40  ;;  %v16343_v12 = vld [vmem:[%s25973_s13 + $0xb70] sm:$0xff] }
0x1791   : > { %v21550_v27 = vpack.c.bf16 %v16344_v38, %v16343_v12  ;;  %v16356_v13 = vld [vmem:[%s25973_s13 + $0xbc8] sm:$0xff] }
0x1792   : > { %19930 = vmatmul.mubr.msk.f32.vlgmr.msra.gmra.mrb[86].mxu1 %vm776_vm2, %v19920_v24  ;;  %v12906_v63 = vadd.f32 %v12902_v52, %v12823_v29  ;;  %v16306_v52 = vld [vmem:[%s25973_s13 + $0xa68] sm:$0xff]  ;;  %v16310_v24 = vld [vmem:[%s25973_s13 + $0xa80] sm:$0xff] }
0x1793   : > { %21439 = vmatpush3.bf16.msra.mxu1 %v23628_v40  ;;  %v21499_v59 = vpack.c.bf16 %v16306_v52, %v16305_v50  ;;  %v16355_v29 = vld [vmem:[%s25973_s13 + $0xbc0] sm:$0xff]  ;;  %v16334_v50 = vld [vmem:[%s25973_s13 + $0xb30] sm:$0xff]  ;;  %v16335_v52 = vld [vmem:[%s25973_s13 + $0xb38] sm:$0xff] }
0x1794   : > { %v19940_v5 = vpop.f32.mrb[60].mxu0  ;;  %21441 = vmatprep.subr.bf16.mxu1 %v23642_v60 }
0x1795   : > { %v13689_v17 = vpop.f32.mrb[61].mxu0 }
0x1796   : > { %19949 = vmatprep.mubr.msk.f32.mxu1 %vm776_vm2, %v13689_v17  ;;  %v16312_v17 = vld [vmem:[%s25973_s13 + $0xa90] sm:$0xff] }
0x1797   : > { %21443 = vmatpush3.bf16.msra.mxu1 %v23642_v60 }
0x1798   : > { %21449 = vmatprep.subr.bf16.mxu1 %v23654_v6 }
0x179a   : > { %19950 = vmatmul.mubr.msk.f32.vlgmr.msra.gmra.mrb[86].mxu1 %vm776_vm2, %v19940_v5 }
0x179b   : > { %21451 = vmatpush3.bf16.msra.mxu1 %v23654_v6  ;;  %v19960_v30 = vpop.f32.mrb[62].mxu0 }
0x179c   : > { %21453 = vmatprep.subr.bf16.mxu1 %v23668_v61  ;;  %v13854_v23 = vpop.f32.mrb[63].mxu0 }
0x179d   : > { %19969 = vmatprep.mubr.msk.f32.mxu1 %vm776_vm2, %v13854_v23  ;;  %v21565_v23 = vpack.c.bf16 %v16356_v13, %v16355_v29  ;;  %v16350_v29 = vld [vmem:[%s25973_s13 + $0xba0] sm:$0xff]  ;;  %v16351_v13 = vld [vmem:[%s25973_s13 + $0xba8] sm:$0xff] }
0x179f   : > { %v12985_v40 = vpop.f32.mrb[84].mxu1  ;;  %21455 = vmatpush3.bf16.msra.mxu1 %v23668_v61 }
0x17a0   : > { %v12989_v7 = vadd.f32 %v12985_v40, %v12906_v63  ;;  %v19839_v9 = vpop.f32.mrb[85].mxu1  ;;  %21461 = vmatprep.subr.bf16.mxu1 %v23685_v58  ;;  %v21505_v63 = vpack.c.bf16 %v16311_v21, %v16310_v24  ;;  %v16349_v24 = vld [vmem:[%s25973_s13 + $0xb98] sm:$0xff] }
0x17a1   : > { %v16358_v9 = vld [vmem:[%s25973_s13 + $0xbd8] sm:$0xff] }
0x17a2   : > { %19970 = vmatmul.mubr.msk.f32.vlgmr.msra.gmra.mrb[86].mxu1 %vm776_vm2, %v19960_v30  ;;  %v19980_v60 = vpop.f32.mrb[64].mxu0  ;;  %v25549_v35 = vadd.f32 %v13068_v55, %v12989_v7  ;;  %v16308_v55 = vld [vmem:[%s25973_s13 + $0xa78] sm:$0xff]  ;;  %v16357_v7 = vld [vmem:[%s25973_s13 + $0xbd0] sm:$0xff] }
0x17a3   : > { %21463 = vmatpush3.bf16.msra.mxu1 %v23685_v58  ;;  %v14012_v6 = vpop.f32.mrb[65].mxu0  ;;  %v16319_v58 = vld [vmem:[%s25973_s13 + $0xac0] sm:$0xff]  ;;  %v21502_v14 = vpack.c.bf16 %v16308_v55, %v16307_v16  ;;  %v16313_v30 = vld [vmem:[%s25973_s13 + $0xa98] sm:$0xff]  ;;  %v21538_v16 = vpack.c.bf16 %v16335_v52, %v16334_v50 }
0x17a4   : > { %21465 = vmatprep.subr.bf16.mxu1 %v23695_v56  ;;  %19989 = vmatprep.mubr.msk.f32.mxu1 %vm776_vm2, %v14012_v6  ;;  %v16314_v6 = vld [vmem:[%s25973_s13 + $0xaa0] sm:$0xff] }
0x17a5   : > { %v16346_v55 = vld [vmem:[%s25973_s13 + $0xb80] sm:$0xff] }
0x17a7   : > { %21467 = vmatpush3.bf16.msra.mxu1 %v23695_v56  ;;  %v16320_v56 = vld [vmem:[%s25973_s13 + $0xac8] sm:$0xff] }
0x17a8   : > { %21473 = vmatprep.subr.bf16.mxu1 %v23709_v44  ;;  %v21517_v28 = vpack.c.bf16 %v16320_v56, %v16319_v58  ;;  %v16359_v58 = vld [vmem:[%s25973_s13 + $0xbe0] sm:$0xff]  ;;  %v16360_v56 = vld [vmem:[%s25973_s13 + $0xbe8] sm:$0xff] }
0x17a9   : > { %v20000_v61 = vpop.f32.mrb[66].mxu0 }
0x17aa   : > { %19990 = vmatmul.mubr.msk.f32.vlgmr.msra.gmra.mrb[86].mxu1 %vm776_vm2, %v19980_v60  ;;  %v14170_v51 = vpop.f32.mrb[67].mxu0  ;;  %v21508_v60 = vpack.c.bf16 %v16313_v30, %v16312_v17  ;;  %v16353_v17 = vld [vmem:[%s25973_s13 + $0xbb8] sm:$0xff] }
0x17ab   : > { %21475 = vmatpush3.bf16.msra.mxu1 %v23709_v44  ;;  %20009 = vmatprep.mubr.msk.f32.mxu1 %vm776_vm2, %v14170_v51  ;;  %v16321_v44 = vld [vmem:[%s25973_s13 + $0xad0] sm:$0xff]  ;;  %v21568_v51 = vpack.c.bf16 %v16358_v9, %v16357_v7 }
0x17ac   : > { %21477 = vmatprep.subr.bf16.mxu1 %v23719_v37  ;;  %v21520_v19 = vpack.c.bf16 %v16322_v49, %v16321_v44  ;;  %v16316_v44 = vld [vmem:[%s25973_s13 + $0xab0] sm:$0xff]  ;;  %v16317_v49 = vld [vmem:[%s25973_s13 + $0xab8] sm:$0xff] }
0x17af   : > { %21479 = vmatpush3.bf16.msra.mxu1 %v23719_v37  ;;  %v16323_v37 = vld [vmem:[%s25973_s13 + $0xae0] sm:$0xff] }
0x17b0   : > { %21516 = vmatprep.subr.bf16.mxu1 %v21803_v4  ;;  %v21523_v26 = vpack.c.bf16 %v16324_v22, %v16323_v37  ;;  %v16361_v37 = vld [vmem:[%s25973_s13 + $0xbf0] sm:$0xff]  ;;  %v16362_v22 = vld [vmem:[%s25973_s13 + $0xbf8] sm:$0xff] }
0x17b1   : > { %v21574_v45 = vpack.c.bf16 %v16362_v22, %v16361_v37  ;;  %v15180_v37 = vld [vmem:[%s25976_s16] sm:$0xff]  ;;  %v15181_v22 = vld [vmem:[%s25976_s16 + $0x8] sm:$0xff] }
0x17b2   : > { %20010 = vmatmul.mubr.msk.f32.vlgmr.msra.gmra.mrb[86].mxu1 %vm776_vm2, %v20000_v61  ;;  %v16315_v61 = vld [vmem:[%s25973_s13 + $0xaa8] sm:$0xff]  ;;  %vm15098_vm2 = vcmask 15360  }
0x17b3   : > { %21518 = vmatpush3.bf16.msra.mxu1 %v21517_v28  ;;  %20085 = vmatprep.mubr.msk.f32.mxu1 %vm21804_vm0, %v21795_v1  ;;  %v21511_v28 = vpack.c.bf16 %v16315_v61, %v16314_v6  ;;  %v16367_v6 = vld [vmem:[%s25973_s13 + $0xc18] sm:$0xff] }
0x17b4   : > { %21519 = vmatprep.subr.bf16.mxu1 %v21803_v4 }
0x17b7   : > { %21521 = vmatpush3.bf16.msra.mxu1 %v21520_v19  ;;  %v21571_v19 = vpack.c.bf16 %v16360_v56, %v16359_v58  ;;  %v16370_v56 = vld [vmem:[%s25973_s13 + $0xc30] sm:$0xff] }
0x17b8   : > { %21522 = vmatprep.subr.bf16.mxu1 %v21803_v4 }
0x17bb   : > { %21524 = vmatpush3.bf16.msra.mxu1 %v21523_v26  ;;  %v21514_v26 = vpack.c.bf16 %v16317_v49, %v16316_v44  ;;  %v15097_v49 = vld [vmem:[%s25974_s14] sm:$0x3] }
0x17bc   : > { %21525 = vmatprep.subr.bf16.mxu1 %v21803_v4 }
0x17bf   : > { %21527 = vmatpush3.bf16.msra.mxu1 %v21526_v39  ;;  %v21529_v39 = vpack.c.bf16 %v16329_v25, %v16328_v62  ;;  %v15182_v62 = vld [vmem:[%s25976_s16 + $0x10] sm:$0xff] }
0x17c0   : > { %21540 = vmatprep.subr.bf16.mxu1 %v21803_v4 }
0x1885   : > { %v25600_v54 = vpop.f32.mrb[86].mxu1 }
0x1886   : > { %v14251_v31 = vpop.f32.mrb[87].mxu1  ;;  %v25793_v41 = vadd.f32 %v25611_v33, %v25600_v54  ;;  %v16347_v54 = vld [vmem:[%s25973_s13 + $0xb88] sm:$0xff] }
0x1887   : > { %v14262_v18 = vadd.f32 %v25611_v33, %v14251_v31  ;;  %v16331_v31 = vld [vmem:[%s25973_s13 + $0xb18] sm:$0xff]  ;;  %v21553_v12 = vpack.c.bf16 %v16347_v54, %v16346_v55 }
0x1888   : > { %v21532_v10 = vpack.c.bf16 %v16331_v31, %v16330_v32  ;;  %v15263_v31 = vld [vmem:[%s25978_s18] sm:$0xff] }
0x1889   : > { %v25620_v11 = vmax.f32 %v14262_v18, 0.0  ;;  %v21589_v18 = vpack.c.bf16 %v16374_v2, %v16373_v48  ;;  %v15185_v48 = vld [vmem:[%s25976_s16 + $0x28] sm:$0xff] }
0x188b   : > { %20029 = vmatmul.mubr.msk.f32.vlgmr.msra.gmra.mrb[68].mxu0 %vm6195_vm3, %v25620_v11  ;;  %v14524_v20 = vrot.slane %v25620_v11, 3  ;;  %v14358_v5 = vrot.slane %v25620_v11, 1  ;;  %v14690_v40 = vrot.slane %v25620_v11, 5  ;;  %v14441_v15 = vrot.slane %v25620_v11, 2 }
0x188c   : > { %21494 = vmatpush3.bf16.msra.mxu0 %v21493_v42  ;;  %20047 = vmatprep.mubr.msk.f32.mxu0 %vm21804_vm0, %v21795_v1  ;;  %v14856_v0 = vrot.slane %v25620_v11, 7  ;;  %v16376_v42 = vld [vmem:[%s25973_s13 + $0xc58] sm:$0xff]  ;;  %v14607_v38 = vrot.slane %v25620_v11, 4  ;;  %v14773_v9 = vrot.slane %v25620_v11, 6  ;;  %v16368_v11 = vld [vmem:[%s25973_s13 + $0xc20] sm:$0xff] }
0x188d   : > { %20086 = vmatmul.mubr.msk.f32.vlgmr.msra.gmra.mrb[88].mxu1 %vm6195_vm3, %v14524_v20  ;;  %21495 = vmatprep.subr.bf16.mxu0 %v21803_v4  ;;  %v21592_v20 = vpack.c.bf16 %v16376_v42, %v16375_v8  ;;  %v15266_v42 = vld [vmem:[%s25978_s18 + $0x18] sm:$0xff] }
0x188e   : > { %21542 = vmatpush3.bf16.msra.mxu1 %v21541_v43  ;;  %20123 = vmatprep.mubr.msk.f32.mxu1 %vm21804_vm0, %v21795_v1  ;;  %v16333_v43 = vld [vmem:[%s25973_s13 + $0xb28] sm:$0xff] }
0x188f   : > { %21543 = vmatprep.subr.bf16.mxu1 %v21803_v4 }
0x1890   : > { %21497 = vmatpush3.bf16.msra.mxu0 %v21496_v53  ;;  %v21535_v53 = vpack.c.bf16 %v16333_v43, %v16332_v46  ;;  %v15267_v46 = vld [vmem:[%s25978_s18 + $0x20] sm:$0xff]  ;;  %v15268_v43 = vld [vmem:[%s25978_s18 + $0x28] sm:$0xff] }
0x1891   : > { %21498 = vmatprep.subr.bf16.mxu0 %v21803_v4 }
0x1892   : > { %21545 = vmatpush3.bf16.msra.mxu1 %v21544_v47  ;;  %v21595_v47 = vpack.c.bf16 %v16378_v57, %v16377_v3 }
0x1893   : > { %21546 = vmatprep.subr.bf16.mxu1 %v21803_v4 }
0x1894   : > { %21500 = vmatpush3.bf16.msra.mxu0 %v21499_v59  ;;  %v16380_v59 = vld [vmem:[%s25973_s13 + $0xc78] sm:$0xff] }
0x1895   : > { %21501 = vmatprep.subr.bf16.mxu0 %v21803_v4  ;;  %v21598_v33 = vpack.c.bf16 %v16380_v59, %v16379_v34 }
0x1896   : > { %21548 = vmatpush3.bf16.msra.mxu1 %v21547_v36  ;;  %v14265_v36 = vmax.f32 %v25793_v41, 0.0 }
0x1897   : > { %21549 = vmatprep.subr.bf16.mxu1 %v21803_v4 }
0x1898   : > { %21503 = vmatpush3.bf16.msra.mxu0 %v21502_v14  ;;  %v16348_v14 = vld [vmem:[%s25973_s13 + $0xb90] sm:$0xff]  ;;  %v15022_v21 = vrot.slane %v14265_v36, 1 }
0x1899   : > { %21504 = vmatprep.subr.bf16.mxu0 %v21803_v4 }
0x189a   : > { %21551 = vmatpush3.bf16.msra.mxu1 %v21550_v27  ;;  %v21556_v27 = vpack.c.bf16 %v16349_v24, %v16348_v14 }
0x189b   : > { %20048 = vmatmul.mubr.msk.f32.vlgmr.msra.gmra.mrb[70].mxu0 %vm6195_vm3, %v14358_v5  ;;  %21564 = vmatprep.subr.bf16.mxu1 %v21803_v4  ;;  %v16352_v5 = vld [vmem:[%s25973_s13 + $0xbb0] sm:$0xff] }
0x189c   : > { %21506 = vmatpush3.bf16.msra.mxu0 %v21505_v63  ;;  %20066 = vmatprep.mubr.msk.f32.mxu0 %vm21804_vm0, %v21795_v1  ;;  %v21559_v63 = vpack.c.bf16 %v16351_v13, %v16350_v29  ;;  %v21562_v30 = vpack.c.bf16 %v16353_v17, %v16352_v5 }
0x189d   : > { %20124 = vmatmul.mubr.msk.f32.vlgmr.msra.gmra.mrb[90].mxu1 %vm6195_vm3, %v14690_v40  ;;  %21507 = vmatprep.subr.bf16.mxu0 %v21803_v4  ;;  %v16365_v40 = vld [vmem:[%s25973_s13 + $0xc08] sm:$0xff] }
0x189e   : > { %21566 = vmatpush3.bf16.msra.mxu1 %v21565_v23  ;;  %20161 = vmatprep.mubr.msk.f32.mxu1 %vm21804_vm0, %v21795_v1  ;;  %v16364_v23 = vld [vmem:[%s25973_s13 + $0xc00] sm:$0xff] }
0x189f   : > { %21567 = vmatprep.subr.bf16.mxu1 %v21803_v4  ;;  %v21577_v7 = vpack.c.bf16 %v16365_v40, %v16364_v23 }
0x18a0   : > { %21509 = vmatpush3.bf16.msra.mxu0 %v21508_v60  ;;  %v16366_v60 = vld [vmem:[%s25973_s13 + $0xc10] sm:$0xff] }
0x18a1   : > { %21510 = vmatprep.subr.bf16.mxu0 %v21803_v4  ;;  %v21580_v61 = vpack.c.bf16 %v16367_v6, %v16366_v60 }
0x18a2   : > { %21569 = vmatpush3.bf16.msra.mxu1 %v21568_v51  ;;  %v16369_v51 = vld [vmem:[%s25973_s13 + $0xc28] sm:$0xff] }
0x18a3   : > { %21570 = vmatprep.subr.bf16.mxu1 %v21803_v4  ;;  %v21583_v58 = vpack.c.bf16 %v16369_v51, %v16368_v11  ;;  %v15269_v51 = vld [vmem:[%s25978_s18 + $0x30] sm:$0xff] }
0x18a4   : > { %21512 = vmatpush3.bf16.msra.mxu0 %v21511_v28  ;;  %v16371_v28 = vld [vmem:[%s25973_s13 + $0xc38] sm:$0xff] }
0x18a5   : > { %21513 = vmatprep.subr.bf16.mxu0 %v21803_v4  ;;  %v21586_v44 = vpack.c.bf16 %v16371_v28, %v16370_v56  ;;  %v15188_v28 = vld [vmem:[%s25977_s17] sm:$0x1] }
0x18a6   : > { %21572 = vmatpush3.bf16.msra.mxu1 %v21571_v19  ;;  %v15096_v19 = vld [vmem:[%s25998_s22] sm:$0x1] }
0x18a7   : > { %21573 = vmatprep.subr.bf16.mxu1 %v21803_v4 }
0x18a8   : > { %21515 = vmatpush3.bf16.msra.mxu0 %v21514_v26  ;;  %v21601_v26 = vpack.c.bf16 %v15181_v22, %v15180_v37  ;;  %v15271_v22 = vld [vmem:[#allocation4] sm:$0x1] }
0x18a9   : > { %21528 = vmatprep.subr.bf16.mxu0 %v21803_v4 }
0x18aa   : > { %21575 = vmatpush3.bf16.msra.mxu1 %v21574_v45  ;;  %v15184_v45 = vld [vmem:[%s25976_s16 + $0x20] sm:$0xff] }
0x18ab   : > { %20067 = vmatmul.mubr.msk.f32.vlgmr.msra.gmra.mrb[72].mxu0 %vm6195_vm3, %v14441_v15  ;;  %21588 = vmatprep.subr.bf16.mxu1 %v21803_v4  ;;  %v21607_v2 = vpack.c.bf16 %v15185_v48, %v15184_v45  ;;  %v15187_v15 = vld [vmem:[%s25976_s16 + $0x38] sm:$0xff] }
0x18ac   : > { %21530 = vmatpush3.bf16.msra.mxu0 %v21529_v39  ;;  %20104 = vmatprep.mubr.msk.f32.mxu0 %vm21804_vm0, %v21795_v1  ;;  %v15186_v39 = vld [vmem:[%s25976_s16 + $0x30] sm:$0xff] }
0x18ad   : > { %20162 = vmatmul.mubr.msk.f32.vlgmr.msra.gmra.mrb[92].mxu1 %vm6195_vm3, %v14856_v0  ;;  %21531 = vmatprep.subr.bf16.mxu0 %v21803_v4  ;;  %v21610_v32 = vpack.c.bf16 %v15187_v15, %v15186_v39  ;;  %v15265_v0 = vld [vmem:[%s25978_s18 + $0x10] sm:$0xff] }
0x18ae   : > { %21590 = vmatpush3.bf16.msra.mxu1 %v21589_v18  ;;  %20199 = vmatprep.mubr.msk.f32.mxu1 %vm21804_vm0, %v21795_v1  ;;  %v15264_v18 = vld [vmem:[%s25978_s18 + $0x8] sm:$0xff] }
0x18af   : > { %21591 = vmatprep.subr.bf16.mxu1 %v21803_v4  ;;  %v21613_v8 = vpack.c.bf16 %v15264_v18, %v15263_v31 }
0x18b0   : > { %21533 = vmatpush3.bf16.msra.mxu0 %v21532_v10  ;;  %v21616_v10 = vpack.c.bf16 %v15266_v42, %v15265_v0 }
0x18b1   : > { %21534 = vmatprep.subr.bf16.mxu0 %v21803_v4 }
0x18b2   : > { %21593 = vmatpush3.bf16.msra.mxu1 %v21592_v20  ;;  %v21619_v20 = vpack.c.bf16 %v15268_v43, %v15267_v46 }
0x18b3   : > { %21594 = vmatprep.subr.bf16.mxu1 %v21803_v4 }
0x18b4   : > { %21536 = vmatpush3.bf16.msra.mxu0 %v21535_v53 }
0x18b5   : > { %21537 = vmatprep.subr.bf16.mxu0 %v21803_v4 }
0x18b6   : > { %21596 = vmatpush3.bf16.msra.mxu1 %v21595_v47 }
0x18b7   : > { %21597 = vmatprep.subr.bf16.mxu1 %v21803_v4 }
0x18b8   : > { %21539 = vmatpush3.bf16.msra.mxu0 %v21538_v16 }
0x18b9   : > { %21552 = vmatprep.subr.bf16.mxu0 %v21803_v4 }
0x18ba   : > { %21599 = vmatpush3.bf16.msra.mxu1 %v21598_v33 }
0x18bb   : > { %20105 = vmatmul.mubr.msk.f32.vlgmr.msra.gmra.mrb[74].mxu0 %vm6195_vm3, %v14607_v38  ;;  %21600 = vmatprep.subr.bf16.mxu1 %v21803_v4 }
0x18bc   : > { %21554 = vmatpush3.bf16.msra.mxu0 %v21553_v12  ;;  %20142 = vmatprep.mubr.msk.f32.mxu0 %vm21804_vm0, %v21795_v1 }
0x18bd   : > { %20200 = vmatmul.mubr.msk.f32.vlgmr.msra.gmra.mrb[94].mxu1 %vm6195_vm3, %v15022_v21  ;;  %21555 = vmatprep.subr.bf16.mxu0 %v21803_v4 }
0x18be   : > { %20223 = vmatprep.mubr.msk.f32.mxu1 %vm21804_vm0, %v21795_v1  ;;  %21602 = vmatpush3.bf16.msra.mxu1 %v21601_v26 }
0x18bf   : > { %21603 = vmatprep.subr.bf16.mxu1 %v21803_v4 }
0x18c0   : > { %21557 = vmatpush3.bf16.msra.mxu0 %v21556_v27 }
0x18c1   : > { %21558 = vmatprep.subr.bf16.mxu0 %v21803_v4 }
0x18c4   : > { %21560 = vmatpush3.bf16.msra.mxu0 %v21559_v63 }
0x18c5   : > { %21561 = vmatprep.subr.bf16.mxu0 %v21803_v4 }
0x18c8   : > { %21563 = vmatpush3.bf16.msra.mxu0 %v21562_v30 }
0x18c9   : > { %21576 = vmatprep.subr.bf16.mxu0 %v21803_v4 }
0x18cb   : > { %20143 = vmatmul.mubr.msk.f32.vlgmr.msra.gmra.mrb[76].mxu0 %vm6195_vm3, %v14773_v9  ;;  %v15177_v9 = vld [vmem:[%s25975_s15] sm:$0x1] }
0x18cc   : > { %21578 = vmatpush3.bf16.msra.mxu0 %v21577_v7  ;;  %20180 = vmatprep.mubr.msk.f32.mxu0 %vm21804_vm0, %v21795_v1 }
0x18cd   : > { %21579 = vmatprep.subr.bf16.mxu0 %v21803_v4 }
0x18d0   : > { %21581 = vmatpush3.bf16.msra.mxu0 %v21580_v61 }
0x18d1   : > { %21582 = vmatprep.subr.bf16.mxu0 %v21803_v4 }
0x18d4   : > { %21584 = vmatpush3.bf16.msra.mxu0 %v21583_v58  ;;  %v15270_v58 = vld [vmem:[%s25978_s18 + $0x38] sm:$0xff] }
0x18d5   : > { %21585 = vmatprep.subr.bf16.mxu0 %v21803_v4  ;;  %v21622_v56 = vpack.c.bf16 %v15270_v58, %v15269_v51 }
0x18d8   : > { %21587 = vmatpush3.bf16.msra.mxu0 %v21586_v44 }
0x18d9   : > { %20202 = vmatprep.subr.mxu0 %v21795_v1 }
0x18db   : > { %20181 = vmatmul.mubr.msk.f32.vlgmr.msra.gmra.mrb[78].mxu0 %vm6195_vm3, %v14265_v36 }
0x18dc   : > { %20203 = vmatpush3.msk.msra.mxu0 %vm855_vm5, %v15097_v49  ;;  %20204 = vmatprep.mubr.msk.f32.mxu0 %vm21804_vm0, %v21795_v1 }
0x18dd   : > { %21612 = vmatprep.subr.bf16.mxu0 %v21803_v4 }
0x18df   : > { %20205 = vmatmul.mubr.msk.f32.vlgmr.msra.gmra.mrb[80].mxu0 %vm15098_vm2, %v15096_v19 }
0x18e0   : > { %20242 = vmatprep.mubr.msk.f32.mxu0 %vm21804_vm0, %v21795_v1  ;;  %v15183_v1 = vld [vmem:[%s25976_s16 + $0x18] sm:$0xff]  ;;  %21614 = vmatpush3.bf16.msra.mxu0 %v21613_v8 }
0x18e1   : > { %v21604_v25 = vpack.c.bf16 %v15183_v1, %v15182_v62  ;;  %21615 = vmatprep.subr.bf16.mxu0 %v21803_v4 }
0x18e3   : > { %21605 = vmatpush3.bf16.msra.mxu1 %v21604_v25 }
0x18e4   : > { %21606 = vmatprep.subr.bf16.mxu1 %v21803_v4  ;;  %21617 = vmatpush3.bf16.msra.mxu0 %v21616_v10 }
0x18e5   : > { %21618 = vmatprep.subr.bf16.mxu0 %v21803_v4 }
0x18e7   : > { %21608 = vmatpush3.bf16.msra.mxu1 %v21607_v2 }
0x18e8   : > { %21609 = vmatprep.subr.bf16.mxu1 %v21803_v4  ;;  %21620 = vmatpush3.bf16.msra.mxu0 %v21619_v20 }
0x18e9   : > { %21621 = vmatprep.subr.bf16.mxu0 %v21803_v4 }
0x18eb   : > { %21611 = vmatpush3.bf16.msra.mxu1 %v21610_v32 }
0x18ec   : > { %21623 = vmatpush3.bf16.msra.mxu0 %v21622_v56 }
0x195e   : > { %v14344_v3 = vpop.f32.mrb[68].mxu0 }
0x195f   : > { %v14348_v57 = vadd.f32 %v14344_v3, %v25549_v35  ;;  %v20030_v53 = vpop.f32.mrb[69].mxu0 }
0x1960   : > { %v14593_v50 = vpop.f32.mrb[88].mxu1 }
0x1961   : > { %v20087_v52 = vpop.f32.mrb[89].mxu1 }
0x196e   : > { %v14427_v47 = vpop.f32.mrb[70].mxu0 }
0x196f   : > { %v14431_v41 = vadd.f32 %v14427_v47, %v14348_v57  ;;  %v20049_v34 = vpop.f32.mrb[71].mxu0 }
0x1970   : > { %v14759_v59 = vpop.f32.mrb[90].mxu1 }
0x1971   : > { %v20125_v16 = vpop.f32.mrb[91].mxu1 }
0x197e   : > { %v14510_v55 = vpop.f32.mrb[72].mxu0 }
0x197f   : > { %v14514_v54 = vadd.f32 %v14510_v55, %v14431_v41  ;;  %v20068_v33 = vpop.f32.mrb[73].mxu0 }
0x1980   : > { %v14925_v36 = vpop.f32.mrb[92].mxu1 }
0x1981   : > { %v20163_v12 = vpop.f32.mrb[93].mxu1  ;;  %v14597_v38 = vadd.f32 %v14593_v50, %v14514_v54 }
0x198e   : > { %v14676_v14 = vpop.f32.mrb[74].mxu0 }
0x198f   : > { %v14680_v24 = vadd.f32 %v14676_v14, %v14597_v38  ;;  %v20106_v4 = vpop.f32.mrb[75].mxu0 }
0x1990   : > { %v15091_v21 = vpop.f32.mrb[94].mxu1 }
0x1991   : > { %v20201_v27 = vpop.f32.mrb[95].mxu1  ;;  %v14763_v35 = vadd.f32 %v14759_v59, %v14680_v24 }
0x199e   : > { %v14842_v29 = vpop.f32.mrb[76].mxu0 }
0x199f   : > { %v14846_v13 = vadd.f32 %v14842_v29, %v14763_v35  ;;  %v20144_v63 = vpop.f32.mrb[77].mxu0 }
0x19a1   : > { %v14929_v5 = vadd.f32 %v14925_v36, %v14846_v13 }
0x19ae   : > { %v15008_v17 = vpop.f32.mrb[78].mxu0 }
0x19af   : > { %v15012_v30 = vadd.f32 %v15008_v17, %v14929_v5  ;;  %v20182_v23 = vpop.f32.mrb[79].mxu0 }
0x19b1   : > { %v15095_v40 = vadd.f32 %v15091_v21, %v15012_v30 }
0x19b2   : > { %v15172_v7 = vpop.f32.mrb[80].mxu0 }
0x19b3   : > { %v15176_v60 = vadd.f32 %v15172_v7, %v15095_v40  ;;  %v20206_v6 = vpop.f32.mrb[81].mxu0 }
0x19b5   : > { %v15178_v61 = vadd.f32 %v15177_v9, %v15176_v60 }
0x19b7   : > { %v15179_v11 = vmax.f32 %v15178_v61, 0.0 }
0x19b9   : > { %20224 = vmatmul.mubr.msk.f32.vlgmr.msra.gmra.mrb[96].mxu1 %vm6195_vm3, %v15179_v11 }
0x1a8c   : > { %v15258_v44 = vpop.f32.mrb[96].mxu1 }
0x1a8d   : > { %v15259_v49 = vadd.f32 %v15258_v44, %v15188_v28  ;;  %v20225_v19 = vpop.f32.mrb[97].mxu1 }
0x1a8f   : > { %v15262_v37 = vmax.f32 %v15259_v49, 0.0 }
0x1a91   : > { %20243 = vmatmul.mubr.msk.f32.vlgmr.msra.gmra.mrb[82].mxu0 %vm6195_vm3, %v15262_v37 }
0x1b64   : > { %v15341_v26 = vpop.f32.mrb[82].mxu0 }
0x1b65   : > { %v15342_v62 = vadd.f32 %v15341_v26, %v15271_v22  ;;  %v20244_v1 = vpop.f32.mrb[83].mxu0 }
0x1b67   : > { %15346 = vst.msk [vmem:[%s25999_s2] sm:$0x1] %vm15345_vm4, %v15342_v62 }
0x1b68 PF: > { %s32_s23 = sadd.s32 1, %s21785_s23  }
0x1b69   : > { %p29_p6 = scmp.ge.s32.totalorder %s32_s23, 4  }
0x1b6b   :  { %31 = sbr.rel (!%p29_p6) target bundleno = 6 (0x6), region = 266 }

</bundles_post_ra>
